<compile_context>
chip_gen: v7x
topology: tpu7x:2x2x1
jax: 0.10.0
libtpu: 0.0.40
codegen_flags: <defaults>
</compile_context>

<pallas_src>
import numpy as np
import jax
import jax.numpy as jnp
from jax import lax
from jax.experimental import pallas as pl
from jax.experimental.pallas import tpu as pltpu


# ---------------------------------------------------------------------------
# Bicubic interpolation matrix (PyTorch semantics: align_corners=False, a=-0.75,
# border-replicated taps).  2-D bicubic is separable: out = Uh @ img @ Uw^T.
# ---------------------------------------------------------------------------
def _cubic_kernel(x, a=-0.75):
    x = np.abs(x)
    w1 = ((a + 2.0) * x - (a + 3.0)) * x * x + 1.0            # |x| <= 1
    w2 = ((a * x - 5.0 * a) * x + 8.0 * a) * x - 4.0 * a      # 1 < |x| < 2
    return np.where(x <= 1.0, w1, np.where(x < 2.0, w2, 0.0))


def bicubic_matrix(out_size, in_size):
    scale = in_size / out_size
    i = np.arange(out_size)
    src = (i + 0.5) * scale - 0.5
    i0 = np.floor(src).astype(np.int64)
    t = src - i0
    taps = np.stack([_cubic_kernel(1.0 + t), _cubic_kernel(t),
                     _cubic_kernel(1.0 - t), _cubic_kernel(2.0 - t)], axis=1)
    M = np.zeros((out_size, in_size), dtype=np.float64)
    for j in range(4):
        idx = np.clip(i0 - 1 + j, 0, in_size - 1)
        np.add.at(M, (i, idx), taps[:, j])
    return M


def _round_up(x, m):
    return ((x + m - 1) // m) * m


def _choose_block(n, max_block):
    """Batch rows per grid step: multiple of 8, <= max_block, >= 2 grid steps if possible."""
    if n <= 8:
        return 8
    return int(min(max_block, _round_up((n + 1) // 2, 8)))


# ---------------------------------------------------------------------------
# Fused decoder builder: fold each (upsample -> conv -> relu) stage into a single matrix.
# ---------------------------------------------------------------------------
def build_decoder(h0, w0, convs, up_sizes, max_block=128):
    """convs: [(w, b, pad)] with w (C_out, C_in, K); up_sizes: [(H_up, W_up)] per stage."""
    stage_F = []     # bf16 folded matrices  (d_in_pad, d_out_pad)
    stage_b = []     # f32 bias rows         (1, d_out_pad)

    h_cur, w_cur = h0, w0
    pad_prev = 0     # zero columns appended to the previous stage's flat output
    for (w, b, pad), (h_up, w_up) in zip(convs, up_sizes):
        w = np.asarray(w, np.float64)
        b = np.asarray(b, np.float64)
        c_out, c_in, ksz = w.shape
        assert c_in == h_up, "Conv1d in_channels must equal the upsampled height"

        uh = bicubic_matrix(h_up, h_cur)                        # (C_in, h_cur)
        uw = bicubic_matrix(w_up, w_cur)                        # (W_up, w_cur)
        uw_pad = np.concatenate([np.zeros((pad, w_cur)), uw,
                                 np.zeros((pad, w_cur))], axis=0)   # (W_up+2p, w_cur)
        l_out = w_up + 2 * pad - ksz + 1

        # F[h, w, o, l] = sum_{k,c} W[o,c,k] * Uh[c,h] * UwPad[l+k, w]
        A = np.einsum('ock,ch->okh', w, uh)                     # (C_out, K, h_cur)
        S = np.stack([uw_pad[k:k + l_out, :] for k in range(ksz)])  # (K, L_out, w_cur)
        F = np.einsum('okh,klw->hwol', A, S).reshape(h_cur * w_cur, c_out * l_out)

        # Rows matching the previous stage's lane padding are zero (padded activations are 0).
        if pad_prev:
            F = np.concatenate([F, np.zeros((pad_prev, F.shape[1]))], axis=0)
        # Lane-align the output flat dim (multiple of 128) -> unmasked stores, aligned GEMMs.
        d_out = c_out * l_out
        d_out_pad = _round_up(d_out, 128)
        if d_out_pad != d_out:
            F = np.concatenate([F, np.zeros((F.shape[0], d_out_pad - d_out))], axis=1)
        b_flat = np.concatenate([np.repeat(b, l_out), np.zeros(d_out_pad - d_out)])

        stage_F.append(jnp.asarray(F.astype(np.float32), dtype=jnp.bfloat16))
        stage_b.append(jnp.asarray(b_flat.astype(np.float32)).reshape(1, d_out_pad))

        h_cur, w_cur = c_out, l_out
        pad_prev = d_out_pad - d_out

    c_final, l_final = h_cur, w_cur
    d_final = c_final * l_final
    d_final_pad = stage_F[-1].shape[1]
    d0 = h0 * w0
    n_stage = len(stage_F)

    consts = []
    const_specs = []
    for F, brow in zip(stage_F, stage_b):
        consts += [F, brow]
        const_specs += [pl.BlockSpec(F.shape, lambda i: (0, 0)),      # grid-invariant
                        pl.BlockSpec(brow.shape, lambda i: (0, 0))]
    n_const = len(consts)

    def kernel(*refs):
        const = refs[:n_const]
        x_ref = refs[n_const]        # (B, d0)          f32
        o_ref = refs[n_const + 1]    # (B, d_final_pad) f32
        h = x_ref[...]
        for s in range(n_stage):
            F_ref, b_ref = const[2 * s], const[2 * s + 1]
            # bf16 x bf16 MXU GEMM, f32 accumulation; M = batch block, K/N lane-aligned.
            z = jnp.dot(h.astype(jnp.bfloat16), F_ref[...],
                        preferred_element_type=jnp.float32)
            h = jnp.maximum(z + b_ref[...], 0.0)
        o_ref[...] = h               # lane-dense (B, 640) store

    def decoder(x_nchw):
        n = x_nchw.shape[0]
        # Squeeze the singleton channel and flatten the (H, W) image row-major.
        x_flat = x_nchw[:, 0].reshape(n, d0)
        blk = _choose_block(n, max_block)
        n_pad = _round_up(n, blk)
        if n_pad != n:
            x_flat = jnp.pad(x_flat, ((0, n_pad - n), (0, 0)))
        out = pl.pallas_call(
            kernel,
            out_shape=jax.ShapeDtypeStruct((n_pad, d_final_pad), jnp.float32),
            grid=(n_pad // blk,),
            in_specs=const_specs + [pl.BlockSpec((blk, d0), lambda i: (i, 0))],
            out_specs=pl.BlockSpec((blk, d_final_pad), lambda i: (i, 0)),
            compiler_params=pltpu.CompilerParams(
                dimension_semantics=("parallel",),       # batch blocks across TCs on v7x
                vmem_limit_bytes=48 * 1024 * 1024),      # headroom for double-buffered consts
        )(*consts, x_flat)
        return out[:n, :d_final].reshape(n, c_final, l_final)

    return jax.jit(decoder)


# ---------------------------------------------------------------------------
# Pure-JAX reference of the same module semantics (sequential upsample->conv, fp32 HIGHEST).
# ---------------------------------------------------------------------------
def ref_decoder(x_nchw, convs, up_sizes):
    h = x_nchw[:, 0]                                          # (N, H, W)
    hp = lax.Precision.HIGHEST
    for (w, b, pad), (h_up, w_up) in zip(convs, up_sizes):
        uh = jnp.asarray(bicubic_matrix(h_up, h.shape[1]).astype(np.float32))
        uw = jnp.asarray(bicubic_matrix(w_up, h.shape[2]).astype(np.float32))
        y = jnp.einsum('oh,nhw->now', uh, h, precision=hp)
        y = jnp.einsum('vw,now->nov', uw, y, precision=hp)    # (N, H_up, W_up)
        yp = jnp.pad(y, ((0, 0), (0, 0), (pad, pad)))
        w = jnp.asarray(w, jnp.float32)
        b = jnp.asarray(b, jnp.float32)
        ksz = w.shape[2]
        l_out = yp.shape[2] - ksz + 1
        acc = jnp.broadcast_to(b[None, :, None], (h.shape[0], w.shape[0], l_out))
        for k in range(ksz):
            acc = acc + jnp.einsum('oc,ncl->nol', w[:, :, k], yp[:, :, k:k + l_out],
                                   precision=hp)
        h = jnp.maximum(acc, 0.0)
    return h


def init_conv(key, c_out, c_in, k):
    kw, kb = jax.random.split(key)
    bound = 1.0 / float(np.sqrt(c_in * k))
    w = jax.random.uniform(kw, (c_out, c_in, k), jnp.float32, -bound, bound)
    b = jax.random.uniform(kb, (c_out,), jnp.float32, -bound, bound)
    return w, b


if __name__ == "__main__":
    key = jax.random.PRNGKey(0)
    k_x, k1, k2, k3 = jax.random.split(key, 4)

    # Small input consistent with the module: NCHW with C=1 (see TODO at top).
    N, H, W = 16, 8, 6
    x = jax.random.normal(k_x, (N, 1, H, W), jnp.float32)

    # PyTorch Conv1d parameter shapes, deterministic init.
    convs = [init_conv(k1, 128, 256, 8) + (1,),    # conv1: (128, 256, 8), pad=1
             init_conv(k2, 64, 128, 12) + (1,),    # conv2: (64, 128, 12), pad=1
             init_conv(k3, 5, 64, 9) + (1,)]       # conv3: (5, 64, 9),   pad=1
    up_sizes = [(256, 18), (128, 48), (64, 112)]   # nn.Upsample targets

    decoder = build_decoder(H, W, convs, up_sizes)
    out = jax.block_until_ready(decoder(x))
    assert out.shape == (N, 5, 106), out.shape

    # Correctness vs. the fp32-HIGHEST sequential reference.  The kernel feeds the MXU
    # bf16 operands (with f32 accumulation), so tolerance is loosened accordingly.
    ref = ref_decoder(x, convs, up_sizes)
    np.testing.assert_allclose(np.asarray(out), np.asarray(ref), rtol=2e-2, atol=2e-2)

    print("KERNEL_OK")
</pallas_src>

<mosaic_0001>
module attributes {stable_mosaic.version = 11 : i64} {
  func.func @kernel(%arg0: i32, %arg1: memref<48x1664xbf16, #tpu.memory_space<vmem>>, %arg2: memref<1x1664xf32, #tpu.memory_space<vmem>>, %arg3: memref<1664x2560xbf16, #tpu.memory_space<vmem>>, %arg4: memref<1x2560xf32, #tpu.memory_space<vmem>>, %arg5: memref<2560x640xbf16, #tpu.memory_space<vmem>>, %arg6: memref<1x640xf32, #tpu.memory_space<vmem>>, %arg7: memref<8x48xf32, #tpu.memory_space<vmem>>, %arg8: memref<8x640xf32, #tpu.memory_space<vmem>>) attributes {dimension_semantics = [#tpu.dimension_semantics<parallel>], iteration_bounds = array<i64: 2>, scalar_prefetch = 0 : i64, scratch_operands = 0 : i64, tpu.core_type = #tpu.core_type<tc>, window_params = [{pipeline_mode = #tpu.pipeline_mode<synchronous>, transform_indices = @transform_0, window_bounds = array<i64: 48, 1664>}, {pipeline_mode = #tpu.pipeline_mode<synchronous>, transform_indices = @transform_1, window_bounds = array<i64: 1, 1664>}, {pipeline_mode = #tpu.pipeline_mode<synchronous>, transform_indices = @transform_2, window_bounds = array<i64: 1664, 2560>}, {pipeline_mode = #tpu.pipeline_mode<synchronous>, transform_indices = @transform_3, window_bounds = array<i64: 1, 2560>}, {pipeline_mode = #tpu.pipeline_mode<synchronous>, transform_indices = @transform_4, window_bounds = array<i64: 2560, 640>}, {pipeline_mode = #tpu.pipeline_mode<synchronous>, transform_indices = @transform_5, window_bounds = array<i64: 1, 640>}, {transform_indices = @transform_6, window_bounds = array<i64: 8, 48>}, {transform_indices = @transform_7, window_bounds = array<i64: 8, 640>}]} {
    %c0 = arith.constant 0 : index
    %c0_0 = arith.constant 0 : index
    %0 = vector.load %arg7[%c0, %c0_0] : memref<8x48xf32, #tpu.memory_space<vmem>>, vector<8x48xf32>
    %1 = arith.truncf %0 : vector<8x48xf32> to vector<8x48xbf16>
    %c0_1 = arith.constant 0 : index
    %c0_2 = arith.constant 0 : index
    %2 = vector.load %arg1[%c0_1, %c0_2] : memref<48x1664xbf16, #tpu.memory_space<vmem>>, vector<48x1664xbf16>
    %cst = arith.constant dense<0.000000e+00> : vector<8x1664xf32>
    %3 = tpu.matmul %1, %2, %cst {dimension_numbers = #tpu.dot_dimension_numbers<[1], [0], [0], [1], [0, 0, 1, 1], [], []>} : vector<8x48xbf16>, vector<48x1664xbf16>, vector<8x1664xf32> -> vector<8x1664xf32>
    %c0_3 = arith.constant 0 : index
    %c0_4 = arith.constant 0 : index
    %4 = vector.load %arg2[%c0_3, %c0_4] : memref<1x1664xf32, #tpu.memory_space<vmem>>, vector<1x1664xf32>
    %5 = vector.broadcast %4 : vector<1x1664xf32> to vector<8x1664xf32>
    %6 = arith.addf %3, %5 : vector<8x1664xf32>
    %cst_5 = arith.constant 0.000000e+00 : f32
    %7 = vector.broadcast %cst_5 : f32 to vector<8x1664xf32>
    %8 = arith.maximumf %6, %7 : vector<8x1664xf32>
    %9 = arith.truncf %8 : vector<8x1664xf32> to vector<8x1664xbf16>
    %c0_6 = arith.constant 0 : index
    %c0_7 = arith.constant 0 : index
    %10 = vector.load %arg3[%c0_6, %c0_7] : memref<1664x2560xbf16, #tpu.memory_space<vmem>>, vector<1664x2560xbf16>
    %cst_8 = arith.constant dense<0.000000e+00> : vector<8x2560xf32>
    %11 = tpu.matmul %9, %10, %cst_8 {dimension_numbers = #tpu.dot_dimension_numbers<[1], [0], [0], [1], [0, 0, 1, 1], [], []>} : vector<8x1664xbf16>, vector<1664x2560xbf16>, vector<8x2560xf32> -> vector<8x2560xf32>
    %c0_9 = arith.constant 0 : index
    %c0_10 = arith.constant 0 : index
    %12 = vector.load %arg4[%c0_9, %c0_10] : memref<1x2560xf32, #tpu.memory_space<vmem>>, vector<1x2560xf32>
    %13 = vector.broadcast %12 : vector<1x2560xf32> to vector<8x2560xf32>
    %14 = arith.addf %11, %13 : vector<8x2560xf32>
    %cst_11 = arith.constant 0.000000e+00 : f32
    %15 = vector.broadcast %cst_11 : f32 to vector<8x2560xf32>
    %16 = arith.maximumf %14, %15 : vector<8x2560xf32>
    %17 = arith.truncf %16 : vector<8x2560xf32> to vector<8x2560xbf16>
    %c0_12 = arith.constant 0 : index
    %c0_13 = arith.constant 0 : index
    %18 = vector.load %arg5[%c0_12, %c0_13] : memref<2560x640xbf16, #tpu.memory_space<vmem>>, vector<2560x640xbf16>
    %cst_14 = arith.constant dense<0.000000e+00> : vector<8x640xf32>
    %19 = tpu.matmul %17, %18, %cst_14 {dimension_numbers = #tpu.dot_dimension_numbers<[1], [0], [0], [1], [0, 0, 1, 1], [], []>} : vector<8x2560xbf16>, vector<2560x640xbf16>, vector<8x640xf32> -> vector<8x640xf32>
    %c0_15 = arith.constant 0 : index
    %c0_16 = arith.constant 0 : index
    %20 = vector.load %arg6[%c0_15, %c0_16] : memref<1x640xf32, #tpu.memory_space<vmem>>, vector<1x640xf32>
    %21 = vector.broadcast %20 : vector<1x640xf32> to vector<8x640xf32>
    %22 = arith.addf %19, %21 : vector<8x640xf32>
    %cst_17 = arith.constant 0.000000e+00 : f32
    %23 = vector.broadcast %cst_17 : f32 to vector<8x640xf32>
    %24 = arith.maximumf %22, %23 : vector<8x640xf32>
    %c0_18 = arith.constant 0 : index
    %c0_19 = arith.constant 0 : index
    %25 = vector.load %arg8[%c0_18, %c0_19] : memref<8x640xf32, #tpu.memory_space<vmem>>, vector<8x640xf32>
    tpu.vector_store %arg8[%c0_18, %c0_19], %24 {strides = array<i32>} : memref<8x640xf32, #tpu.memory_space<vmem>>, vector<8x640xf32>,
    return
  }
  func.func @transform_0(%arg0: i32) -> (i32, i32) {
    %c0_i32 = arith.constant 0 : i32
    %c0_i32_0 = arith.constant 0 : i32
    %c0_i32_1 = arith.constant 0 : i32
    return %c0_i32, %c0_i32_0 : i32, i32
  }
  func.func @transform_1(%arg0: i32) -> (i32, i32) {
    %c0_i32 = arith.constant 0 : i32
    %c0_i32_0 = arith.constant 0 : i32
    %c0_i32_1 = arith.constant 0 : i32
    return %c0_i32, %c0_i32_0 : i32, i32
  }
  func.func @transform_2(%arg0: i32) -> (i32, i32) {
    %c0_i32 = arith.constant 0 : i32
    %c0_i32_0 = arith.constant 0 : i32
    %c0_i32_1 = arith.constant 0 : i32
    return %c0_i32, %c0_i32_0 : i32, i32
  }
  func.func @transform_3(%arg0: i32) -> (i32, i32) {
    %c0_i32 = arith.constant 0 : i32
    %c0_i32_0 = arith.constant 0 : i32
    %c0_i32_1 = arith.constant 0 : i32
    return %c0_i32, %c0_i32_0 : i32, i32
  }
  func.func @transform_4(%arg0: i32) -> (i32, i32) {
    %c0_i32 = arith.constant 0 : i32
    %c0_i32_0 = arith.constant 0 : i32
    %c0_i32_1 = arith.constant 0 : i32
    return %c0_i32, %c0_i32_0 : i32, i32
  }
  func.func @transform_5(%arg0: i32) -> (i32, i32) {
    %c0_i32 = arith.constant 0 : i32
    %c0_i32_0 = arith.constant 0 : i32
    %c0_i32_1 = arith.constant 0 : i32
    return %c0_i32, %c0_i32_0 : i32, i32
  }
  func.func @transform_6(%arg0: i32) -> (i32, i32) {
    %c0_i32 = arith.constant 0 : i32
    %c0_i32_0 = arith.constant 0 : i32
    return %arg0, %c0_i32 : i32, i32
  }
  func.func @transform_7(%arg0: i32) -> (i32, i32) {
    %c0_i32 = arith.constant 0 : i32
    %c0_i32_0 = arith.constant 0 : i32
    return %arg0, %c0_i32 : i32, i32
  }
}

</mosaic_0001>

<bundles_post_ra>
// kernel: squeeze.1
= control target key start
LH: loop header
LB: loop body
LE: loop exit
PB: predicated region body
PF: predicated region fallthrough
CT: control target
= control target key end

     0   :  { %vm3_vm0 = vcmask 130048   ;;  %s120_s0 = inlined_call_operand.vmem [shape: f32[16,1,8,6], index: 0, kind: input, shape index: {}]   ;;  %s121_s1 = inlined_call_operand.vmem [shape: f32[16,48], index: 1, kind: output, shape index: {}]  }
   0x1   :  { %v2_v0 = vld [vmem:[%s120_s0] sm:$0x3f]   ;;  %v40_v1 = vld [vmem:[%s120_s0 + $0x8] sm:$0x3f]   ;;  %v42_v2 = vld [vmem:[%s120_s0 + $0x10] sm:$0x3f]  }
   0x2   :  { %4 = vst.msk [vmem:[%s121_s1] sm:$0x3f] %vm3_vm0, %v2_v0   ;;  %41 = vst.msk [vmem:[%s121_s1 + $0x6] sm:$0x3f] %vm3_vm0, %v40_v1   ;;  %v44_v3 = vld [vmem:[%s120_s0 + $0x18] sm:$0x3f]  }
   0x3   :  { %43 = vst.msk [vmem:[%s121_s1 + $0xc] sm:$0x3f] %vm3_vm0, %v42_v2   ;;  %v46_v4 = vld [vmem:[%s120_s0 + $0x20] sm:$0x3f]   ;;  %v48_v5 = vld [vmem:[%s120_s0 + $0x28] sm:$0x3f]  }
   0x4   :  { %45 = vst.msk [vmem:[%s121_s1 + $0x12] sm:$0x3f] %vm3_vm0, %v44_v3   ;;  %47 = vst.msk [vmem:[%s121_s1 + $0x18] sm:$0x3f] %vm3_vm0, %v46_v4   ;;  %v50_v6 = vld [vmem:[%s120_s0 + $0x30] sm:$0x3f]  }
   0x5   :  { %49 = vst.msk [vmem:[%s121_s1 + $0x1e] sm:$0x3f] %vm3_vm0, %v48_v5   ;;  %v52_v7 = vld [vmem:[%s120_s0 + $0x38] sm:$0x3f]   ;;  %51 = vst.msk [vmem:[%s121_s1 + $0x24] sm:$0x3f] %vm3_vm0, %v50_v6  }
   0x6   :  { %53 = vst.msk [vmem:[%s121_s1 + $0x2a] sm:$0x3f] %vm3_vm0, %v52_v7  }

// kernel: decoder.1
= control target key start
LH: loop header
LB: loop body
LE: loop exit
PB: predicated region body
PF: predicated region fallthrough
CT: control target
= control target key end

     0   :  { %s30702_s24 = smov 0   ;;  %s40000_s0 = inlined_call_operand.vmem [shape: bf16[48,1664], index: 0, kind: input, shape index: {}]   ;;  %s40001_s1 = inlined_call_operand.vmem [shape: f32[1,1664], index: 1, kind: input, shape index: {}]   ;;  %s40002_s2 = inlined_call_operand.vmem [shape: bf16[1664,2560], index: 2, kind: input, shape index: {}]   ;;  %s40003_s3 = inlined_call_operand.vmem [shape: f32[1,2560], index: 3, kind: input, shape index: {}]   ;;  %s40004_s4 = inlined_call_operand.vmem [shape: bf16[2560,640], index: 4, kind: input, shape index: {}]   ;;  %s40005_s5 = inlined_call_operand.vmem [shape: f32[1,640], index: 5, kind: input, shape index: {}]   ;;  %s40006_s6 = inlined_call_operand.vmem [shape: f32[16,48], index: 6, kind: input, shape index: {}]   ;;  %s40007_s7 = inlined_call_operand.vmem [shape: f32[16,640], index: 7, kind: output, shape index: {}]  }
   0x1 LB: > { %s22832_s25 = sadd.s32 4294967295, %s30657_s24   ;;  %p22836_p0 = scmp.ge.s32.totalorder %s30657_s24, 1  ;;  %s30657_s24 = sphi %s30702_s24, %s17_s24  }
   0x2   : > { %p236_p1 = scmp.lt.s32.totalorder %s30657_s24, 3 }
   0x4   : > { %p237_p2 = pnand %p22836_p0, %p236_p1 }
   0x5   : > { %v26349_v0 = vld [vmem:[%s40000_s0 + $0x4] ss:$52 sps:$4 sm:$0xff] (!%p237_p2)   ;;  %p267_p3 = scmp.lt.s32.totalorder (!%p237_p2), %s22832_s25, 1  ;;  %v26351_v1 = vld [vmem:[%s40000_s0] ss:$52 sps:$4 sm:$0xff] (!%p237_p2)   ;;  %v30659_v2 = vmov (!%p237_p2), 0  }
   0x6   : > { %240 = sbr.rel (%p237_p2) target bundleno = 3277 (0xccd), region = 48  ;;  %624 = vmatprep.mubr.bf16.mxu0 (!%p237_p2), %v30659_v2  ;;  %665 = vmatprep.mubr.bf16.mxu1 (!%p237_p2), %v30659_v2  ;;  %v26352_v3 = vld [vmem:[%s40000_s0 + $0x6c] ss:$52 sps:$4 sm:$0xff] (!%p237_p2)   ;;  %v26354_v4 = vld [vmem:[%s40000_s0 + $0x68] ss:$52 sps:$4 sm:$0xff] (!%p237_p2)   ;;  %vm588_vm0 = vcmask (!%p237_p2), 392192  }
   0x7   : > { %592 = vmatprep.subr.bf16.mxu0 (!%p237_p2), %v26349_v0  ;;  %v26355_v5 = vld [vmem:[%s40000_s0 + $0xd4] ss:$52 sps:$4 sm:$0xff] (!%p237_p2)   ;;  %v26358_v6 = vld [vmem:[%s40000_s0 + $0xc] ss:$52 sps:$4 sm:$0xff] (!%p237_p2)   ;;  %v26357_v8 = vld [vmem:[%s40000_s0 + $0xd0] ss:$52 sps:$4 sm:$0xff] (!%p237_p2)  }
   0x8   : > { %593 = vmatpush1.bf16.msra.mxu0 (!%p237_p2), %v26351_v1  ;;  %v26360_v7 = vld [vmem:[%s40000_s0 + $0x8] ss:$52 sps:$4 sm:$0xff] (!%p237_p2)   ;;  %633 = vmatprep.subr.bf16.mxu1 (!%p237_p2), %v26358_v6  ;;  %v26363_v11 = vld [vmem:[%s40000_s0 + $0x70] ss:$52 sps:$4 sm:$0xff] (!%p237_p2)   ;;  %v26366_v15 = vld [vmem:[%s40000_s0 + $0xd8] ss:$52 sps:$4 sm:$0xff] (!%p237_p2)  }
   0x9   : > { %594 = vmatprep.subr.bf16.mxu0 (!%p237_p2), %v26352_v3  ;;  %v26361_v10 = vld [vmem:[%s40000_s0 + $0x74] ss:$52 sps:$4 sm:$0xff] (!%p237_p2)   ;;  %634 = vmatpush1.bf16.msra.mxu1 (!%p237_p2), %v26360_v7  ;;  %v26364_v12 = vld [vmem:[%s40000_s0 + $0xdc] ss:$52 sps:$4 sm:$0xff] (!%p237_p2)   ;;  %v26370_v19 = vld [vmem:[%s40000_s0 + $0x78] ss:$52 sps:$4 sm:$0xff] (!%p237_p2)  }
   0xa   : > { %635 = vmatprep.subr.bf16.mxu1 (!%p237_p2), %v26361_v10  ;;  %v26369_v13 = vld [vmem:[%s40000_s0 + $0x14] ss:$52 sps:$4 sm:$0xff] (!%p237_p2)   ;;  %v26367_v16 = vld [vmem:[%s40000_s0 + $0x10] ss:$52 sps:$4 sm:$0xff] (!%p237_p2)   ;;  %v26376_v21 = vld [vmem:[%s40000_s0 + $0x18] ss:$52 sps:$4 sm:$0xff] (!%p237_p2)  }
   0xb   : > { %v26372_v17 = vld [vmem:[%s40000_s0 + $0x7c] ss:$52 sps:$4 sm:$0xff] (!%p237_p2)   ;;  %v26375_v20 = vld [vmem:[%s40000_s0 + $0xe4] ss:$52 sps:$4 sm:$0xff] (!%p237_p2)   ;;  %v26373_v23 = vld [vmem:[%s40000_s0 + $0xe0] ss:$52 sps:$4 sm:$0xff] (!%p237_p2)  }
   0xc   : > { %595 = vmatpush1.bf16.msra.mxu0 (!%p237_p2), %v26354_v4  ;;  %v26378_v18 = vld [vmem:[%s40000_s0 + $0x1c] ss:$52 sps:$4 sm:$0xff] (!%p237_p2)   ;;  %v26384_v22 = vld [vmem:[%s40000_s0 + $0x84] ss:$52 sps:$4 sm:$0xff] (!%p237_p2)   ;;  %v26382_v25 = vld [vmem:[%s40000_s0 + $0x80] ss:$52 sps:$4 sm:$0xff] (!%p237_p2)  }
   0xd   : > { %s40009_s25 = smov (!%p267_p3, %s22832_s25), 1  ;;  %596 = vmatprep.subr.bf16.mxu0 %v26355_v5  ;;  %636 = vmatpush1.bf16.msra.mxu1 %v26363_v11  ;;  %v26381_v24 = vld [vmem:[%s40000_s0 + $0x24] ss:$52 sps:$4 sm:$0xff]   ;;  %v26390_v26 = vld [vmem:[%s40000_s0 + $0xec] ss:$52 sps:$4 sm:$0xff]   ;;  %v30660_v40 = vmov 0.0  }
   0xe   : > { %s22837_s13 = sshll.u32 %s40009_s25, 3  ;;  %637 = vmatprep.subr.bf16.mxu1 %v26364_v12  ;;  %v26379_v27 = vld [vmem:[%s40000_s0 + $0x20] ss:$52 sps:$4 sm:$0xff]   ;;  %v26388_v29 = vld [vmem:[%s40000_s0 + $0xe8] ss:$52 sps:$4 sm:$0xff]   ;;  %vm30661_vm1 = vmmov 0  }
   0xf   : > { %s270_s18 = scalar_lea.vmem %s40006_s6, %s22837_s13  ;;  %v26387_v28 = vld [vmem:[%s40000_s0 + $0x8c] ss:$52 sps:$4 sm:$0xff]   ;;  %v26385_v31 = vld [vmem:[%s40000_s0 + $0x88] ss:$52 sps:$4 sm:$0xff]   ;;  %v26391_v35 = vld [vmem:[%s40000_s0 + $0xf0] ss:$52 sps:$4 sm:$0xff]  }
  0x10   : > { %v277_v9 = vld [vmem:[%s270_s18] sm:$0xff]  ;;  %597 = vmatpush1.bf16.msra.mxu0 %v26357_v8  ;;  %v26394_v32 = vld [vmem:[%s40000_s0 + $0x28] ss:$52 sps:$4 sm:$0xff]   ;;  %v26402_v39 = vld [vmem:[%s40000_s0 + $0xf8] ss:$52 sps:$4 sm:$0xff]   ;;  %s26337_s8 = smul.u32 40, %s40009_s25 }
  0x11   : > { %v30754_v14 = vpack.c.bf16 %v277_v9, %v277_v9  ;;  %674 = vmatprep.subr.bf16.mxu0 %v26369_v13  ;;  %638 = vmatpush1.bf16.msra.mxu1 %v26366_v15  ;;  %v26396_v30 = vld [vmem:[%s40000_s0 + $0x2c] ss:$52 sps:$4 sm:$0xff]   ;;  %v26393_v33 = vld [vmem:[%s40000_s0 + $0xf4] ss:$52 sps:$4 sm:$0xff]   ;;  %v26398_v36 = vld [vmem:[%s40000_s0 + $0x90] ss:$52 sps:$4 sm:$0xff]  }
  0x12   : > { %715 = vmatprep.subr.bf16.mxu1 %v26378_v18  ;;  %v26400_v34 = vld [vmem:[%s40000_s0 + $0x94] ss:$52 sps:$4 sm:$0xff]   ;;  %v26404_v37 = vld [vmem:[%s40000_s0 + $0xfc] ss:$52 sps:$4 sm:$0xff]   ;;  %v26401_v42 = vld [vmem:[%s40000_s0 + $0x98] ss:$52 sps:$4 sm:$0xff]   ;;  %s39989_s11 = scalar_lea.vmem %s40007_s7, %s26337_s8 }
  0x13   : > { %22878 = vmatmul.mubr.msk.bf16.vlgmr.msra.gmra.mrb[0].mxu0 %vm588_vm0, %v30754_v14  ;;  %v26397_v38 = vld [vmem:[%s40000_s0 + $0x30] ss:$52 sps:$4 sm:$0xff]   ;;  %v26405_v45 = vld [vmem:[%s40000_s0 + $0x100] ss:$52 sps:$4 sm:$0xff]   ;;  %v26411_v47 = vld [vmem:[%s40002_s2 + $0xc] ss:$80 sps:$4 sm:$0xff]  }
  0x14   : > { %675 = vmatpush1.bf16.msra.mxu0 %v26367_v16  ;;  %706 = vmatprep.mubr.bf16.mxu0 %v30659_v2  ;;  %v26408_v41 = vld [vmem:[%s40002_s2 + $0x4] ss:$80 sps:$4 sm:$0xff]   ;;  %v26406_v43 = vld [vmem:[%s40002_s2] ss:$80 sps:$4 sm:$0xff]   ;;  %v26409_v49 = vld [vmem:[%s40002_s2 + $0x8] ss:$80 sps:$4 sm:$0xff]  }
  0x15   : > { %676 = vmatprep.subr.bf16.mxu0 %v26372_v17  ;;  %22879 = vmatmul.mubr.msk.bf16.vlgmr.msra.gmra.mrb[0].mxu1 %vm588_vm0, %v30754_v14  ;;  %v26414_v44 = vld [vmem:[%s40002_s2 + $0xa4] ss:$80 sps:$4 sm:$0xff]   ;;  %v26412_v46 = vld [vmem:[%s40002_s2 + $0xa0] ss:$80 sps:$4 sm:$0xff]   ;;  %v26417_v51 = vld [vmem:[%s40002_s2 + $0xac] ss:$80 sps:$4 sm:$0xff]  }
  0x16   : > { %716 = vmatpush1.bf16.msra.mxu1 %v26376_v21  ;;  %747 = vmatprep.mubr.bf16.mxu1 %v30659_v2  ;;  %v26420_v48 = vld [vmem:[%s40002_s2 + $0x144] ss:$80 sps:$4 sm:$0xff]   ;;  %v26418_v50 = vld [vmem:[%s40002_s2 + $0x140] ss:$80 sps:$4 sm:$0xff]   ;;  %v26415_v53 = vld [vmem:[%s40002_s2 + $0xa8] ss:$80 sps:$4 sm:$0xff]  }
  0x17   : > { %717 = vmatprep.subr.bf16.mxu1 %v26384_v22  ;;  %v26426_v52 = vld [vmem:[%s40002_s2 + $0x1e4] ss:$80 sps:$4 sm:$0xff]   ;;  %v26424_v54 = vld [vmem:[%s40002_s2 + $0x1e0] ss:$80 sps:$4 sm:$0xff]   ;;  %v26423_v55 = vld [vmem:[%s40002_s2 + $0x14c] ss:$80 sps:$4 sm:$0xff]  }
  0x18   : > { %677 = vmatpush1.bf16.msra.mxu0 %v26370_v19  ;;  %v26432_v56 = vld [vmem:[%s40002_s2 + $0x284] ss:$80 sps:$4 sm:$0xff]   ;;  %v26421_v57 = vld [vmem:[%s40002_s2 + $0x148] ss:$80 sps:$4 sm:$0xff]   ;;  %v26430_v58 = vld [vmem:[%s40002_s2 + $0x280] ss:$80 sps:$4 sm:$0xff]  }
  0x19   : > { %678 = vmatprep.subr.bf16.mxu0 %v26375_v20  ;;  %v26429_v59 = vld [vmem:[%s40002_s2 + $0x1ec] ss:$80 sps:$4 sm:$0xff]   ;;  %v26438_v60 = vld [vmem:[%s40002_s2 + $0x324] ss:$80 sps:$4 sm:$0xff]   ;;  %v26427_v61 = vld [vmem:[%s40002_s2 + $0x1e8] ss:$80 sps:$4 sm:$0xff]  }
  0x1a   : > { %718 = vmatpush1.bf16.msra.mxu1 %v26382_v25  ;;  %v26436_v62 = vld [vmem:[%s40002_s2 + $0x320] ss:$80 sps:$4 sm:$0xff]   ;;  %v26435_v63 = vld [vmem:[%s40002_s2 + $0x28c] ss:$80 sps:$4 sm:$0xff]   ;;  %v26444_v0 = vld [vmem:[%s40002_s2 + $0x3c4] ss:$80 sps:$4 sm:$0xff]  }
  0x1b   : > { %719 = vmatprep.subr.bf16.mxu1 %v26390_v26  ;;  %v26433_v1 = vld [vmem:[%s40002_s2 + $0x288] ss:$80 sps:$4 sm:$0xff]   ;;  %v26442_v3 = vld [vmem:[%s40002_s2 + $0x3c0] ss:$80 sps:$4 sm:$0xff]   ;;  %v26441_v4 = vld [vmem:[%s40002_s2 + $0x32c] ss:$80 sps:$4 sm:$0xff]  }
  0x1c   : > { %679 = vmatpush1.bf16.msra.mxu0 %v26373_v23  ;;  %v26450_v5 = vld [vmem:[%s40002_s2 + $0x464] ss:$80 sps:$4 sm:$0xff]   ;;  %v26439_v6 = vld [vmem:[%s40002_s2 + $0x328] ss:$80 sps:$4 sm:$0xff]   ;;  %v26448_v7 = vld [vmem:[%s40002_s2 + $0x460] ss:$80 sps:$4 sm:$0xff]  }
  0x1d   : > { %756 = vmatprep.subr.bf16.mxu0 %v26381_v24  ;;  %v26447_v8 = vld [vmem:[%s40002_s2 + $0x3cc] ss:$80 sps:$4 sm:$0xff]   ;;  %v26456_v9 = vld [vmem:[%s40002_s2 + $0x504] ss:$80 sps:$4 sm:$0xff]   ;;  %v26445_v10 = vld [vmem:[%s40002_s2 + $0x3c8] ss:$80 sps:$4 sm:$0xff]  }
  0x1e   : > { %720 = vmatpush1.bf16.msra.mxu1 %v26388_v29  ;;  %v26454_v11 = vld [vmem:[%s40002_s2 + $0x500] ss:$80 sps:$4 sm:$0xff]   ;;  %v26453_v12 = vld [vmem:[%s40002_s2 + $0x46c] ss:$80 sps:$4 sm:$0xff]   ;;  %v26462_v13 = vld [vmem:[%s40002_s2 + $0x5a4] ss:$80 sps:$4 sm:$0xff]  }
  0x1f   : > { %22880 = vmatmul.mubr.msk.bf16.vlgmr.msra.gmra.mrb[4].mxu0 %vm588_vm0, %v30754_v14  ;;  %797 = vmatprep.subr.bf16.mxu1 %v26396_v30  ;;  %v26460_v15 = vld [vmem:[%s40002_s2 + $0x5a0] ss:$80 sps:$4 sm:$0xff]   ;;  %v26459_v16 = vld [vmem:[%s40002_s2 + $0x50c] ss:$80 sps:$4 sm:$0xff]   ;;  %v26468_v17 = vld [vmem:[%s40002_s2 + $0x644] ss:$80 sps:$4 sm:$0xff]  }
  0x20   : > { %757 = vmatpush1.bf16.msra.mxu0 %v26379_v27  ;;  %788 = vmatprep.mubr.bf16.mxu0 %v30659_v2  ;;  %v26457_v18 = vld [vmem:[%s40002_s2 + $0x508] ss:$80 sps:$4 sm:$0xff]   ;;  %v26466_v19 = vld [vmem:[%s40002_s2 + $0x640] ss:$80 sps:$4 sm:$0xff]   ;;  %v26465_v20 = vld [vmem:[%s40002_s2 + $0x5ac] ss:$80 sps:$4 sm:$0xff]  }
  0x21   : > { %758 = vmatprep.subr.bf16.mxu0 %v26387_v28  ;;  %22881 = vmatmul.mubr.msk.bf16.vlgmr.msra.gmra.mrb[4].mxu1 %vm588_vm0, %v30754_v14  ;;  %v26474_v21 = vld [vmem:[%s40002_s2 + $0x6e4] ss:$80 sps:$4 sm:$0xff]   ;;  %v26463_v22 = vld [vmem:[%s40002_s2 + $0x5a8] ss:$80 sps:$4 sm:$0xff]   ;;  %v26472_v23 = vld [vmem:[%s40002_s2 + $0x6e0] ss:$80 sps:$4 sm:$0xff]  }
  0x22   : > { %798 = vmatpush1.bf16.msra.mxu1 %v26394_v32  ;;  %829 = vmatprep.mubr.bf16.mxu1 %v30659_v2  ;;  %v26471_v24 = vld [vmem:[%s40002_s2 + $0x64c] ss:$80 sps:$4 sm:$0xff]   ;;  %v26480_v25 = vld [vmem:[%s40002_s2 + $0x784] ss:$80 sps:$4 sm:$0xff]   ;;  %v26469_v26 = vld [vmem:[%s40002_s2 + $0x648] ss:$80 sps:$4 sm:$0xff]  }
  0x23   : > { %799 = vmatprep.subr.bf16.mxu1 %v26400_v34  ;;  %v26478_v27 = vld [vmem:[%s40002_s2 + $0x780] ss:$80 sps:$4 sm:$0xff]   ;;  %v26477_v28 = vld [vmem:[%s40002_s2 + $0x6ec] ss:$80 sps:$4 sm:$0xff]   ;;  %v26486_v29 = vld [vmem:[%s40002_s2 + $0x824] ss:$80 sps:$4 sm:$0xff]  }
  0x24   : > { %759 = vmatpush1.bf16.msra.mxu0 %v26385_v31  ;;  %v26475_v30 = vld [vmem:[%s40002_s2 + $0x6e8] ss:$80 sps:$4 sm:$0xff]   ;;  %v26484_v31 = vld [vmem:[%s40002_s2 + $0x820] ss:$80 sps:$4 sm:$0xff]   ;;  %v26483_v32 = vld [vmem:[%s40002_s2 + $0x78c] ss:$80 sps:$4 sm:$0xff]  }
  0x25   : > { %760 = vmatprep.subr.bf16.mxu0 %v26393_v33  ;;  %v26481_v33 = vld [vmem:[%s40002_s2 + $0x788] ss:$80 sps:$4 sm:$0xff]   ;;  %v26492_v34 = vld [vmem:[%s40002_s2 + $0x8c4] ss:$80 sps:$4 sm:$0xff]  }
  0x26   : > { %800 = vmatpush1.bf16.msra.mxu1 %v26398_v36  ;;  %v26490_v36 = vld [vmem:[%s40002_s2 + $0x8c0] ss:$80 sps:$4 sm:$0xff]  }
  0x27   : > { %801 = vmatprep.subr.bf16.mxu1 %v26404_v37  ;;  %v26487_v37 = vld [vmem:[%s40002_s2 + $0x828] ss:$80 sps:$4 sm:$0xff]  }
  0x28   : > { %761 = vmatpush1.bf16.msra.mxu0 %v26391_v35  ;;  %v26489_v35 = vld [vmem:[%s40002_s2 + $0x82c] ss:$80 sps:$4 sm:$0xff]  }
  0x29   : > { %25991 = vmatprep.subr.bf16.mxu0 %v30660_v40 }
  0x2a   : > { %802 = vmatpush1.bf16.msra.mxu1 %v26402_v39  ;;  %v26495_v39 = vld [vmem:[%s40002_s2 + $0x8cc] ss:$80 sps:$4 sm:$0xff]  }
  0x2b   : > { %22882 = vmatmul.mubr.msk.bf16.vlgmr.msra.gmra.mrb[8].mxu0 %vm588_vm0, %v30754_v14  ;;  %13490 = vmatprep.subr.bf16.mxu1 %v26408_v41  ;;  %v26493_v41 = vld [vmem:[%s40002_s2 + $0x8c8] ss:$80 sps:$4 sm:$0xff]  }
  0x2c   : > { %25992 = vmatpush3.bf16.msra.mxu0 %v26397_v38  ;;  %25997 = vmatprep.mubr.msk.bf16.mxu0 %vm30661_vm1, %v30660_v40  ;;  %v26498_v38 = vld [vmem:[%s40002_s2 + $0x964] ss:$80 sps:$4 sm:$0xff]  }
  0x2d   : > { %25993 = vmatprep.subr.bf16.mxu0 %v30660_v40  ;;  %22883 = vmatmul.mubr.msk.bf16.vlgmr.msra.gmra.mrb[8].mxu1 %vm588_vm0, %v30754_v14 }
  0x2e   : > { %13491 = vmatpush1.bf16.msra.mxu1 %v26406_v43  ;;  %v26501_v43 = vld [vmem:[%s40002_s2 + $0x96c] ss:$80 sps:$4 sm:$0xff]  }
  0x2f   : > { %13492 = vmatprep.subr.bf16.mxu1 %v26414_v44  ;;  %v26499_v44 = vld [vmem:[%s40002_s2 + $0x968] ss:$80 sps:$4 sm:$0xff]  }
  0x30   : > { %25994 = vmatpush3.bf16.msra.mxu0 %v26401_v42  ;;  %v26504_v42 = vld [vmem:[%s40002_s2 + $0xa04] ss:$80 sps:$4 sm:$0xff]  }
  0x31   : > { %25995 = vmatprep.subr.bf16.mxu0 %v30660_v40  ;;  %v26496_v40 = vld [vmem:[%s40002_s2 + $0x960] ss:$80 sps:$4 sm:$0xff]  }
  0x32   : > { %13493 = vmatpush1.bf16.msra.mxu1 %v26412_v46  ;;  %v325_v46 = vlaneseq }
  0x33   : > { %13494 = vmatprep.subr.bf16.mxu1 %v26420_v48 }
  0x34   : > { %25996 = vmatpush3.bf16.msra.mxu0 %v26405_v45  ;;  %v26507_v45 = vld [vmem:[%s40002_s2 + $0xa0c] ss:$80 sps:$4 sm:$0xff]  }
  0x35   : > { %13777 = vmatprep.subr.bf16.mxu0 %v26411_v47  ;;  %v31053_v47 = vshrl.u32 %v325_v46, 7  ;;  %v26540_v46 = vld [vmem:[%s40002_s2 + $0xdc4] ss:$80 sps:$4 sm:$0xff]  }
  0x36   : > { %13495 = vmatpush1.bf16.msra.mxu1 %v26418_v50 }
  0x37   : > { %25998 = vmatmul.mubr.msk.bf16.vlgmr.msra.gmra.mrb[12].mxu0 %vm588_vm0, %v30754_v14  ;;  %13496 = vmatprep.subr.bf16.mxu1 %v26426_v52  ;;  %v26451_v14 = vld [vmem:[%s40002_s2 + $0x468] ss:$80 sps:$4 sm:$0xff]   ;;  %v31056_v48 = vsub.s32 0, %v31053_v47  ;;  %v31064_v50 = vsub.s32 1, %v31053_v47 }
  0x38   : > { %13778 = vmatpush1.bf16.msra.mxu0 %v26409_v49  ;;  %v31061_v49 = vld [vmem:[%s40001_s1] sm:$0xff] }
  0x39   : > { %13779 = vmatprep.subr.bf16.mxu0 %v26417_v51  ;;  %v328_v51 = vrot.slane %v31061_v49, %v31056_v48  ;;  %v332_v52 = vrot.slane %v31061_v49, %v31064_v50 }
  0x3a   : > { %13497 = vmatpush1.bf16.msra.mxu1 %v26424_v54 }
  0x3b   : > { %13498 = vmatprep.subr.bf16.mxu1 %v26432_v56 }
  0x3c   : > { %13780 = vmatpush1.bf16.msra.mxu0 %v26415_v53  ;;  %v31071_v53 = vsub.s32 3, %v31053_v47 }
  0x3d   : > { %13781 = vmatprep.subr.bf16.mxu0 %v26423_v55 }
  0x3e   : > { %13499 = vmatpush1.bf16.msra.mxu1 %v26430_v58 }
  0x3f   : > { %13500 = vmatprep.subr.bf16.mxu1 %v26438_v60 }
  0x40   : > { %13782 = vmatpush1.bf16.msra.mxu0 %v26421_v57 }
  0x41   : > { %13783 = vmatprep.subr.bf16.mxu0 %v26429_v59  ;;  %v340_v59 = vrot.slane %v31061_v49, %v31071_v53 }
  0x42   : > { %13501 = vmatpush1.bf16.msra.mxu1 %v26436_v62 }
  0x43   : > { %13502 = vmatprep.subr.bf16.mxu1 %v26444_v0  ;;  %v26505_v0 = vld [vmem:[%s40002_s2 + $0xa08] ss:$80 sps:$4 sm:$0xff]  }
  0x44   : > { %13784 = vmatpush1.bf16.msra.mxu0 %v26427_v61 }
  0x45   : > { %13785 = vmatprep.subr.bf16.mxu0 %v26435_v63  ;;  %v26502_v63 = vld [vmem:[%s40002_s2 + $0xa00] ss:$80 sps:$4 sm:$0xff]  }
  0x46   : > { %13503 = vmatpush1.bf16.msra.mxu1 %v26442_v3 }
  0x47   : > { %13504 = vmatprep.subr.bf16.mxu1 %v26450_v5 }
  0x48   : > { %13786 = vmatpush1.bf16.msra.mxu0 %v26433_v1 }
  0x49   : > { %13787 = vmatprep.subr.bf16.mxu0 %v26441_v4 }
  0x4a   : > { %13505 = vmatpush1.bf16.msra.mxu1 %v26448_v7 }
  0x4b   : > { %13506 = vmatprep.subr.bf16.mxu1 %v26456_v9  ;;  %v26513_v9 = vld [vmem:[%s40002_s2 + $0xaac] ss:$80 sps:$4 sm:$0xff]  }
  0x4c   : > { %13788 = vmatpush1.bf16.msra.mxu0 %v26439_v6 }
  0x4d   : > { %13789 = vmatprep.subr.bf16.mxu0 %v26447_v8  ;;  %v26510_v8 = vld [vmem:[%s40002_s2 + $0xaa4] ss:$80 sps:$4 sm:$0xff]  }
  0x4e   : > { %13507 = vmatpush1.bf16.msra.mxu1 %v26454_v11 }
  0x4f   : > { %13508 = vmatprep.subr.bf16.mxu1 %v26462_v13  ;;  %v26511_v13 = vld [vmem:[%s40002_s2 + $0xaa8] ss:$80 sps:$4 sm:$0xff]  }
  0x50   : > { %13790 = vmatpush1.bf16.msra.mxu0 %v26445_v10 }
  0x51   : > { %13791 = vmatprep.subr.bf16.mxu0 %v26453_v12  ;;  %v26508_v12 = vld [vmem:[%s40002_s2 + $0xaa0] ss:$80 sps:$4 sm:$0xff]  }
  0x52   : > { %13509 = vmatpush1.bf16.msra.mxu1 %v26460_v15  ;;  %v26516_v15 = vld [vmem:[%s40002_s2 + $0xb44] ss:$80 sps:$4 sm:$0xff]  }
  0x53   : > { %13510 = vmatprep.subr.bf16.mxu1 %v26468_v17 }
  0x54   : > { %13792 = vmatpush1.bf16.msra.mxu0 %v26451_v14 }
  0x55   : > { %13793 = vmatprep.subr.bf16.mxu0 %v26459_v16  ;;  %v26519_v16 = vld [vmem:[%s40002_s2 + $0xb4c] ss:$80 sps:$4 sm:$0xff]  }
  0x56   : > { %13511 = vmatpush1.bf16.msra.mxu1 %v26466_v19  ;;  %v26514_v19 = vld [vmem:[%s40002_s2 + $0xb40] ss:$80 sps:$4 sm:$0xff]  }
  0x57   : > { %13512 = vmatprep.subr.bf16.mxu1 %v26474_v21 }
  0x58   : > { %13794 = vmatpush1.bf16.msra.mxu0 %v26457_v18 }
  0x59   : > { %13795 = vmatprep.subr.bf16.mxu0 %v26465_v20  ;;  %v26517_v20 = vld [vmem:[%s40002_s2 + $0xb48] ss:$80 sps:$4 sm:$0xff]  }
  0x5a   : > { %13513 = vmatpush1.bf16.msra.mxu1 %v26472_v23  ;;  %v26525_v23 = vld [vmem:[%s40002_s2 + $0xbec] ss:$80 sps:$4 sm:$0xff]  }
  0x5b   : > { %13514 = vmatprep.subr.bf16.mxu1 %v26480_v25 }
  0x5c   : > { %13796 = vmatpush1.bf16.msra.mxu0 %v26463_v22  ;;  %v26522_v22 = vld [vmem:[%s40002_s2 + $0xbe4] ss:$80 sps:$4 sm:$0xff]  }
  0x5d   : > { %13797 = vmatprep.subr.bf16.mxu0 %v26471_v24 }
  0x5e   : > { %13515 = vmatpush1.bf16.msra.mxu1 %v26478_v27  ;;  %v26520_v27 = vld [vmem:[%s40002_s2 + $0xbe0] ss:$80 sps:$4 sm:$0xff]  }
  0x5f   : > { %13516 = vmatprep.subr.bf16.mxu1 %v26486_v29 }
  0x60   : > { %13798 = vmatpush1.bf16.msra.mxu0 %v26469_v26 }
  0x61   : > { %13799 = vmatprep.subr.bf16.mxu0 %v26477_v28  ;;  %v26523_v28 = vld [vmem:[%s40002_s2 + $0xbe8] ss:$80 sps:$4 sm:$0xff]  }
  0x62   : > { %13517 = vmatpush1.bf16.msra.mxu1 %v26484_v31  ;;  %v26531_v31 = vld [vmem:[%s40002_s2 + $0xc8c] ss:$80 sps:$4 sm:$0xff]  }
  0x63   : > { %13518 = vmatprep.subr.bf16.mxu1 %v26492_v34  ;;  %v26529_v34 = vld [vmem:[%s40002_s2 + $0xc88] ss:$80 sps:$4 sm:$0xff]  }
  0x64   : > { %13800 = vmatpush1.bf16.msra.mxu0 %v26475_v30  ;;  %v26528_v30 = vld [vmem:[%s40002_s2 + $0xc84] ss:$80 sps:$4 sm:$0xff]  }
  0x65   : > { %13801 = vmatprep.subr.bf16.mxu0 %v26483_v32 }
  0x66   : > { %13519 = vmatpush1.bf16.msra.mxu1 %v26490_v36  ;;  %v26537_v36 = vld [vmem:[%s40002_s2 + $0xd2c] ss:$80 sps:$4 sm:$0xff]  }
  0x67   : > { %13520 = vmatprep.subr.bf16.mxu1 %v26498_v38  ;;  %v322_v38 = vld [vmem:[%s40001_s1 + $0x8] sm:$0x1f] }
  0x68   : > { %13802 = vmatpush1.bf16.msra.mxu0 %v26481_v33  ;;  %v26526_v33 = vld [vmem:[%s40002_s2 + $0xc80] ss:$80 sps:$4 sm:$0xff]  }
  0x69   : > { %13803 = vmatprep.subr.bf16.mxu0 %v26489_v35  ;;  %v26534_v35 = vld [vmem:[%s40002_s2 + $0xd24] ss:$80 sps:$4 sm:$0xff]  }
  0x6a   : > { %13521 = vmatpush1.bf16.msra.mxu1 %v26496_v40 }
  0x6b   : > { %13531 = vmatprep.subr.bf16.mxu1 %v26504_v42  ;;  %v26532_v42 = vld [vmem:[%s40002_s2 + $0xd20] ss:$80 sps:$4 sm:$0xff]  }
  0x6c   : > { %13804 = vmatpush1.bf16.msra.mxu0 %v26487_v37  ;;  %v31158_v37 = vsub.s32 2, %v31053_v47 }
  0x6d   : > { %13805 = vmatprep.subr.bf16.mxu0 %v26495_v39 }
  0x70   : > { %13806 = vmatpush1.bf16.msra.mxu0 %v26493_v41  ;;  %v368_v41 = vrot.slane %v322_v38, %v31158_v37 }
  0x71   : > { %13807 = vmatprep.subr.bf16.mxu0 %v26501_v43  ;;  %v26535_v43 = vld [vmem:[%s40002_s2 + $0xd28] ss:$80 sps:$4 sm:$0xff]  }
  0x74   : > { %13808 = vmatpush1.bf16.msra.mxu0 %v26499_v44 }
  0x75   : > { %13818 = vmatprep.subr.bf16.mxu0 %v26507_v45  ;;  %v372_v45 = vrot.slane %v322_v38, %v31071_v53 }
  0xe6   : > { %v626_v54 = vpop.f32.mrb[0].mxu0 }
  0xe7   : > { %v627_v55 = vadd.f32 %v626_v54, %v328_v51  ;;  %v628_v56 = vpop.f32.mrb[1].mxu0  ;;  %v26543_v51 = vld [vmem:[%s40002_s2 + $0xdcc] ss:$80 sps:$4 sm:$0xff]  }
  0xe8   : > { %v629_v57 = vadd.f32 %v628_v56, %v332_v52  ;;  %v630_v58 = vpop.f32.mrb[2].mxu0  ;;  %v31081_v1 = vpop.f32.mrb[0].mxu1 }
  0xe9   : > { %v878_v60 = vmax.f32 %v627_v55, 0.0  ;;  %v631_v61 = vpop.f32.mrb[3].mxu0  ;;  %v669_v3 = vpop.f32.mrb[1].mxu1  ;;  %v26541_v58 = vld [vmem:[%s40002_s2 + $0xdc8] ss:$80 sps:$4 sm:$0xff]  }
  0xea   : > { %v879_v62 = vmax.f32 %v629_v57, 0.0  ;;  %v670_v5 = vadd.f32 %v669_v3, %v340_v59  ;;  %v671_v6 = vpop.f32.mrb[2].mxu1  ;;  %v26538_v57 = vld [vmem:[%s40002_s2 + $0xdc0] ss:$80 sps:$4 sm:$0xff]   ;;  %v26546_v61 = vld [vmem:[%s40002_s2 + $0xe64] ss:$80 sps:$4 sm:$0xff]  }
  0xeb   : > { %v31085_v7 = vpack.c.bf16 %v878_v60, %v878_v60  ;;  %v672_v10 = vpop.f32.mrb[3].mxu1  ;;  %v26547_v6 = vld [vmem:[%s40002_s2 + $0xe68] ss:$80 sps:$4 sm:$0xff]  }
  0xec   : > { %v31083_v4 = vpack.c.bf16 %v879_v62, %v879_v62  ;;  %v881_v11 = vmax.f32 %v670_v5, 0.0  ;;  %v26549_v62 = vld [vmem:[%s40002_s2 + $0xe6c] ss:$80 sps:$4 sm:$0xff]   ;;  %v26544_v5 = vld [vmem:[%s40002_s2 + $0xe60] ss:$80 sps:$4 sm:$0xff]  }
  0xee   : > { %13522 = vmatprep.mubr.bf16.mxu1 %v31083_v4  ;;  %13809 = vmatprep.mubr.bf16.mxu0 %v31083_v4  ;;  %v31103_v14 = vpack.c.bf16 %v881_v11, %v881_v11 }
  0xef   : > { %13523 = vmatmul.mubr.bf16.vlgmr.msra.gmra.mrb[12].mxu1 %v31085_v7  ;;  %13810 = vmatmul.mubr.bf16.vlgmr.msra.gmra.mrb[16].mxu0 %v31085_v7 }
  0xf0   : > { %13532 = vmatpush1.bf16.msra.mxu1 %v26502_v63  ;;  %13819 = vmatpush1.bf16.msra.mxu0 %v26505_v0  ;;  %v31198_v63 = vsub.s32 4, %v31053_v47 }
  0xf1   : > { %13533 = vmatprep.subr.bf16.mxu1 %v26510_v8  ;;  %13820 = vmatprep.subr.bf16.mxu0 %v26513_v9  ;;  %v26552_v8 = vld [vmem:[%s40002_s2 + $0xf04] ss:$80 sps:$4 sm:$0xff]   ;;  %v26555_v9 = vld [vmem:[%s40002_s2 + $0xf0c] ss:$80 sps:$4 sm:$0xff]  }
  0xf2   : > { %13563 = vmatprep.mubr.bf16.mxu1 %v31103_v14  ;;  %13850 = vmatprep.mubr.bf16.mxu0 %v31103_v14  ;;  %v31113_v17 = vpop.f32.mrb[4].mxu0  ;;  %v376_v3 = vrot.slane %v322_v38, %v31198_v63  ;;  %v26577_v38 = vld [vmem:[%s40002_s2 + $0x1188] ss:$80 sps:$4 sm:$0xff]  }
  0xf3   : > { %v31115_v18 = vpop.f32.mrb[5].mxu0 }
  0xf4   : > { %13534 = vmatpush1.bf16.msra.mxu1 %v26508_v12  ;;  %13821 = vmatpush1.bf16.msra.mxu0 %v26511_v13  ;;  %v712_v21 = vpop.f32.mrb[6].mxu0  ;;  %v31129_v25 = vpop.f32.mrb[4].mxu1  ;;  %v26550_v13 = vld [vmem:[%s40002_s2 + $0xf00] ss:$80 sps:$4 sm:$0xff]  }
  0xf5   : > { %13535 = vmatprep.subr.bf16.mxu1 %v26516_v15  ;;  %13822 = vmatprep.subr.bf16.mxu0 %v26519_v16  ;;  %v713_v24 = vpop.f32.mrb[7].mxu0  ;;  %v31131_v26 = vpop.f32.mrb[5].mxu1  ;;  %v26553_v15 = vld [vmem:[%s40002_s2 + $0xf08] ss:$80 sps:$4 sm:$0xff]  }
  0xf6   : > { %v753_v29 = vpop.f32.mrb[6].mxu1  ;;  %v26564_v24 = vld [vmem:[%s40002_s2 + $0x1044] ss:$80 sps:$4 sm:$0xff]  }
  0xf7   : > { %v754_v32 = vpop.f32.mrb[7].mxu1  ;;  %v26565_v29 = vld [vmem:[%s40002_s2 + $0x1048] ss:$80 sps:$4 sm:$0xff]  }
  0xf8   : > { %13536 = vmatpush1.bf16.msra.mxu1 %v26514_v19  ;;  %13823 = vmatpush1.bf16.msra.mxu0 %v26517_v20  ;;  %v26558_v19 = vld [vmem:[%s40002_s2 + $0xfa4] ss:$80 sps:$4 sm:$0xff]   ;;  %v26561_v20 = vld [vmem:[%s40002_s2 + $0xfac] ss:$80 sps:$4 sm:$0xff]   ;;  %v26568_v32 = vld [vmem:[%s40002_s2 + $0x10e0] ss:$80 sps:$4 sm:$0xff]  }
  0xf9   : > { %13537 = vmatprep.subr.bf16.mxu1 %v26522_v22  ;;  %13824 = vmatprep.subr.bf16.mxu0 %v26525_v23  ;;  %v26556_v22 = vld [vmem:[%s40002_s2 + $0xfa0] ss:$80 sps:$4 sm:$0xff]   ;;  %v26559_v23 = vld [vmem:[%s40002_s2 + $0xfa8] ss:$80 sps:$4 sm:$0xff]  }
  0xfc   : > { %13538 = vmatpush1.bf16.msra.mxu1 %v26520_v27  ;;  %13825 = vmatpush1.bf16.msra.mxu0 %v26523_v28  ;;  %v26567_v27 = vld [vmem:[%s40002_s2 + $0x104c] ss:$80 sps:$4 sm:$0xff]   ;;  %v26562_v28 = vld [vmem:[%s40002_s2 + $0x1040] ss:$80 sps:$4 sm:$0xff]  }
  0xfd   : > { %13539 = vmatprep.subr.bf16.mxu1 %v26528_v30  ;;  %13826 = vmatprep.subr.bf16.mxu0 %v26531_v31  ;;  %v26570_v30 = vld [vmem:[%s40002_s2 + $0x10e4] ss:$80 sps:$4 sm:$0xff]   ;;  %v26573_v31 = vld [vmem:[%s40002_s2 + $0x10ec] ss:$80 sps:$4 sm:$0xff]  }
  0xfe   : > { %v31163_v39 = vpop.f32.mrb[8].mxu0 }
  0xff   : > { %v31165_v40 = vpop.f32.mrb[9].mxu0 }
 0x100   : > { %13540 = vmatpush1.bf16.msra.mxu1 %v26526_v33  ;;  %13827 = vmatpush1.bf16.msra.mxu0 %v26529_v34  ;;  %v794_v44 = vpop.f32.mrb[10].mxu0  ;;  %v831_v54 = vpop.f32.mrb[8].mxu1  ;;  %v26571_v33 = vld [vmem:[%s40002_s2 + $0x10e8] ss:$80 sps:$4 sm:$0xff]   ;;  %v26576_v34 = vld [vmem:[%s40002_s2 + $0x1184] ss:$80 sps:$4 sm:$0xff]  }
 0x101   : > { %13541 = vmatprep.subr.bf16.mxu1 %v26534_v35  ;;  %13828 = vmatprep.subr.bf16.mxu0 %v26537_v36  ;;  %v795_v52 = vpop.f32.mrb[11].mxu0  ;;  %v31181_v55 = vadd.f32 %v831_v54, %v368_v41  ;;  %v833_v56 = vpop.f32.mrb[9].mxu1  ;;  %v26579_v35 = vld [vmem:[%s40002_s2 + $0x118c] ss:$80 sps:$4 sm:$0xff]   ;;  %v26574_v36 = vld [vmem:[%s40002_s2 + $0x1180] ss:$80 sps:$4 sm:$0xff]   ;;  %v336_v44 = vrot.slane %v31061_v49, %v31158_v37 }
 0x102   : > { %v31189_v59 = vadd.f32 %v833_v56, %v372_v45  ;;  %v835_v60 = vpop.f32.mrb[10].mxu1  ;;  %v26582_v41 = vld [vmem:[%s40002_s2 + $0x1224] ss:$80 sps:$4 sm:$0xff]   ;;  %v26580_v45 = vld [vmem:[%s40002_s2 + $0x1220] ss:$80 sps:$4 sm:$0xff]  }
 0x103   : > { %v836_v0 = vpop.f32.mrb[11].mxu1  ;;  %v26591_v52 = vld [vmem:[%s40002_s2 + $0x12cc] ss:$80 sps:$4 sm:$0xff]   ;;  %v668_v56 = vadd.f32 %v31081_v1, %v336_v44  ;;  %v26594_v60 = vld [vmem:[%s40002_s2 + $0x1364] ss:$80 sps:$4 sm:$0xff]  }
 0x104   : > { %13542 = vmatpush1.bf16.msra.mxu1 %v26532_v42  ;;  %13829 = vmatpush1.bf16.msra.mxu0 %v26535_v43  ;;  %v26585_v42 = vld [vmem:[%s40002_s2 + $0x122c] ss:$80 sps:$4 sm:$0xff]   ;;  %v31276_v43 = vsub.s32 5, %v31053_v47  ;;  %v26595_v0 = vld [vmem:[%s40002_s2 + $0x1368] ss:$80 sps:$4 sm:$0xff]  }
 0x105   : > { %13543 = vmatprep.subr.bf16.mxu1 %v26540_v46  ;;  %13830 = vmatprep.subr.bf16.mxu0 %v26543_v51  ;;  %v26583_v46 = vld [vmem:[%s40002_s2 + $0x1228] ss:$80 sps:$4 sm:$0xff]   ;;  %v26588_v51 = vld [vmem:[%s40002_s2 + $0x12c4] ss:$80 sps:$4 sm:$0xff]  }
 0x106   : > { %v348_v54 = vrot.slane %v31061_v49, %v31276_v43  ;;  %v26597_v49 = vld [vmem:[%s40002_s2 + $0x136c] ss:$80 sps:$4 sm:$0xff]   ;;  %v26637_v44 = vld [vmem:[%s40002_s2 + $0x17c8] ss:$80 sps:$4 sm:$0xff]  }
 0x108   : > { %13544 = vmatpush1.bf16.msra.mxu1 %v26538_v57  ;;  %13831 = vmatpush1.bf16.msra.mxu0 %v26541_v58  ;;  %v26586_v57 = vld [vmem:[%s40002_s2 + $0x12c0] ss:$80 sps:$4 sm:$0xff]   ;;  %v26589_v58 = vld [vmem:[%s40002_s2 + $0x12c8] ss:$80 sps:$4 sm:$0xff]   ;;  %v711_v1 = vadd.f32 %v31115_v18, %v348_v54  ;;  %v26603_v18 = vld [vmem:[%s40002_s2 + $0x140c] ss:$80 sps:$4 sm:$0xff]  }
 0x109   : > { %13545 = vmatprep.subr.bf16.mxu1 %v26546_v61  ;;  %13832 = vmatprep.subr.bf16.mxu0 %v26549_v62  ;;  %v880_v61 = vmax.f32 %v668_v56, 0.0  ;;  %v26592_v62 = vld [vmem:[%s40002_s2 + $0x1360] ss:$80 sps:$4 sm:$0xff]   ;;  %v26648_v54 = vld [vmem:[%s40002_s2 + $0x1904] ss:$80 sps:$4 sm:$0xff]  }
 0x10a   : > { %v872_v10 = vpop.f32.mrb[12].mxu0  ;;  %v26651_v56 = vld [vmem:[%s40002_s2 + $0x190c] ss:$80 sps:$4 sm:$0xff]  }
 0x10b   : > { %v31213_v11 = vadd.f32 %v872_v10, %v376_v3  ;;  %v25999_v12 = vpop.f32.mrb[13].mxu0  ;;  %v26600_v3 = vld [vmem:[%s40002_s2 + $0x1404] ss:$80 sps:$4 sm:$0xff]  }
 0x10c   : > { %13546 = vmatpush1.bf16.msra.mxu1 %v26544_v5  ;;  %13833 = vmatpush1.bf16.msra.mxu0 %v26547_v6  ;;  %v875_v16 = vpop.f32.mrb[14].mxu0  ;;  %v26598_v5 = vld [vmem:[%s40002_s2 + $0x1400] ss:$80 sps:$4 sm:$0xff]   ;;  %v26601_v6 = vld [vmem:[%s40002_s2 + $0x1408] ss:$80 sps:$4 sm:$0xff]  }
 0x10d   : > { %13547 = vmatprep.subr.bf16.mxu1 %v26552_v8  ;;  %13834 = vmatprep.subr.bf16.mxu0 %v26555_v9  ;;  %v26000_v21 = vpop.f32.mrb[15].mxu0  ;;  %v883_v8 = vmax.f32 %v711_v1, 0.0  ;;  %v31326_v9 = vpack.c.bf16 %v880_v61, %v880_v61  ;;  %v26606_v10 = vld [vmem:[%s40002_s2 + $0x14a4] ss:$80 sps:$4 sm:$0xff]   ;;  %v26609_v12 = vld [vmem:[%s40002_s2 + $0x14ac] ss:$80 sps:$4 sm:$0xff]  }
 0x10e   : > { %v26610_v21 = vld [vmem:[%s40002_s2 + $0x1540] ss:$80 sps:$4 sm:$0xff]   ;;  %v26655_v61 = vld [vmem:[%s40002_s2 + $0x19a8] ss:$80 sps:$4 sm:$0xff]  }
 0x10f   : > { %v31340_v16 = vpack.c.bf16 %v883_v8, %v883_v8  ;;  %v26652_v1 = vld [vmem:[%s40002_s2 + $0x19a0] ss:$80 sps:$4 sm:$0xff]  }
 0x110   : > { %13548 = vmatpush1.bf16.msra.mxu1 %v26550_v13  ;;  %13835 = vmatpush1.bf16.msra.mxu0 %v26553_v15  ;;  %v26604_v13 = vld [vmem:[%s40002_s2 + $0x14a0] ss:$80 sps:$4 sm:$0xff]   ;;  %v26607_v15 = vld [vmem:[%s40002_s2 + $0x14a8] ss:$80 sps:$4 sm:$0xff]  }
 0x111   : > { %13549 = vmatprep.subr.bf16.mxu1 %v26558_v19  ;;  %13836 = vmatprep.subr.bf16.mxu0 %v26561_v20  ;;  %v26612_v19 = vld [vmem:[%s40002_s2 + $0x1544] ss:$80 sps:$4 sm:$0xff]   ;;  %v26615_v20 = vld [vmem:[%s40002_s2 + $0x154c] ss:$80 sps:$4 sm:$0xff]   ;;  %v26664_v8 = vld [vmem:[%s40002_s2 + $0x1ae0] ss:$80 sps:$4 sm:$0xff]  }
 0x114   : > { %13550 = vmatpush1.bf16.msra.mxu1 %v26556_v22  ;;  %13837 = vmatpush1.bf16.msra.mxu0 %v26559_v23  ;;  %v26613_v22 = vld [vmem:[%s40002_s2 + $0x1548] ss:$80 sps:$4 sm:$0xff]   ;;  %v26618_v23 = vld [vmem:[%s40002_s2 + $0x15e4] ss:$80 sps:$4 sm:$0xff]  }
 0x115   : > { %13551 = vmatprep.subr.bf16.mxu1 %v26564_v24  ;;  %13838 = vmatprep.subr.bf16.mxu0 %v26567_v27  ;;  %v26621_v24 = vld [vmem:[%s40002_s2 + $0x15ec] ss:$80 sps:$4 sm:$0xff]   ;;  %v26616_v27 = vld [vmem:[%s40002_s2 + $0x15e0] ss:$80 sps:$4 sm:$0xff]  }
 0x118   : > { %13552 = vmatpush1.bf16.msra.mxu1 %v26562_v28  ;;  %13839 = vmatpush1.bf16.msra.mxu0 %v26565_v29  ;;  %v26619_v28 = vld [vmem:[%s40002_s2 + $0x15e8] ss:$80 sps:$4 sm:$0xff]   ;;  %v26624_v29 = vld [vmem:[%s40002_s2 + $0x1684] ss:$80 sps:$4 sm:$0xff]  }
 0x119   : > { %13553 = vmatprep.subr.bf16.mxu1 %v26570_v30  ;;  %13840 = vmatprep.subr.bf16.mxu0 %v26573_v31  ;;  %v26627_v30 = vld [vmem:[%s40002_s2 + $0x168c] ss:$80 sps:$4 sm:$0xff]   ;;  %v26622_v31 = vld [vmem:[%s40002_s2 + $0x1680] ss:$80 sps:$4 sm:$0xff]  }
 0x11c   : > { %13554 = vmatpush1.bf16.msra.mxu1 %v26568_v32  ;;  %13841 = vmatpush1.bf16.msra.mxu0 %v26571_v33  ;;  %v26625_v32 = vld [vmem:[%s40002_s2 + $0x1688] ss:$80 sps:$4 sm:$0xff]   ;;  %v26630_v33 = vld [vmem:[%s40002_s2 + $0x1724] ss:$80 sps:$4 sm:$0xff]  }
 0x11d   : > { %13555 = vmatprep.subr.bf16.mxu1 %v26576_v34  ;;  %13842 = vmatprep.subr.bf16.mxu0 %v26579_v35  ;;  %v26633_v34 = vld [vmem:[%s40002_s2 + $0x172c] ss:$80 sps:$4 sm:$0xff]   ;;  %v26628_v35 = vld [vmem:[%s40002_s2 + $0x1720] ss:$80 sps:$4 sm:$0xff]  }
 0x120   : > { %13556 = vmatpush1.bf16.msra.mxu1 %v26574_v36  ;;  %13843 = vmatpush1.bf16.msra.mxu0 %v26577_v38  ;;  %v26631_v36 = vld [vmem:[%s40002_s2 + $0x1728] ss:$80 sps:$4 sm:$0xff]   ;;  %v26636_v38 = vld [vmem:[%s40002_s2 + $0x17c4] ss:$80 sps:$4 sm:$0xff]  }
 0x121   : > { %13557 = vmatprep.subr.bf16.mxu1 %v26582_v41  ;;  %13844 = vmatprep.subr.bf16.mxu0 %v26585_v42  ;;  %v26639_v41 = vld [vmem:[%s40002_s2 + $0x17cc] ss:$80 sps:$4 sm:$0xff]   ;;  %v26634_v42 = vld [vmem:[%s40002_s2 + $0x17c0] ss:$80 sps:$4 sm:$0xff]  }
 0x124   : > { %13558 = vmatpush1.bf16.msra.mxu1 %v26580_v45  ;;  %13845 = vmatpush1.bf16.msra.mxu0 %v26583_v46  ;;  %v26642_v45 = vld [vmem:[%s40002_s2 + $0x1864] ss:$80 sps:$4 sm:$0xff]   ;;  %v26645_v46 = vld [vmem:[%s40002_s2 + $0x186c] ss:$80 sps:$4 sm:$0xff]  }
 0x125   : > { %13559 = vmatprep.subr.bf16.mxu1 %v26588_v51  ;;  %13846 = vmatprep.subr.bf16.mxu0 %v26591_v52  ;;  %v26640_v51 = vld [vmem:[%s40002_s2 + $0x1860] ss:$80 sps:$4 sm:$0xff]   ;;  %v26643_v52 = vld [vmem:[%s40002_s2 + $0x1868] ss:$80 sps:$4 sm:$0xff]  }
 0x128   : > { %13560 = vmatpush1.bf16.msra.mxu1 %v26586_v57  ;;  %13847 = vmatpush1.bf16.msra.mxu0 %v26589_v58  ;;  %v26646_v57 = vld [vmem:[%s40002_s2 + $0x1900] ss:$80 sps:$4 sm:$0xff]   ;;  %v26649_v58 = vld [vmem:[%s40002_s2 + $0x1908] ss:$80 sps:$4 sm:$0xff]  }
 0x129   : > { %13561 = vmatprep.subr.bf16.mxu1 %v26594_v60  ;;  %13848 = vmatprep.subr.bf16.mxu0 %v26597_v49  ;;  %v26654_v60 = vld [vmem:[%s40002_s2 + $0x19a4] ss:$80 sps:$4 sm:$0xff]   ;;  %v26657_v49 = vld [vmem:[%s40002_s2 + $0x19ac] ss:$80 sps:$4 sm:$0xff]  }
 0x12c   : > { %13562 = vmatpush1.bf16.msra.mxu1 %v26592_v62  ;;  %13849 = vmatpush1.bf16.msra.mxu0 %v26595_v0  ;;  %v26660_v62 = vld [vmem:[%s40002_s2 + $0x1a44] ss:$80 sps:$4 sm:$0xff]   ;;  %v26663_v0 = vld [vmem:[%s40002_s2 + $0x1a4c] ss:$80 sps:$4 sm:$0xff]  }
 0x12d   : > { %13572 = vmatprep.subr.bf16.mxu1 %v26600_v3  ;;  %13859 = vmatprep.subr.bf16.mxu0 %v26603_v18  ;;  %v26658_v3 = vld [vmem:[%s40002_s2 + $0x1a40] ss:$80 sps:$4 sm:$0xff]   ;;  %v26661_v18 = vld [vmem:[%s40002_s2 + $0x1a48] ss:$80 sps:$4 sm:$0xff]  }
 0x12f   : > { %13564 = vmatmul.mubr.bf16.vlgmr.msra.gmra.mrb[12].mxu1 %v31326_v9  ;;  %13851 = vmatmul.mubr.bf16.vlgmr.msra.gmra.mrb[16].mxu0 %v31326_v9 }
 0x130   : > { %13573 = vmatpush1.bf16.msra.mxu1 %v26598_v5  ;;  %13860 = vmatpush1.bf16.msra.mxu0 %v26601_v6  ;;  %v26666_v5 = vld [vmem:[%s40002_s2 + $0x1ae4] ss:$80 sps:$4 sm:$0xff]   ;;  %v26669_v6 = vld [vmem:[%s40002_s2 + $0x1aec] ss:$80 sps:$4 sm:$0xff]  }
 0x131   : > { %13574 = vmatprep.subr.bf16.mxu1 %v26606_v10  ;;  %13861 = vmatprep.subr.bf16.mxu0 %v26609_v12  ;;  %v26667_v10 = vld [vmem:[%s40002_s2 + $0x1ae8] ss:$80 sps:$4 sm:$0xff]   ;;  %v26672_v12 = vld [vmem:[%s40002_s2 + $0x1b84] ss:$80 sps:$4 sm:$0xff]  }
 0x132   : > { %13604 = vmatprep.mubr.bf16.mxu1 %v31340_v16  ;;  %13891 = vmatprep.mubr.bf16.mxu0 %v31340_v16 }
 0x134   : > { %13575 = vmatpush1.bf16.msra.mxu1 %v26604_v13  ;;  %13862 = vmatpush1.bf16.msra.mxu0 %v26607_v15  ;;  %v26675_v13 = vld [vmem:[%s40002_s2 + $0x1b8c] ss:$80 sps:$4 sm:$0xff]   ;;  %v26670_v15 = vld [vmem:[%s40002_s2 + $0x1b80] ss:$80 sps:$4 sm:$0xff]  }
 0x135   : > { %13576 = vmatprep.subr.bf16.mxu1 %v26612_v19  ;;  %13863 = vmatprep.subr.bf16.mxu0 %v26615_v20  ;;  %v26673_v19 = vld [vmem:[%s40002_s2 + $0x1b88] ss:$80 sps:$4 sm:$0xff]   ;;  %v26678_v20 = vld [vmem:[%s40002_s2 + $0x1c24] ss:$80 sps:$4 sm:$0xff]  }
 0x138   : > { %13577 = vmatpush1.bf16.msra.mxu1 %v26610_v21  ;;  %13864 = vmatpush1.bf16.msra.mxu0 %v26613_v22  ;;  %v26681_v21 = vld [vmem:[%s40002_s2 + $0x1c2c] ss:$80 sps:$4 sm:$0xff]   ;;  %v26676_v22 = vld [vmem:[%s40002_s2 + $0x1c20] ss:$80 sps:$4 sm:$0xff]  }
 0x139   : > { %13578 = vmatprep.subr.bf16.mxu1 %v26618_v23  ;;  %13865 = vmatprep.subr.bf16.mxu0 %v26621_v24  ;;  %v26679_v23 = vld [vmem:[%s40002_s2 + $0x1c28] ss:$80 sps:$4 sm:$0xff]   ;;  %v31491_v24 = vsub.s32 7, %v31053_v47 }
 0x13c   : > { %13579 = vmatpush1.bf16.msra.mxu1 %v26616_v27  ;;  %13866 = vmatpush1.bf16.msra.mxu0 %v26619_v28  ;;  %v31496_v27 = vld [vmem:[%s40001_s1] sm:$0xff] }
 0x13d   : > { %13580 = vmatprep.subr.bf16.mxu1 %v26624_v29  ;;  %13867 = vmatprep.subr.bf16.mxu0 %v26627_v30  ;;  %v344_v28 = vrot.slane %v31496_v27, %v31198_v63  ;;  %v26684_v29 = vld [vmem:[%s40002_s2 + $0x1cc4] ss:$80 sps:$4 sm:$0xff]   ;;  %v26687_v30 = vld [vmem:[%s40002_s2 + $0x1ccc] ss:$80 sps:$4 sm:$0xff]  }
 0x140   : > { %13581 = vmatpush1.bf16.msra.mxu1 %v26622_v31  ;;  %13868 = vmatpush1.bf16.msra.mxu0 %v26625_v32  ;;  %v26682_v31 = vld [vmem:[%s40002_s2 + $0x1cc0] ss:$80 sps:$4 sm:$0xff]   ;;  %v26685_v32 = vld [vmem:[%s40002_s2 + $0x1cc8] ss:$80 sps:$4 sm:$0xff]  }
 0x141   : > { %13582 = vmatprep.subr.bf16.mxu1 %v26630_v33  ;;  %13869 = vmatprep.subr.bf16.mxu0 %v26633_v34  ;;  %v356_v33 = vrot.slane %v31496_v27, %v31491_v24  ;;  %v709_v34 = vadd.f32 %v31113_v17, %v344_v28  ;;  %v26691_v17 = vld [vmem:[%s40002_s2 + $0x1d68] ss:$80 sps:$4 sm:$0xff]  }
 0x142   : > { %v26733_v28 = vld [vmem:[%s40002_s2 + $0x21c8] ss:$80 sps:$4 sm:$0xff]  }
 0x144   : > { %13583 = vmatpush1.bf16.msra.mxu1 %v26628_v35  ;;  %13870 = vmatpush1.bf16.msra.mxu0 %v26631_v36  ;;  %v26690_v35 = vld [vmem:[%s40002_s2 + $0x1d64] ss:$80 sps:$4 sm:$0xff]   ;;  %v26693_v36 = vld [vmem:[%s40002_s2 + $0x1d6c] ss:$80 sps:$4 sm:$0xff]  }
 0x145   : > { %13584 = vmatprep.subr.bf16.mxu1 %v26636_v38  ;;  %13871 = vmatprep.subr.bf16.mxu0 %v26639_v41  ;;  %v26688_v38 = vld [vmem:[%s40002_s2 + $0x1d60] ss:$80 sps:$4 sm:$0xff]   ;;  %v752_v41 = vadd.f32 %v31131_v26, %v356_v33  ;;  %v26697_v26 = vld [vmem:[%s40002_s2 + $0x1e08] ss:$80 sps:$4 sm:$0xff]   ;;  %v26744_v33 = vld [vmem:[%s40002_s2 + $0x2304] ss:$80 sps:$4 sm:$0xff]  }
 0x148   : > { %13585 = vmatpush1.bf16.msra.mxu1 %v26634_v42  ;;  %13872 = vmatpush1.bf16.msra.mxu0 %v26637_v44  ;;  %v882_v42 = vmax.f32 %v709_v34, 0.0  ;;  %v26696_v44 = vld [vmem:[%s40002_s2 + $0x1e04] ss:$80 sps:$4 sm:$0xff]   ;;  %v26747_v34 = vld [vmem:[%s40002_s2 + $0x230c] ss:$80 sps:$4 sm:$0xff]  }
 0x149   : > { %13586 = vmatprep.subr.bf16.mxu1 %v26642_v45  ;;  %13873 = vmatprep.subr.bf16.mxu0 %v26645_v46  ;;  %v26699_v45 = vld [vmem:[%s40002_s2 + $0x1e0c] ss:$80 sps:$4 sm:$0xff]   ;;  %v26694_v46 = vld [vmem:[%s40002_s2 + $0x1e00] ss:$80 sps:$4 sm:$0xff]  }
 0x14c   : > { %13587 = vmatpush1.bf16.msra.mxu1 %v26640_v51  ;;  %13874 = vmatpush1.bf16.msra.mxu0 %v26643_v52  ;;  %v885_v51 = vmax.f32 %v752_v41, 0.0  ;;  %v31540_v52 = vpack.c.bf16 %v882_v42, %v882_v42  ;;  %v26748_v41 = vld [vmem:[%s40002_s2 + $0x23a0] ss:$80 sps:$4 sm:$0xff]   ;;  %v26751_v42 = vld [vmem:[%s40002_s2 + $0x23a8] ss:$80 sps:$4 sm:$0xff]  }
 0x14d   : > { %13588 = vmatprep.subr.bf16.mxu1 %v26648_v54  ;;  %13875 = vmatprep.subr.bf16.mxu0 %v26651_v56  ;;  %v26702_v54 = vld [vmem:[%s40002_s2 + $0x1ea4] ss:$80 sps:$4 sm:$0xff]   ;;  %v26705_v56 = vld [vmem:[%s40002_s2 + $0x1eac] ss:$80 sps:$4 sm:$0xff]  }
 0x150   : > { %13589 = vmatpush1.bf16.msra.mxu1 %v26646_v57  ;;  %13876 = vmatpush1.bf16.msra.mxu0 %v26649_v58  ;;  %v26700_v57 = vld [vmem:[%s40002_s2 + $0x1ea0] ss:$80 sps:$4 sm:$0xff]   ;;  %v26703_v58 = vld [vmem:[%s40002_s2 + $0x1ea8] ss:$80 sps:$4 sm:$0xff]  }
 0x151   : > { %13590 = vmatprep.subr.bf16.mxu1 %v26654_v60  ;;  %13877 = vmatprep.subr.bf16.mxu0 %v26657_v49  ;;  %v31554_v60 = vpack.c.bf16 %v885_v51, %v885_v51  ;;  %v26708_v49 = vld [vmem:[%s40002_s2 + $0x1f44] ss:$80 sps:$4 sm:$0xff]  }
 0x152   : > { %v26762_v51 = vld [vmem:[%s40002_s2 + $0x24e4] ss:$80 sps:$4 sm:$0xff]  }
 0x154   : > { %13591 = vmatpush1.bf16.msra.mxu1 %v26652_v1  ;;  %13878 = vmatpush1.bf16.msra.mxu0 %v26655_v61  ;;  %v26711_v1 = vld [vmem:[%s40002_s2 + $0x1f4c] ss:$80 sps:$4 sm:$0xff]   ;;  %v26706_v61 = vld [vmem:[%s40002_s2 + $0x1f40] ss:$80 sps:$4 sm:$0xff]  }
 0x155   : > { %13592 = vmatprep.subr.bf16.mxu1 %v26660_v62  ;;  %13879 = vmatprep.subr.bf16.mxu0 %v26663_v0  ;;  %v26709_v62 = vld [vmem:[%s40002_s2 + $0x1f48] ss:$80 sps:$4 sm:$0xff]   ;;  %v26714_v0 = vld [vmem:[%s40002_s2 + $0x1fe4] ss:$80 sps:$4 sm:$0xff]  }
 0x158   : > { %13593 = vmatpush1.bf16.msra.mxu1 %v26658_v3  ;;  %13880 = vmatpush1.bf16.msra.mxu0 %v26661_v18  ;;  %v26717_v3 = vld [vmem:[%s40002_s2 + $0x1fec] ss:$80 sps:$4 sm:$0xff]   ;;  %v26712_v18 = vld [vmem:[%s40002_s2 + $0x1fe0] ss:$80 sps:$4 sm:$0xff]  }
 0x159   : > { %13594 = vmatprep.subr.bf16.mxu1 %v26666_v5  ;;  %13881 = vmatprep.subr.bf16.mxu0 %v26669_v6  ;;  %v26715_v5 = vld [vmem:[%s40002_s2 + $0x1fe8] ss:$80 sps:$4 sm:$0xff]   ;;  %v26720_v6 = vld [vmem:[%s40002_s2 + $0x2084] ss:$80 sps:$4 sm:$0xff]  }
 0x15c   : > { %13595 = vmatpush1.bf16.msra.mxu1 %v26664_v8  ;;  %13882 = vmatpush1.bf16.msra.mxu0 %v26667_v10  ;;  %v26723_v8 = vld [vmem:[%s40002_s2 + $0x208c] ss:$80 sps:$4 sm:$0xff]   ;;  %v26718_v10 = vld [vmem:[%s40002_s2 + $0x2080] ss:$80 sps:$4 sm:$0xff]  }
 0x15d   : > { %13596 = vmatprep.subr.bf16.mxu1 %v26672_v12  ;;  %13883 = vmatprep.subr.bf16.mxu0 %v26675_v13  ;;  %v26721_v12 = vld [vmem:[%s40002_s2 + $0x2088] ss:$80 sps:$4 sm:$0xff]   ;;  %v26726_v13 = vld [vmem:[%s40002_s2 + $0x2124] ss:$80 sps:$4 sm:$0xff]  }
 0x160   : > { %13597 = vmatpush1.bf16.msra.mxu1 %v26670_v15  ;;  %13884 = vmatpush1.bf16.msra.mxu0 %v26673_v19  ;;  %v26729_v15 = vld [vmem:[%s40002_s2 + $0x212c] ss:$80 sps:$4 sm:$0xff]   ;;  %v26724_v19 = vld [vmem:[%s40002_s2 + $0x2120] ss:$80 sps:$4 sm:$0xff]  }
 0x161   : > { %13598 = vmatprep.subr.bf16.mxu1 %v26678_v20  ;;  %13885 = vmatprep.subr.bf16.mxu0 %v26681_v21  ;;  %v26727_v20 = vld [vmem:[%s40002_s2 + $0x2128] ss:$80 sps:$4 sm:$0xff]   ;;  %v26732_v21 = vld [vmem:[%s40002_s2 + $0x21c4] ss:$80 sps:$4 sm:$0xff]  }
 0x164   : > { %13599 = vmatpush1.bf16.msra.mxu1 %v26676_v22  ;;  %13886 = vmatpush1.bf16.msra.mxu0 %v26679_v23  ;;  %v26735_v22 = vld [vmem:[%s40002_s2 + $0x21cc] ss:$80 sps:$4 sm:$0xff]   ;;  %v26730_v23 = vld [vmem:[%s40002_s2 + $0x21c0] ss:$80 sps:$4 sm:$0xff]  }
 0x165   : > { %13600 = vmatprep.subr.bf16.mxu1 %v26684_v29  ;;  %13887 = vmatprep.subr.bf16.mxu0 %v26687_v30  ;;  %v26738_v29 = vld [vmem:[%s40002_s2 + $0x2264] ss:$80 sps:$4 sm:$0xff]   ;;  %v26741_v30 = vld [vmem:[%s40002_s2 + $0x226c] ss:$80 sps:$4 sm:$0xff]  }
 0x168   : > { %13601 = vmatpush1.bf16.msra.mxu1 %v26682_v31  ;;  %13888 = vmatpush1.bf16.msra.mxu0 %v26685_v32  ;;  %v26736_v31 = vld [vmem:[%s40002_s2 + $0x2260] ss:$80 sps:$4 sm:$0xff]   ;;  %v26739_v32 = vld [vmem:[%s40002_s2 + $0x2268] ss:$80 sps:$4 sm:$0xff]  }
 0x169   : > { %13602 = vmatprep.subr.bf16.mxu1 %v26690_v35  ;;  %13889 = vmatprep.subr.bf16.mxu0 %v26693_v36  ;;  %v26742_v35 = vld [vmem:[%s40002_s2 + $0x2300] ss:$80 sps:$4 sm:$0xff]   ;;  %v26745_v36 = vld [vmem:[%s40002_s2 + $0x2308] ss:$80 sps:$4 sm:$0xff]  }
 0x16c   : > { %13603 = vmatpush1.bf16.msra.mxu1 %v26688_v38  ;;  %13890 = vmatpush1.bf16.msra.mxu0 %v26691_v17  ;;  %v26750_v38 = vld [vmem:[%s40002_s2 + $0x23a4] ss:$80 sps:$4 sm:$0xff]   ;;  %v26753_v17 = vld [vmem:[%s40002_s2 + $0x23ac] ss:$80 sps:$4 sm:$0xff]  }
 0x16d   : > { %13613 = vmatprep.subr.bf16.mxu1 %v26696_v44  ;;  %13900 = vmatprep.subr.bf16.mxu0 %v26699_v45  ;;  %v26756_v44 = vld [vmem:[%s40002_s2 + $0x2444] ss:$80 sps:$4 sm:$0xff]   ;;  %v26759_v45 = vld [vmem:[%s40002_s2 + $0x244c] ss:$80 sps:$4 sm:$0xff]  }
 0x16f   : > { %13605 = vmatmul.mubr.bf16.vlgmr.msra.gmra.mrb[12].mxu1 %v31540_v52  ;;  %13892 = vmatmul.mubr.bf16.vlgmr.msra.gmra.mrb[16].mxu0 %v31540_v52 }
 0x170   : > { %13614 = vmatpush1.bf16.msra.mxu1 %v26694_v46  ;;  %13901 = vmatpush1.bf16.msra.mxu0 %v26697_v26  ;;  %v26754_v46 = vld [vmem:[%s40002_s2 + $0x2440] ss:$80 sps:$4 sm:$0xff]   ;;  %v26757_v26 = vld [vmem:[%s40002_s2 + $0x2448] ss:$80 sps:$4 sm:$0xff]  }
 0x171   : > { %13615 = vmatprep.subr.bf16.mxu1 %v26702_v54  ;;  %13902 = vmatprep.subr.bf16.mxu0 %v26705_v56  ;;  %v26765_v54 = vld [vmem:[%s40002_s2 + $0x24ec] ss:$80 sps:$4 sm:$0xff]   ;;  %v26760_v56 = vld [vmem:[%s40002_s2 + $0x24e0] ss:$80 sps:$4 sm:$0xff]  }
 0x172   : > { %13645 = vmatprep.mubr.bf16.mxu1 %v31554_v60  ;;  %13932 = vmatprep.mubr.bf16.mxu0 %v31554_v60 }
 0x174   : > { %13616 = vmatpush1.bf16.msra.mxu1 %v26700_v57  ;;  %13903 = vmatpush1.bf16.msra.mxu0 %v26703_v58  ;;  %v26763_v57 = vld [vmem:[%s40002_s2 + $0x24e8] ss:$80 sps:$4 sm:$0xff]   ;;  %v26768_v58 = vld [vmem:[%s40002_s2 + $0x2584] ss:$80 sps:$4 sm:$0xff]  }
 0x175   : > { %13617 = vmatprep.subr.bf16.mxu1 %v26708_v49  ;;  %13904 = vmatprep.subr.bf16.mxu0 %v26711_v1  ;;  %v26771_v49 = vld [vmem:[%s40002_s2 + $0x258c] ss:$80 sps:$4 sm:$0xff]   ;;  %v26766_v1 = vld [vmem:[%s40002_s2 + $0x2580] ss:$80 sps:$4 sm:$0xff]  }
 0x178   : > { %13618 = vmatpush1.bf16.msra.mxu1 %v26706_v61  ;;  %13905 = vmatpush1.bf16.msra.mxu0 %v26709_v62  ;;  %v26769_v61 = vld [vmem:[%s40002_s2 + $0x2588] ss:$80 sps:$4 sm:$0xff]   ;;  %v31693_v62 = vsub.s32 6, %v31053_v47 }
 0x179   : > { %13619 = vmatprep.subr.bf16.mxu1 %v26714_v0  ;;  %13906 = vmatprep.subr.bf16.mxu0 %v26717_v3  ;;  %v26774_v0 = vld [vmem:[%s40002_s2 + $0x2624] ss:$80 sps:$4 sm:$0xff]   ;;  %v26777_v3 = vld [vmem:[%s40002_s2 + $0x262c] ss:$80 sps:$4 sm:$0xff]  }
 0x17a   : > { %v352_v47 = vrot.slane %v31496_v27, %v31693_v62  ;;  %v26778_v27 = vld [vmem:[%s40002_s2 + $0x26c0] ss:$80 sps:$4 sm:$0xff]  }
 0x17c   : > { %13620 = vmatpush1.bf16.msra.mxu1 %v26712_v18  ;;  %13907 = vmatpush1.bf16.msra.mxu0 %v26715_v5  ;;  %v26772_v18 = vld [vmem:[%s40002_s2 + $0x2620] ss:$80 sps:$4 sm:$0xff]   ;;  %v26775_v5 = vld [vmem:[%s40002_s2 + $0x2628] ss:$80 sps:$4 sm:$0xff]  }
 0x17d   : > { %13621 = vmatprep.subr.bf16.mxu1 %v26720_v6  ;;  %13908 = vmatprep.subr.bf16.mxu0 %v26723_v8  ;;  %v26780_v6 = vld [vmem:[%s40002_s2 + $0x26c4] ss:$80 sps:$4 sm:$0xff]   ;;  %v26783_v8 = vld [vmem:[%s40002_s2 + $0x26cc] ss:$80 sps:$4 sm:$0xff]  }
 0x180   : > { %13622 = vmatpush1.bf16.msra.mxu1 %v26718_v10  ;;  %13909 = vmatpush1.bf16.msra.mxu0 %v26721_v12  ;;  %v31718_v10 = vld [vmem:[%s40001_s1 + $0x8] sm:$0x1f] }
 0x181   : > { %13623 = vmatprep.subr.bf16.mxu1 %v26726_v13  ;;  %13910 = vmatprep.subr.bf16.mxu0 %v26729_v15  ;;  %v364_v12 = vrot.slane %v31718_v10, %v31064_v50  ;;  %v26781_v13 = vld [vmem:[%s40002_s2 + $0x26c8] ss:$80 sps:$4 sm:$0xff]   ;;  %v750_v15 = vadd.f32 %v31129_v25, %v352_v47 }
 0x182   : > { %v26787_v25 = vld [vmem:[%s40002_s2 + $0x2768] ss:$80 sps:$4 sm:$0xff]  }
 0x183   : > { %v26829_v47 = vld [vmem:[%s40002_s2 + $0x2bc8] ss:$80 sps:$4 sm:$0xff]  }
 0x184   : > { %13624 = vmatpush1.bf16.msra.mxu1 %v26724_v19  ;;  %13911 = vmatpush1.bf16.msra.mxu0 %v26727_v20  ;;  %v26786_v19 = vld [vmem:[%s40002_s2 + $0x2764] ss:$80 sps:$4 sm:$0xff]   ;;  %v26789_v20 = vld [vmem:[%s40002_s2 + $0x276c] ss:$80 sps:$4 sm:$0xff]  }
 0x185   : > { %13625 = vmatprep.subr.bf16.mxu1 %v26732_v21  ;;  %13912 = vmatprep.subr.bf16.mxu0 %v26735_v22  ;;  %v793_v21 = vadd.f32 %v31165_v40, %v364_v12  ;;  %v26784_v22 = vld [vmem:[%s40002_s2 + $0x2760] ss:$80 sps:$4 sm:$0xff]   ;;  %v26795_v40 = vld [vmem:[%s40002_s2 + $0x280c] ss:$80 sps:$4 sm:$0xff]  }
 0x186   : > { %v26837_v12 = vld [vmem:[%s40002_s2 + $0x2c6c] ss:$80 sps:$4 sm:$0xff]  }
 0x188   : > { %13626 = vmatpush1.bf16.msra.mxu1 %v26730_v23  ;;  %13913 = vmatpush1.bf16.msra.mxu0 %v26733_v28  ;;  %v884_v23 = vmax.f32 %v750_v15, 0.0  ;;  %v26792_v28 = vld [vmem:[%s40002_s2 + $0x2804] ss:$80 sps:$4 sm:$0xff]   ;;  %v26838_v15 = vld [vmem:[%s40002_s2 + $0x2d00] ss:$80 sps:$4 sm:$0xff]  }
 0x189   : > { %13627 = vmatprep.subr.bf16.mxu1 %v26738_v29  ;;  %13914 = vmatprep.subr.bf16.mxu0 %v26741_v30  ;;  %v887_v29 = vmax.f32 %v793_v21, 0.0  ;;  %v26790_v30 = vld [vmem:[%s40002_s2 + $0x2800] ss:$80 sps:$4 sm:$0xff]   ;;  %v26846_v21 = vld [vmem:[%s40002_s2 + $0x2da4] ss:$80 sps:$4 sm:$0xff]  }
 0x18c   : > { %13628 = vmatpush1.bf16.msra.mxu1 %v26736_v31  ;;  %13915 = vmatpush1.bf16.msra.mxu0 %v26739_v32  ;;  %v26793_v31 = vld [vmem:[%s40002_s2 + $0x2808] ss:$80 sps:$4 sm:$0xff]   ;;  %v26798_v32 = vld [vmem:[%s40002_s2 + $0x28a4] ss:$80 sps:$4 sm:$0xff]  }
 0x18d   : > { %13629 = vmatprep.subr.bf16.mxu1 %v26744_v33  ;;  %13916 = vmatprep.subr.bf16.mxu0 %v26747_v34  ;;  %v26801_v33 = vld [vmem:[%s40002_s2 + $0x28ac] ss:$80 sps:$4 sm:$0xff]   ;;  %v31760_v34 = vpack.c.bf16 %v884_v23, %v884_v23  ;;  %v26847_v23 = vld [vmem:[%s40002_s2 + $0x2da8] ss:$80 sps:$4 sm:$0xff]  }
 0x190   : > { %13630 = vmatpush1.bf16.msra.mxu1 %v26742_v35  ;;  %13917 = vmatpush1.bf16.msra.mxu0 %v26745_v36  ;;  %v31762_v35 = vpack.c.bf16 %v887_v29, %v887_v29  ;;  %v26796_v36 = vld [vmem:[%s40002_s2 + $0x28a0] ss:$80 sps:$4 sm:$0xff]  }
 0x191   : > { %13631 = vmatprep.subr.bf16.mxu1 %v26750_v38  ;;  %13918 = vmatprep.subr.bf16.mxu0 %v26753_v17  ;;  %v26799_v38 = vld [vmem:[%s40002_s2 + $0x28a8] ss:$80 sps:$4 sm:$0xff]   ;;  %v26804_v17 = vld [vmem:[%s40002_s2 + $0x2944] ss:$80 sps:$4 sm:$0xff]   ;;  %v26850_v29 = vld [vmem:[%s40002_s2 + $0x2e40] ss:$80 sps:$4 sm:$0xff]  }
 0x194   : > { %13632 = vmatpush1.bf16.msra.mxu1 %v26748_v41  ;;  %13919 = vmatpush1.bf16.msra.mxu0 %v26751_v42  ;;  %v26802_v41 = vld [vmem:[%s40002_s2 + $0x2940] ss:$80 sps:$4 sm:$0xff]   ;;  %v26807_v42 = vld [vmem:[%s40002_s2 + $0x294c] ss:$80 sps:$4 sm:$0xff]  }
 0x195   : > { %13633 = vmatprep.subr.bf16.mxu1 %v26756_v44  ;;  %13920 = vmatprep.subr.bf16.mxu0 %v26759_v45  ;;  %v26805_v44 = vld [vmem:[%s40002_s2 + $0x2948] ss:$80 sps:$4 sm:$0xff]   ;;  %v26810_v45 = vld [vmem:[%s40002_s2 + $0x29e4] ss:$80 sps:$4 sm:$0xff]  }
 0x198   : > { %13634 = vmatpush1.bf16.msra.mxu1 %v26754_v46  ;;  %13921 = vmatpush1.bf16.msra.mxu0 %v26757_v26  ;;  %v26808_v46 = vld [vmem:[%s40002_s2 + $0x29e0] ss:$80 sps:$4 sm:$0xff]   ;;  %v26813_v26 = vld [vmem:[%s40002_s2 + $0x29ec] ss:$80 sps:$4 sm:$0xff]  }
 0x199   : > { %13635 = vmatprep.subr.bf16.mxu1 %v26762_v51  ;;  %13922 = vmatprep.subr.bf16.mxu0 %v26765_v54  ;;  %v26811_v51 = vld [vmem:[%s40002_s2 + $0x29e8] ss:$80 sps:$4 sm:$0xff]   ;;  %v26816_v54 = vld [vmem:[%s40002_s2 + $0x2a84] ss:$80 sps:$4 sm:$0xff]  }
 0x19c   : > { %13636 = vmatpush1.bf16.msra.mxu1 %v26760_v56  ;;  %13923 = vmatpush1.bf16.msra.mxu0 %v26763_v57  ;;  %v26814_v56 = vld [vmem:[%s40002_s2 + $0x2a80] ss:$80 sps:$4 sm:$0xff]   ;;  %v26819_v57 = vld [vmem:[%s40002_s2 + $0x2a8c] ss:$80 sps:$4 sm:$0xff]  }
 0x19d   : > { %13637 = vmatprep.subr.bf16.mxu1 %v26768_v58  ;;  %13924 = vmatprep.subr.bf16.mxu0 %v26771_v49  ;;  %v26817_v58 = vld [vmem:[%s40002_s2 + $0x2a88] ss:$80 sps:$4 sm:$0xff]   ;;  %v26822_v49 = vld [vmem:[%s40002_s2 + $0x2b24] ss:$80 sps:$4 sm:$0xff]  }
 0x1a0   : > { %13638 = vmatpush1.bf16.msra.mxu1 %v26766_v1  ;;  %13925 = vmatpush1.bf16.msra.mxu0 %v26769_v61  ;;  %v26820_v1 = vld [vmem:[%s40002_s2 + $0x2b20] ss:$80 sps:$4 sm:$0xff]   ;;  %v26825_v61 = vld [vmem:[%s40002_s2 + $0x2b2c] ss:$80 sps:$4 sm:$0xff]  }
 0x1a1   : > { %13639 = vmatprep.subr.bf16.mxu1 %v26774_v0  ;;  %13926 = vmatprep.subr.bf16.mxu0 %v26777_v3  ;;  %v26823_v0 = vld [vmem:[%s40002_s2 + $0x2b28] ss:$80 sps:$4 sm:$0xff]   ;;  %v26828_v3 = vld [vmem:[%s40002_s2 + $0x2bc4] ss:$80 sps:$4 sm:$0xff]  }
 0x1a4   : > { %13640 = vmatpush1.bf16.msra.mxu1 %v26772_v18  ;;  %13927 = vmatpush1.bf16.msra.mxu0 %v26775_v5  ;;  %v26826_v18 = vld [vmem:[%s40002_s2 + $0x2bc0] ss:$80 sps:$4 sm:$0xff]   ;;  %v26831_v5 = vld [vmem:[%s40002_s2 + $0x2bcc] ss:$80 sps:$4 sm:$0xff]  }
 0x1a5   : > { %13641 = vmatprep.subr.bf16.mxu1 %v26780_v6  ;;  %13928 = vmatprep.subr.bf16.mxu0 %v26783_v8  ;;  %v26834_v6 = vld [vmem:[%s40002_s2 + $0x2c64] ss:$80 sps:$4 sm:$0xff]   ;;  %v26832_v8 = vld [vmem:[%s40002_s2 + $0x2c60] ss:$80 sps:$4 sm:$0xff]  }
 0x1a8   : > { %13642 = vmatpush1.bf16.msra.mxu1 %v26778_v27  ;;  %13929 = vmatpush1.bf16.msra.mxu0 %v26781_v13  ;;  %v26835_v27 = vld [vmem:[%s40002_s2 + $0x2c68] ss:$80 sps:$4 sm:$0xff]   ;;  %v26840_v13 = vld [vmem:[%s40002_s2 + $0x2d04] ss:$80 sps:$4 sm:$0xff]  }
 0x1a9   : > { %13643 = vmatprep.subr.bf16.mxu1 %v26786_v19  ;;  %13930 = vmatprep.subr.bf16.mxu0 %v26789_v20  ;;  %v26843_v19 = vld [vmem:[%s40002_s2 + $0x2d0c] ss:$80 sps:$4 sm:$0xff]   ;;  %v26841_v20 = vld [vmem:[%s40002_s2 + $0x2d08] ss:$80 sps:$4 sm:$0xff]  }
 0x1ac   : > { %13644 = vmatpush1.bf16.msra.mxu1 %v26784_v22  ;;  %13931 = vmatpush1.bf16.msra.mxu0 %v26787_v25  ;;  %v26849_v22 = vld [vmem:[%s40002_s2 + $0x2dac] ss:$80 sps:$4 sm:$0xff]   ;;  %v26844_v25 = vld [vmem:[%s40002_s2 + $0x2da0] ss:$80 sps:$4 sm:$0xff]  }
 0x1ad   : > { %13654 = vmatprep.subr.bf16.mxu1 %v26792_v28  ;;  %13941 = vmatprep.subr.bf16.mxu0 %v26795_v40  ;;  %v26852_v28 = vld [vmem:[%s40002_s2 + $0x2e44] ss:$80 sps:$4 sm:$0xff]   ;;  %v26855_v40 = vld [vmem:[%s40002_s2 + $0x2e4c] ss:$80 sps:$4 sm:$0xff]  }
 0x1af   : > { %13646 = vmatmul.mubr.bf16.vlgmr.msra.gmra.mrb[12].mxu1 %v31760_v34  ;;  %13933 = vmatmul.mubr.bf16.vlgmr.msra.gmra.mrb[16].mxu0 %v31760_v34 }
 0x1b0   : > { %13655 = vmatpush1.bf16.msra.mxu1 %v26790_v30  ;;  %13686 = vmatprep.mubr.bf16.mxu1 %v31762_v35  ;;  %v26853_v30 = vld [vmem:[%s40002_s2 + $0x2e48] ss:$80 sps:$4 sm:$0xff]  }
 0x1b1   : > { %13942 = vmatpush1.bf16.msra.mxu0 %v26793_v31  ;;  %13973 = vmatprep.mubr.bf16.mxu0 %v31762_v35  ;;  %v26858_v31 = vld [vmem:[%s40002_s2 + $0x2ee4] ss:$80 sps:$4 sm:$0xff]  }
 0x1b2   : > { %13656 = vmatprep.subr.bf16.mxu1 %v26798_v32  ;;  %13943 = vmatprep.subr.bf16.mxu0 %v26801_v33  ;;  %v26856_v32 = vld [vmem:[%s40002_s2 + $0x2ee0] ss:$80 sps:$4 sm:$0xff]   ;;  %v26861_v33 = vld [vmem:[%s40002_s2 + $0x2eec] ss:$80 sps:$4 sm:$0xff]  }
 0x1b4   : > { %13657 = vmatpush1.bf16.msra.mxu1 %v26796_v36  ;;  %v26859_v36 = vld [vmem:[%s40002_s2 + $0x2ee8] ss:$80 sps:$4 sm:$0xff]  }
 0x1b5   : > { %13944 = vmatpush1.bf16.msra.mxu0 %v26799_v38  ;;  %13658 = vmatprep.subr.bf16.mxu1 %v26804_v17  ;;  %v26864_v38 = vld [vmem:[%s40002_s2 + $0x2f84] ss:$80 sps:$4 sm:$0xff]   ;;  %v26862_v17 = vld [vmem:[%s40002_s2 + $0x2f80] ss:$80 sps:$4 sm:$0xff]  }
 0x1b6   : > { %13945 = vmatprep.subr.bf16.mxu0 %v26807_v42  ;;  %v26865_v42 = vld [vmem:[%s40002_s2 + $0x2f88] ss:$80 sps:$4 sm:$0xff]  }
 0x1b8   : > { %13659 = vmatpush1.bf16.msra.mxu1 %v26802_v41  ;;  %v26867_v41 = vld [vmem:[%s40002_s2 + $0x2f8c] ss:$80 sps:$4 sm:$0xff]  }
 0x1b9   : > { %13946 = vmatpush1.bf16.msra.mxu0 %v26805_v44  ;;  %13660 = vmatprep.subr.bf16.mxu1 %v26810_v45  ;;  %v26870_v44 = vld [vmem:[%s40002_s2 + $0x3024] ss:$80 sps:$4 sm:$0xff]   ;;  %v26868_v45 = vld [vmem:[%s40002_s2 + $0x3020] ss:$80 sps:$4 sm:$0xff]  }
 0x1ba   : > { %13947 = vmatprep.subr.bf16.mxu0 %v26813_v26  ;;  %v360_v26 = vrot.slane %v31718_v10, %v31056_v48  ;;  %v26879_v10 = vld [vmem:[%s40002_s2 + $0x30cc] ss:$80 sps:$4 sm:$0xff]  }
 0x1bc   : > { %13661 = vmatpush1.bf16.msra.mxu1 %v26808_v46  ;;  %v26873_v46 = vld [vmem:[%s40002_s2 + $0x302c] ss:$80 sps:$4 sm:$0xff]  }
 0x1bd   : > { %13948 = vmatpush1.bf16.msra.mxu0 %v26811_v51  ;;  %13662 = vmatprep.subr.bf16.mxu1 %v26816_v54  ;;  %v26871_v51 = vld [vmem:[%s40002_s2 + $0x3028] ss:$80 sps:$4 sm:$0xff]   ;;  %v26876_v54 = vld [vmem:[%s40002_s2 + $0x30c4] ss:$80 sps:$4 sm:$0xff]  }
 0x1be   : > { %13949 = vmatprep.subr.bf16.mxu0 %v26819_v57  ;;  %v791_v57 = vadd.f32 %v31163_v39, %v360_v26  ;;  %v26885_v39 = vld [vmem:[%s40002_s2 + $0x316c] ss:$80 sps:$4 sm:$0xff]   ;;  %v26928_v26 = vld [vmem:[%s40002_s2 + $0x3660] ss:$80 sps:$4 sm:$0xff]  }
 0x1c0   : > { %13663 = vmatpush1.bf16.msra.mxu1 %v26814_v56  ;;  %v26874_v56 = vld [vmem:[%s40002_s2 + $0x30c0] ss:$80 sps:$4 sm:$0xff]  }
 0x1c1   : > { %13950 = vmatpush1.bf16.msra.mxu0 %v26817_v58  ;;  %13664 = vmatprep.subr.bf16.mxu1 %v26822_v49  ;;  %v26877_v58 = vld [vmem:[%s40002_s2 + $0x30c8] ss:$80 sps:$4 sm:$0xff]   ;;  %v26882_v49 = vld [vmem:[%s40002_s2 + $0x3164] ss:$80 sps:$4 sm:$0xff]  }
 0x1c2   : > { %13951 = vmatprep.subr.bf16.mxu0 %v26825_v61  ;;  %v886_v61 = vmax.f32 %v791_v57, 0.0  ;;  %v26939_v57 = vld [vmem:[%s40002_s2 + $0x370c] ss:$80 sps:$4 sm:$0xff]  }
 0x1c4   : > { %13665 = vmatpush1.bf16.msra.mxu1 %v26820_v1  ;;  %v26880_v1 = vld [vmem:[%s40002_s2 + $0x3160] ss:$80 sps:$4 sm:$0xff]  }
 0x1c5   : > { %13952 = vmatpush1.bf16.msra.mxu0 %v26823_v0  ;;  %13666 = vmatprep.subr.bf16.mxu1 %v26828_v3  ;;  %v26883_v0 = vld [vmem:[%s40002_s2 + $0x3168] ss:$80 sps:$4 sm:$0xff]   ;;  %v26888_v3 = vld [vmem:[%s40002_s2 + $0x3204] ss:$80 sps:$4 sm:$0xff]  }
 0x1c6   : > { %13953 = vmatprep.subr.bf16.mxu0 %v26831_v5  ;;  %v26886_v5 = vld [vmem:[%s40002_s2 + $0x3200] ss:$80 sps:$4 sm:$0xff]  }
 0x1c8   : > { %13667 = vmatpush1.bf16.msra.mxu1 %v26826_v18  ;;  %v26891_v18 = vld [vmem:[%s40002_s2 + $0x320c] ss:$80 sps:$4 sm:$0xff]  }
 0x1c9   : > { %13954 = vmatpush1.bf16.msra.mxu0 %v26829_v47  ;;  %13668 = vmatprep.subr.bf16.mxu1 %v26834_v6  ;;  %v889_v47 = vmax.f32 %v31189_v59, 0.0  ;;  %v31955_v6 = vpack.c.bf16 %v886_v61, %v886_v61  ;;  %v26897_v59 = vld [vmem:[%s40002_s2 + $0x32ac] ss:$80 sps:$4 sm:$0xff]   ;;  %v26943_v61 = vld [vmem:[%s40002_s2 + $0x37a8] ss:$80 sps:$4 sm:$0xff]  }
 0x1ca   : > { %13955 = vmatprep.subr.bf16.mxu0 %v26837_v12  ;;  %v26894_v12 = vld [vmem:[%s40002_s2 + $0x32a4] ss:$80 sps:$4 sm:$0xff]  }
 0x1cc   : > { %13669 = vmatpush1.bf16.msra.mxu1 %v26832_v8  ;;  %v26889_v8 = vld [vmem:[%s40002_s2 + $0x3208] ss:$80 sps:$4 sm:$0xff]  }
 0x1cd   : > { %13956 = vmatpush1.bf16.msra.mxu0 %v26835_v27  ;;  %13670 = vmatprep.subr.bf16.mxu1 %v26840_v13  ;;  %v26892_v27 = vld [vmem:[%s40002_s2 + $0x32a0] ss:$80 sps:$4 sm:$0xff]   ;;  %v31969_v13 = vpack.c.bf16 %v889_v47, %v889_v47  ;;  %v26954_v47 = vld [vmem:[%s40002_s2 + $0x38e4] ss:$80 sps:$4 sm:$0xff]  }
 0x1ce   : > { %13957 = vmatprep.subr.bf16.mxu0 %v26843_v19  ;;  %v26900_v19 = vld [vmem:[%s40002_s2 + $0x3344] ss:$80 sps:$4 sm:$0xff]  }
 0x1d0   : > { %13671 = vmatpush1.bf16.msra.mxu1 %v26838_v15  ;;  %v26895_v15 = vld [vmem:[%s40002_s2 + $0x32a8] ss:$80 sps:$4 sm:$0xff]  }
 0x1d1   : > { %13958 = vmatpush1.bf16.msra.mxu0 %v26841_v20  ;;  %13672 = vmatprep.subr.bf16.mxu1 %v26846_v21  ;;  %v26898_v20 = vld [vmem:[%s40002_s2 + $0x3340] ss:$80 sps:$4 sm:$0xff]   ;;  %v26903_v21 = vld [vmem:[%s40002_s2 + $0x334c] ss:$80 sps:$4 sm:$0xff]  }
 0x1d2   : > { %13959 = vmatprep.subr.bf16.mxu0 %v26849_v22  ;;  %v26901_v22 = vld [vmem:[%s40002_s2 + $0x3348] ss:$80 sps:$4 sm:$0xff]  }
 0x1d4   : > { %13673 = vmatpush1.bf16.msra.mxu1 %v26844_v25  ;;  %v26906_v25 = vld [vmem:[%s40002_s2 + $0x33e4] ss:$80 sps:$4 sm:$0xff]  }
 0x1d5   : > { %13960 = vmatpush1.bf16.msra.mxu0 %v26847_v23  ;;  %13674 = vmatprep.subr.bf16.mxu1 %v26852_v28  ;;  %v26904_v23 = vld [vmem:[%s40002_s2 + $0x33e0] ss:$80 sps:$4 sm:$0xff]   ;;  %v26909_v28 = vld [vmem:[%s40002_s2 + $0x33ec] ss:$80 sps:$4 sm:$0xff]  }
 0x1d6   : > { %13961 = vmatprep.subr.bf16.mxu0 %v26855_v40  ;;  %v26907_v40 = vld [vmem:[%s40002_s2 + $0x33e8] ss:$80 sps:$4 sm:$0xff]  }
 0x1d8   : > { %13675 = vmatpush1.bf16.msra.mxu1 %v26850_v29  ;;  %v26912_v29 = vld [vmem:[%s40002_s2 + $0x3484] ss:$80 sps:$4 sm:$0xff]  }
 0x1d9   : > { %13962 = vmatpush1.bf16.msra.mxu0 %v26853_v30  ;;  %13676 = vmatprep.subr.bf16.mxu1 %v26858_v31  ;;  %v26910_v30 = vld [vmem:[%s40002_s2 + $0x3480] ss:$80 sps:$4 sm:$0xff]   ;;  %v26915_v31 = vld [vmem:[%s40002_s2 + $0x348c] ss:$80 sps:$4 sm:$0xff]  }
 0x1da   : > { %13963 = vmatprep.subr.bf16.mxu0 %v26861_v33  ;;  %v26918_v33 = vld [vmem:[%s40002_s2 + $0x3524] ss:$80 sps:$4 sm:$0xff]  }
 0x1dc   : > { %13677 = vmatpush1.bf16.msra.mxu1 %v26856_v32  ;;  %v26913_v32 = vld [vmem:[%s40002_s2 + $0x3488] ss:$80 sps:$4 sm:$0xff]  }
 0x1dd   : > { %13964 = vmatpush1.bf16.msra.mxu0 %v26859_v36  ;;  %13678 = vmatprep.subr.bf16.mxu1 %v26864_v38  ;;  %v26916_v36 = vld [vmem:[%s40002_s2 + $0x3520] ss:$80 sps:$4 sm:$0xff]   ;;  %v26921_v38 = vld [vmem:[%s40002_s2 + $0x352c] ss:$80 sps:$4 sm:$0xff]  }
 0x1de   : > { %13965 = vmatprep.subr.bf16.mxu0 %v26867_v41  ;;  %v26924_v41 = vld [vmem:[%s40002_s2 + $0x35c4] ss:$80 sps:$4 sm:$0xff]  }
 0x1e0   : > { %13679 = vmatpush1.bf16.msra.mxu1 %v26862_v17  ;;  %v26919_v17 = vld [vmem:[%s40002_s2 + $0x3528] ss:$80 sps:$4 sm:$0xff]  }
 0x1e1   : > { %13966 = vmatpush1.bf16.msra.mxu0 %v26865_v42  ;;  %13680 = vmatprep.subr.bf16.mxu1 %v26870_v44  ;;  %v26922_v42 = vld [vmem:[%s40002_s2 + $0x35c0] ss:$80 sps:$4 sm:$0xff]   ;;  %v26927_v44 = vld [vmem:[%s40002_s2 + $0x35cc] ss:$80 sps:$4 sm:$0xff]  }
 0x1e2   : > { %13967 = vmatprep.subr.bf16.mxu0 %v26873_v46  ;;  %v26930_v46 = vld [vmem:[%s40002_s2 + $0x3664] ss:$80 sps:$4 sm:$0xff]  }
 0x1e4   : > { %13681 = vmatpush1.bf16.msra.mxu1 %v26868_v45  ;;  %v26925_v45 = vld [vmem:[%s40002_s2 + $0x35c8] ss:$80 sps:$4 sm:$0xff]  }
 0x1e5   : > { %13968 = vmatpush1.bf16.msra.mxu0 %v26871_v51  ;;  %13682 = vmatprep.subr.bf16.mxu1 %v26876_v54  ;;  %v26933_v51 = vld [vmem:[%s40002_s2 + $0x366c] ss:$80 sps:$4 sm:$0xff]   ;;  %v26931_v54 = vld [vmem:[%s40002_s2 + $0x3668] ss:$80 sps:$4 sm:$0xff]  }
 0x1e6   : > { %13969 = vmatprep.subr.bf16.mxu0 %v26879_v10  ;;  %v26934_v10 = vld [vmem:[%s40002_s2 + $0x3700] ss:$80 sps:$4 sm:$0xff]  }
 0x1e8   : > { %13683 = vmatpush1.bf16.msra.mxu1 %v26874_v56  ;;  %v26936_v56 = vld [vmem:[%s40002_s2 + $0x3704] ss:$80 sps:$4 sm:$0xff]  }
 0x1e9   : > { %13970 = vmatpush1.bf16.msra.mxu0 %v26877_v58  ;;  %13684 = vmatprep.subr.bf16.mxu1 %v26882_v49  ;;  %v26937_v58 = vld [vmem:[%s40002_s2 + $0x3708] ss:$80 sps:$4 sm:$0xff]   ;;  %v26942_v49 = vld [vmem:[%s40002_s2 + $0x37a4] ss:$80 sps:$4 sm:$0xff]  }
 0x1ea   : > { %13971 = vmatprep.subr.bf16.mxu0 %v26885_v39  ;;  %v26940_v39 = vld [vmem:[%s40002_s2 + $0x37a0] ss:$80 sps:$4 sm:$0xff]  }
 0x1ec   : > { %13685 = vmatpush1.bf16.msra.mxu1 %v26880_v1  ;;  %v26945_v1 = vld [vmem:[%s40002_s2 + $0x37ac] ss:$80 sps:$4 sm:$0xff]  }
 0x1ed   : > { %13972 = vmatpush1.bf16.msra.mxu0 %v26883_v0  ;;  %13695 = vmatprep.subr.bf16.mxu1 %v26888_v3  ;;  %v26948_v0 = vld [vmem:[%s40002_s2 + $0x3844] ss:$80 sps:$4 sm:$0xff]   ;;  %v26951_v3 = vld [vmem:[%s40002_s2 + $0x384c] ss:$80 sps:$4 sm:$0xff]  }
 0x1ee   : > { %13982 = vmatprep.subr.bf16.mxu0 %v26891_v18  ;;  %v26946_v18 = vld [vmem:[%s40002_s2 + $0x3840] ss:$80 sps:$4 sm:$0xff]  }
 0x1ef   : > { %13687 = vmatmul.mubr.bf16.vlgmr.msra.gmra.mrb[12].mxu1 %v31955_v6 }
 0x1f0   : > { %13974 = vmatmul.mubr.bf16.vlgmr.msra.gmra.mrb[16].mxu0 %v31955_v6  ;;  %13696 = vmatpush1.bf16.msra.mxu1 %v26886_v5  ;;  %v26949_v5 = vld [vmem:[%s40002_s2 + $0x3848] ss:$80 sps:$4 sm:$0xff]  }
 0x1f1   : > { %13727 = vmatprep.mubr.bf16.mxu1 %v31969_v13  ;;  %13983 = vmatpush1.bf16.msra.mxu0 %v26889_v8  ;;  %v26952_v8 = vld [vmem:[%s40002_s2 + $0x38e0] ss:$80 sps:$4 sm:$0xff]  }
 0x1f2   : > { %14014 = vmatprep.mubr.bf16.mxu0 %v31969_v13  ;;  %13697 = vmatprep.subr.bf16.mxu1 %v26894_v12  ;;  %v26957_v12 = vld [vmem:[%s40002_s2 + $0x38ec] ss:$80 sps:$4 sm:$0xff]  }
 0x1f3   : > { %13984 = vmatprep.subr.bf16.mxu0 %v26897_v59  ;;  %v26960_v59 = vld [vmem:[%s40002_s2 + $0x3984] ss:$80 sps:$4 sm:$0xff]  }
 0x1f4   : > { %13698 = vmatpush1.bf16.msra.mxu1 %v26892_v27  ;;  %v26955_v27 = vld [vmem:[%s40002_s2 + $0x38e8] ss:$80 sps:$4 sm:$0xff]  }
 0x1f5   : > { %13985 = vmatpush1.bf16.msra.mxu0 %v26895_v15  ;;  %13699 = vmatprep.subr.bf16.mxu1 %v26900_v19  ;;  %v26958_v15 = vld [vmem:[%s40002_s2 + $0x3980] ss:$80 sps:$4 sm:$0xff]   ;;  %v26963_v19 = vld [vmem:[%s40002_s2 + $0x398c] ss:$80 sps:$4 sm:$0xff]  }
 0x1f6   : > { %13986 = vmatprep.subr.bf16.mxu0 %v26903_v21  ;;  %v26966_v21 = vld [vmem:[%s40002_s2 + $0x3a24] ss:$80 sps:$4 sm:$0xff]  }
 0x1f8   : > { %13700 = vmatpush1.bf16.msra.mxu1 %v26898_v20  ;;  %v26961_v20 = vld [vmem:[%s40002_s2 + $0x3988] ss:$80 sps:$4 sm:$0xff]  }
 0x1f9   : > { %13987 = vmatpush1.bf16.msra.mxu0 %v26901_v22  ;;  %13701 = vmatprep.subr.bf16.mxu1 %v26906_v25  ;;  %v26964_v22 = vld [vmem:[%s40002_s2 + $0x3a20] ss:$80 sps:$4 sm:$0xff]   ;;  %v26969_v25 = vld [vmem:[%s40002_s2 + $0x3a2c] ss:$80 sps:$4 sm:$0xff]  }
 0x1fa   : > { %13988 = vmatprep.subr.bf16.mxu0 %v26909_v28  ;;  %v26972_v28 = vld [vmem:[%s40002_s2 + $0x3ac4] ss:$80 sps:$4 sm:$0xff]  }
 0x1fc   : > { %13702 = vmatpush1.bf16.msra.mxu1 %v26904_v23  ;;  %v26967_v23 = vld [vmem:[%s40002_s2 + $0x3a28] ss:$80 sps:$4 sm:$0xff]  }
 0x1fd   : > { %13989 = vmatpush1.bf16.msra.mxu0 %v26907_v40  ;;  %13703 = vmatprep.subr.bf16.mxu1 %v26912_v29  ;;  %v26970_v40 = vld [vmem:[%s40002_s2 + $0x3ac0] ss:$80 sps:$4 sm:$0xff]   ;;  %v26975_v29 = vld [vmem:[%s40002_s2 + $0x3acc] ss:$80 sps:$4 sm:$0xff]  }
 0x1fe   : > { %13990 = vmatprep.subr.bf16.mxu0 %v26915_v31  ;;  %v26978_v31 = vld [vmem:[%s40002_s2 + $0x3b64] ss:$80 sps:$4 sm:$0xff]  }
 0x200   : > { %13704 = vmatpush1.bf16.msra.mxu1 %v26910_v30  ;;  %v26973_v30 = vld [vmem:[%s40002_s2 + $0x3ac8] ss:$80 sps:$4 sm:$0xff]  }
 0x201   : > { %13991 = vmatpush1.bf16.msra.mxu0 %v26913_v32  ;;  %13705 = vmatprep.subr.bf16.mxu1 %v26918_v33  ;;  %v26976_v32 = vld [vmem:[%s40002_s2 + $0x3b60] ss:$80 sps:$4 sm:$0xff]   ;;  %v26981_v33 = vld [vmem:[%s40002_s2 + $0x3b6c] ss:$80 sps:$4 sm:$0xff]  }
 0x202   : > { %13992 = vmatprep.subr.bf16.mxu0 %v26921_v38  ;;  %v26979_v38 = vld [vmem:[%s40002_s2 + $0x3b68] ss:$80 sps:$4 sm:$0xff]  }
 0x204   : > { %13706 = vmatpush1.bf16.msra.mxu1 %v26916_v36  ;;  %v888_v36 = vmax.f32 %v31181_v55, 0.0 }
 0x205   : > { %13993 = vmatpush1.bf16.msra.mxu0 %v26919_v17  ;;  %13707 = vmatprep.subr.bf16.mxu1 %v26924_v41  ;;  %v26984_v17 = vld [vmem:[%s40002_s2 + $0x3c04] ss:$80 sps:$4 sm:$0xff]   ;;  %v26982_v41 = vld [vmem:[%s40002_s2 + $0x3c00] ss:$80 sps:$4 sm:$0xff]  }
 0x206   : > { %13994 = vmatprep.subr.bf16.mxu0 %v26927_v44  ;;  %v32156_v55 = vpack.c.bf16 %v888_v36, %v888_v36  ;;  %v26985_v44 = vld [vmem:[%s40002_s2 + $0x3c08] ss:$80 sps:$4 sm:$0xff]   ;;  %v27041_v36 = vld [vmem:[%s40002_s2 + $0xbc] ss:$80 sps:$4 sm:$0xff]  }
 0x208   : > { %13708 = vmatpush1.bf16.msra.mxu1 %v26922_v42  ;;  %v26987_v42 = vld [vmem:[%s40002_s2 + $0x3c0c] ss:$80 sps:$4 sm:$0xff]  }
 0x209   : > { %13995 = vmatpush1.bf16.msra.mxu0 %v26925_v45  ;;  %13709 = vmatprep.subr.bf16.mxu1 %v26930_v46  ;;  %v26990_v45 = vld [vmem:[%s40002_s2 + $0x3ca4] ss:$80 sps:$4 sm:$0xff]   ;;  %v26988_v46 = vld [vmem:[%s40002_s2 + $0x3ca0] ss:$80 sps:$4 sm:$0xff]  }
 0x20a   : > { %13996 = vmatprep.subr.bf16.mxu0 %v26933_v51  ;;  %v26991_v51 = vld [vmem:[%s40002_s2 + $0x3ca8] ss:$80 sps:$4 sm:$0xff]  }
 0x20c   : > { %13710 = vmatpush1.bf16.msra.mxu1 %v26928_v26  ;;  %v26993_v26 = vld [vmem:[%s40002_s2 + $0x3cac] ss:$80 sps:$4 sm:$0xff]  }
 0x20d   : > { %13997 = vmatpush1.bf16.msra.mxu0 %v26931_v54  ;;  %13711 = vmatprep.subr.bf16.mxu1 %v26936_v56  ;;  %v26996_v54 = vld [vmem:[%s40002_s2 + $0x3d44] ss:$80 sps:$4 sm:$0xff]   ;;  %v26994_v56 = vld [vmem:[%s40002_s2 + $0x3d40] ss:$80 sps:$4 sm:$0xff]  }
 0x20e   : > { %13998 = vmatprep.subr.bf16.mxu0 %v26939_v57  ;;  %v26997_v57 = vld [vmem:[%s40002_s2 + $0x3d48] ss:$80 sps:$4 sm:$0xff]  }
 0x210   : > { %13712 = vmatpush1.bf16.msra.mxu1 %v26934_v10  ;;  %v26999_v10 = vld [vmem:[%s40002_s2 + $0x3d4c] ss:$80 sps:$4 sm:$0xff]  }
 0x211   : > { %13999 = vmatpush1.bf16.msra.mxu0 %v26937_v58  ;;  %13713 = vmatprep.subr.bf16.mxu1 %v26942_v49  ;;  %v27002_v58 = vld [vmem:[%s40002_s2 + $0x3de4] ss:$80 sps:$4 sm:$0xff]   ;;  %v27000_v49 = vld [vmem:[%s40002_s2 + $0x3de0] ss:$80 sps:$4 sm:$0xff]  }
 0x212   : > { %14000 = vmatprep.subr.bf16.mxu0 %v26945_v1  ;;  %v27005_v1 = vld [vmem:[%s40002_s2 + $0x3dec] ss:$80 sps:$4 sm:$0xff]  }
 0x214   : > { %13714 = vmatpush1.bf16.msra.mxu1 %v26940_v39  ;;  %v27003_v39 = vld [vmem:[%s40002_s2 + $0x3de8] ss:$80 sps:$4 sm:$0xff]  }
 0x215   : > { %14001 = vmatpush1.bf16.msra.mxu0 %v26943_v61  ;;  %13715 = vmatprep.subr.bf16.mxu1 %v26948_v0  ;;  %v27008_v61 = vld [vmem:[%s40002_s2 + $0x3e84] ss:$80 sps:$4 sm:$0xff]   ;;  %v27006_v0 = vld [vmem:[%s40002_s2 + $0x3e80] ss:$80 sps:$4 sm:$0xff]  }
 0x216   : > { %14002 = vmatprep.subr.bf16.mxu0 %v26951_v3  ;;  %v27011_v3 = vld [vmem:[%s40002_s2 + $0x3e8c] ss:$80 sps:$4 sm:$0xff]  }
 0x218   : > { %13716 = vmatpush1.bf16.msra.mxu1 %v26946_v18  ;;  %v27009_v18 = vld [vmem:[%s40002_s2 + $0x3e88] ss:$80 sps:$4 sm:$0xff]  }
 0x219   : > { %14003 = vmatpush1.bf16.msra.mxu0 %v26949_v5  ;;  %13717 = vmatprep.subr.bf16.mxu1 %v26954_v47  ;;  %v27014_v5 = vld [vmem:[%s40002_s2 + $0x3f24] ss:$80 sps:$4 sm:$0xff]   ;;  %v27012_v47 = vld [vmem:[%s40002_s2 + $0x3f20] ss:$80 sps:$4 sm:$0xff]  }
 0x21a   : > { %14004 = vmatprep.subr.bf16.mxu0 %v26957_v12  ;;  %v27015_v12 = vld [vmem:[%s40002_s2 + $0x3f28] ss:$80 sps:$4 sm:$0xff]  }
 0x21c   : > { %13718 = vmatpush1.bf16.msra.mxu1 %v26952_v8  ;;  %v27017_v8 = vld [vmem:[%s40002_s2 + $0x3f2c] ss:$80 sps:$4 sm:$0xff]  }
 0x21d   : > { %14005 = vmatpush1.bf16.msra.mxu0 %v26955_v27  ;;  %13719 = vmatprep.subr.bf16.mxu1 %v26960_v59  ;;  %v27020_v27 = vld [vmem:[%s40002_s2 + $0x3fc4] ss:$80 sps:$4 sm:$0xff]   ;;  %v27018_v59 = vld [vmem:[%s40002_s2 + $0x3fc0] ss:$80 sps:$4 sm:$0xff]  }
 0x21e   : > { %14006 = vmatprep.subr.bf16.mxu0 %v26963_v19  ;;  %v27021_v19 = vld [vmem:[%s40002_s2 + $0x3fc8] ss:$80 sps:$4 sm:$0xff]  }
 0x220   : > { %13720 = vmatpush1.bf16.msra.mxu1 %v26958_v15  ;;  %v27023_v15 = vld [vmem:[%s40002_s2 + $0x3fcc] ss:$80 sps:$4 sm:$0xff]  }
 0x221   : > { %14007 = vmatpush1.bf16.msra.mxu0 %v26961_v20  ;;  %13721 = vmatprep.subr.bf16.mxu1 %v26966_v21  ;;  %v27026_v20 = vld [vmem:[%s40002_s2 + $0x4064] ss:$80 sps:$4 sm:$0xff]   ;;  %v27024_v21 = vld [vmem:[%s40002_s2 + $0x4060] ss:$80 sps:$4 sm:$0xff]  }
 0x222   : > { %14008 = vmatprep.subr.bf16.mxu0 %v26969_v25  ;;  %v890_v25 = vmax.f32 %v31213_v11, 0.0  ;;  %v27030_v11 = vld [vmem:[%s40002_s2 + $0x10] ss:$80 sps:$4 sm:$0xff]  }
 0x224   : > { %13722 = vmatpush1.bf16.msra.mxu1 %v26964_v22  ;;  %v27029_v22 = vld [vmem:[%s40002_s2 + $0x406c] ss:$80 sps:$4 sm:$0xff]  }
 0x225   : > { %14009 = vmatpush1.bf16.msra.mxu0 %v26967_v23  ;;  %13723 = vmatprep.subr.bf16.mxu1 %v26972_v28  ;;  %v27027_v23 = vld [vmem:[%s40002_s2 + $0x4068] ss:$80 sps:$4 sm:$0xff]   ;;  %v27032_v28 = vld [vmem:[%s40002_s2 + $0x14] ss:$80 sps:$4 sm:$0xff]  }
 0x226   : > { %14010 = vmatprep.subr.bf16.mxu0 %v26975_v29  ;;  %v27033_v29 = vld [vmem:[%s40002_s2 + $0x18] ss:$80 sps:$4 sm:$0xff]  }
 0x228   : > { %13724 = vmatpush1.bf16.msra.mxu1 %v26970_v40  ;;  %v27035_v40 = vld [vmem:[%s40002_s2 + $0x1c] ss:$80 sps:$4 sm:$0xff]  }
 0x229   : > { %14011 = vmatpush1.bf16.msra.mxu0 %v26973_v30  ;;  %13725 = vmatprep.subr.bf16.mxu1 %v26978_v31  ;;  %v27038_v30 = vld [vmem:[%s40002_s2 + $0xb4] ss:$80 sps:$4 sm:$0xff]   ;;  %v32265_v31 = vpack.c.bf16 %v890_v25, %v890_v25 }
 0x22a   : > { %14012 = vmatprep.subr.bf16.mxu0 %v26981_v33  ;;  %v27039_v33 = vld [vmem:[%s40002_s2 + $0xb8] ss:$80 sps:$4 sm:$0xff]   ;;  %v27092_v25 = vld [vmem:[%s40002_s2 + $0x654] ss:$80 sps:$4 sm:$0xff]  }
 0x22c   : > { %13726 = vmatpush1.bf16.msra.mxu1 %v26976_v32  ;;  %v27036_v32 = vld [vmem:[%s40002_s2 + $0xb0] ss:$80 sps:$4 sm:$0xff]  }
 0x22d   : > { %14013 = vmatpush1.bf16.msra.mxu0 %v26979_v38  ;;  %13736 = vmatprep.subr.bf16.mxu1 %v26984_v17  ;;  %v27044_v38 = vld [vmem:[%s40002_s2 + $0x154] ss:$80 sps:$4 sm:$0xff]   ;;  %v27047_v17 = vld [vmem:[%s40002_s2 + $0x15c] ss:$80 sps:$4 sm:$0xff]  }
 0x22e   : > { %14023 = vmatprep.subr.bf16.mxu0 %v26987_v42  ;;  %v27045_v42 = vld [vmem:[%s40002_s2 + $0x158] ss:$80 sps:$4 sm:$0xff]  }
 0x22f   : > { %13728 = vmatmul.mubr.bf16.vlgmr.msra.gmra.mrb[12].mxu1 %v32156_v55 }
 0x230   : > { %14015 = vmatmul.mubr.bf16.vlgmr.msra.gmra.mrb[16].mxu0 %v32156_v55  ;;  %13737 = vmatpush1.bf16.msra.mxu1 %v26982_v41  ;;  %v27042_v41 = vld [vmem:[%s40002_s2 + $0x150] ss:$80 sps:$4 sm:$0xff]  }
 0x231   : > { %14024 = vmatpush1.bf16.msra.mxu0 %v26985_v44  ;;  %13738 = vmatprep.subr.bf16.mxu1 %v26990_v45  ;;  %v27050_v44 = vld [vmem:[%s40002_s2 + $0x1f4] ss:$80 sps:$4 sm:$0xff]   ;;  %v27048_v45 = vld [vmem:[%s40002_s2 + $0x1f0] ss:$80 sps:$4 sm:$0xff]  }
 0x232   : > { %14025 = vmatprep.subr.bf16.mxu0 %v26993_v26  ;;  %13768 = vmatprep.mubr.bf16.mxu1 %v30659_v2  ;;  %v27051_v26 = vld [vmem:[%s40002_s2 + $0x1f8] ss:$80 sps:$4 sm:$0xff]  }
 0x233   : > { %14055 = vmatprep.mubr.bf16.mxu0 %v30659_v2 }
 0x234   : > { %13739 = vmatpush1.bf16.msra.mxu1 %v26988_v46  ;;  %v27053_v46 = vld [vmem:[%s40002_s2 + $0x1fc] ss:$80 sps:$4 sm:$0xff]  }
 0x235   : > { %14026 = vmatpush1.bf16.msra.mxu0 %v26991_v51  ;;  %13740 = vmatprep.subr.bf16.mxu1 %v26996_v54  ;;  %v27056_v51 = vld [vmem:[%s40002_s2 + $0x294] ss:$80 sps:$4 sm:$0xff]   ;;  %v27054_v54 = vld [vmem:[%s40002_s2 + $0x290] ss:$80 sps:$4 sm:$0xff]  }
 0x236   : > { %14027 = vmatprep.subr.bf16.mxu0 %v26999_v10  ;;  %v27057_v10 = vld [vmem:[%s40002_s2 + $0x298] ss:$80 sps:$4 sm:$0xff]  }
 0x238   : > { %13741 = vmatpush1.bf16.msra.mxu1 %v26994_v56  ;;  %v27059_v56 = vld [vmem:[%s40002_s2 + $0x29c] ss:$80 sps:$4 sm:$0xff]  }
 0x239   : > { %14028 = vmatpush1.bf16.msra.mxu0 %v26997_v57  ;;  %13742 = vmatprep.subr.bf16.mxu1 %v27002_v58  ;;  %v27062_v57 = vld [vmem:[%s40002_s2 + $0x334] ss:$80 sps:$4 sm:$0xff]   ;;  %v27060_v58 = vld [vmem:[%s40002_s2 + $0x330] ss:$80 sps:$4 sm:$0xff]  }
 0x23a   : > { %14029 = vmatprep.subr.bf16.mxu0 %v27005_v1  ;;  %v27063_v1 = vld [vmem:[%s40002_s2 + $0x338] ss:$80 sps:$4 sm:$0xff]  }
 0x23c   : > { %13743 = vmatpush1.bf16.msra.mxu1 %v27000_v49  ;;  %v27065_v49 = vld [vmem:[%s40002_s2 + $0x33c] ss:$80 sps:$4 sm:$0xff]  }
 0x23d   : > { %14030 = vmatpush1.bf16.msra.mxu0 %v27003_v39  ;;  %13744 = vmatprep.subr.bf16.mxu1 %v27008_v61  ;;  %v27068_v39 = vld [vmem:[%s40002_s2 + $0x3d4] ss:$80 sps:$4 sm:$0xff]   ;;  %v27066_v61 = vld [vmem:[%s40002_s2 + $0x3d0] ss:$80 sps:$4 sm:$0xff]  }
 0x23e   : > { %14031 = vmatprep.subr.bf16.mxu0 %v27011_v3  ;;  %v27069_v3 = vld [vmem:[%s40002_s2 + $0x3d8] ss:$80 sps:$4 sm:$0xff]  }
 0x240   : > { %13745 = vmatpush1.bf16.msra.mxu1 %v27006_v0  ;;  %v27071_v0 = vld [vmem:[%s40002_s2 + $0x3dc] ss:$80 sps:$4 sm:$0xff]  }
 0x241   : > { %14032 = vmatpush1.bf16.msra.mxu0 %v27009_v18  ;;  %13746 = vmatprep.subr.bf16.mxu1 %v27014_v5  ;;  %v27074_v18 = vld [vmem:[%s40002_s2 + $0x474] ss:$80 sps:$4 sm:$0xff]   ;;  %v27072_v5 = vld [vmem:[%s40002_s2 + $0x470] ss:$80 sps:$4 sm:$0xff]  }
 0x242   : > { %14033 = vmatprep.subr.bf16.mxu0 %v27017_v8  ;;  %v27075_v8 = vld [vmem:[%s40002_s2 + $0x478] ss:$80 sps:$4 sm:$0xff]  }
 0x244   : > { %13747 = vmatpush1.bf16.msra.mxu1 %v27012_v47  ;;  %v27077_v47 = vld [vmem:[%s40002_s2 + $0x47c] ss:$80 sps:$4 sm:$0xff]  }
 0x245   : > { %14034 = vmatpush1.bf16.msra.mxu0 %v27015_v12  ;;  %13748 = vmatprep.subr.bf16.mxu1 %v27020_v27  ;;  %v27080_v12 = vld [vmem:[%s40002_s2 + $0x514] ss:$80 sps:$4 sm:$0xff]   ;;  %v27078_v27 = vld [vmem:[%s40002_s2 + $0x510] ss:$80 sps:$4 sm:$0xff]  }
 0x246   : > { %14035 = vmatprep.subr.bf16.mxu0 %v27023_v15  ;;  %v27081_v15 = vld [vmem:[%s40002_s2 + $0x518] ss:$80 sps:$4 sm:$0xff]  }
 0x248   : > { %13749 = vmatpush1.bf16.msra.mxu1 %v27018_v59  ;;  %v27083_v59 = vld [vmem:[%s40002_s2 + $0x51c] ss:$80 sps:$4 sm:$0xff]  }
 0x249   : > { %14036 = vmatpush1.bf16.msra.mxu0 %v27021_v19  ;;  %13750 = vmatprep.subr.bf16.mxu1 %v27026_v20  ;;  %v27086_v19 = vld [vmem:[%s40002_s2 + $0x5b4] ss:$80 sps:$4 sm:$0xff]   ;;  %v27084_v20 = vld [vmem:[%s40002_s2 + $0x5b0] ss:$80 sps:$4 sm:$0xff]  }
 0x24a   : > { %14037 = vmatprep.subr.bf16.mxu0 %v27029_v22  ;;  %v27087_v22 = vld [vmem:[%s40002_s2 + $0x5b8] ss:$80 sps:$4 sm:$0xff]  }
 0x24c   : > { %13751 = vmatpush1.bf16.msra.mxu1 %v27024_v21  ;;  %v27089_v21 = vld [vmem:[%s40002_s2 + $0x5bc] ss:$80 sps:$4 sm:$0xff]  }
 0x24d   : > { %14038 = vmatpush1.bf16.msra.mxu0 %v27027_v23  ;;  %14064 = vmatprep.subr.bf16.mxu1 %v27032_v28  ;;  %v27090_v23 = vld [vmem:[%s40002_s2 + $0x650] ss:$80 sps:$4 sm:$0xff]   ;;  %v27095_v28 = vld [vmem:[%s40002_s2 + $0x65c] ss:$80 sps:$4 sm:$0xff]  }
 0x24e   : > { %14351 = vmatprep.subr.bf16.mxu0 %v27035_v40  ;;  %v27093_v40 = vld [vmem:[%s40002_s2 + $0x658] ss:$80 sps:$4 sm:$0xff]  }
 0x24f   : > { %13769 = vmatmul.mubr.bf16.vlgmr.msra.gmra.mrb[12].mxu1 %v32265_v31 }
 0x250   : > { %14056 = vmatmul.mubr.bf16.vlgmr.msra.gmra.mrb[16].mxu0 %v32265_v31  ;;  %14065 = vmatpush1.bf16.msra.mxu1 %v27030_v11  ;;  %v27098_v11 = vld [vmem:[%s40002_s2 + $0x6f4] ss:$80 sps:$4 sm:$0xff]  }
 0x251   : > { %14096 = vmatprep.mubr.bf16.mxu1 %v31083_v4  ;;  %14352 = vmatpush1.bf16.msra.mxu0 %v27033_v29  ;;  %v27096_v29 = vld [vmem:[%s40002_s2 + $0x6f0] ss:$80 sps:$4 sm:$0xff]  }
 0x252   : > { %14383 = vmatprep.mubr.bf16.mxu0 %v31083_v4  ;;  %14066 = vmatprep.subr.bf16.mxu1 %v27038_v30  ;;  %v27101_v30 = vld [vmem:[%s40002_s2 + $0x6fc] ss:$80 sps:$4 sm:$0xff]  }
 0x253   : > { %14353 = vmatprep.subr.bf16.mxu0 %v27041_v36  ;;  %v27102_v36 = vld [vmem:[%s40002_s2 + $0x790] ss:$80 sps:$4 sm:$0xff]  }
 0x254   : > { %14067 = vmatpush1.bf16.msra.mxu1 %v27036_v32  ;;  %v27099_v32 = vld [vmem:[%s40002_s2 + $0x6f8] ss:$80 sps:$4 sm:$0xff]  }
 0x255   : > { %14354 = vmatpush1.bf16.msra.mxu0 %v27039_v33  ;;  %14068 = vmatprep.subr.bf16.mxu1 %v27044_v38  ;;  %v27104_v33 = vld [vmem:[%s40002_s2 + $0x794] ss:$80 sps:$4 sm:$0xff]   ;;  %v27107_v38 = vld [vmem:[%s40002_s2 + $0x79c] ss:$80 sps:$4 sm:$0xff]  }
 0x256   : > { %14355 = vmatprep.subr.bf16.mxu0 %v27047_v17  ;;  %v27105_v17 = vld [vmem:[%s40002_s2 + $0x798] ss:$80 sps:$4 sm:$0xff]  }
 0x258   : > { %14069 = vmatpush1.bf16.msra.mxu1 %v27042_v41  ;;  %v27110_v41 = vld [vmem:[%s40002_s2 + $0x834] ss:$80 sps:$4 sm:$0xff]  }
 0x259   : > { %14356 = vmatpush1.bf16.msra.mxu0 %v27045_v42  ;;  %14070 = vmatprep.subr.bf16.mxu1 %v27050_v44  ;;  %v27108_v42 = vld [vmem:[%s40002_s2 + $0x830] ss:$80 sps:$4 sm:$0xff]   ;;  %v27113_v44 = vld [vmem:[%s40002_s2 + $0x83c] ss:$80 sps:$4 sm:$0xff]  }
 0x25a   : > { %14357 = vmatprep.subr.bf16.mxu0 %v27053_v46  ;;  %v27116_v46 = vld [vmem:[%s40002_s2 + $0x8d4] ss:$80 sps:$4 sm:$0xff]  }
 0x25c   : > { %14071 = vmatpush1.bf16.msra.mxu1 %v27048_v45  ;;  %v27111_v45 = vld [vmem:[%s40002_s2 + $0x838] ss:$80 sps:$4 sm:$0xff]  }
 0x25d   : > { %14358 = vmatpush1.bf16.msra.mxu0 %v27051_v26  ;;  %14072 = vmatprep.subr.bf16.mxu1 %v27056_v51  ;;  %v27114_v26 = vld [vmem:[%s40002_s2 + $0x8d0] ss:$80 sps:$4 sm:$0xff]   ;;  %v27119_v51 = vld [vmem:[%s40002_s2 + $0x8dc] ss:$80 sps:$4 sm:$0xff]  }
 0x25e   : > { %14359 = vmatprep.subr.bf16.mxu0 %v27059_v56  ;;  %v27122_v56 = vld [vmem:[%s40002_s2 + $0x974] ss:$80 sps:$4 sm:$0xff]  }
 0x260   : > { %14073 = vmatpush1.bf16.msra.mxu1 %v27054_v54  ;;  %v27117_v54 = vld [vmem:[%s40002_s2 + $0x8d8] ss:$80 sps:$4 sm:$0xff]  }
 0x261   : > { %14360 = vmatpush1.bf16.msra.mxu0 %v27057_v10  ;;  %14074 = vmatprep.subr.bf16.mxu1 %v27062_v57  ;;  %v27120_v10 = vld [vmem:[%s40002_s2 + $0x970] ss:$80 sps:$4 sm:$0xff]   ;;  %v27125_v57 = vld [vmem:[%s40002_s2 + $0x97c] ss:$80 sps:$4 sm:$0xff]  }
 0x262   : > { %14361 = vmatprep.subr.bf16.mxu0 %v27065_v49  ;;  %v27128_v49 = vld [vmem:[%s40002_s2 + $0xa14] ss:$80 sps:$4 sm:$0xff]  }
 0x264   : > { %14075 = vmatpush1.bf16.msra.mxu1 %v27060_v58  ;;  %v27123_v58 = vld [vmem:[%s40002_s2 + $0x978] ss:$80 sps:$4 sm:$0xff]  }
 0x265   : > { %14362 = vmatpush1.bf16.msra.mxu0 %v27063_v1  ;;  %14076 = vmatprep.subr.bf16.mxu1 %v27068_v39  ;;  %v27126_v1 = vld [vmem:[%s40002_s2 + $0xa10] ss:$80 sps:$4 sm:$0xff]   ;;  %v27131_v39 = vld [vmem:[%s40002_s2 + $0xa1c] ss:$80 sps:$4 sm:$0xff]  }
 0x266   : > { %14363 = vmatprep.subr.bf16.mxu0 %v27071_v0  ;;  %v27134_v0 = vld [vmem:[%s40002_s2 + $0xab4] ss:$80 sps:$4 sm:$0xff]  }
 0x268   : > { %14077 = vmatpush1.bf16.msra.mxu1 %v27066_v61  ;;  %v27129_v61 = vld [vmem:[%s40002_s2 + $0xa18] ss:$80 sps:$4 sm:$0xff]  }
 0x269   : > { %14364 = vmatpush1.bf16.msra.mxu0 %v27069_v3  ;;  %14078 = vmatprep.subr.bf16.mxu1 %v27074_v18  ;;  %v27132_v3 = vld [vmem:[%s40002_s2 + $0xab0] ss:$80 sps:$4 sm:$0xff]   ;;  %v27135_v18 = vld [vmem:[%s40002_s2 + $0xab8] ss:$80 sps:$4 sm:$0xff]  }
 0x26a   : > { %14365 = vmatprep.subr.bf16.mxu0 %v27077_v47  ;;  %v27140_v47 = vld [vmem:[%s40002_s2 + $0xb54] ss:$80 sps:$4 sm:$0xff]  }
 0x26c   : > { %14079 = vmatpush1.bf16.msra.mxu1 %v27072_v5  ;;  %v27137_v5 = vld [vmem:[%s40002_s2 + $0xabc] ss:$80 sps:$4 sm:$0xff]  }
 0x26d   : > { %14366 = vmatpush1.bf16.msra.mxu0 %v27075_v8  ;;  %14080 = vmatprep.subr.bf16.mxu1 %v27080_v12  ;;  %v27143_v8 = vld [vmem:[%s40002_s2 + $0xb5c] ss:$80 sps:$4 sm:$0xff]   ;;  %v27138_v12 = vld [vmem:[%s40002_s2 + $0xb50] ss:$80 sps:$4 sm:$0xff]  }
 0x26e   : > { %14367 = vmatprep.subr.bf16.mxu0 %v27083_v59  ;;  %v27146_v59 = vld [vmem:[%s40002_s2 + $0xbf4] ss:$80 sps:$4 sm:$0xff]  }
 0x270   : > { %14081 = vmatpush1.bf16.msra.mxu1 %v27078_v27  ;;  %v27141_v27 = vld [vmem:[%s40002_s2 + $0xb58] ss:$80 sps:$4 sm:$0xff]  }
 0x271   : > { %14368 = vmatpush1.bf16.msra.mxu0 %v27081_v15  ;;  %14082 = vmatprep.subr.bf16.mxu1 %v27086_v19  ;;  %v27144_v15 = vld [vmem:[%s40002_s2 + $0xbf0] ss:$80 sps:$4 sm:$0xff]   ;;  %v27149_v19 = vld [vmem:[%s40002_s2 + $0xbfc] ss:$80 sps:$4 sm:$0xff]  }
 0x272   : > { %14369 = vmatprep.subr.bf16.mxu0 %v27089_v21  ;;  %v27152_v21 = vld [vmem:[%s40002_s2 + $0xc94] ss:$80 sps:$4 sm:$0xff]  }
 0x274   : > { %14083 = vmatpush1.bf16.msra.mxu1 %v27084_v20  ;;  %v27147_v20 = vld [vmem:[%s40002_s2 + $0xbf8] ss:$80 sps:$4 sm:$0xff]  }
 0x275   : > { %14370 = vmatpush1.bf16.msra.mxu0 %v27087_v22  ;;  %14084 = vmatprep.subr.bf16.mxu1 %v27092_v25  ;;  %v27150_v22 = vld [vmem:[%s40002_s2 + $0xc90] ss:$80 sps:$4 sm:$0xff]   ;;  %v27155_v25 = vld [vmem:[%s40002_s2 + $0xc9c] ss:$80 sps:$4 sm:$0xff]  }
 0x276   : > { %14371 = vmatprep.subr.bf16.mxu0 %v27095_v28  ;;  %v27158_v28 = vld [vmem:[%s40002_s2 + $0xd34] ss:$80 sps:$4 sm:$0xff]  }
 0x278   : > { %14085 = vmatpush1.bf16.msra.mxu1 %v27090_v23  ;;  %v27153_v23 = vld [vmem:[%s40002_s2 + $0xc98] ss:$80 sps:$4 sm:$0xff]  }
 0x279   : > { %14372 = vmatpush1.bf16.msra.mxu0 %v27093_v40  ;;  %14086 = vmatprep.subr.bf16.mxu1 %v27098_v11  ;;  %v27156_v40 = vld [vmem:[%s40002_s2 + $0xd30] ss:$80 sps:$4 sm:$0xff]   ;;  %v27161_v11 = vld [vmem:[%s40002_s2 + $0xd3c] ss:$80 sps:$4 sm:$0xff]  }
 0x27a   : > { %14373 = vmatprep.subr.bf16.mxu0 %v27101_v30  ;;  %v27164_v30 = vld [vmem:[%s40002_s2 + $0xdd4] ss:$80 sps:$4 sm:$0xff]  }
 0x27c   : > { %14087 = vmatpush1.bf16.msra.mxu1 %v27096_v29  ;;  %v27159_v29 = vld [vmem:[%s40002_s2 + $0xd38] ss:$80 sps:$4 sm:$0xff]  }
 0x27d   : > { %14374 = vmatpush1.bf16.msra.mxu0 %v27099_v32  ;;  %14088 = vmatprep.subr.bf16.mxu1 %v27104_v33  ;;  %v27167_v32 = vld [vmem:[%s40002_s2 + $0xddc] ss:$80 sps:$4 sm:$0xff]   ;;  %v27162_v33 = vld [vmem:[%s40002_s2 + $0xdd0] ss:$80 sps:$4 sm:$0xff]  }
 0x27e   : > { %14375 = vmatprep.subr.bf16.mxu0 %v27107_v38  ;;  %v27170_v38 = vld [vmem:[%s40002_s2 + $0xe74] ss:$80 sps:$4 sm:$0xff]  }
 0x280   : > { %14089 = vmatpush1.bf16.msra.mxu1 %v27102_v36  ;;  %v27165_v36 = vld [vmem:[%s40002_s2 + $0xdd8] ss:$80 sps:$4 sm:$0xff]  }
 0x281   : > { %14376 = vmatpush1.bf16.msra.mxu0 %v27105_v17  ;;  %14090 = vmatprep.subr.bf16.mxu1 %v27110_v41  ;;  %v27173_v17 = vld [vmem:[%s40002_s2 + $0xe7c] ss:$80 sps:$4 sm:$0xff]   ;;  %v27168_v41 = vld [vmem:[%s40002_s2 + $0xe70] ss:$80 sps:$4 sm:$0xff]  }
 0x282   : > { %14377 = vmatprep.subr.bf16.mxu0 %v27113_v44  ;;  %v27176_v44 = vld [vmem:[%s40002_s2 + $0xf14] ss:$80 sps:$4 sm:$0xff]  }
 0x284   : > { %14091 = vmatpush1.bf16.msra.mxu1 %v27108_v42  ;;  %v27171_v42 = vld [vmem:[%s40002_s2 + $0xe78] ss:$80 sps:$4 sm:$0xff]  }
 0x285   : > { %14378 = vmatpush1.bf16.msra.mxu0 %v27111_v45  ;;  %14092 = vmatprep.subr.bf16.mxu1 %v27116_v46  ;;  %v27174_v45 = vld [vmem:[%s40002_s2 + $0xf10] ss:$80 sps:$4 sm:$0xff]   ;;  %v27179_v46 = vld [vmem:[%s40002_s2 + $0xf1c] ss:$80 sps:$4 sm:$0xff]  }
 0x286   : > { %14379 = vmatprep.subr.bf16.mxu0 %v27119_v51  ;;  %v27182_v51 = vld [vmem:[%s40002_s2 + $0xfb4] ss:$80 sps:$4 sm:$0xff]  }
 0x288   : > { %14093 = vmatpush1.bf16.msra.mxu1 %v27114_v26  ;;  %v27177_v26 = vld [vmem:[%s40002_s2 + $0xf18] ss:$80 sps:$4 sm:$0xff]  }
 0x289   : > { %14380 = vmatpush1.bf16.msra.mxu0 %v27117_v54  ;;  %14094 = vmatprep.subr.bf16.mxu1 %v27122_v56  ;;  %v27180_v54 = vld [vmem:[%s40002_s2 + $0xfb0] ss:$80 sps:$4 sm:$0xff]   ;;  %v27185_v56 = vld [vmem:[%s40002_s2 + $0xfbc] ss:$80 sps:$4 sm:$0xff]  }
 0x28a   : > { %14381 = vmatprep.subr.bf16.mxu0 %v27125_v57  ;;  %v27188_v57 = vld [vmem:[%s40002_s2 + $0x1054] ss:$80 sps:$4 sm:$0xff]  }
 0x28c   : > { %14095 = vmatpush1.bf16.msra.mxu1 %v27120_v10  ;;  %v27183_v10 = vld [vmem:[%s40002_s2 + $0xfb8] ss:$80 sps:$4 sm:$0xff]  }
 0x28d   : > { %14382 = vmatpush1.bf16.msra.mxu0 %v27123_v58  ;;  %14105 = vmatprep.subr.bf16.mxu1 %v27128_v49  ;;  %v27186_v58 = vld [vmem:[%s40002_s2 + $0x1050] ss:$80 sps:$4 sm:$0xff]   ;;  %v27191_v49 = vld [vmem:[%s40002_s2 + $0x105c] ss:$80 sps:$4 sm:$0xff]  }
 0x28e   : > { %14392 = vmatprep.subr.bf16.mxu0 %v27131_v39  ;;  %v27194_v39 = vld [vmem:[%s40002_s2 + $0x10f4] ss:$80 sps:$4 sm:$0xff]  }
 0x28f   : > { %14097 = vmatmul.mubr.bf16.vlgmr.msra.gmra.mrb[16].mxu1 %v31085_v7 }
 0x290   : > { %14384 = vmatmul.mubr.bf16.vlgmr.msra.gmra.mrb[20].mxu0 %v31085_v7  ;;  %14106 = vmatpush1.bf16.msra.mxu1 %v27126_v1  ;;  %v27189_v1 = vld [vmem:[%s40002_s2 + $0x1058] ss:$80 sps:$4 sm:$0xff]  }
 0x291   : > { %14137 = vmatprep.mubr.bf16.mxu1 %v31103_v14  ;;  %14393 = vmatpush1.bf16.msra.mxu0 %v27129_v61  ;;  %v27192_v61 = vld [vmem:[%s40002_s2 + $0x10f0] ss:$80 sps:$4 sm:$0xff]  }
 0x292   : > { %14424 = vmatprep.mubr.bf16.mxu0 %v31103_v14  ;;  %14107 = vmatprep.subr.bf16.mxu1 %v27134_v0  ;;  %v27197_v0 = vld [vmem:[%s40002_s2 + $0x10fc] ss:$80 sps:$4 sm:$0xff]  }
 0x293   : > { %14394 = vmatprep.subr.bf16.mxu0 %v27137_v5  ;;  %v27198_v5 = vld [vmem:[%s40002_s2 + $0x1190] ss:$80 sps:$4 sm:$0xff]  }
 0x294   : > { %14108 = vmatpush1.bf16.msra.mxu1 %v27132_v3  ;;  %v27195_v3 = vld [vmem:[%s40002_s2 + $0x10f8] ss:$80 sps:$4 sm:$0xff]  }
 0x295   : > { %14395 = vmatpush1.bf16.msra.mxu0 %v27135_v18  ;;  %14109 = vmatprep.subr.bf16.mxu1 %v27140_v47  ;;  %v27200_v18 = vld [vmem:[%s40002_s2 + $0x1194] ss:$80 sps:$4 sm:$0xff]   ;;  %v27203_v47 = vld [vmem:[%s40002_s2 + $0x119c] ss:$80 sps:$4 sm:$0xff]  }
 0x296   : > { %14396 = vmatprep.subr.bf16.mxu0 %v27143_v8  ;;  %v27201_v8 = vld [vmem:[%s40002_s2 + $0x1198] ss:$80 sps:$4 sm:$0xff]  }
 0x298   : > { %14110 = vmatpush1.bf16.msra.mxu1 %v27138_v12  ;;  %v27206_v12 = vld [vmem:[%s40002_s2 + $0x1234] ss:$80 sps:$4 sm:$0xff]  }
 0x299   : > { %14397 = vmatpush1.bf16.msra.mxu0 %v27141_v27  ;;  %14111 = vmatprep.subr.bf16.mxu1 %v27146_v59  ;;  %v27204_v27 = vld [vmem:[%s40002_s2 + $0x1230] ss:$80 sps:$4 sm:$0xff]   ;;  %v27209_v59 = vld [vmem:[%s40002_s2 + $0x123c] ss:$80 sps:$4 sm:$0xff]  }
 0x29a   : > { %14398 = vmatprep.subr.bf16.mxu0 %v27149_v19  ;;  %v27212_v19 = vld [vmem:[%s40002_s2 + $0x12d4] ss:$80 sps:$4 sm:$0xff]  }
 0x29c   : > { %14112 = vmatpush1.bf16.msra.mxu1 %v27144_v15  ;;  %v27207_v15 = vld [vmem:[%s40002_s2 + $0x1238] ss:$80 sps:$4 sm:$0xff]  }
 0x29d   : > { %14399 = vmatpush1.bf16.msra.mxu0 %v27147_v20  ;;  %14113 = vmatprep.subr.bf16.mxu1 %v27152_v21  ;;  %v27210_v20 = vld [vmem:[%s40002_s2 + $0x12d0] ss:$80 sps:$4 sm:$0xff]   ;;  %v27215_v21 = vld [vmem:[%s40002_s2 + $0x12dc] ss:$80 sps:$4 sm:$0xff]  }
 0x29e   : > { %14400 = vmatprep.subr.bf16.mxu0 %v27155_v25  ;;  %v27218_v25 = vld [vmem:[%s40002_s2 + $0x1374] ss:$80 sps:$4 sm:$0xff]  }
 0x2a0   : > { %14114 = vmatpush1.bf16.msra.mxu1 %v27150_v22  ;;  %v27213_v22 = vld [vmem:[%s40002_s2 + $0x12d8] ss:$80 sps:$4 sm:$0xff]  }
 0x2a1   : > { %14401 = vmatpush1.bf16.msra.mxu0 %v27153_v23  ;;  %14115 = vmatprep.subr.bf16.mxu1 %v27158_v28  ;;  %v27216_v23 = vld [vmem:[%s40002_s2 + $0x1370] ss:$80 sps:$4 sm:$0xff]   ;;  %v27221_v28 = vld [vmem:[%s40002_s2 + $0x137c] ss:$80 sps:$4 sm:$0xff]  }
 0x2a2   : > { %14402 = vmatprep.subr.bf16.mxu0 %v27161_v11  ;;  %v27224_v11 = vld [vmem:[%s40002_s2 + $0x1414] ss:$80 sps:$4 sm:$0xff]  }
 0x2a4   : > { %14116 = vmatpush1.bf16.msra.mxu1 %v27156_v40  ;;  %v27219_v40 = vld [vmem:[%s40002_s2 + $0x1378] ss:$80 sps:$4 sm:$0xff]  }
 0x2a5   : > { %14403 = vmatpush1.bf16.msra.mxu0 %v27159_v29  ;;  %14117 = vmatprep.subr.bf16.mxu1 %v27164_v30  ;;  %v27222_v29 = vld [vmem:[%s40002_s2 + $0x1410] ss:$80 sps:$4 sm:$0xff]   ;;  %v27227_v30 = vld [vmem:[%s40002_s2 + $0x141c] ss:$80 sps:$4 sm:$0xff]  }
 0x2a6   : > { %14404 = vmatprep.subr.bf16.mxu0 %v27167_v32  ;;  %v27225_v32 = vld [vmem:[%s40002_s2 + $0x1418] ss:$80 sps:$4 sm:$0xff]  }
 0x2a8   : > { %14118 = vmatpush1.bf16.msra.mxu1 %v27162_v33  ;;  %v27230_v33 = vld [vmem:[%s40002_s2 + $0x14b4] ss:$80 sps:$4 sm:$0xff]  }
 0x2a9   : > { %14405 = vmatpush1.bf16.msra.mxu0 %v27165_v36  ;;  %14119 = vmatprep.subr.bf16.mxu1 %v27170_v38  ;;  %v27228_v36 = vld [vmem:[%s40002_s2 + $0x14b0] ss:$80 sps:$4 sm:$0xff]   ;;  %v27231_v38 = vld [vmem:[%s40002_s2 + $0x14b8] ss:$80 sps:$4 sm:$0xff]  }
 0x2aa   : > { %14406 = vmatprep.subr.bf16.mxu0 %v27173_v17  ;;  %v27233_v17 = vld [vmem:[%s40002_s2 + $0x14bc] ss:$80 sps:$4 sm:$0xff]  }
 0x2ac   : > { %14120 = vmatpush1.bf16.msra.mxu1 %v27168_v41  ;;  %v27236_v41 = vld [vmem:[%s40002_s2 + $0x1554] ss:$80 sps:$4 sm:$0xff]  }
 0x2ad   : > { %14407 = vmatpush1.bf16.msra.mxu0 %v27171_v42  ;;  %14121 = vmatprep.subr.bf16.mxu1 %v27176_v44  ;;  %v27239_v42 = vld [vmem:[%s40002_s2 + $0x155c] ss:$80 sps:$4 sm:$0xff]   ;;  %v27234_v44 = vld [vmem:[%s40002_s2 + $0x1550] ss:$80 sps:$4 sm:$0xff]  }
 0x2ae   : > { %14408 = vmatprep.subr.bf16.mxu0 %v27179_v46  ;;  %v27242_v46 = vld [vmem:[%s40002_s2 + $0x15f4] ss:$80 sps:$4 sm:$0xff]  }
 0x2b0   : > { %14122 = vmatpush1.bf16.msra.mxu1 %v27174_v45  ;;  %v27237_v45 = vld [vmem:[%s40002_s2 + $0x1558] ss:$80 sps:$4 sm:$0xff]  }
 0x2b1   : > { %14409 = vmatpush1.bf16.msra.mxu0 %v27177_v26  ;;  %14123 = vmatprep.subr.bf16.mxu1 %v27182_v51  ;;  %v27240_v26 = vld [vmem:[%s40002_s2 + $0x15f0] ss:$80 sps:$4 sm:$0xff]   ;;  %v27245_v51 = vld [vmem:[%s40002_s2 + $0x15fc] ss:$80 sps:$4 sm:$0xff]  }
 0x2b2   : > { %14410 = vmatprep.subr.bf16.mxu0 %v27185_v56  ;;  %v27248_v56 = vld [vmem:[%s40002_s2 + $0x1694] ss:$80 sps:$4 sm:$0xff]  }
 0x2b4   : > { %14124 = vmatpush1.bf16.msra.mxu1 %v27180_v54  ;;  %v27243_v54 = vld [vmem:[%s40002_s2 + $0x15f8] ss:$80 sps:$4 sm:$0xff]  }
 0x2b5   : > { %14411 = vmatpush1.bf16.msra.mxu0 %v27183_v10  ;;  %14125 = vmatprep.subr.bf16.mxu1 %v27188_v57  ;;  %v27246_v10 = vld [vmem:[%s40002_s2 + $0x1690] ss:$80 sps:$4 sm:$0xff]   ;;  %v27251_v57 = vld [vmem:[%s40002_s2 + $0x169c] ss:$80 sps:$4 sm:$0xff]  }
 0x2b6   : > { %14412 = vmatprep.subr.bf16.mxu0 %v27191_v49  ;;  %v27254_v49 = vld [vmem:[%s40002_s2 + $0x1734] ss:$80 sps:$4 sm:$0xff]  }
 0x2b8   : > { %14126 = vmatpush1.bf16.msra.mxu1 %v27186_v58  ;;  %v27249_v58 = vld [vmem:[%s40002_s2 + $0x1698] ss:$80 sps:$4 sm:$0xff]  }
 0x2b9   : > { %14413 = vmatpush1.bf16.msra.mxu0 %v27189_v1  ;;  %14127 = vmatprep.subr.bf16.mxu1 %v27194_v39  ;;  %v27252_v1 = vld [vmem:[%s40002_s2 + $0x1730] ss:$80 sps:$4 sm:$0xff]   ;;  %v27257_v39 = vld [vmem:[%s40002_s2 + $0x173c] ss:$80 sps:$4 sm:$0xff]  }
 0x2ba   : > { %14414 = vmatprep.subr.bf16.mxu0 %v27197_v0  ;;  %v27260_v0 = vld [vmem:[%s40002_s2 + $0x17d4] ss:$80 sps:$4 sm:$0xff]  }
 0x2bc   : > { %14128 = vmatpush1.bf16.msra.mxu1 %v27192_v61  ;;  %v27255_v61 = vld [vmem:[%s40002_s2 + $0x1738] ss:$80 sps:$4 sm:$0xff]  }
 0x2bd   : > { %14415 = vmatpush1.bf16.msra.mxu0 %v27195_v3  ;;  %14129 = vmatprep.subr.bf16.mxu1 %v27200_v18  ;;  %v27258_v3 = vld [vmem:[%s40002_s2 + $0x17d0] ss:$80 sps:$4 sm:$0xff]   ;;  %v27263_v18 = vld [vmem:[%s40002_s2 + $0x17dc] ss:$80 sps:$4 sm:$0xff]  }
 0x2be   : > { %14416 = vmatprep.subr.bf16.mxu0 %v27203_v47  ;;  %v27266_v47 = vld [vmem:[%s40002_s2 + $0x1874] ss:$80 sps:$4 sm:$0xff]  }
 0x2c0   : > { %14130 = vmatpush1.bf16.msra.mxu1 %v27198_v5  ;;  %v27261_v5 = vld [vmem:[%s40002_s2 + $0x17d8] ss:$80 sps:$4 sm:$0xff]  }
 0x2c1   : > { %14417 = vmatpush1.bf16.msra.mxu0 %v27201_v8  ;;  %14131 = vmatprep.subr.bf16.mxu1 %v27206_v12  ;;  %v27264_v8 = vld [vmem:[%s40002_s2 + $0x1870] ss:$80 sps:$4 sm:$0xff]   ;;  %v27269_v12 = vld [vmem:[%s40002_s2 + $0x187c] ss:$80 sps:$4 sm:$0xff]  }
 0x2c2   : > { %14418 = vmatprep.subr.bf16.mxu0 %v27209_v59  ;;  %v27272_v59 = vld [vmem:[%s40002_s2 + $0x1914] ss:$80 sps:$4 sm:$0xff]  }
 0x2c4   : > { %14132 = vmatpush1.bf16.msra.mxu1 %v27204_v27  ;;  %v27267_v27 = vld [vmem:[%s40002_s2 + $0x1878] ss:$80 sps:$4 sm:$0xff]  }
 0x2c5   : > { %14419 = vmatpush1.bf16.msra.mxu0 %v27207_v15  ;;  %14133 = vmatprep.subr.bf16.mxu1 %v27212_v19  ;;  %v27270_v15 = vld [vmem:[%s40002_s2 + $0x1910] ss:$80 sps:$4 sm:$0xff]   ;;  %v27275_v19 = vld [vmem:[%s40002_s2 + $0x191c] ss:$80 sps:$4 sm:$0xff]  }
 0x2c6   : > { %14420 = vmatprep.subr.bf16.mxu0 %v27215_v21  ;;  %v27278_v21 = vld [vmem:[%s40002_s2 + $0x19b4] ss:$80 sps:$4 sm:$0xff]  }
 0x2c8   : > { %14134 = vmatpush1.bf16.msra.mxu1 %v27210_v20  ;;  %v27273_v20 = vld [vmem:[%s40002_s2 + $0x1918] ss:$80 sps:$4 sm:$0xff]  }
 0x2c9   : > { %14421 = vmatpush1.bf16.msra.mxu0 %v27213_v22  ;;  %14135 = vmatprep.subr.bf16.mxu1 %v27218_v25  ;;  %v27276_v22 = vld [vmem:[%s40002_s2 + $0x19b0] ss:$80 sps:$4 sm:$0xff]   ;;  %v27281_v25 = vld [vmem:[%s40002_s2 + $0x19bc] ss:$80 sps:$4 sm:$0xff]  }
 0x2ca   : > { %14422 = vmatprep.subr.bf16.mxu0 %v27221_v28  ;;  %v27284_v28 = vld [vmem:[%s40002_s2 + $0x1a54] ss:$80 sps:$4 sm:$0xff]  }
 0x2cc   : > { %14136 = vmatpush1.bf16.msra.mxu1 %v27216_v23  ;;  %v27279_v23 = vld [vmem:[%s40002_s2 + $0x19b8] ss:$80 sps:$4 sm:$0xff]  }
 0x2cd   : > { %14423 = vmatpush1.bf16.msra.mxu0 %v27219_v40  ;;  %14146 = vmatprep.subr.bf16.mxu1 %v27224_v11  ;;  %v27282_v40 = vld [vmem:[%s40002_s2 + $0x1a50] ss:$80 sps:$4 sm:$0xff]   ;;  %v27287_v11 = vld [vmem:[%s40002_s2 + $0x1a5c] ss:$80 sps:$4 sm:$0xff]  }
 0x2ce   : > { %14433 = vmatprep.subr.bf16.mxu0 %v27227_v30  ;;  %v27290_v30 = vld [vmem:[%s40002_s2 + $0x1af4] ss:$80 sps:$4 sm:$0xff]  }
 0x2cf   : > { %14138 = vmatmul.mubr.bf16.vlgmr.msra.gmra.mrb[16].mxu1 %v31326_v9 }
 0x2d0   : > { %14425 = vmatmul.mubr.bf16.vlgmr.msra.gmra.mrb[20].mxu0 %v31326_v9  ;;  %14147 = vmatpush1.bf16.msra.mxu1 %v27222_v29  ;;  %v27285_v29 = vld [vmem:[%s40002_s2 + $0x1a58] ss:$80 sps:$4 sm:$0xff]  }
 0x2d1   : > { %14178 = vmatprep.mubr.bf16.mxu1 %v31340_v16  ;;  %14434 = vmatpush1.bf16.msra.mxu0 %v27225_v32  ;;  %v27288_v32 = vld [vmem:[%s40002_s2 + $0x1af0] ss:$80 sps:$4 sm:$0xff]  }
 0x2d2   : > { %14465 = vmatprep.mubr.bf16.mxu0 %v31340_v16  ;;  %14148 = vmatprep.subr.bf16.mxu1 %v27230_v33  ;;  %v27293_v33 = vld [vmem:[%s40002_s2 + $0x1afc] ss:$80 sps:$4 sm:$0xff]  }
 0x2d3   : > { %14435 = vmatprep.subr.bf16.mxu0 %v27233_v17  ;;  %v27294_v17 = vld [vmem:[%s40002_s2 + $0x1b90] ss:$80 sps:$4 sm:$0xff]  }
 0x2d4   : > { %14149 = vmatpush1.bf16.msra.mxu1 %v27228_v36  ;;  %v27291_v36 = vld [vmem:[%s40002_s2 + $0x1af8] ss:$80 sps:$4 sm:$0xff]  }
 0x2d5   : > { %14436 = vmatpush1.bf16.msra.mxu0 %v27231_v38  ;;  %14150 = vmatprep.subr.bf16.mxu1 %v27236_v41  ;;  %v27296_v38 = vld [vmem:[%s40002_s2 + $0x1b94] ss:$80 sps:$4 sm:$0xff]   ;;  %v27299_v41 = vld [vmem:[%s40002_s2 + $0x1b9c] ss:$80 sps:$4 sm:$0xff]  }
 0x2d6   : > { %14437 = vmatprep.subr.bf16.mxu0 %v27239_v42  ;;  %v27297_v42 = vld [vmem:[%s40002_s2 + $0x1b98] ss:$80 sps:$4 sm:$0xff]  }
 0x2d8   : > { %14151 = vmatpush1.bf16.msra.mxu1 %v27234_v44  ;;  %v27302_v44 = vld [vmem:[%s40002_s2 + $0x1c34] ss:$80 sps:$4 sm:$0xff]  }
 0x2d9   : > { %14438 = vmatpush1.bf16.msra.mxu0 %v27237_v45  ;;  %14152 = vmatprep.subr.bf16.mxu1 %v27242_v46  ;;  %v27300_v45 = vld [vmem:[%s40002_s2 + $0x1c30] ss:$80 sps:$4 sm:$0xff]   ;;  %v27305_v46 = vld [vmem:[%s40002_s2 + $0x1c3c] ss:$80 sps:$4 sm:$0xff]  }
 0x2da   : > { %14439 = vmatprep.subr.bf16.mxu0 %v27245_v51  ;;  %v27308_v51 = vld [vmem:[%s40002_s2 + $0x1cd4] ss:$80 sps:$4 sm:$0xff]  }
 0x2dc   : > { %14153 = vmatpush1.bf16.msra.mxu1 %v27240_v26  ;;  %v27303_v26 = vld [vmem:[%s40002_s2 + $0x1c38] ss:$80 sps:$4 sm:$0xff]  }
 0x2dd   : > { %14440 = vmatpush1.bf16.msra.mxu0 %v27243_v54  ;;  %14154 = vmatprep.subr.bf16.mxu1 %v27248_v56  ;;  %v27306_v54 = vld [vmem:[%s40002_s2 + $0x1cd0] ss:$80 sps:$4 sm:$0xff]   ;;  %v27311_v56 = vld [vmem:[%s40002_s2 + $0x1cdc] ss:$80 sps:$4 sm:$0xff]  }
 0x2de   : > { %14441 = vmatprep.subr.bf16.mxu0 %v27251_v57  ;;  %v27314_v57 = vld [vmem:[%s40002_s2 + $0x1d74] ss:$80 sps:$4 sm:$0xff]  }
 0x2e0   : > { %14155 = vmatpush1.bf16.msra.mxu1 %v27246_v10  ;;  %v27309_v10 = vld [vmem:[%s40002_s2 + $0x1cd8] ss:$80 sps:$4 sm:$0xff]  }
 0x2e1   : > { %14442 = vmatpush1.bf16.msra.mxu0 %v27249_v58  ;;  %14156 = vmatprep.subr.bf16.mxu1 %v27254_v49  ;;  %v27312_v58 = vld [vmem:[%s40002_s2 + $0x1d70] ss:$80 sps:$4 sm:$0xff]   ;;  %v27317_v49 = vld [vmem:[%s40002_s2 + $0x1d7c] ss:$80 sps:$4 sm:$0xff]  }
 0x2e2   : > { %14443 = vmatprep.subr.bf16.mxu0 %v27257_v39  ;;  %v27320_v39 = vld [vmem:[%s40002_s2 + $0x1e14] ss:$80 sps:$4 sm:$0xff]  }
 0x2e4   : > { %14157 = vmatpush1.bf16.msra.mxu1 %v27252_v1  ;;  %v27315_v1 = vld [vmem:[%s40002_s2 + $0x1d78] ss:$80 sps:$4 sm:$0xff]  }
 0x2e5   : > { %14444 = vmatpush1.bf16.msra.mxu0 %v27255_v61  ;;  %14158 = vmatprep.subr.bf16.mxu1 %v27260_v0  ;;  %v27318_v61 = vld [vmem:[%s40002_s2 + $0x1e10] ss:$80 sps:$4 sm:$0xff]   ;;  %v27323_v0 = vld [vmem:[%s40002_s2 + $0x1e1c] ss:$80 sps:$4 sm:$0xff]  }
 0x2e6   : > { %14445 = vmatprep.subr.bf16.mxu0 %v27263_v18  ;;  %v27326_v18 = vld [vmem:[%s40002_s2 + $0x1eb4] ss:$80 sps:$4 sm:$0xff]  }
 0x2e8   : > { %14159 = vmatpush1.bf16.msra.mxu1 %v27258_v3  ;;  %v27321_v3 = vld [vmem:[%s40002_s2 + $0x1e18] ss:$80 sps:$4 sm:$0xff]  }
 0x2e9   : > { %14446 = vmatpush1.bf16.msra.mxu0 %v27261_v5  ;;  %14160 = vmatprep.subr.bf16.mxu1 %v27266_v47  ;;  %v27324_v5 = vld [vmem:[%s40002_s2 + $0x1eb0] ss:$80 sps:$4 sm:$0xff]   ;;  %v27327_v47 = vld [vmem:[%s40002_s2 + $0x1eb8] ss:$80 sps:$4 sm:$0xff]  }
 0x2ea   : > { %14447 = vmatprep.subr.bf16.mxu0 %v27269_v12  ;;  %v27332_v12 = vld [vmem:[%s40002_s2 + $0x1f54] ss:$80 sps:$4 sm:$0xff]  }
 0x2ec   : > { %14161 = vmatpush1.bf16.msra.mxu1 %v27264_v8  ;;  %v27329_v8 = vld [vmem:[%s40002_s2 + $0x1ebc] ss:$80 sps:$4 sm:$0xff]  }
 0x2ed   : > { %14448 = vmatpush1.bf16.msra.mxu0 %v27267_v27  ;;  %14162 = vmatprep.subr.bf16.mxu1 %v27272_v59  ;;  %v27335_v27 = vld [vmem:[%s40002_s2 + $0x1f5c] ss:$80 sps:$4 sm:$0xff]   ;;  %v27330_v59 = vld [vmem:[%s40002_s2 + $0x1f50] ss:$80 sps:$4 sm:$0xff]  }
 0x2ee   : > { %14449 = vmatprep.subr.bf16.mxu0 %v27275_v19  ;;  %v27338_v19 = vld [vmem:[%s40002_s2 + $0x1ff4] ss:$80 sps:$4 sm:$0xff]  }
 0x2f0   : > { %14163 = vmatpush1.bf16.msra.mxu1 %v27270_v15  ;;  %v27333_v15 = vld [vmem:[%s40002_s2 + $0x1f58] ss:$80 sps:$4 sm:$0xff]  }
 0x2f1   : > { %14450 = vmatpush1.bf16.msra.mxu0 %v27273_v20  ;;  %14164 = vmatprep.subr.bf16.mxu1 %v27278_v21  ;;  %v27336_v20 = vld [vmem:[%s40002_s2 + $0x1ff0] ss:$80 sps:$4 sm:$0xff]   ;;  %v27341_v21 = vld [vmem:[%s40002_s2 + $0x1ffc] ss:$80 sps:$4 sm:$0xff]  }
 0x2f2   : > { %14451 = vmatprep.subr.bf16.mxu0 %v27281_v25  ;;  %v27344_v25 = vld [vmem:[%s40002_s2 + $0x2094] ss:$80 sps:$4 sm:$0xff]  }
 0x2f4   : > { %14165 = vmatpush1.bf16.msra.mxu1 %v27276_v22  ;;  %v27339_v22 = vld [vmem:[%s40002_s2 + $0x1ff8] ss:$80 sps:$4 sm:$0xff]  }
 0x2f5   : > { %14452 = vmatpush1.bf16.msra.mxu0 %v27279_v23  ;;  %14166 = vmatprep.subr.bf16.mxu1 %v27284_v28  ;;  %v27342_v23 = vld [vmem:[%s40002_s2 + $0x2090] ss:$80 sps:$4 sm:$0xff]   ;;  %v27347_v28 = vld [vmem:[%s40002_s2 + $0x209c] ss:$80 sps:$4 sm:$0xff]  }
 0x2f6   : > { %14453 = vmatprep.subr.bf16.mxu0 %v27287_v11  ;;  %v27350_v11 = vld [vmem:[%s40002_s2 + $0x2134] ss:$80 sps:$4 sm:$0xff]  }
 0x2f8   : > { %14167 = vmatpush1.bf16.msra.mxu1 %v27282_v40  ;;  %v27345_v40 = vld [vmem:[%s40002_s2 + $0x2098] ss:$80 sps:$4 sm:$0xff]  }
 0x2f9   : > { %14454 = vmatpush1.bf16.msra.mxu0 %v27285_v29  ;;  %14168 = vmatprep.subr.bf16.mxu1 %v27290_v30  ;;  %v27353_v29 = vld [vmem:[%s40002_s2 + $0x213c] ss:$80 sps:$4 sm:$0xff]   ;;  %v27348_v30 = vld [vmem:[%s40002_s2 + $0x2130] ss:$80 sps:$4 sm:$0xff]  }
 0x2fa   : > { %14455 = vmatprep.subr.bf16.mxu0 %v27293_v33  ;;  %v27356_v33 = vld [vmem:[%s40002_s2 + $0x21d4] ss:$80 sps:$4 sm:$0xff]  }
 0x2fc   : > { %14169 = vmatpush1.bf16.msra.mxu1 %v27288_v32  ;;  %v27351_v32 = vld [vmem:[%s40002_s2 + $0x2138] ss:$80 sps:$4 sm:$0xff]  }
 0x2fd   : > { %14456 = vmatpush1.bf16.msra.mxu0 %v27291_v36  ;;  %14170 = vmatprep.subr.bf16.mxu1 %v27296_v38  ;;  %v27359_v36 = vld [vmem:[%s40002_s2 + $0x21dc] ss:$80 sps:$4 sm:$0xff]  }
 0x2fe   : > { %14457 = vmatprep.subr.bf16.mxu0 %v27299_v41 }
 0x300   : > { %14171 = vmatpush1.bf16.msra.mxu1 %v27294_v17  ;;  %v27354_v17 = vld [vmem:[%s40002_s2 + $0x21d0] ss:$80 sps:$4 sm:$0xff]  }
 0x301   : > { %14458 = vmatpush1.bf16.msra.mxu0 %v27297_v42  ;;  %14172 = vmatprep.subr.bf16.mxu1 %v27302_v44  ;;  %v27357_v44 = vld [vmem:[%s40002_s2 + $0x21d8] ss:$80 sps:$4 sm:$0xff]  }
 0x302   : > { %14459 = vmatprep.subr.bf16.mxu0 %v27305_v46 }
 0x304   : > { %14173 = vmatpush1.bf16.msra.mxu1 %v27300_v45 }
 0x305   : > { %14460 = vmatpush1.bf16.msra.mxu0 %v27303_v26  ;;  %14174 = vmatprep.subr.bf16.mxu1 %v27308_v51 }
 0x306   : > { %14461 = vmatprep.subr.bf16.mxu0 %v27311_v56 }
 0x308   : > { %14175 = vmatpush1.bf16.msra.mxu1 %v27306_v54  ;;  %v27362_v54 = vld [vmem:[%s40002_s2 + $0x2274] ss:$80 sps:$4 sm:$0xff]  }
 0x309   : > { %14462 = vmatpush1.bf16.msra.mxu0 %v27309_v10  ;;  %14176 = vmatprep.subr.bf16.mxu1 %v27314_v57  ;;  %v27365_v10 = vld [vmem:[%s40002_s2 + $0x227c] ss:$80 sps:$4 sm:$0xff]   ;;  %v27360_v57 = vld [vmem:[%s40002_s2 + $0x2270] ss:$80 sps:$4 sm:$0xff]  }
 0x30a   : > { %14463 = vmatprep.subr.bf16.mxu0 %v27317_v49  ;;  %v27368_v49 = vld [vmem:[%s40002_s2 + $0x2314] ss:$80 sps:$4 sm:$0xff]  }
 0x30c   : > { %14177 = vmatpush1.bf16.msra.mxu1 %v27312_v58  ;;  %v27363_v58 = vld [vmem:[%s40002_s2 + $0x2278] ss:$80 sps:$4 sm:$0xff]  }
 0x30d   : > { %14464 = vmatpush1.bf16.msra.mxu0 %v27315_v1  ;;  %14187 = vmatprep.subr.bf16.mxu1 %v27320_v39  ;;  %v27366_v1 = vld [vmem:[%s40002_s2 + $0x2310] ss:$80 sps:$4 sm:$0xff]   ;;  %v27371_v39 = vld [vmem:[%s40002_s2 + $0x231c] ss:$80 sps:$4 sm:$0xff]  }
 0x30e   : > { %14474 = vmatprep.subr.bf16.mxu0 %v27323_v0  ;;  %v27374_v0 = vld [vmem:[%s40002_s2 + $0x23b4] ss:$80 sps:$4 sm:$0xff]  }
 0x30f   : > { %14179 = vmatmul.mubr.bf16.vlgmr.msra.gmra.mrb[16].mxu1 %v31540_v52 }
 0x310   : > { %14466 = vmatmul.mubr.bf16.vlgmr.msra.gmra.mrb[20].mxu0 %v31540_v52  ;;  %14188 = vmatpush1.bf16.msra.mxu1 %v27318_v61  ;;  %v27369_v61 = vld [vmem:[%s40002_s2 + $0x2318] ss:$80 sps:$4 sm:$0xff]  }
 0x311   : > { %14219 = vmatprep.mubr.bf16.mxu1 %v31554_v60  ;;  %14475 = vmatpush1.bf16.msra.mxu0 %v27321_v3  ;;  %v27372_v3 = vld [vmem:[%s40002_s2 + $0x23b0] ss:$80 sps:$4 sm:$0xff]  }
 0x312   : > { %14506 = vmatprep.mubr.bf16.mxu0 %v31554_v60  ;;  %14189 = vmatprep.subr.bf16.mxu1 %v27326_v18  ;;  %v27377_v18 = vld [vmem:[%s40002_s2 + $0x23bc] ss:$80 sps:$4 sm:$0xff]  }
 0x313   : > { %14476 = vmatprep.subr.bf16.mxu0 %v27329_v8  ;;  %v27378_v8 = vld [vmem:[%s40002_s2 + $0x2450] ss:$80 sps:$4 sm:$0xff]  }
 0x314   : > { %14190 = vmatpush1.bf16.msra.mxu1 %v27324_v5  ;;  %v27375_v5 = vld [vmem:[%s40002_s2 + $0x23b8] ss:$80 sps:$4 sm:$0xff]  }
 0x315   : > { %14477 = vmatpush1.bf16.msra.mxu0 %v27327_v47  ;;  %14191 = vmatprep.subr.bf16.mxu1 %v27332_v12  ;;  %v27380_v47 = vld [vmem:[%s40002_s2 + $0x2454] ss:$80 sps:$4 sm:$0xff]   ;;  %v27383_v12 = vld [vmem:[%s40002_s2 + $0x245c] ss:$80 sps:$4 sm:$0xff]  }
 0x316   : > { %14478 = vmatprep.subr.bf16.mxu0 %v27335_v27  ;;  %v27381_v27 = vld [vmem:[%s40002_s2 + $0x2458] ss:$80 sps:$4 sm:$0xff]  }
 0x318   : > { %14192 = vmatpush1.bf16.msra.mxu1 %v27330_v59  ;;  %v27386_v59 = vld [vmem:[%s40002_s2 + $0x24f4] ss:$80 sps:$4 sm:$0xff]  }
 0x319   : > { %14479 = vmatpush1.bf16.msra.mxu0 %v27333_v15  ;;  %14193 = vmatprep.subr.bf16.mxu1 %v27338_v19  ;;  %v27384_v15 = vld [vmem:[%s40002_s2 + $0x24f0] ss:$80 sps:$4 sm:$0xff]   ;;  %v27389_v19 = vld [vmem:[%s40002_s2 + $0x24fc] ss:$80 sps:$4 sm:$0xff]  }
 0x31a   : > { %14480 = vmatprep.subr.bf16.mxu0 %v27341_v21  ;;  %v27392_v21 = vld [vmem:[%s40002_s2 + $0x2594] ss:$80 sps:$4 sm:$0xff]  }
 0x31c   : > { %14194 = vmatpush1.bf16.msra.mxu1 %v27336_v20  ;;  %v27387_v20 = vld [vmem:[%s40002_s2 + $0x24f8] ss:$80 sps:$4 sm:$0xff]  }
 0x31d   : > { %14481 = vmatpush1.bf16.msra.mxu0 %v27339_v22  ;;  %14195 = vmatprep.subr.bf16.mxu1 %v27344_v25  ;;  %v27390_v22 = vld [vmem:[%s40002_s2 + $0x2590] ss:$80 sps:$4 sm:$0xff]   ;;  %v27395_v25 = vld [vmem:[%s40002_s2 + $0x259c] ss:$80 sps:$4 sm:$0xff]  }
 0x31e   : > { %14482 = vmatprep.subr.bf16.mxu0 %v27347_v28  ;;  %v27398_v28 = vld [vmem:[%s40002_s2 + $0x2634] ss:$80 sps:$4 sm:$0xff]  }
 0x320   : > { %14196 = vmatpush1.bf16.msra.mxu1 %v27342_v23  ;;  %v27393_v23 = vld [vmem:[%s40002_s2 + $0x2598] ss:$80 sps:$4 sm:$0xff]  }
 0x321   : > { %14483 = vmatpush1.bf16.msra.mxu0 %v27345_v40  ;;  %14197 = vmatprep.subr.bf16.mxu1 %v27350_v11  ;;  %v27396_v40 = vld [vmem:[%s40002_s2 + $0x2630] ss:$80 sps:$4 sm:$0xff]   ;;  %v27401_v11 = vld [vmem:[%s40002_s2 + $0x263c] ss:$80 sps:$4 sm:$0xff]  }
 0x322   : > { %v32922_v38 = vpop.f32.mrb[12].mxu1  ;;  %14484 = vmatprep.subr.bf16.mxu0 %v27353_v29  ;;  %v27399_v29 = vld [vmem:[%s40002_s2 + $0x2638] ss:$80 sps:$4 sm:$0xff]  }
 0x323   : > { %v32927_v41 = vpop.f32.mrb[16].mxu0  ;;  %v32929_v42 = vpop.f32.mrb[13].mxu1 }
 0x324   : > { %v32934_v45 = vpop.f32.mrb[17].mxu0  ;;  %v13774_v46 = vpop.f32.mrb[14].mxu1  ;;  %14198 = vmatpush1.bf16.msra.mxu1 %v27348_v30  ;;  %v27404_v30 = vld [vmem:[%s40002_s2 + $0x26d4] ss:$80 sps:$4 sm:$0xff]  }
 0x325   : > { %v14061_v26 = vpop.f32.mrb[18].mxu0  ;;  %14485 = vmatpush1.bf16.msra.mxu0 %v27351_v32  ;;  %v13775_v51 = vpop.f32.mrb[15].mxu1  ;;  %14199 = vmatprep.subr.bf16.mxu1 %v27356_v33  ;;  %v27402_v32 = vld [vmem:[%s40002_s2 + $0x26d0] ss:$80 sps:$4 sm:$0xff]   ;;  %v27407_v33 = vld [vmem:[%s40002_s2 + $0x26dc] ss:$80 sps:$4 sm:$0xff]  }
 0x326   : > { %v14062_v56 = vpop.f32.mrb[19].mxu0  ;;  %14486 = vmatprep.subr.bf16.mxu0 %v27359_v36  ;;  %v27405_v36 = vld [vmem:[%s40002_s2 + $0x26d8] ss:$80 sps:$4 sm:$0xff]   ;;  %v27413_v46 = vld [vmem:[%s40002_s2 + $0x277c] ss:$80 sps:$4 sm:$0xff]  }
 0x327   : > { %v27411_v26 = vld [vmem:[%s40002_s2 + $0x2778] ss:$80 sps:$4 sm:$0xff]   ;;  %v27416_v51 = vld [vmem:[%s40002_s2 + $0x2814] ss:$80 sps:$4 sm:$0xff]   ;;  %v27419_v56 = vld [vmem:[%s40002_s2 + $0x281c] ss:$80 sps:$4 sm:$0xff]  }
 0x328   : > { %14200 = vmatpush1.bf16.msra.mxu1 %v27354_v17  ;;  %v27410_v17 = vld [vmem:[%s40002_s2 + $0x2774] ss:$80 sps:$4 sm:$0xff]  }
 0x329   : > { %14487 = vmatpush1.bf16.msra.mxu0 %v27357_v44  ;;  %14201 = vmatprep.subr.bf16.mxu1 %v27362_v54  ;;  %v27408_v44 = vld [vmem:[%s40002_s2 + $0x2770] ss:$80 sps:$4 sm:$0xff]  }
 0x32a   : > { %14488 = vmatprep.subr.bf16.mxu0 %v27365_v10  ;;  %v27414_v54 = vld [vmem:[%s40002_s2 + $0x2810] ss:$80 sps:$4 sm:$0xff]   ;;  %v27417_v10 = vld [vmem:[%s40002_s2 + $0x2818] ss:$80 sps:$4 sm:$0xff]  }
 0x32c   : > { %14202 = vmatpush1.bf16.msra.mxu1 %v27360_v57  ;;  %v27422_v57 = vld [vmem:[%s40002_s2 + $0x28b4] ss:$80 sps:$4 sm:$0xff]  }
 0x32d   : > { %14489 = vmatpush1.bf16.msra.mxu0 %v27363_v58  ;;  %14203 = vmatprep.subr.bf16.mxu1 %v27368_v49  ;;  %v27425_v58 = vld [vmem:[%s40002_s2 + $0x28bc] ss:$80 sps:$4 sm:$0xff]   ;;  %v27420_v49 = vld [vmem:[%s40002_s2 + $0x28b0] ss:$80 sps:$4 sm:$0xff]  }
 0x32e   : > { %14490 = vmatprep.subr.bf16.mxu0 %v27371_v39  ;;  %v27428_v39 = vld [vmem:[%s40002_s2 + $0x2954] ss:$80 sps:$4 sm:$0xff]  }
 0x330   : > { %14204 = vmatpush1.bf16.msra.mxu1 %v27366_v1  ;;  %v27423_v1 = vld [vmem:[%s40002_s2 + $0x28b8] ss:$80 sps:$4 sm:$0xff]  }
 0x331   : > { %14491 = vmatpush1.bf16.msra.mxu0 %v27369_v61  ;;  %14205 = vmatprep.subr.bf16.mxu1 %v27374_v0  ;;  %v27426_v61 = vld [vmem:[%s40002_s2 + $0x2950] ss:$80 sps:$4 sm:$0xff]   ;;  %v27431_v0 = vld [vmem:[%s40002_s2 + $0x295c] ss:$80 sps:$4 sm:$0xff]  }
 0x332   : > { %14492 = vmatprep.subr.bf16.mxu0 %v27377_v18  ;;  %v27434_v18 = vld [vmem:[%s40002_s2 + $0x29f4] ss:$80 sps:$4 sm:$0xff]  }
 0x334   : > { %14206 = vmatpush1.bf16.msra.mxu1 %v27372_v3  ;;  %v27429_v3 = vld [vmem:[%s40002_s2 + $0x2958] ss:$80 sps:$4 sm:$0xff]  }
 0x335   : > { %14493 = vmatpush1.bf16.msra.mxu0 %v27375_v5  ;;  %14207 = vmatprep.subr.bf16.mxu1 %v27380_v47  ;;  %v27432_v5 = vld [vmem:[%s40002_s2 + $0x29f0] ss:$80 sps:$4 sm:$0xff]   ;;  %v27437_v47 = vld [vmem:[%s40002_s2 + $0x29fc] ss:$80 sps:$4 sm:$0xff]  }
 0x336   : > { %14494 = vmatprep.subr.bf16.mxu0 %v27383_v12  ;;  %v27440_v12 = vld [vmem:[%s40002_s2 + $0x2a94] ss:$80 sps:$4 sm:$0xff]  }
 0x338   : > { %14208 = vmatpush1.bf16.msra.mxu1 %v27378_v8  ;;  %v27435_v8 = vld [vmem:[%s40002_s2 + $0x29f8] ss:$80 sps:$4 sm:$0xff]  }
 0x339   : > { %14495 = vmatpush1.bf16.msra.mxu0 %v27381_v27  ;;  %14209 = vmatprep.subr.bf16.mxu1 %v27386_v59  ;;  %v27438_v27 = vld [vmem:[%s40002_s2 + $0x2a90] ss:$80 sps:$4 sm:$0xff]   ;;  %v27443_v59 = vld [vmem:[%s40002_s2 + $0x2a9c] ss:$80 sps:$4 sm:$0xff]  }
 0x33a   : > { %14496 = vmatprep.subr.bf16.mxu0 %v27389_v19  ;;  %v27446_v19 = vld [vmem:[%s40002_s2 + $0x2b34] ss:$80 sps:$4 sm:$0xff]  }
 0x33c   : > { %14210 = vmatpush1.bf16.msra.mxu1 %v27384_v15  ;;  %v27441_v15 = vld [vmem:[%s40002_s2 + $0x2a98] ss:$80 sps:$4 sm:$0xff]  }
 0x33d   : > { %14497 = vmatpush1.bf16.msra.mxu0 %v27387_v20  ;;  %14211 = vmatprep.subr.bf16.mxu1 %v27392_v21  ;;  %v27444_v20 = vld [vmem:[%s40002_s2 + $0x2b30] ss:$80 sps:$4 sm:$0xff]   ;;  %v27449_v21 = vld [vmem:[%s40002_s2 + $0x2b3c] ss:$80 sps:$4 sm:$0xff]  }
 0x33e   : > { %14498 = vmatprep.subr.bf16.mxu0 %v27395_v25  ;;  %v27452_v25 = vld [vmem:[%s40002_s2 + $0x2bd4] ss:$80 sps:$4 sm:$0xff]  }
 0x340   : > { %14212 = vmatpush1.bf16.msra.mxu1 %v27390_v22  ;;  %v27447_v22 = vld [vmem:[%s40002_s2 + $0x2b38] ss:$80 sps:$4 sm:$0xff]  }
 0x341   : > { %14499 = vmatpush1.bf16.msra.mxu0 %v27393_v23  ;;  %14213 = vmatprep.subr.bf16.mxu1 %v27398_v28  ;;  %v27450_v23 = vld [vmem:[%s40002_s2 + $0x2bd0] ss:$80 sps:$4 sm:$0xff]   ;;  %v27455_v28 = vld [vmem:[%s40002_s2 + $0x2bdc] ss:$80 sps:$4 sm:$0xff]  }
 0x342   : > { %14500 = vmatprep.subr.bf16.mxu0 %v27401_v11  ;;  %v27458_v11 = vld [vmem:[%s40002_s2 + $0x2c74] ss:$80 sps:$4 sm:$0xff]  }
 0x344   : > { %14214 = vmatpush1.bf16.msra.mxu1 %v27396_v40  ;;  %v27453_v40 = vld [vmem:[%s40002_s2 + $0x2bd8] ss:$80 sps:$4 sm:$0xff]  }
 0x345   : > { %14501 = vmatpush1.bf16.msra.mxu0 %v27399_v29  ;;  %14215 = vmatprep.subr.bf16.mxu1 %v27404_v30  ;;  %v27456_v29 = vld [vmem:[%s40002_s2 + $0x2c70] ss:$80 sps:$4 sm:$0xff]   ;;  %v27461_v30 = vld [vmem:[%s40002_s2 + $0x2c7c] ss:$80 sps:$4 sm:$0xff]  }
 0x346   : > { %14502 = vmatprep.subr.bf16.mxu0 %v27407_v33  ;;  %v27464_v33 = vld [vmem:[%s40002_s2 + $0x2d14] ss:$80 sps:$4 sm:$0xff]  }
 0x348   : > { %14216 = vmatpush1.bf16.msra.mxu1 %v27402_v32  ;;  %v27459_v32 = vld [vmem:[%s40002_s2 + $0x2c78] ss:$80 sps:$4 sm:$0xff]  }
 0x349   : > { %14503 = vmatpush1.bf16.msra.mxu0 %v27405_v36  ;;  %14217 = vmatprep.subr.bf16.mxu1 %v27410_v17  ;;  %v27462_v36 = vld [vmem:[%s40002_s2 + $0x2d10] ss:$80 sps:$4 sm:$0xff]   ;;  %v27467_v17 = vld [vmem:[%s40002_s2 + $0x2d1c] ss:$80 sps:$4 sm:$0xff]  }
 0x34a   : > { %14504 = vmatprep.subr.bf16.mxu0 %v27413_v46  ;;  %v27470_v46 = vld [vmem:[%s40002_s2 + $0x2db4] ss:$80 sps:$4 sm:$0xff]  }
 0x34c   : > { %14218 = vmatpush1.bf16.msra.mxu1 %v27408_v44  ;;  %v27465_v44 = vld [vmem:[%s40002_s2 + $0x2d18] ss:$80 sps:$4 sm:$0xff]  }
 0x34d   : > { %14505 = vmatpush1.bf16.msra.mxu0 %v27411_v26  ;;  %14228 = vmatprep.subr.bf16.mxu1 %v27416_v51  ;;  %v27473_v26 = vld [vmem:[%s40002_s2 + $0x2dbc] ss:$80 sps:$4 sm:$0xff]   ;;  %v27468_v51 = vld [vmem:[%s40002_s2 + $0x2db0] ss:$80 sps:$4 sm:$0xff]  }
 0x34e   : > { %14515 = vmatprep.subr.bf16.mxu0 %v27419_v56  ;;  %v27476_v56 = vld [vmem:[%s40002_s2 + $0x2e54] ss:$80 sps:$4 sm:$0xff]  }
 0x34f   : > { %14220 = vmatmul.mubr.bf16.vlgmr.msra.gmra.mrb[16].mxu1 %v31760_v34 }
 0x350   : > { %14507 = vmatmul.mubr.bf16.vlgmr.msra.gmra.mrb[20].mxu0 %v31760_v34  ;;  %14229 = vmatpush1.bf16.msra.mxu1 %v27414_v54  ;;  %v27471_v54 = vld [vmem:[%s40002_s2 + $0x2db8] ss:$80 sps:$4 sm:$0xff]  }
 0x351   : > { %14260 = vmatprep.mubr.bf16.mxu1 %v31762_v35  ;;  %14516 = vmatpush1.bf16.msra.mxu0 %v27417_v10  ;;  %v27479_v10 = vld [vmem:[%s40002_s2 + $0x2e5c] ss:$80 sps:$4 sm:$0xff]  }
 0x352   : > { %14547 = vmatprep.mubr.bf16.mxu0 %v31762_v35  ;;  %14230 = vmatprep.subr.bf16.mxu1 %v27422_v57  ;;  %v27474_v57 = vld [vmem:[%s40002_s2 + $0x2e50] ss:$80 sps:$4 sm:$0xff]  }
 0x353   : > { %14517 = vmatprep.subr.bf16.mxu0 %v27425_v58  ;;  %v27477_v58 = vld [vmem:[%s40002_s2 + $0x2e58] ss:$80 sps:$4 sm:$0xff]  }
 0x354   : > { %14231 = vmatpush1.bf16.msra.mxu1 %v27420_v49  ;;  %v27482_v49 = vld [vmem:[%s40002_s2 + $0x2ef4] ss:$80 sps:$4 sm:$0xff]  }
 0x355   : > { %14518 = vmatpush1.bf16.msra.mxu0 %v27423_v1  ;;  %14232 = vmatprep.subr.bf16.mxu1 %v27428_v39  ;;  %v27480_v1 = vld [vmem:[%s40002_s2 + $0x2ef0] ss:$80 sps:$4 sm:$0xff]   ;;  %v27485_v39 = vld [vmem:[%s40002_s2 + $0x2efc] ss:$80 sps:$4 sm:$0xff]  }
 0x356   : > { %14519 = vmatprep.subr.bf16.mxu0 %v27431_v0  ;;  %v27488_v0 = vld [vmem:[%s40002_s2 + $0x2f94] ss:$80 sps:$4 sm:$0xff]  }
 0x358   : > { %14233 = vmatpush1.bf16.msra.mxu1 %v27426_v61  ;;  %v27483_v61 = vld [vmem:[%s40002_s2 + $0x2ef8] ss:$80 sps:$4 sm:$0xff]  }
 0x359   : > { %14520 = vmatpush1.bf16.msra.mxu0 %v27429_v3  ;;  %14234 = vmatprep.subr.bf16.mxu1 %v27434_v18  ;;  %v27486_v3 = vld [vmem:[%s40002_s2 + $0x2f90] ss:$80 sps:$4 sm:$0xff]   ;;  %v27491_v18 = vld [vmem:[%s40002_s2 + $0x2f9c] ss:$80 sps:$4 sm:$0xff]  }
 0x35a   : > { %14521 = vmatprep.subr.bf16.mxu0 %v27437_v47  ;;  %v27494_v47 = vld [vmem:[%s40002_s2 + $0x3034] ss:$80 sps:$4 sm:$0xff]  }
 0x35c   : > { %14235 = vmatpush1.bf16.msra.mxu1 %v27432_v5  ;;  %v27489_v5 = vld [vmem:[%s40002_s2 + $0x2f98] ss:$80 sps:$4 sm:$0xff]  }
 0x35d   : > { %14522 = vmatpush1.bf16.msra.mxu0 %v27435_v8  ;;  %14236 = vmatprep.subr.bf16.mxu1 %v27440_v12  ;;  %v27492_v8 = vld [vmem:[%s40002_s2 + $0x3030] ss:$80 sps:$4 sm:$0xff]   ;;  %v27497_v12 = vld [vmem:[%s40002_s2 + $0x303c] ss:$80 sps:$4 sm:$0xff]  }
 0x35e   : > { %14523 = vmatprep.subr.bf16.mxu0 %v27443_v59  ;;  %v27500_v59 = vld [vmem:[%s40002_s2 + $0x30d4] ss:$80 sps:$4 sm:$0xff]  }
 0x360   : > { %14237 = vmatpush1.bf16.msra.mxu1 %v27438_v27  ;;  %v27495_v27 = vld [vmem:[%s40002_s2 + $0x3038] ss:$80 sps:$4 sm:$0xff]  }
 0x361   : > { %14524 = vmatpush1.bf16.msra.mxu0 %v27441_v15  ;;  %14238 = vmatprep.subr.bf16.mxu1 %v27446_v19  ;;  %v27498_v15 = vld [vmem:[%s40002_s2 + $0x30d0] ss:$80 sps:$4 sm:$0xff]   ;;  %v27503_v19 = vld [vmem:[%s40002_s2 + $0x30dc] ss:$80 sps:$4 sm:$0xff]  }
 0x362   : > { %14525 = vmatprep.subr.bf16.mxu0 %v27449_v21  ;;  %v27506_v21 = vld [vmem:[%s40002_s2 + $0x3174] ss:$80 sps:$4 sm:$0xff]  }
 0x364   : > { %14239 = vmatpush1.bf16.msra.mxu1 %v27444_v20  ;;  %v27501_v20 = vld [vmem:[%s40002_s2 + $0x30d8] ss:$80 sps:$4 sm:$0xff]  }
 0x365   : > { %14526 = vmatpush1.bf16.msra.mxu0 %v27447_v22  ;;  %14240 = vmatprep.subr.bf16.mxu1 %v27452_v25  ;;  %v27504_v22 = vld [vmem:[%s40002_s2 + $0x3170] ss:$80 sps:$4 sm:$0xff]   ;;  %v27509_v25 = vld [vmem:[%s40002_s2 + $0x317c] ss:$80 sps:$4 sm:$0xff]  }
 0x366   : > { %14527 = vmatprep.subr.bf16.mxu0 %v27455_v28  ;;  %v27512_v28 = vld [vmem:[%s40002_s2 + $0x3214] ss:$80 sps:$4 sm:$0xff]  }
 0x368   : > { %14241 = vmatpush1.bf16.msra.mxu1 %v27450_v23  ;;  %v27507_v23 = vld [vmem:[%s40002_s2 + $0x3178] ss:$80 sps:$4 sm:$0xff]  }
 0x369   : > { %14528 = vmatpush1.bf16.msra.mxu0 %v27453_v40  ;;  %14242 = vmatprep.subr.bf16.mxu1 %v27458_v11  ;;  %v27510_v40 = vld [vmem:[%s40002_s2 + $0x3210] ss:$80 sps:$4 sm:$0xff]   ;;  %v27515_v11 = vld [vmem:[%s40002_s2 + $0x321c] ss:$80 sps:$4 sm:$0xff]  }
 0x36a   : > { %14529 = vmatprep.subr.bf16.mxu0 %v27461_v30  ;;  %v27518_v30 = vld [vmem:[%s40002_s2 + $0x32b4] ss:$80 sps:$4 sm:$0xff]  }
 0x36c   : > { %14243 = vmatpush1.bf16.msra.mxu1 %v27456_v29  ;;  %v27513_v29 = vld [vmem:[%s40002_s2 + $0x3218] ss:$80 sps:$4 sm:$0xff]  }
 0x36d   : > { %14530 = vmatpush1.bf16.msra.mxu0 %v27459_v32  ;;  %14244 = vmatprep.subr.bf16.mxu1 %v27464_v33  ;;  %v27516_v32 = vld [vmem:[%s40002_s2 + $0x32b0] ss:$80 sps:$4 sm:$0xff]   ;;  %v27521_v33 = vld [vmem:[%s40002_s2 + $0x32bc] ss:$80 sps:$4 sm:$0xff]  }
 0x36e   : > { %14531 = vmatprep.subr.bf16.mxu0 %v27467_v17  ;;  %v27524_v17 = vld [vmem:[%s40002_s2 + $0x3354] ss:$80 sps:$4 sm:$0xff]  }
 0x370   : > { %14245 = vmatpush1.bf16.msra.mxu1 %v27462_v36  ;;  %v27519_v36 = vld [vmem:[%s40002_s2 + $0x32b8] ss:$80 sps:$4 sm:$0xff]  }
 0x371   : > { %14532 = vmatpush1.bf16.msra.mxu0 %v27465_v44  ;;  %14246 = vmatprep.subr.bf16.mxu1 %v27470_v46  ;;  %v27522_v44 = vld [vmem:[%s40002_s2 + $0x3350] ss:$80 sps:$4 sm:$0xff]   ;;  %v27527_v46 = vld [vmem:[%s40002_s2 + $0x335c] ss:$80 sps:$4 sm:$0xff]  }
 0x372   : > { %14533 = vmatprep.subr.bf16.mxu0 %v27473_v26  ;;  %v27525_v26 = vld [vmem:[%s40002_s2 + $0x3358] ss:$80 sps:$4 sm:$0xff]  }
 0x374   : > { %14247 = vmatpush1.bf16.msra.mxu1 %v27468_v51  ;;  %v27530_v51 = vld [vmem:[%s40002_s2 + $0x33f4] ss:$80 sps:$4 sm:$0xff]  }
 0x375   : > { %14534 = vmatpush1.bf16.msra.mxu0 %v27471_v54  ;;  %14248 = vmatprep.subr.bf16.mxu1 %v27476_v56  ;;  %v27528_v54 = vld [vmem:[%s40002_s2 + $0x33f0] ss:$80 sps:$4 sm:$0xff]   ;;  %v27533_v56 = vld [vmem:[%s40002_s2 + $0x33fc] ss:$80 sps:$4 sm:$0xff]  }
 0x376   : > { %14535 = vmatprep.subr.bf16.mxu0 %v27479_v10  ;;  %v27531_v10 = vld [vmem:[%s40002_s2 + $0x33f8] ss:$80 sps:$4 sm:$0xff]  }
 0x378   : > { %14249 = vmatpush1.bf16.msra.mxu1 %v27474_v57  ;;  %v27536_v57 = vld [vmem:[%s40002_s2 + $0x3494] ss:$80 sps:$4 sm:$0xff]  }
 0x379   : > { %14536 = vmatpush1.bf16.msra.mxu0 %v27477_v58  ;;  %14250 = vmatprep.subr.bf16.mxu1 %v27482_v49  ;;  %v27534_v58 = vld [vmem:[%s40002_s2 + $0x3490] ss:$80 sps:$4 sm:$0xff]   ;;  %v27539_v49 = vld [vmem:[%s40002_s2 + $0x349c] ss:$80 sps:$4 sm:$0xff]  }
 0x37a   : > { %14537 = vmatprep.subr.bf16.mxu0 %v27485_v39  ;;  %v27542_v39 = vld [vmem:[%s40002_s2 + $0x3534] ss:$80 sps:$4 sm:$0xff]  }
 0x37c   : > { %14251 = vmatpush1.bf16.msra.mxu1 %v27480_v1  ;;  %v27537_v1 = vld [vmem:[%s40002_s2 + $0x3498] ss:$80 sps:$4 sm:$0xff]  }
 0x37d   : > { %14538 = vmatpush1.bf16.msra.mxu0 %v27483_v61  ;;  %14252 = vmatprep.subr.bf16.mxu1 %v27488_v0  ;;  %v27540_v61 = vld [vmem:[%s40002_s2 + $0x3530] ss:$80 sps:$4 sm:$0xff]   ;;  %v27545_v0 = vld [vmem:[%s40002_s2 + $0x353c] ss:$80 sps:$4 sm:$0xff]  }
 0x37e   : > { %14539 = vmatprep.subr.bf16.mxu0 %v27491_v18  ;;  %v27548_v18 = vld [vmem:[%s40002_s2 + $0x35d4] ss:$80 sps:$4 sm:$0xff]  }
 0x380   : > { %14253 = vmatpush1.bf16.msra.mxu1 %v27486_v3  ;;  %v27543_v3 = vld [vmem:[%s40002_s2 + $0x3538] ss:$80 sps:$4 sm:$0xff]  }
 0x381   : > { %14540 = vmatpush1.bf16.msra.mxu0 %v27489_v5  ;;  %14254 = vmatprep.subr.bf16.mxu1 %v27494_v47  ;;  %v27546_v5 = vld [vmem:[%s40002_s2 + $0x35d0] ss:$80 sps:$4 sm:$0xff]   ;;  %v27551_v47 = vld [vmem:[%s40002_s2 + $0x35dc] ss:$80 sps:$4 sm:$0xff]  }
 0x382   : > { %14541 = vmatprep.subr.bf16.mxu0 %v27497_v12  ;;  %v27554_v12 = vld [vmem:[%s40002_s2 + $0x3674] ss:$80 sps:$4 sm:$0xff]  }
 0x384   : > { %14255 = vmatpush1.bf16.msra.mxu1 %v27492_v8  ;;  %v27549_v8 = vld [vmem:[%s40002_s2 + $0x35d8] ss:$80 sps:$4 sm:$0xff]  }
 0x385   : > { %14542 = vmatpush1.bf16.msra.mxu0 %v27495_v27  ;;  %14256 = vmatprep.subr.bf16.mxu1 %v27500_v59  ;;  %v27552_v27 = vld [vmem:[%s40002_s2 + $0x3670] ss:$80 sps:$4 sm:$0xff]   ;;  %v27557_v59 = vld [vmem:[%s40002_s2 + $0x367c] ss:$80 sps:$4 sm:$0xff]  }
 0x386   : > { %14543 = vmatprep.subr.bf16.mxu0 %v27503_v19  ;;  %v27560_v19 = vld [vmem:[%s40002_s2 + $0x3714] ss:$80 sps:$4 sm:$0xff]  }
 0x388   : > { %14257 = vmatpush1.bf16.msra.mxu1 %v27498_v15  ;;  %v27555_v15 = vld [vmem:[%s40002_s2 + $0x3678] ss:$80 sps:$4 sm:$0xff]  }
 0x389   : > { %14544 = vmatpush1.bf16.msra.mxu0 %v27501_v20  ;;  %14258 = vmatprep.subr.bf16.mxu1 %v27506_v21  ;;  %v27558_v20 = vld [vmem:[%s40002_s2 + $0x3710] ss:$80 sps:$4 sm:$0xff]   ;;  %v27563_v21 = vld [vmem:[%s40002_s2 + $0x371c] ss:$80 sps:$4 sm:$0xff]  }
 0x38a   : > { %14545 = vmatprep.subr.bf16.mxu0 %v27509_v25  ;;  %v27566_v25 = vld [vmem:[%s40002_s2 + $0x37b4] ss:$80 sps:$4 sm:$0xff]  }
 0x38c   : > { %14259 = vmatpush1.bf16.msra.mxu1 %v27504_v22  ;;  %v27561_v22 = vld [vmem:[%s40002_s2 + $0x3718] ss:$80 sps:$4 sm:$0xff]  }
 0x38d   : > { %14546 = vmatpush1.bf16.msra.mxu0 %v27507_v23  ;;  %14269 = vmatprep.subr.bf16.mxu1 %v27512_v28  ;;  %v27569_v23 = vld [vmem:[%s40002_s2 + $0x37bc] ss:$80 sps:$4 sm:$0xff]   ;;  %v27564_v28 = vld [vmem:[%s40002_s2 + $0x37b0] ss:$80 sps:$4 sm:$0xff]  }
 0x38e   : > { %14556 = vmatprep.subr.bf16.mxu0 %v27515_v11  ;;  %v27572_v11 = vld [vmem:[%s40002_s2 + $0x3854] ss:$80 sps:$4 sm:$0xff]  }
 0x38f   : > { %14261 = vmatmul.mubr.bf16.vlgmr.msra.gmra.mrb[16].mxu1 %v31955_v6 }
 0x390   : > { %14548 = vmatmul.mubr.bf16.vlgmr.msra.gmra.mrb[20].mxu0 %v31955_v6  ;;  %14270 = vmatpush1.bf16.msra.mxu1 %v27510_v40  ;;  %v27567_v40 = vld [vmem:[%s40002_s2 + $0x37b8] ss:$80 sps:$4 sm:$0xff]  }
 0x391   : > { %14301 = vmatprep.mubr.bf16.mxu1 %v31969_v13  ;;  %14557 = vmatpush1.bf16.msra.mxu0 %v27513_v29  ;;  %v27575_v29 = vld [vmem:[%s40002_s2 + $0x385c] ss:$80 sps:$4 sm:$0xff]  }
 0x392   : > { %14588 = vmatprep.mubr.bf16.mxu0 %v31969_v13  ;;  %14271 = vmatprep.subr.bf16.mxu1 %v27518_v30  ;;  %v27570_v30 = vld [vmem:[%s40002_s2 + $0x3850] ss:$80 sps:$4 sm:$0xff]  }
 0x393   : > { %14558 = vmatprep.subr.bf16.mxu0 %v27521_v33  ;;  %v27578_v33 = vld [vmem:[%s40002_s2 + $0x38f4] ss:$80 sps:$4 sm:$0xff]  }
 0x394   : > { %14272 = vmatpush1.bf16.msra.mxu1 %v27516_v32  ;;  %v27573_v32 = vld [vmem:[%s40002_s2 + $0x3858] ss:$80 sps:$4 sm:$0xff]  }
 0x395   : > { %14559 = vmatpush1.bf16.msra.mxu0 %v27519_v36  ;;  %14273 = vmatprep.subr.bf16.mxu1 %v27524_v17  ;;  %v27576_v36 = vld [vmem:[%s40002_s2 + $0x38f0] ss:$80 sps:$4 sm:$0xff]   ;;  %v27581_v17 = vld [vmem:[%s40002_s2 + $0x38fc] ss:$80 sps:$4 sm:$0xff]  }
 0x396   : > { %14560 = vmatprep.subr.bf16.mxu0 %v27527_v46  ;;  %v27584_v46 = vld [vmem:[%s40002_s2 + $0x3994] ss:$80 sps:$4 sm:$0xff]  }
 0x398   : > { %14274 = vmatpush1.bf16.msra.mxu1 %v27522_v44  ;;  %v27579_v44 = vld [vmem:[%s40002_s2 + $0x38f8] ss:$80 sps:$4 sm:$0xff]  }
 0x399   : > { %14561 = vmatpush1.bf16.msra.mxu0 %v27525_v26  ;;  %14275 = vmatprep.subr.bf16.mxu1 %v27530_v51  ;;  %v27582_v26 = vld [vmem:[%s40002_s2 + $0x3990] ss:$80 sps:$4 sm:$0xff]   ;;  %v27587_v51 = vld [vmem:[%s40002_s2 + $0x399c] ss:$80 sps:$4 sm:$0xff]  }
 0x39a   : > { %14562 = vmatprep.subr.bf16.mxu0 %v27533_v56  ;;  %v27590_v56 = vld [vmem:[%s40002_s2 + $0x3a34] ss:$80 sps:$4 sm:$0xff]  }
 0x39c   : > { %14276 = vmatpush1.bf16.msra.mxu1 %v27528_v54  ;;  %v27585_v54 = vld [vmem:[%s40002_s2 + $0x3998] ss:$80 sps:$4 sm:$0xff]  }
 0x39d   : > { %14563 = vmatpush1.bf16.msra.mxu0 %v27531_v10  ;;  %14277 = vmatprep.subr.bf16.mxu1 %v27536_v57  ;;  %v27588_v10 = vld [vmem:[%s40002_s2 + $0x3a30] ss:$80 sps:$4 sm:$0xff]   ;;  %v27593_v57 = vld [vmem:[%s40002_s2 + $0x3a3c] ss:$80 sps:$4 sm:$0xff]  }
 0x39e   : > { %14564 = vmatprep.subr.bf16.mxu0 %v27539_v49  ;;  %v27596_v49 = vld [vmem:[%s40002_s2 + $0x3ad4] ss:$80 sps:$4 sm:$0xff]  }
 0x3a0   : > { %14278 = vmatpush1.bf16.msra.mxu1 %v27534_v58  ;;  %v27591_v58 = vld [vmem:[%s40002_s2 + $0x3a38] ss:$80 sps:$4 sm:$0xff]  }
 0x3a1   : > { %14565 = vmatpush1.bf16.msra.mxu0 %v27537_v1  ;;  %14279 = vmatprep.subr.bf16.mxu1 %v27542_v39  ;;  %v27594_v1 = vld [vmem:[%s40002_s2 + $0x3ad0] ss:$80 sps:$4 sm:$0xff]   ;;  %v27599_v39 = vld [vmem:[%s40002_s2 + $0x3adc] ss:$80 sps:$4 sm:$0xff]  }
 0x3a2   : > { %14566 = vmatprep.subr.bf16.mxu0 %v27545_v0  ;;  %v27602_v0 = vld [vmem:[%s40002_s2 + $0x3b74] ss:$80 sps:$4 sm:$0xff]  }
 0x3a4   : > { %14280 = vmatpush1.bf16.msra.mxu1 %v27540_v61  ;;  %v27597_v61 = vld [vmem:[%s40002_s2 + $0x3ad8] ss:$80 sps:$4 sm:$0xff]  }
 0x3a5   : > { %14567 = vmatpush1.bf16.msra.mxu0 %v27543_v3  ;;  %14281 = vmatprep.subr.bf16.mxu1 %v27548_v18  ;;  %v27600_v3 = vld [vmem:[%s40002_s2 + $0x3b70] ss:$80 sps:$4 sm:$0xff]   ;;  %v27605_v18 = vld [vmem:[%s40002_s2 + $0x3b7c] ss:$80 sps:$4 sm:$0xff]  }
 0x3a6   : > { %14568 = vmatprep.subr.bf16.mxu0 %v27551_v47  ;;  %v27608_v47 = vld [vmem:[%s40002_s2 + $0x3c14] ss:$80 sps:$4 sm:$0xff]  }
 0x3a8   : > { %14282 = vmatpush1.bf16.msra.mxu1 %v27546_v5  ;;  %v27603_v5 = vld [vmem:[%s40002_s2 + $0x3b78] ss:$80 sps:$4 sm:$0xff]  }
 0x3a9   : > { %14569 = vmatpush1.bf16.msra.mxu0 %v27549_v8  ;;  %14283 = vmatprep.subr.bf16.mxu1 %v27554_v12  ;;  %v27606_v8 = vld [vmem:[%s40002_s2 + $0x3c10] ss:$80 sps:$4 sm:$0xff]   ;;  %v27611_v12 = vld [vmem:[%s40002_s2 + $0x3c1c] ss:$80 sps:$4 sm:$0xff]  }
 0x3aa   : > { %14570 = vmatprep.subr.bf16.mxu0 %v27557_v59  ;;  %v27614_v59 = vld [vmem:[%s40002_s2 + $0x3cb4] ss:$80 sps:$4 sm:$0xff]  }
 0x3ac   : > { %14284 = vmatpush1.bf16.msra.mxu1 %v27552_v27  ;;  %v27609_v27 = vld [vmem:[%s40002_s2 + $0x3c18] ss:$80 sps:$4 sm:$0xff]  }
 0x3ad   : > { %14571 = vmatpush1.bf16.msra.mxu0 %v27555_v15  ;;  %14285 = vmatprep.subr.bf16.mxu1 %v27560_v19  ;;  %v27612_v15 = vld [vmem:[%s40002_s2 + $0x3cb0] ss:$80 sps:$4 sm:$0xff]   ;;  %v27617_v19 = vld [vmem:[%s40002_s2 + $0x3cbc] ss:$80 sps:$4 sm:$0xff]  }
 0x3ae   : > { %14572 = vmatprep.subr.bf16.mxu0 %v27563_v21  ;;  %v27620_v21 = vld [vmem:[%s40002_s2 + $0x3d54] ss:$80 sps:$4 sm:$0xff]  }
 0x3b0   : > { %14286 = vmatpush1.bf16.msra.mxu1 %v27558_v20  ;;  %v27615_v20 = vld [vmem:[%s40002_s2 + $0x3cb8] ss:$80 sps:$4 sm:$0xff]  }
 0x3b1   : > { %14573 = vmatpush1.bf16.msra.mxu0 %v27561_v22  ;;  %14287 = vmatprep.subr.bf16.mxu1 %v27566_v25  ;;  %v27618_v22 = vld [vmem:[%s40002_s2 + $0x3d50] ss:$80 sps:$4 sm:$0xff]   ;;  %v27623_v25 = vld [vmem:[%s40002_s2 + $0x3d5c] ss:$80 sps:$4 sm:$0xff]  }
 0x3b2   : > { %14574 = vmatprep.subr.bf16.mxu0 %v27569_v23  ;;  %v27621_v23 = vld [vmem:[%s40002_s2 + $0x3d58] ss:$80 sps:$4 sm:$0xff]  }
 0x3b4   : > { %14288 = vmatpush1.bf16.msra.mxu1 %v27564_v28  ;;  %v27626_v28 = vld [vmem:[%s40002_s2 + $0x3df4] ss:$80 sps:$4 sm:$0xff]  }
 0x3b5   : > { %14575 = vmatpush1.bf16.msra.mxu0 %v27567_v40  ;;  %14289 = vmatprep.subr.bf16.mxu1 %v27572_v11  ;;  %v27624_v40 = vld [vmem:[%s40002_s2 + $0x3df0] ss:$80 sps:$4 sm:$0xff]   ;;  %v27629_v11 = vld [vmem:[%s40002_s2 + $0x3dfc] ss:$80 sps:$4 sm:$0xff]  }
 0x3b6   : > { %14576 = vmatprep.subr.bf16.mxu0 %v27575_v29  ;;  %v27627_v29 = vld [vmem:[%s40002_s2 + $0x3df8] ss:$80 sps:$4 sm:$0xff]  }
 0x3b8   : > { %14290 = vmatpush1.bf16.msra.mxu1 %v27570_v30  ;;  %v27632_v30 = vld [vmem:[%s40002_s2 + $0x3e94] ss:$80 sps:$4 sm:$0xff]  }
 0x3b9   : > { %14577 = vmatpush1.bf16.msra.mxu0 %v27573_v32  ;;  %14291 = vmatprep.subr.bf16.mxu1 %v27578_v33  ;;  %v27630_v32 = vld [vmem:[%s40002_s2 + $0x3e90] ss:$80 sps:$4 sm:$0xff]   ;;  %v27635_v33 = vld [vmem:[%s40002_s2 + $0x3e9c] ss:$80 sps:$4 sm:$0xff]  }
 0x3ba   : > { %14578 = vmatprep.subr.bf16.mxu0 %v27581_v17  ;;  %v27638_v17 = vld [vmem:[%s40002_s2 + $0x3f34] ss:$80 sps:$4 sm:$0xff]  }
 0x3bc   : > { %14292 = vmatpush1.bf16.msra.mxu1 %v27576_v36  ;;  %v27633_v36 = vld [vmem:[%s40002_s2 + $0x3e98] ss:$80 sps:$4 sm:$0xff]  }
 0x3bd   : > { %14579 = vmatpush1.bf16.msra.mxu0 %v27579_v44  ;;  %14293 = vmatprep.subr.bf16.mxu1 %v27584_v46  ;;  %v27636_v44 = vld [vmem:[%s40002_s2 + $0x3f30] ss:$80 sps:$4 sm:$0xff]   ;;  %v27641_v46 = vld [vmem:[%s40002_s2 + $0x3f3c] ss:$80 sps:$4 sm:$0xff]  }
 0x3be   : > { %14580 = vmatprep.subr.bf16.mxu0 %v27587_v51  ;;  %v27644_v51 = vld [vmem:[%s40002_s2 + $0x3fd4] ss:$80 sps:$4 sm:$0xff]  }
 0x3c0   : > { %14294 = vmatpush1.bf16.msra.mxu1 %v27582_v26  ;;  %v27639_v26 = vld [vmem:[%s40002_s2 + $0x3f38] ss:$80 sps:$4 sm:$0xff]  }
 0x3c1   : > { %14581 = vmatpush1.bf16.msra.mxu0 %v27585_v54  ;;  %14295 = vmatprep.subr.bf16.mxu1 %v27590_v56  ;;  %v27642_v54 = vld [vmem:[%s40002_s2 + $0x3fd0] ss:$80 sps:$4 sm:$0xff]   ;;  %v27647_v56 = vld [vmem:[%s40002_s2 + $0x3fdc] ss:$80 sps:$4 sm:$0xff]  }
 0x3c2   : > { %14582 = vmatprep.subr.bf16.mxu0 %v27593_v57  ;;  %v27650_v57 = vld [vmem:[%s40002_s2 + $0x4074] ss:$80 sps:$4 sm:$0xff]  }
 0x3c4   : > { %14296 = vmatpush1.bf16.msra.mxu1 %v27588_v10  ;;  %v27645_v10 = vld [vmem:[%s40002_s2 + $0x3fd8] ss:$80 sps:$4 sm:$0xff]  }
 0x3c5   : > { %14583 = vmatpush1.bf16.msra.mxu0 %v27591_v58  ;;  %14297 = vmatprep.subr.bf16.mxu1 %v27596_v49  ;;  %v27648_v58 = vld [vmem:[%s40002_s2 + $0x4070] ss:$80 sps:$4 sm:$0xff]   ;;  %v27653_v49 = vld [vmem:[%s40002_s2 + $0x407c] ss:$80 sps:$4 sm:$0xff]  }
 0x3c6   : > { %14584 = vmatprep.subr.bf16.mxu0 %v27599_v39  ;;  %v27656_v39 = vld [vmem:[%s40002_s2 + $0x24] ss:$80 sps:$4 sm:$0xff]  }
 0x3c8   : > { %14298 = vmatpush1.bf16.msra.mxu1 %v27594_v1  ;;  %v27651_v1 = vld [vmem:[%s40002_s2 + $0x4078] ss:$80 sps:$4 sm:$0xff]  }
 0x3c9   : > { %14585 = vmatpush1.bf16.msra.mxu0 %v27597_v61  ;;  %14299 = vmatprep.subr.bf16.mxu1 %v27602_v0  ;;  %v27659_v61 = vld [vmem:[%s40002_s2 + $0x2c] ss:$80 sps:$4 sm:$0xff]   ;;  %v27654_v0 = vld [vmem:[%s40002_s2 + $0x20] ss:$80 sps:$4 sm:$0xff]  }
 0x3ca   : > { %14586 = vmatprep.subr.bf16.mxu0 %v27605_v18  ;;  %v27662_v18 = vld [vmem:[%s40002_s2 + $0xc4] ss:$80 sps:$4 sm:$0xff]  }
 0x3cc   : > { %14300 = vmatpush1.bf16.msra.mxu1 %v27600_v3  ;;  %v27657_v3 = vld [vmem:[%s40002_s2 + $0x28] ss:$80 sps:$4 sm:$0xff]  }
 0x3cd   : > { %14587 = vmatpush1.bf16.msra.mxu0 %v27603_v5  ;;  %14310 = vmatprep.subr.bf16.mxu1 %v27608_v47  ;;  %v27660_v5 = vld [vmem:[%s40002_s2 + $0xc0] ss:$80 sps:$4 sm:$0xff]   ;;  %v27663_v47 = vld [vmem:[%s40002_s2 + $0xc8] ss:$80 sps:$4 sm:$0xff]  }
 0x3ce   : > { %14597 = vmatprep.subr.bf16.mxu0 %v27611_v12  ;;  %v27668_v12 = vld [vmem:[%s40002_s2 + $0x164] ss:$80 sps:$4 sm:$0xff]  }
 0x3cf   : > { %14302 = vmatmul.mubr.bf16.vlgmr.msra.gmra.mrb[16].mxu1 %v32156_v55 }
 0x3d0   : > { %14589 = vmatmul.mubr.bf16.vlgmr.msra.gmra.mrb[20].mxu0 %v32156_v55  ;;  %14311 = vmatpush1.bf16.msra.mxu1 %v27606_v8  ;;  %v27665_v8 = vld [vmem:[%s40002_s2 + $0xcc] ss:$80 sps:$4 sm:$0xff]  }
 0x3d1   : > { %14598 = vmatpush1.bf16.msra.mxu0 %v27609_v27  ;;  %14312 = vmatprep.subr.bf16.mxu1 %v27614_v59  ;;  %v27671_v27 = vld [vmem:[%s40002_s2 + $0x16c] ss:$80 sps:$4 sm:$0xff]   ;;  %v27666_v59 = vld [vmem:[%s40002_s2 + $0x160] ss:$80 sps:$4 sm:$0xff]  }
 0x3d2   : > { %14599 = vmatprep.subr.bf16.mxu0 %v27617_v19  ;;  %14342 = vmatprep.mubr.bf16.mxu1 %v30659_v2  ;;  %v27674_v19 = vld [vmem:[%s40002_s2 + $0x204] ss:$80 sps:$4 sm:$0xff]  }
 0x3d3   : > { %14629 = vmatprep.mubr.bf16.mxu0 %v30659_v2 }
 0x3d4   : > { %14313 = vmatpush1.bf16.msra.mxu1 %v27612_v15  ;;  %v27669_v15 = vld [vmem:[%s40002_s2 + $0x168] ss:$80 sps:$4 sm:$0xff]  }
 0x3d5   : > { %14600 = vmatpush1.bf16.msra.mxu0 %v27615_v20  ;;  %14314 = vmatprep.subr.bf16.mxu1 %v27620_v21  ;;  %v27672_v20 = vld [vmem:[%s40002_s2 + $0x200] ss:$80 sps:$4 sm:$0xff]   ;;  %v27677_v21 = vld [vmem:[%s40002_s2 + $0x20c] ss:$80 sps:$4 sm:$0xff]  }
 0x3d6   : > { %14601 = vmatprep.subr.bf16.mxu0 %v27623_v25  ;;  %v27680_v25 = vld [vmem:[%s40002_s2 + $0x2a4] ss:$80 sps:$4 sm:$0xff]  }
 0x3d8   : > { %14315 = vmatpush1.bf16.msra.mxu1 %v27618_v22  ;;  %v27675_v22 = vld [vmem:[%s40002_s2 + $0x208] ss:$80 sps:$4 sm:$0xff]  }
 0x3d9   : > { %14602 = vmatpush1.bf16.msra.mxu0 %v27621_v23  ;;  %14316 = vmatprep.subr.bf16.mxu1 %v27626_v28  ;;  %v27678_v23 = vld [vmem:[%s40002_s2 + $0x2a0] ss:$80 sps:$4 sm:$0xff]   ;;  %v27683_v28 = vld [vmem:[%s40002_s2 + $0x2ac] ss:$80 sps:$4 sm:$0xff]  }
 0x3da   : > { %14603 = vmatprep.subr.bf16.mxu0 %v27629_v11  ;;  %v27686_v11 = vld [vmem:[%s40002_s2 + $0x344] ss:$80 sps:$4 sm:$0xff]  }
 0x3dc   : > { %14317 = vmatpush1.bf16.msra.mxu1 %v27624_v40  ;;  %v27681_v40 = vld [vmem:[%s40002_s2 + $0x2a8] ss:$80 sps:$4 sm:$0xff]  }
 0x3dd   : > { %14604 = vmatpush1.bf16.msra.mxu0 %v27627_v29  ;;  %14318 = vmatprep.subr.bf16.mxu1 %v27632_v30  ;;  %v27684_v29 = vld [vmem:[%s40002_s2 + $0x340] ss:$80 sps:$4 sm:$0xff]   ;;  %v27689_v30 = vld [vmem:[%s40002_s2 + $0x34c] ss:$80 sps:$4 sm:$0xff]  }
 0x3de   : > { %14605 = vmatprep.subr.bf16.mxu0 %v27635_v33  ;;  %v27692_v33 = vld [vmem:[%s40002_s2 + $0x3e4] ss:$80 sps:$4 sm:$0xff]  }
 0x3e0   : > { %14319 = vmatpush1.bf16.msra.mxu1 %v27630_v32  ;;  %v27687_v32 = vld [vmem:[%s40002_s2 + $0x348] ss:$80 sps:$4 sm:$0xff]  }
 0x3e1   : > { %14606 = vmatpush1.bf16.msra.mxu0 %v27633_v36  ;;  %14320 = vmatprep.subr.bf16.mxu1 %v27638_v17  ;;  %v27690_v36 = vld [vmem:[%s40002_s2 + $0x3e0] ss:$80 sps:$4 sm:$0xff]   ;;  %v27695_v17 = vld [vmem:[%s40002_s2 + $0x3ec] ss:$80 sps:$4 sm:$0xff]  }
 0x3e2   : > { %14607 = vmatprep.subr.bf16.mxu0 %v27641_v46  ;;  %v27698_v46 = vld [vmem:[%s40002_s2 + $0x484] ss:$80 sps:$4 sm:$0xff]  }
 0x3e4   : > { %14321 = vmatpush1.bf16.msra.mxu1 %v27636_v44  ;;  %v27693_v44 = vld [vmem:[%s40002_s2 + $0x3e8] ss:$80 sps:$4 sm:$0xff]  }
 0x3e5   : > { %14608 = vmatpush1.bf16.msra.mxu0 %v27639_v26  ;;  %14322 = vmatprep.subr.bf16.mxu1 %v27644_v51  ;;  %v27696_v26 = vld [vmem:[%s40002_s2 + $0x480] ss:$80 sps:$4 sm:$0xff]   ;;  %v27701_v51 = vld [vmem:[%s40002_s2 + $0x48c] ss:$80 sps:$4 sm:$0xff]  }
 0x3e6   : > { %14609 = vmatprep.subr.bf16.mxu0 %v27647_v56  ;;  %v27704_v56 = vld [vmem:[%s40002_s2 + $0x524] ss:$80 sps:$4 sm:$0xff]  }
 0x3e8   : > { %14323 = vmatpush1.bf16.msra.mxu1 %v27642_v54  ;;  %v27699_v54 = vld [vmem:[%s40002_s2 + $0x488] ss:$80 sps:$4 sm:$0xff]  }
 0x3e9   : > { %14610 = vmatpush1.bf16.msra.mxu0 %v27645_v10  ;;  %14324 = vmatprep.subr.bf16.mxu1 %v27650_v57  ;;  %v27702_v10 = vld [vmem:[%s40002_s2 + $0x520] ss:$80 sps:$4 sm:$0xff]   ;;  %v27707_v57 = vld [vmem:[%s40002_s2 + $0x52c] ss:$80 sps:$4 sm:$0xff]  }
 0x3ea   : > { %14611 = vmatprep.subr.bf16.mxu0 %v27653_v49  ;;  %v27710_v49 = vld [vmem:[%s40002_s2 + $0x5c4] ss:$80 sps:$4 sm:$0xff]  }
 0x3ec   : > { %14325 = vmatpush1.bf16.msra.mxu1 %v27648_v58  ;;  %v27705_v58 = vld [vmem:[%s40002_s2 + $0x528] ss:$80 sps:$4 sm:$0xff]  }
 0x3ed   : > { %14612 = vmatpush1.bf16.msra.mxu0 %v27651_v1  ;;  %14638 = vmatprep.subr.bf16.mxu1 %v27656_v39  ;;  %v27708_v1 = vld [vmem:[%s40002_s2 + $0x5c0] ss:$80 sps:$4 sm:$0xff]   ;;  %v27713_v39 = vld [vmem:[%s40002_s2 + $0x5cc] ss:$80 sps:$4 sm:$0xff]  }
 0x3ee   : > { %14925 = vmatprep.subr.bf16.mxu0 %v27659_v61  ;;  %v27711_v61 = vld [vmem:[%s40002_s2 + $0x5c8] ss:$80 sps:$4 sm:$0xff]  }
 0x3ef   : > { %14343 = vmatmul.mubr.bf16.vlgmr.msra.gmra.mrb[16].mxu1 %v32265_v31 }
 0x3f0   : > { %14630 = vmatmul.mubr.bf16.vlgmr.msra.gmra.mrb[20].mxu0 %v32265_v31  ;;  %14639 = vmatpush1.bf16.msra.mxu1 %v27654_v0  ;;  %v27716_v0 = vld [vmem:[%s40002_s2 + $0x664] ss:$80 sps:$4 sm:$0xff]  }
 0x3f1   : > { %14670 = vmatprep.mubr.bf16.mxu1 %v31083_v4  ;;  %14926 = vmatpush1.bf16.msra.mxu0 %v27657_v3  ;;  %v27714_v3 = vld [vmem:[%s40002_s2 + $0x660] ss:$80 sps:$4 sm:$0xff]  }
 0x3f2   : > { %14957 = vmatprep.mubr.bf16.mxu0 %v31083_v4  ;;  %14640 = vmatprep.subr.bf16.mxu1 %v27662_v18  ;;  %v27719_v18 = vld [vmem:[%s40002_s2 + $0x66c] ss:$80 sps:$4 sm:$0xff]  }
 0x3f3   : > { %14927 = vmatprep.subr.bf16.mxu0 %v27665_v8  ;;  %v27720_v8 = vld [vmem:[%s40002_s2 + $0x700] ss:$80 sps:$4 sm:$0xff]  }
 0x3f4   : > { %14641 = vmatpush1.bf16.msra.mxu1 %v27660_v5  ;;  %v27717_v5 = vld [vmem:[%s40002_s2 + $0x668] ss:$80 sps:$4 sm:$0xff]  }
 0x3f5   : > { %14928 = vmatpush1.bf16.msra.mxu0 %v27663_v47  ;;  %14642 = vmatprep.subr.bf16.mxu1 %v27668_v12  ;;  %v27722_v47 = vld [vmem:[%s40002_s2 + $0x704] ss:$80 sps:$4 sm:$0xff]   ;;  %v27725_v12 = vld [vmem:[%s40002_s2 + $0x70c] ss:$80 sps:$4 sm:$0xff]  }
 0x3f6   : > { %14929 = vmatprep.subr.bf16.mxu0 %v27671_v27  ;;  %v27723_v27 = vld [vmem:[%s40002_s2 + $0x708] ss:$80 sps:$4 sm:$0xff]  }
 0x3f8   : > { %14643 = vmatpush1.bf16.msra.mxu1 %v27666_v59  ;;  %v27728_v59 = vld [vmem:[%s40002_s2 + $0x7a4] ss:$80 sps:$4 sm:$0xff]  }
 0x3f9   : > { %14930 = vmatpush1.bf16.msra.mxu0 %v27669_v15  ;;  %14644 = vmatprep.subr.bf16.mxu1 %v27674_v19  ;;  %v27726_v15 = vld [vmem:[%s40002_s2 + $0x7a0] ss:$80 sps:$4 sm:$0xff]   ;;  %v27731_v19 = vld [vmem:[%s40002_s2 + $0x7ac] ss:$80 sps:$4 sm:$0xff]  }
 0x3fa   : > { %14931 = vmatprep.subr.bf16.mxu0 %v27677_v21  ;;  %v27734_v21 = vld [vmem:[%s40002_s2 + $0x844] ss:$80 sps:$4 sm:$0xff]  }
 0x3fc   : > { %14645 = vmatpush1.bf16.msra.mxu1 %v27672_v20  ;;  %v27729_v20 = vld [vmem:[%s40002_s2 + $0x7a8] ss:$80 sps:$4 sm:$0xff]  }
 0x3fd   : > { %14932 = vmatpush1.bf16.msra.mxu0 %v27675_v22  ;;  %14646 = vmatprep.subr.bf16.mxu1 %v27680_v25  ;;  %v27732_v22 = vld [vmem:[%s40002_s2 + $0x840] ss:$80 sps:$4 sm:$0xff]   ;;  %v27737_v25 = vld [vmem:[%s40002_s2 + $0x84c] ss:$80 sps:$4 sm:$0xff]  }
 0x3fe   : > { %14933 = vmatprep.subr.bf16.mxu0 %v27683_v28  ;;  %v27740_v28 = vld [vmem:[%s40002_s2 + $0x8e4] ss:$80 sps:$4 sm:$0xff]  }
 0x400   : > { %14647 = vmatpush1.bf16.msra.mxu1 %v27678_v23  ;;  %v27735_v23 = vld [vmem:[%s40002_s2 + $0x848] ss:$80 sps:$4 sm:$0xff]  }
 0x401   : > { %14934 = vmatpush1.bf16.msra.mxu0 %v27681_v40  ;;  %14648 = vmatprep.subr.bf16.mxu1 %v27686_v11  ;;  %v27738_v40 = vld [vmem:[%s40002_s2 + $0x8e0] ss:$80 sps:$4 sm:$0xff]   ;;  %v27743_v11 = vld [vmem:[%s40002_s2 + $0x8ec] ss:$80 sps:$4 sm:$0xff]  }
 0x402   : > { %14935 = vmatprep.subr.bf16.mxu0 %v27689_v30  ;;  %v27746_v30 = vld [vmem:[%s40002_s2 + $0x984] ss:$80 sps:$4 sm:$0xff]  }
 0x404   : > { %14649 = vmatpush1.bf16.msra.mxu1 %v27684_v29  ;;  %v27741_v29 = vld [vmem:[%s40002_s2 + $0x8e8] ss:$80 sps:$4 sm:$0xff]  }
 0x405   : > { %14936 = vmatpush1.bf16.msra.mxu0 %v27687_v32  ;;  %14650 = vmatprep.subr.bf16.mxu1 %v27692_v33  ;;  %v27744_v32 = vld [vmem:[%s40002_s2 + $0x980] ss:$80 sps:$4 sm:$0xff]   ;;  %v27749_v33 = vld [vmem:[%s40002_s2 + $0x98c] ss:$80 sps:$4 sm:$0xff]  }
 0x406   : > { %14937 = vmatprep.subr.bf16.mxu0 %v27695_v17  ;;  %v27752_v17 = vld [vmem:[%s40002_s2 + $0xa24] ss:$80 sps:$4 sm:$0xff]  }
 0x408   : > { %14651 = vmatpush1.bf16.msra.mxu1 %v27690_v36  ;;  %v27747_v36 = vld [vmem:[%s40002_s2 + $0x988] ss:$80 sps:$4 sm:$0xff]  }
 0x409   : > { %14938 = vmatpush1.bf16.msra.mxu0 %v27693_v44  ;;  %14652 = vmatprep.subr.bf16.mxu1 %v27698_v46  ;;  %v27750_v44 = vld [vmem:[%s40002_s2 + $0xa20] ss:$80 sps:$4 sm:$0xff]   ;;  %v27755_v46 = vld [vmem:[%s40002_s2 + $0xa2c] ss:$80 sps:$4 sm:$0xff]  }
 0x40a   : > { %14939 = vmatprep.subr.bf16.mxu0 %v27701_v51  ;;  %v27758_v51 = vld [vmem:[%s40002_s2 + $0xac4] ss:$80 sps:$4 sm:$0xff]  }
 0x40c   : > { %14653 = vmatpush1.bf16.msra.mxu1 %v27696_v26  ;;  %v27753_v26 = vld [vmem:[%s40002_s2 + $0xa28] ss:$80 sps:$4 sm:$0xff]  }
 0x40d   : > { %14940 = vmatpush1.bf16.msra.mxu0 %v27699_v54  ;;  %14654 = vmatprep.subr.bf16.mxu1 %v27704_v56  ;;  %v27756_v54 = vld [vmem:[%s40002_s2 + $0xac0] ss:$80 sps:$4 sm:$0xff]   ;;  %v27759_v56 = vld [vmem:[%s40002_s2 + $0xac8] ss:$80 sps:$4 sm:$0xff]  }
 0x40e   : > { %14941 = vmatprep.subr.bf16.mxu0 %v27707_v57  ;;  %v27764_v57 = vld [vmem:[%s40002_s2 + $0xb64] ss:$80 sps:$4 sm:$0xff]  }
 0x410   : > { %14655 = vmatpush1.bf16.msra.mxu1 %v27702_v10  ;;  %v27761_v10 = vld [vmem:[%s40002_s2 + $0xacc] ss:$80 sps:$4 sm:$0xff]  }
 0x411   : > { %14942 = vmatpush1.bf16.msra.mxu0 %v27705_v58  ;;  %14656 = vmatprep.subr.bf16.mxu1 %v27710_v49  ;;  %v27767_v58 = vld [vmem:[%s40002_s2 + $0xb6c] ss:$80 sps:$4 sm:$0xff]   ;;  %v27762_v49 = vld [vmem:[%s40002_s2 + $0xb60] ss:$80 sps:$4 sm:$0xff]  }
 0x412   : > { %14943 = vmatprep.subr.bf16.mxu0 %v27713_v39  ;;  %v27770_v39 = vld [vmem:[%s40002_s2 + $0xc04] ss:$80 sps:$4 sm:$0xff]  }
 0x414   : > { %14657 = vmatpush1.bf16.msra.mxu1 %v27708_v1  ;;  %v27765_v1 = vld [vmem:[%s40002_s2 + $0xb68] ss:$80 sps:$4 sm:$0xff]  }
 0x415   : > { %14944 = vmatpush1.bf16.msra.mxu0 %v27711_v61  ;;  %14658 = vmatprep.subr.bf16.mxu1 %v27716_v0  ;;  %v27768_v61 = vld [vmem:[%s40002_s2 + $0xc00] ss:$80 sps:$4 sm:$0xff]   ;;  %v27773_v0 = vld [vmem:[%s40002_s2 + $0xc0c] ss:$80 sps:$4 sm:$0xff]  }
 0x416   : > { %14945 = vmatprep.subr.bf16.mxu0 %v27719_v18  ;;  %v27776_v18 = vld [vmem:[%s40002_s2 + $0xca4] ss:$80 sps:$4 sm:$0xff]  }
 0x418   : > { %14659 = vmatpush1.bf16.msra.mxu1 %v27714_v3  ;;  %v27771_v3 = vld [vmem:[%s40002_s2 + $0xc08] ss:$80 sps:$4 sm:$0xff]  }
 0x419   : > { %14946 = vmatpush1.bf16.msra.mxu0 %v27717_v5  ;;  %14660 = vmatprep.subr.bf16.mxu1 %v27722_v47  ;;  %v27774_v5 = vld [vmem:[%s40002_s2 + $0xca0] ss:$80 sps:$4 sm:$0xff]   ;;  %v27779_v47 = vld [vmem:[%s40002_s2 + $0xcac] ss:$80 sps:$4 sm:$0xff]  }
 0x41a   : > { %14947 = vmatprep.subr.bf16.mxu0 %v27725_v12  ;;  %v27782_v12 = vld [vmem:[%s40002_s2 + $0xd44] ss:$80 sps:$4 sm:$0xff]  }
 0x41c   : > { %14661 = vmatpush1.bf16.msra.mxu1 %v27720_v8  ;;  %v27777_v8 = vld [vmem:[%s40002_s2 + $0xca8] ss:$80 sps:$4 sm:$0xff]  }
 0x41d   : > { %14948 = vmatpush1.bf16.msra.mxu0 %v27723_v27  ;;  %14662 = vmatprep.subr.bf16.mxu1 %v27728_v59  ;;  %v27780_v27 = vld [vmem:[%s40002_s2 + $0xd40] ss:$80 sps:$4 sm:$0xff]   ;;  %v27785_v59 = vld [vmem:[%s40002_s2 + $0xd4c] ss:$80 sps:$4 sm:$0xff]  }
 0x41e   : > { %14949 = vmatprep.subr.bf16.mxu0 %v27731_v19  ;;  %v27788_v19 = vld [vmem:[%s40002_s2 + $0xde4] ss:$80 sps:$4 sm:$0xff]  }
 0x420   : > { %14663 = vmatpush1.bf16.msra.mxu1 %v27726_v15  ;;  %v27783_v15 = vld [vmem:[%s40002_s2 + $0xd48] ss:$80 sps:$4 sm:$0xff]  }
 0x421   : > { %14950 = vmatpush1.bf16.msra.mxu0 %v27729_v20  ;;  %14664 = vmatprep.subr.bf16.mxu1 %v27734_v21  ;;  %v27791_v20 = vld [vmem:[%s40002_s2 + $0xdec] ss:$80 sps:$4 sm:$0xff]   ;;  %v27786_v21 = vld [vmem:[%s40002_s2 + $0xde0] ss:$80 sps:$4 sm:$0xff]  }
 0x422   : > { %14951 = vmatprep.subr.bf16.mxu0 %v27737_v25  ;;  %v27794_v25 = vld [vmem:[%s40002_s2 + $0xe84] ss:$80 sps:$4 sm:$0xff]  }
 0x424   : > { %14665 = vmatpush1.bf16.msra.mxu1 %v27732_v22  ;;  %v27789_v22 = vld [vmem:[%s40002_s2 + $0xde8] ss:$80 sps:$4 sm:$0xff]  }
 0x425   : > { %14952 = vmatpush1.bf16.msra.mxu0 %v27735_v23  ;;  %14666 = vmatprep.subr.bf16.mxu1 %v27740_v28  ;;  %v27797_v23 = vld [vmem:[%s40002_s2 + $0xe8c] ss:$80 sps:$4 sm:$0xff]   ;;  %v27792_v28 = vld [vmem:[%s40002_s2 + $0xe80] ss:$80 sps:$4 sm:$0xff]  }
 0x426   : > { %14953 = vmatprep.subr.bf16.mxu0 %v27743_v11  ;;  %v27800_v11 = vld [vmem:[%s40002_s2 + $0xf24] ss:$80 sps:$4 sm:$0xff]  }
 0x428   : > { %14667 = vmatpush1.bf16.msra.mxu1 %v27738_v40  ;;  %v27795_v40 = vld [vmem:[%s40002_s2 + $0xe88] ss:$80 sps:$4 sm:$0xff]  }
 0x429   : > { %14954 = vmatpush1.bf16.msra.mxu0 %v27741_v29  ;;  %14668 = vmatprep.subr.bf16.mxu1 %v27746_v30  ;;  %v27798_v29 = vld [vmem:[%s40002_s2 + $0xf20] ss:$80 sps:$4 sm:$0xff]   ;;  %v27803_v30 = vld [vmem:[%s40002_s2 + $0xf2c] ss:$80 sps:$4 sm:$0xff]  }
 0x42a   : > { %14955 = vmatprep.subr.bf16.mxu0 %v27749_v33  ;;  %v27806_v33 = vld [vmem:[%s40002_s2 + $0xfc4] ss:$80 sps:$4 sm:$0xff]  }
 0x42c   : > { %14669 = vmatpush1.bf16.msra.mxu1 %v27744_v32  ;;  %v27801_v32 = vld [vmem:[%s40002_s2 + $0xf28] ss:$80 sps:$4 sm:$0xff]  }
 0x42d   : > { %14956 = vmatpush1.bf16.msra.mxu0 %v27747_v36  ;;  %14679 = vmatprep.subr.bf16.mxu1 %v27752_v17  ;;  %v27804_v36 = vld [vmem:[%s40002_s2 + $0xfc0] ss:$80 sps:$4 sm:$0xff]   ;;  %v27809_v17 = vld [vmem:[%s40002_s2 + $0xfcc] ss:$80 sps:$4 sm:$0xff]  }
 0x42e   : > { %14966 = vmatprep.subr.bf16.mxu0 %v27755_v46  ;;  %v27812_v46 = vld [vmem:[%s40002_s2 + $0x1064] ss:$80 sps:$4 sm:$0xff]  }
 0x42f   : > { %14671 = vmatmul.mubr.bf16.vlgmr.msra.gmra.mrb[20].mxu1 %v31085_v7 }
 0x430   : > { %14958 = vmatmul.mubr.bf16.vlgmr.msra.gmra.mrb[24].mxu0 %v31085_v7  ;;  %14680 = vmatpush1.bf16.msra.mxu1 %v27750_v44  ;;  %v27807_v44 = vld [vmem:[%s40002_s2 + $0xfc8] ss:$80 sps:$4 sm:$0xff]  }
 0x431   : > { %14711 = vmatprep.mubr.bf16.mxu1 %v31103_v14  ;;  %14967 = vmatpush1.bf16.msra.mxu0 %v27753_v26  ;;  %v27810_v26 = vld [vmem:[%s40002_s2 + $0x1060] ss:$80 sps:$4 sm:$0xff]  }
 0x432   : > { %14998 = vmatprep.mubr.bf16.mxu0 %v31103_v14  ;;  %14681 = vmatprep.subr.bf16.mxu1 %v27758_v51  ;;  %v27815_v51 = vld [vmem:[%s40002_s2 + $0x106c] ss:$80 sps:$4 sm:$0xff]  }
 0x433   : > { %14968 = vmatprep.subr.bf16.mxu0 %v27761_v10  ;;  %v27816_v10 = vld [vmem:[%s40002_s2 + $0x1100] ss:$80 sps:$4 sm:$0xff]  }
 0x434   : > { %14682 = vmatpush1.bf16.msra.mxu1 %v27756_v54  ;;  %v27813_v54 = vld [vmem:[%s40002_s2 + $0x1068] ss:$80 sps:$4 sm:$0xff]  }
 0x435   : > { %14969 = vmatpush1.bf16.msra.mxu0 %v27759_v56  ;;  %14683 = vmatprep.subr.bf16.mxu1 %v27764_v57  ;;  %v27818_v56 = vld [vmem:[%s40002_s2 + $0x1104] ss:$80 sps:$4 sm:$0xff]   ;;  %v27821_v57 = vld [vmem:[%s40002_s2 + $0x110c] ss:$80 sps:$4 sm:$0xff]  }
 0x436   : > { %14970 = vmatprep.subr.bf16.mxu0 %v27767_v58  ;;  %v27819_v58 = vld [vmem:[%s40002_s2 + $0x1108] ss:$80 sps:$4 sm:$0xff]  }
 0x438   : > { %14684 = vmatpush1.bf16.msra.mxu1 %v27762_v49  ;;  %v27824_v49 = vld [vmem:[%s40002_s2 + $0x11a4] ss:$80 sps:$4 sm:$0xff]  }
 0x439   : > { %14971 = vmatpush1.bf16.msra.mxu0 %v27765_v1  ;;  %14685 = vmatprep.subr.bf16.mxu1 %v27770_v39  ;;  %v27822_v1 = vld [vmem:[%s40002_s2 + $0x11a0] ss:$80 sps:$4 sm:$0xff]   ;;  %v27827_v39 = vld [vmem:[%s40002_s2 + $0x11ac] ss:$80 sps:$4 sm:$0xff]  }
 0x43a   : > { %14972 = vmatprep.subr.bf16.mxu0 %v27773_v0  ;;  %v27830_v0 = vld [vmem:[%s40002_s2 + $0x1244] ss:$80 sps:$4 sm:$0xff]  }
 0x43c   : > { %14686 = vmatpush1.bf16.msra.mxu1 %v27768_v61  ;;  %v27825_v61 = vld [vmem:[%s40002_s2 + $0x11a8] ss:$80 sps:$4 sm:$0xff]  }
 0x43d   : > { %14973 = vmatpush1.bf16.msra.mxu0 %v27771_v3  ;;  %14687 = vmatprep.subr.bf16.mxu1 %v27776_v18  ;;  %v27828_v3 = vld [vmem:[%s40002_s2 + $0x1240] ss:$80 sps:$4 sm:$0xff]   ;;  %v27833_v18 = vld [vmem:[%s40002_s2 + $0x124c] ss:$80 sps:$4 sm:$0xff]  }
 0x43e   : > { %14974 = vmatprep.subr.bf16.mxu0 %v27779_v47  ;;  %v27836_v47 = vld [vmem:[%s40002_s2 + $0x12e4] ss:$80 sps:$4 sm:$0xff]  }
 0x440   : > { %14688 = vmatpush1.bf16.msra.mxu1 %v27774_v5  ;;  %v27831_v5 = vld [vmem:[%s40002_s2 + $0x1248] ss:$80 sps:$4 sm:$0xff]  }
 0x441   : > { %14975 = vmatpush1.bf16.msra.mxu0 %v27777_v8  ;;  %14689 = vmatprep.subr.bf16.mxu1 %v27782_v12  ;;  %v27834_v8 = vld [vmem:[%s40002_s2 + $0x12e0] ss:$80 sps:$4 sm:$0xff]   ;;  %v27839_v12 = vld [vmem:[%s40002_s2 + $0x12ec] ss:$80 sps:$4 sm:$0xff]  }
 0x442   : > { %14976 = vmatprep.subr.bf16.mxu0 %v27785_v59  ;;  %v27842_v59 = vld [vmem:[%s40002_s2 + $0x1384] ss:$80 sps:$4 sm:$0xff]  }
 0x444   : > { %14690 = vmatpush1.bf16.msra.mxu1 %v27780_v27  ;;  %v27837_v27 = vld [vmem:[%s40002_s2 + $0x12e8] ss:$80 sps:$4 sm:$0xff]  }
 0x445   : > { %14977 = vmatpush1.bf16.msra.mxu0 %v27783_v15  ;;  %14691 = vmatprep.subr.bf16.mxu1 %v27788_v19  ;;  %v27840_v15 = vld [vmem:[%s40002_s2 + $0x1380] ss:$80 sps:$4 sm:$0xff]   ;;  %v27845_v19 = vld [vmem:[%s40002_s2 + $0x138c] ss:$80 sps:$4 sm:$0xff]  }
 0x446   : > { %14978 = vmatprep.subr.bf16.mxu0 %v27791_v20  ;;  %v27843_v20 = vld [vmem:[%s40002_s2 + $0x1388] ss:$80 sps:$4 sm:$0xff]  }
 0x448   : > { %14692 = vmatpush1.bf16.msra.mxu1 %v27786_v21  ;;  %v27848_v21 = vld [vmem:[%s40002_s2 + $0x1424] ss:$80 sps:$4 sm:$0xff]  }
 0x449   : > { %14979 = vmatpush1.bf16.msra.mxu0 %v27789_v22  ;;  %14693 = vmatprep.subr.bf16.mxu1 %v27794_v25  ;;  %v27846_v22 = vld [vmem:[%s40002_s2 + $0x1420] ss:$80 sps:$4 sm:$0xff]   ;;  %v27851_v25 = vld [vmem:[%s40002_s2 + $0x142c] ss:$80 sps:$4 sm:$0xff]  }
 0x44a   : > { %14980 = vmatprep.subr.bf16.mxu0 %v27797_v23  ;;  %v27849_v23 = vld [vmem:[%s40002_s2 + $0x1428] ss:$80 sps:$4 sm:$0xff]  }
 0x44c   : > { %14694 = vmatpush1.bf16.msra.mxu1 %v27792_v28  ;;  %v27854_v28 = vld [vmem:[%s40002_s2 + $0x14c4] ss:$80 sps:$4 sm:$0xff]  }
 0x44d   : > { %14981 = vmatpush1.bf16.msra.mxu0 %v27795_v40  ;;  %14695 = vmatprep.subr.bf16.mxu1 %v27800_v11  ;;  %v27852_v40 = vld [vmem:[%s40002_s2 + $0x14c0] ss:$80 sps:$4 sm:$0xff]   ;;  %v27855_v11 = vld [vmem:[%s40002_s2 + $0x14c8] ss:$80 sps:$4 sm:$0xff]  }
 0x44e   : > { %14982 = vmatprep.subr.bf16.mxu0 %v27803_v30  ;;  %v27860_v30 = vld [vmem:[%s40002_s2 + $0x1564] ss:$80 sps:$4 sm:$0xff]  }
 0x450   : > { %14696 = vmatpush1.bf16.msra.mxu1 %v27798_v29  ;;  %v27857_v29 = vld [vmem:[%s40002_s2 + $0x14cc] ss:$80 sps:$4 sm:$0xff]  }
 0x451   : > { %14983 = vmatpush1.bf16.msra.mxu0 %v27801_v32  ;;  %14697 = vmatprep.subr.bf16.mxu1 %v27806_v33  ;;  %v27863_v32 = vld [vmem:[%s40002_s2 + $0x156c] ss:$80 sps:$4 sm:$0xff]   ;;  %v27858_v33 = vld [vmem:[%s40002_s2 + $0x1560] ss:$80 sps:$4 sm:$0xff]  }
 0x452   : > { %14984 = vmatprep.subr.bf16.mxu0 %v27809_v17  ;;  %v27866_v17 = vld [vmem:[%s40002_s2 + $0x1604] ss:$80 sps:$4 sm:$0xff]  }
 0x454   : > { %14698 = vmatpush1.bf16.msra.mxu1 %v27804_v36  ;;  %v27861_v36 = vld [vmem:[%s40002_s2 + $0x1568] ss:$80 sps:$4 sm:$0xff]  }
 0x455   : > { %14985 = vmatpush1.bf16.msra.mxu0 %v27807_v44  ;;  %14699 = vmatprep.subr.bf16.mxu1 %v27812_v46  ;;  %v27864_v44 = vld [vmem:[%s40002_s2 + $0x1600] ss:$80 sps:$4 sm:$0xff]   ;;  %v27869_v46 = vld [vmem:[%s40002_s2 + $0x160c] ss:$80 sps:$4 sm:$0xff]  }
 0x456   : > { %14986 = vmatprep.subr.bf16.mxu0 %v27815_v51  ;;  %v27872_v51 = vld [vmem:[%s40002_s2 + $0x16a4] ss:$80 sps:$4 sm:$0xff]  }
 0x458   : > { %14700 = vmatpush1.bf16.msra.mxu1 %v27810_v26  ;;  %v27867_v26 = vld [vmem:[%s40002_s2 + $0x1608] ss:$80 sps:$4 sm:$0xff]  }
 0x459   : > { %14987 = vmatpush1.bf16.msra.mxu0 %v27813_v54  ;;  %14701 = vmatprep.subr.bf16.mxu1 %v27818_v56  ;;  %v27870_v54 = vld [vmem:[%s40002_s2 + $0x16a0] ss:$80 sps:$4 sm:$0xff]   ;;  %v27875_v56 = vld [vmem:[%s40002_s2 + $0x16ac] ss:$80 sps:$4 sm:$0xff]  }
 0x45a   : > { %14988 = vmatprep.subr.bf16.mxu0 %v27821_v57  ;;  %v27878_v57 = vld [vmem:[%s40002_s2 + $0x1744] ss:$80 sps:$4 sm:$0xff]  }
 0x45c   : > { %14702 = vmatpush1.bf16.msra.mxu1 %v27816_v10  ;;  %v27873_v10 = vld [vmem:[%s40002_s2 + $0x16a8] ss:$80 sps:$4 sm:$0xff]  }
 0x45d   : > { %14989 = vmatpush1.bf16.msra.mxu0 %v27819_v58  ;;  %14703 = vmatprep.subr.bf16.mxu1 %v27824_v49  ;;  %v27876_v58 = vld [vmem:[%s40002_s2 + $0x1740] ss:$80 sps:$4 sm:$0xff]   ;;  %v27881_v49 = vld [vmem:[%s40002_s2 + $0x174c] ss:$80 sps:$4 sm:$0xff]  }
 0x45e   : > { %14990 = vmatprep.subr.bf16.mxu0 %v27827_v39  ;;  %v27884_v39 = vld [vmem:[%s40002_s2 + $0x17e4] ss:$80 sps:$4 sm:$0xff]  }
 0x460   : > { %14704 = vmatpush1.bf16.msra.mxu1 %v27822_v1  ;;  %v27879_v1 = vld [vmem:[%s40002_s2 + $0x1748] ss:$80 sps:$4 sm:$0xff]  }
 0x461   : > { %14991 = vmatpush1.bf16.msra.mxu0 %v27825_v61  ;;  %14705 = vmatprep.subr.bf16.mxu1 %v27830_v0  ;;  %v27882_v61 = vld [vmem:[%s40002_s2 + $0x17e0] ss:$80 sps:$4 sm:$0xff]   ;;  %v27887_v0 = vld [vmem:[%s40002_s2 + $0x17ec] ss:$80 sps:$4 sm:$0xff]  }
 0x462   : > { %14992 = vmatprep.subr.bf16.mxu0 %v27833_v18  ;;  %v27890_v18 = vld [vmem:[%s40002_s2 + $0x1884] ss:$80 sps:$4 sm:$0xff]  }
 0x464   : > { %14706 = vmatpush1.bf16.msra.mxu1 %v27828_v3  ;;  %v27885_v3 = vld [vmem:[%s40002_s2 + $0x17e8] ss:$80 sps:$4 sm:$0xff]  }
 0x465   : > { %14993 = vmatpush1.bf16.msra.mxu0 %v27831_v5  ;;  %14707 = vmatprep.subr.bf16.mxu1 %v27836_v47  ;;  %v27888_v5 = vld [vmem:[%s40002_s2 + $0x1880] ss:$80 sps:$4 sm:$0xff]   ;;  %v27893_v47 = vld [vmem:[%s40002_s2 + $0x188c] ss:$80 sps:$4 sm:$0xff]  }
 0x466   : > { %14994 = vmatprep.subr.bf16.mxu0 %v27839_v12  ;;  %v27896_v12 = vld [vmem:[%s40002_s2 + $0x1924] ss:$80 sps:$4 sm:$0xff]  }
 0x468   : > { %14708 = vmatpush1.bf16.msra.mxu1 %v27834_v8  ;;  %v27891_v8 = vld [vmem:[%s40002_s2 + $0x1888] ss:$80 sps:$4 sm:$0xff]  }
 0x469   : > { %14995 = vmatpush1.bf16.msra.mxu0 %v27837_v27  ;;  %14709 = vmatprep.subr.bf16.mxu1 %v27842_v59  ;;  %v27894_v27 = vld [vmem:[%s40002_s2 + $0x1920] ss:$80 sps:$4 sm:$0xff]   ;;  %v27899_v59 = vld [vmem:[%s40002_s2 + $0x192c] ss:$80 sps:$4 sm:$0xff]  }
 0x46a   : > { %14996 = vmatprep.subr.bf16.mxu0 %v27845_v19  ;;  %v27902_v19 = vld [vmem:[%s40002_s2 + $0x19c4] ss:$80 sps:$4 sm:$0xff]  }
 0x46c   : > { %14710 = vmatpush1.bf16.msra.mxu1 %v27840_v15  ;;  %v27897_v15 = vld [vmem:[%s40002_s2 + $0x1928] ss:$80 sps:$4 sm:$0xff]  }
 0x46d   : > { %14997 = vmatpush1.bf16.msra.mxu0 %v27843_v20  ;;  %14720 = vmatprep.subr.bf16.mxu1 %v27848_v21  ;;  %v27900_v20 = vld [vmem:[%s40002_s2 + $0x19c0] ss:$80 sps:$4 sm:$0xff]   ;;  %v27905_v21 = vld [vmem:[%s40002_s2 + $0x19cc] ss:$80 sps:$4 sm:$0xff]  }
 0x46e   : > { %15007 = vmatprep.subr.bf16.mxu0 %v27851_v25  ;;  %v27908_v25 = vld [vmem:[%s40002_s2 + $0x1a64] ss:$80 sps:$4 sm:$0xff]  }
 0x46f   : > { %14712 = vmatmul.mubr.bf16.vlgmr.msra.gmra.mrb[20].mxu1 %v31326_v9 }
 0x470   : > { %14999 = vmatmul.mubr.bf16.vlgmr.msra.gmra.mrb[24].mxu0 %v31326_v9  ;;  %14721 = vmatpush1.bf16.msra.mxu1 %v27846_v22  ;;  %v27903_v22 = vld [vmem:[%s40002_s2 + $0x19c8] ss:$80 sps:$4 sm:$0xff]  }
 0x471   : > { %14752 = vmatprep.mubr.bf16.mxu1 %v31340_v16  ;;  %15008 = vmatpush1.bf16.msra.mxu0 %v27849_v23  ;;  %v27906_v23 = vld [vmem:[%s40002_s2 + $0x1a60] ss:$80 sps:$4 sm:$0xff]  }
 0x472   : > { %15039 = vmatprep.mubr.bf16.mxu0 %v31340_v16  ;;  %14722 = vmatprep.subr.bf16.mxu1 %v27854_v28  ;;  %v27911_v28 = vld [vmem:[%s40002_s2 + $0x1a6c] ss:$80 sps:$4 sm:$0xff]  }
 0x473   : > { %15009 = vmatprep.subr.bf16.mxu0 %v27857_v29  ;;  %v27912_v29 = vld [vmem:[%s40002_s2 + $0x1b00] ss:$80 sps:$4 sm:$0xff]  }
 0x474   : > { %14723 = vmatpush1.bf16.msra.mxu1 %v27852_v40  ;;  %v27909_v40 = vld [vmem:[%s40002_s2 + $0x1a68] ss:$80 sps:$4 sm:$0xff]  }
 0x475   : > { %15010 = vmatpush1.bf16.msra.mxu0 %v27855_v11  ;;  %14724 = vmatprep.subr.bf16.mxu1 %v27860_v30  ;;  %v27914_v11 = vld [vmem:[%s40002_s2 + $0x1b04] ss:$80 sps:$4 sm:$0xff]   ;;  %v27917_v30 = vld [vmem:[%s40002_s2 + $0x1b0c] ss:$80 sps:$4 sm:$0xff]  }
 0x476   : > { %15011 = vmatprep.subr.bf16.mxu0 %v27863_v32  ;;  %v27915_v32 = vld [vmem:[%s40002_s2 + $0x1b08] ss:$80 sps:$4 sm:$0xff]  }
 0x478   : > { %14725 = vmatpush1.bf16.msra.mxu1 %v27858_v33  ;;  %v27920_v33 = vld [vmem:[%s40002_s2 + $0x1ba4] ss:$80 sps:$4 sm:$0xff]  }
 0x479   : > { %15012 = vmatpush1.bf16.msra.mxu0 %v27861_v36  ;;  %14726 = vmatprep.subr.bf16.mxu1 %v27866_v17  ;;  %v27918_v36 = vld [vmem:[%s40002_s2 + $0x1ba0] ss:$80 sps:$4 sm:$0xff]   ;;  %v27923_v17 = vld [vmem:[%s40002_s2 + $0x1bac] ss:$80 sps:$4 sm:$0xff]  }
 0x47a   : > { %15013 = vmatprep.subr.bf16.mxu0 %v27869_v46  ;;  %v27926_v46 = vld [vmem:[%s40002_s2 + $0x1c44] ss:$80 sps:$4 sm:$0xff]  }
 0x47c   : > { %14727 = vmatpush1.bf16.msra.mxu1 %v27864_v44  ;;  %v27921_v44 = vld [vmem:[%s40002_s2 + $0x1ba8] ss:$80 sps:$4 sm:$0xff]  }
 0x47d   : > { %15014 = vmatpush1.bf16.msra.mxu0 %v27867_v26  ;;  %14728 = vmatprep.subr.bf16.mxu1 %v27872_v51  ;;  %v27924_v26 = vld [vmem:[%s40002_s2 + $0x1c40] ss:$80 sps:$4 sm:$0xff]   ;;  %v27929_v51 = vld [vmem:[%s40002_s2 + $0x1c4c] ss:$80 sps:$4 sm:$0xff]  }
 0x47e   : > { %15015 = vmatprep.subr.bf16.mxu0 %v27875_v56  ;;  %v27932_v56 = vld [vmem:[%s40002_s2 + $0x1ce4] ss:$80 sps:$4 sm:$0xff]  }
 0x480   : > { %14729 = vmatpush1.bf16.msra.mxu1 %v27870_v54  ;;  %v27927_v54 = vld [vmem:[%s40002_s2 + $0x1c48] ss:$80 sps:$4 sm:$0xff]  }
 0x481   : > { %15016 = vmatpush1.bf16.msra.mxu0 %v27873_v10  ;;  %14730 = vmatprep.subr.bf16.mxu1 %v27878_v57  ;;  %v27930_v10 = vld [vmem:[%s40002_s2 + $0x1ce0] ss:$80 sps:$4 sm:$0xff]   ;;  %v27935_v57 = vld [vmem:[%s40002_s2 + $0x1cec] ss:$80 sps:$4 sm:$0xff]  }
 0x482   : > { %15017 = vmatprep.subr.bf16.mxu0 %v27881_v49  ;;  %v27938_v49 = vld [vmem:[%s40002_s2 + $0x1d84] ss:$80 sps:$4 sm:$0xff]  }
 0x484   : > { %14731 = vmatpush1.bf16.msra.mxu1 %v27876_v58  ;;  %v27933_v58 = vld [vmem:[%s40002_s2 + $0x1ce8] ss:$80 sps:$4 sm:$0xff]  }
 0x485   : > { %15018 = vmatpush1.bf16.msra.mxu0 %v27879_v1  ;;  %14732 = vmatprep.subr.bf16.mxu1 %v27884_v39  ;;  %v27936_v1 = vld [vmem:[%s40002_s2 + $0x1d80] ss:$80 sps:$4 sm:$0xff]   ;;  %v27941_v39 = vld [vmem:[%s40002_s2 + $0x1d8c] ss:$80 sps:$4 sm:$0xff]  }
 0x486   : > { %15019 = vmatprep.subr.bf16.mxu0 %v27887_v0  ;;  %v27944_v0 = vld [vmem:[%s40002_s2 + $0x1e24] ss:$80 sps:$4 sm:$0xff]  }
 0x488   : > { %14733 = vmatpush1.bf16.msra.mxu1 %v27882_v61  ;;  %v27939_v61 = vld [vmem:[%s40002_s2 + $0x1d88] ss:$80 sps:$4 sm:$0xff]  }
 0x489   : > { %15020 = vmatpush1.bf16.msra.mxu0 %v27885_v3  ;;  %14734 = vmatprep.subr.bf16.mxu1 %v27890_v18  ;;  %v27942_v3 = vld [vmem:[%s40002_s2 + $0x1e20] ss:$80 sps:$4 sm:$0xff]   ;;  %v27947_v18 = vld [vmem:[%s40002_s2 + $0x1e2c] ss:$80 sps:$4 sm:$0xff]  }
 0x48a   : > { %15021 = vmatprep.subr.bf16.mxu0 %v27893_v47  ;;  %v27950_v47 = vld [vmem:[%s40002_s2 + $0x1ec4] ss:$80 sps:$4 sm:$0xff]  }
 0x48c   : > { %14735 = vmatpush1.bf16.msra.mxu1 %v27888_v5  ;;  %v27945_v5 = vld [vmem:[%s40002_s2 + $0x1e28] ss:$80 sps:$4 sm:$0xff]  }
 0x48d   : > { %15022 = vmatpush1.bf16.msra.mxu0 %v27891_v8  ;;  %14736 = vmatprep.subr.bf16.mxu1 %v27896_v12  ;;  %v27948_v8 = vld [vmem:[%s40002_s2 + $0x1ec0] ss:$80 sps:$4 sm:$0xff]   ;;  %v27951_v12 = vld [vmem:[%s40002_s2 + $0x1ec8] ss:$80 sps:$4 sm:$0xff]  }
 0x48e   : > { %15023 = vmatprep.subr.bf16.mxu0 %v27899_v59  ;;  %v27956_v59 = vld [vmem:[%s40002_s2 + $0x1f64] ss:$80 sps:$4 sm:$0xff]  }
 0x490   : > { %14737 = vmatpush1.bf16.msra.mxu1 %v27894_v27  ;;  %v27953_v27 = vld [vmem:[%s40002_s2 + $0x1ecc] ss:$80 sps:$4 sm:$0xff]  }
 0x491   : > { %15024 = vmatpush1.bf16.msra.mxu0 %v27897_v15  ;;  %14738 = vmatprep.subr.bf16.mxu1 %v27902_v19  ;;  %v27959_v15 = vld [vmem:[%s40002_s2 + $0x1f6c] ss:$80 sps:$4 sm:$0xff]   ;;  %v27954_v19 = vld [vmem:[%s40002_s2 + $0x1f60] ss:$80 sps:$4 sm:$0xff]  }
 0x492   : > { %15025 = vmatprep.subr.bf16.mxu0 %v27905_v21  ;;  %v27962_v21 = vld [vmem:[%s40002_s2 + $0x2004] ss:$80 sps:$4 sm:$0xff]  }
 0x494   : > { %14739 = vmatpush1.bf16.msra.mxu1 %v27900_v20  ;;  %v27957_v20 = vld [vmem:[%s40002_s2 + $0x1f68] ss:$80 sps:$4 sm:$0xff]  }
 0x495   : > { %15026 = vmatpush1.bf16.msra.mxu0 %v27903_v22  ;;  %14740 = vmatprep.subr.bf16.mxu1 %v27908_v25  ;;  %v27960_v22 = vld [vmem:[%s40002_s2 + $0x2000] ss:$80 sps:$4 sm:$0xff]   ;;  %v27965_v25 = vld [vmem:[%s40002_s2 + $0x200c] ss:$80 sps:$4 sm:$0xff]  }
 0x496   : > { %15027 = vmatprep.subr.bf16.mxu0 %v27911_v28  ;;  %v27968_v28 = vld [vmem:[%s40002_s2 + $0x20a4] ss:$80 sps:$4 sm:$0xff]  }
 0x498   : > { %14741 = vmatpush1.bf16.msra.mxu1 %v27906_v23  ;;  %v27963_v23 = vld [vmem:[%s40002_s2 + $0x2008] ss:$80 sps:$4 sm:$0xff]  }
 0x499   : > { %15028 = vmatpush1.bf16.msra.mxu0 %v27909_v40  ;;  %14742 = vmatprep.subr.bf16.mxu1 %v27914_v11  ;;  %v27966_v40 = vld [vmem:[%s40002_s2 + $0x20a0] ss:$80 sps:$4 sm:$0xff]   ;;  %v27971_v11 = vld [vmem:[%s40002_s2 + $0x20ac] ss:$80 sps:$4 sm:$0xff]  }
 0x49a   : > { %15029 = vmatprep.subr.bf16.mxu0 %v27917_v30  ;;  %v27974_v30 = vld [vmem:[%s40002_s2 + $0x2144] ss:$80 sps:$4 sm:$0xff]  }
 0x49c   : > { %14743 = vmatpush1.bf16.msra.mxu1 %v27912_v29  ;;  %v27969_v29 = vld [vmem:[%s40002_s2 + $0x20a8] ss:$80 sps:$4 sm:$0xff]  }
 0x49d   : > { %15030 = vmatpush1.bf16.msra.mxu0 %v27915_v32  ;;  %14744 = vmatprep.subr.bf16.mxu1 %v27920_v33  ;;  %v27977_v32 = vld [vmem:[%s40002_s2 + $0x214c] ss:$80 sps:$4 sm:$0xff]   ;;  %v27972_v33 = vld [vmem:[%s40002_s2 + $0x2140] ss:$80 sps:$4 sm:$0xff]  }
 0x49e   : > { %15031 = vmatprep.subr.bf16.mxu0 %v27923_v17  ;;  %v27980_v17 = vld [vmem:[%s40002_s2 + $0x21e4] ss:$80 sps:$4 sm:$0xff]  }
 0x4a0   : > { %14745 = vmatpush1.bf16.msra.mxu1 %v27918_v36  ;;  %v27975_v36 = vld [vmem:[%s40002_s2 + $0x2148] ss:$80 sps:$4 sm:$0xff]  }
 0x4a1   : > { %15032 = vmatpush1.bf16.msra.mxu0 %v27921_v44  ;;  %14746 = vmatprep.subr.bf16.mxu1 %v27926_v46  ;;  %v27983_v44 = vld [vmem:[%s40002_s2 + $0x21ec] ss:$80 sps:$4 sm:$0xff]  }
 0x4a2   : > { %15033 = vmatprep.subr.bf16.mxu0 %v27929_v51 }
 0x4a4   : > { %14747 = vmatpush1.bf16.msra.mxu1 %v27924_v26  ;;  %v27978_v26 = vld [vmem:[%s40002_s2 + $0x21e0] ss:$80 sps:$4 sm:$0xff]  }
 0x4a5   : > { %15034 = vmatpush1.bf16.msra.mxu0 %v27927_v54  ;;  %14748 = vmatprep.subr.bf16.mxu1 %v27932_v56  ;;  %v27981_v56 = vld [vmem:[%s40002_s2 + $0x21e8] ss:$80 sps:$4 sm:$0xff]  }
 0x4a6   : > { %15035 = vmatprep.subr.bf16.mxu0 %v27935_v57 }
 0x4a8   : > { %14749 = vmatpush1.bf16.msra.mxu1 %v27930_v10 }
 0x4a9   : > { %15036 = vmatpush1.bf16.msra.mxu0 %v27933_v58  ;;  %14750 = vmatprep.subr.bf16.mxu1 %v27938_v49 }
 0x4aa   : > { %15037 = vmatprep.subr.bf16.mxu0 %v27941_v39 }
 0x4ac   : > { %14751 = vmatpush1.bf16.msra.mxu1 %v27936_v1  ;;  %v27986_v1 = vld [vmem:[%s40002_s2 + $0x2284] ss:$80 sps:$4 sm:$0xff]  }
 0x4ad   : > { %15038 = vmatpush1.bf16.msra.mxu0 %v27939_v61  ;;  %14761 = vmatprep.subr.bf16.mxu1 %v27944_v0  ;;  %v27989_v61 = vld [vmem:[%s40002_s2 + $0x228c] ss:$80 sps:$4 sm:$0xff]   ;;  %v27984_v0 = vld [vmem:[%s40002_s2 + $0x2280] ss:$80 sps:$4 sm:$0xff]  }
 0x4ae   : > { %15048 = vmatprep.subr.bf16.mxu0 %v27947_v18  ;;  %v27992_v18 = vld [vmem:[%s40002_s2 + $0x2324] ss:$80 sps:$4 sm:$0xff]  }
 0x4af   : > { %14753 = vmatmul.mubr.bf16.vlgmr.msra.gmra.mrb[20].mxu1 %v31540_v52 }
 0x4b0   : > { %15040 = vmatmul.mubr.bf16.vlgmr.msra.gmra.mrb[24].mxu0 %v31540_v52  ;;  %14762 = vmatpush1.bf16.msra.mxu1 %v27942_v3  ;;  %v27987_v3 = vld [vmem:[%s40002_s2 + $0x2288] ss:$80 sps:$4 sm:$0xff]  }
 0x4b1   : > { %14793 = vmatprep.mubr.bf16.mxu1 %v31554_v60  ;;  %15049 = vmatpush1.bf16.msra.mxu0 %v27945_v5  ;;  %v27990_v5 = vld [vmem:[%s40002_s2 + $0x2320] ss:$80 sps:$4 sm:$0xff]  }
 0x4b2   : > { %15080 = vmatprep.mubr.bf16.mxu0 %v31554_v60  ;;  %14763 = vmatprep.subr.bf16.mxu1 %v27950_v47  ;;  %v27995_v47 = vld [vmem:[%s40002_s2 + $0x232c] ss:$80 sps:$4 sm:$0xff]  }
 0x4b3   : > { %15050 = vmatprep.subr.bf16.mxu0 %v27953_v27  ;;  %v27996_v27 = vld [vmem:[%s40002_s2 + $0x23c0] ss:$80 sps:$4 sm:$0xff]  }
 0x4b4   : > { %14764 = vmatpush1.bf16.msra.mxu1 %v27948_v8  ;;  %v27993_v8 = vld [vmem:[%s40002_s2 + $0x2328] ss:$80 sps:$4 sm:$0xff]  }
 0x4b5   : > { %15051 = vmatpush1.bf16.msra.mxu0 %v27951_v12  ;;  %14765 = vmatprep.subr.bf16.mxu1 %v27956_v59  ;;  %v27998_v12 = vld [vmem:[%s40002_s2 + $0x23c4] ss:$80 sps:$4 sm:$0xff]   ;;  %v28001_v59 = vld [vmem:[%s40002_s2 + $0x23cc] ss:$80 sps:$4 sm:$0xff]  }
 0x4b6   : > { %15052 = vmatprep.subr.bf16.mxu0 %v27959_v15  ;;  %v27999_v15 = vld [vmem:[%s40002_s2 + $0x23c8] ss:$80 sps:$4 sm:$0xff]  }
 0x4b8   : > { %14766 = vmatpush1.bf16.msra.mxu1 %v27954_v19  ;;  %v28004_v19 = vld [vmem:[%s40002_s2 + $0x2464] ss:$80 sps:$4 sm:$0xff]  }
 0x4b9   : > { %15053 = vmatpush1.bf16.msra.mxu0 %v27957_v20  ;;  %14767 = vmatprep.subr.bf16.mxu1 %v27962_v21  ;;  %v28002_v20 = vld [vmem:[%s40002_s2 + $0x2460] ss:$80 sps:$4 sm:$0xff]   ;;  %v28007_v21 = vld [vmem:[%s40002_s2 + $0x246c] ss:$80 sps:$4 sm:$0xff]  }
 0x4ba   : > { %15054 = vmatprep.subr.bf16.mxu0 %v27965_v25  ;;  %v28010_v25 = vld [vmem:[%s40002_s2 + $0x2504] ss:$80 sps:$4 sm:$0xff]  }
 0x4bc   : > { %14768 = vmatpush1.bf16.msra.mxu1 %v27960_v22  ;;  %v28005_v22 = vld [vmem:[%s40002_s2 + $0x2468] ss:$80 sps:$4 sm:$0xff]  }
 0x4bd   : > { %15055 = vmatpush1.bf16.msra.mxu0 %v27963_v23  ;;  %14769 = vmatprep.subr.bf16.mxu1 %v27968_v28  ;;  %v28008_v23 = vld [vmem:[%s40002_s2 + $0x2500] ss:$80 sps:$4 sm:$0xff]   ;;  %v28013_v28 = vld [vmem:[%s40002_s2 + $0x250c] ss:$80 sps:$4 sm:$0xff]  }
 0x4be   : > { %15056 = vmatprep.subr.bf16.mxu0 %v27971_v11  ;;  %v28016_v11 = vld [vmem:[%s40002_s2 + $0x25a4] ss:$80 sps:$4 sm:$0xff]  }
 0x4c0   : > { %14770 = vmatpush1.bf16.msra.mxu1 %v27966_v40  ;;  %v28011_v40 = vld [vmem:[%s40002_s2 + $0x2508] ss:$80 sps:$4 sm:$0xff]  }
 0x4c1   : > { %15057 = vmatpush1.bf16.msra.mxu0 %v27969_v29  ;;  %14771 = vmatprep.subr.bf16.mxu1 %v27974_v30  ;;  %v28014_v29 = vld [vmem:[%s40002_s2 + $0x25a0] ss:$80 sps:$4 sm:$0xff]   ;;  %v28019_v30 = vld [vmem:[%s40002_s2 + $0x25ac] ss:$80 sps:$4 sm:$0xff]  }
 0x4c2   : > { %v34206_v46 = vpop.f32.mrb[16].mxu1  ;;  %15058 = vmatprep.subr.bf16.mxu0 %v27977_v32  ;;  %v28017_v32 = vld [vmem:[%s40002_s2 + $0x25a8] ss:$80 sps:$4 sm:$0xff]  }
 0x4c3   : > { %v34211_v51 = vpop.f32.mrb[20].mxu0  ;;  %v34213_v54 = vpop.f32.mrb[17].mxu1 }
 0x4c4   : > { %v34218_v10 = vpop.f32.mrb[21].mxu0  ;;  %v14348_v57 = vpop.f32.mrb[18].mxu1  ;;  %14772 = vmatpush1.bf16.msra.mxu1 %v27972_v33  ;;  %v28022_v33 = vld [vmem:[%s40002_s2 + $0x2644] ss:$80 sps:$4 sm:$0xff]  }
 0x4c5   : > { %v14635_v58 = vpop.f32.mrb[22].mxu0  ;;  %15059 = vmatpush1.bf16.msra.mxu0 %v27975_v36  ;;  %v14349_v49 = vpop.f32.mrb[19].mxu1  ;;  %14773 = vmatprep.subr.bf16.mxu1 %v27980_v17  ;;  %v28020_v36 = vld [vmem:[%s40002_s2 + $0x2640] ss:$80 sps:$4 sm:$0xff]   ;;  %v28025_v17 = vld [vmem:[%s40002_s2 + $0x264c] ss:$80 sps:$4 sm:$0xff]  }
 0x4c6   : > { %v14636_v39 = vpop.f32.mrb[23].mxu0  ;;  %15060 = vmatprep.subr.bf16.mxu0 %v27983_v44  ;;  %v28023_v44 = vld [vmem:[%s40002_s2 + $0x2648] ss:$80 sps:$4 sm:$0xff]   ;;  %v28031_v57 = vld [vmem:[%s40002_s2 + $0x26ec] ss:$80 sps:$4 sm:$0xff]  }
 0x4c7   : > { %v28029_v58 = vld [vmem:[%s40002_s2 + $0x26e8] ss:$80 sps:$4 sm:$0xff]   ;;  %v28034_v49 = vld [vmem:[%s40002_s2 + $0x2784] ss:$80 sps:$4 sm:$0xff]   ;;  %v28037_v39 = vld [vmem:[%s40002_s2 + $0x278c] ss:$80 sps:$4 sm:$0xff]  }
 0x4c8   : > { %14774 = vmatpush1.bf16.msra.mxu1 %v27978_v26  ;;  %v28028_v26 = vld [vmem:[%s40002_s2 + $0x26e4] ss:$80 sps:$4 sm:$0xff]  }
 0x4c9   : > { %15061 = vmatpush1.bf16.msra.mxu0 %v27981_v56  ;;  %14775 = vmatprep.subr.bf16.mxu1 %v27986_v1  ;;  %v28026_v56 = vld [vmem:[%s40002_s2 + $0x26e0] ss:$80 sps:$4 sm:$0xff]  }
 0x4ca   : > { %15062 = vmatprep.subr.bf16.mxu0 %v27989_v61  ;;  %v28032_v1 = vld [vmem:[%s40002_s2 + $0x2780] ss:$80 sps:$4 sm:$0xff]   ;;  %v28035_v61 = vld [vmem:[%s40002_s2 + $0x2788] ss:$80 sps:$4 sm:$0xff]  }
 0x4cc   : > { %14776 = vmatpush1.bf16.msra.mxu1 %v27984_v0  ;;  %v28040_v0 = vld [vmem:[%s40002_s2 + $0x2824] ss:$80 sps:$4 sm:$0xff]  }
 0x4cd   : > { %15063 = vmatpush1.bf16.msra.mxu0 %v27987_v3  ;;  %14777 = vmatprep.subr.bf16.mxu1 %v27992_v18  ;;  %v28038_v3 = vld [vmem:[%s40002_s2 + $0x2820] ss:$80 sps:$4 sm:$0xff]   ;;  %v28043_v18 = vld [vmem:[%s40002_s2 + $0x282c] ss:$80 sps:$4 sm:$0xff]  }
 0x4ce   : > { %15064 = vmatprep.subr.bf16.mxu0 %v27995_v47  ;;  %v28046_v47 = vld [vmem:[%s40002_s2 + $0x28c4] ss:$80 sps:$4 sm:$0xff]  }
 0x4d0   : > { %14778 = vmatpush1.bf16.msra.mxu1 %v27990_v5  ;;  %v28041_v5 = vld [vmem:[%s40002_s2 + $0x2828] ss:$80 sps:$4 sm:$0xff]  }
 0x4d1   : > { %15065 = vmatpush1.bf16.msra.mxu0 %v27993_v8  ;;  %14779 = vmatprep.subr.bf16.mxu1 %v27998_v12  ;;  %v28049_v8 = vld [vmem:[%s40002_s2 + $0x28cc] ss:$80 sps:$4 sm:$0xff]   ;;  %v28044_v12 = vld [vmem:[%s40002_s2 + $0x28c0] ss:$80 sps:$4 sm:$0xff]  }
 0x4d2   : > { %15066 = vmatprep.subr.bf16.mxu0 %v28001_v59  ;;  %v28052_v59 = vld [vmem:[%s40002_s2 + $0x2964] ss:$80 sps:$4 sm:$0xff]  }
 0x4d4   : > { %14780 = vmatpush1.bf16.msra.mxu1 %v27996_v27  ;;  %v28047_v27 = vld [vmem:[%s40002_s2 + $0x28c8] ss:$80 sps:$4 sm:$0xff]  }
 0x4d5   : > { %15067 = vmatpush1.bf16.msra.mxu0 %v27999_v15  ;;  %14781 = vmatprep.subr.bf16.mxu1 %v28004_v19  ;;  %v28050_v15 = vld [vmem:[%s40002_s2 + $0x2960] ss:$80 sps:$4 sm:$0xff]   ;;  %v28055_v19 = vld [vmem:[%s40002_s2 + $0x296c] ss:$80 sps:$4 sm:$0xff]  }
 0x4d6   : > { %15068 = vmatprep.subr.bf16.mxu0 %v28007_v21  ;;  %v28058_v21 = vld [vmem:[%s40002_s2 + $0x2a04] ss:$80 sps:$4 sm:$0xff]  }
 0x4d8   : > { %14782 = vmatpush1.bf16.msra.mxu1 %v28002_v20  ;;  %v28053_v20 = vld [vmem:[%s40002_s2 + $0x2968] ss:$80 sps:$4 sm:$0xff]  }
 0x4d9   : > { %15069 = vmatpush1.bf16.msra.mxu0 %v28005_v22  ;;  %14783 = vmatprep.subr.bf16.mxu1 %v28010_v25  ;;  %v28056_v22 = vld [vmem:[%s40002_s2 + $0x2a00] ss:$80 sps:$4 sm:$0xff]   ;;  %v28061_v25 = vld [vmem:[%s40002_s2 + $0x2a0c] ss:$80 sps:$4 sm:$0xff]  }
 0x4da   : > { %15070 = vmatprep.subr.bf16.mxu0 %v28013_v28  ;;  %v28064_v28 = vld [vmem:[%s40002_s2 + $0x2aa4] ss:$80 sps:$4 sm:$0xff]  }
 0x4dc   : > { %14784 = vmatpush1.bf16.msra.mxu1 %v28008_v23  ;;  %v28059_v23 = vld [vmem:[%s40002_s2 + $0x2a08] ss:$80 sps:$4 sm:$0xff]  }
 0x4dd   : > { %15071 = vmatpush1.bf16.msra.mxu0 %v28011_v40  ;;  %14785 = vmatprep.subr.bf16.mxu1 %v28016_v11  ;;  %v28062_v40 = vld [vmem:[%s40002_s2 + $0x2aa0] ss:$80 sps:$4 sm:$0xff]   ;;  %v28067_v11 = vld [vmem:[%s40002_s2 + $0x2aac] ss:$80 sps:$4 sm:$0xff]  }
 0x4de   : > { %15072 = vmatprep.subr.bf16.mxu0 %v28019_v30  ;;  %v28070_v30 = vld [vmem:[%s40002_s2 + $0x2b44] ss:$80 sps:$4 sm:$0xff]  }
 0x4e0   : > { %14786 = vmatpush1.bf16.msra.mxu1 %v28014_v29  ;;  %v28065_v29 = vld [vmem:[%s40002_s2 + $0x2aa8] ss:$80 sps:$4 sm:$0xff]  }
 0x4e1   : > { %15073 = vmatpush1.bf16.msra.mxu0 %v28017_v32  ;;  %14787 = vmatprep.subr.bf16.mxu1 %v28022_v33  ;;  %v28068_v32 = vld [vmem:[%s40002_s2 + $0x2b40] ss:$80 sps:$4 sm:$0xff]   ;;  %v28073_v33 = vld [vmem:[%s40002_s2 + $0x2b4c] ss:$80 sps:$4 sm:$0xff]  }
 0x4e2   : > { %15074 = vmatprep.subr.bf16.mxu0 %v28025_v17  ;;  %v28076_v17 = vld [vmem:[%s40002_s2 + $0x2be4] ss:$80 sps:$4 sm:$0xff]  }
 0x4e4   : > { %14788 = vmatpush1.bf16.msra.mxu1 %v28020_v36  ;;  %v28071_v36 = vld [vmem:[%s40002_s2 + $0x2b48] ss:$80 sps:$4 sm:$0xff]  }
 0x4e5   : > { %15075 = vmatpush1.bf16.msra.mxu0 %v28023_v44  ;;  %14789 = vmatprep.subr.bf16.mxu1 %v28028_v26  ;;  %v28074_v44 = vld [vmem:[%s40002_s2 + $0x2be0] ss:$80 sps:$4 sm:$0xff]   ;;  %v28079_v26 = vld [vmem:[%s40002_s2 + $0x2bec] ss:$80 sps:$4 sm:$0xff]  }
 0x4e6   : > { %15076 = vmatprep.subr.bf16.mxu0 %v28031_v57  ;;  %v28082_v57 = vld [vmem:[%s40002_s2 + $0x2c84] ss:$80 sps:$4 sm:$0xff]  }
 0x4e8   : > { %14790 = vmatpush1.bf16.msra.mxu1 %v28026_v56  ;;  %v28077_v56 = vld [vmem:[%s40002_s2 + $0x2be8] ss:$80 sps:$4 sm:$0xff]  }
 0x4e9   : > { %15077 = vmatpush1.bf16.msra.mxu0 %v28029_v58  ;;  %14791 = vmatprep.subr.bf16.mxu1 %v28034_v49  ;;  %v28080_v58 = vld [vmem:[%s40002_s2 + $0x2c80] ss:$80 sps:$4 sm:$0xff]   ;;  %v28085_v49 = vld [vmem:[%s40002_s2 + $0x2c8c] ss:$80 sps:$4 sm:$0xff]  }
 0x4ea   : > { %15078 = vmatprep.subr.bf16.mxu0 %v28037_v39  ;;  %v28088_v39 = vld [vmem:[%s40002_s2 + $0x2d24] ss:$80 sps:$4 sm:$0xff]  }
 0x4ec   : > { %14792 = vmatpush1.bf16.msra.mxu1 %v28032_v1  ;;  %v28083_v1 = vld [vmem:[%s40002_s2 + $0x2c88] ss:$80 sps:$4 sm:$0xff]  }
 0x4ed   : > { %15079 = vmatpush1.bf16.msra.mxu0 %v28035_v61  ;;  %14802 = vmatprep.subr.bf16.mxu1 %v28040_v0  ;;  %v28086_v61 = vld [vmem:[%s40002_s2 + $0x2d20] ss:$80 sps:$4 sm:$0xff]   ;;  %v28091_v0 = vld [vmem:[%s40002_s2 + $0x2d2c] ss:$80 sps:$4 sm:$0xff]  }
 0x4ee   : > { %15089 = vmatprep.subr.bf16.mxu0 %v28043_v18  ;;  %v28094_v18 = vld [vmem:[%s40002_s2 + $0x2dc4] ss:$80 sps:$4 sm:$0xff]  }
 0x4ef   : > { %14794 = vmatmul.mubr.bf16.vlgmr.msra.gmra.mrb[20].mxu1 %v31760_v34 }
 0x4f0   : > { %15081 = vmatmul.mubr.bf16.vlgmr.msra.gmra.mrb[24].mxu0 %v31760_v34  ;;  %14803 = vmatpush1.bf16.msra.mxu1 %v28038_v3  ;;  %v28089_v3 = vld [vmem:[%s40002_s2 + $0x2d28] ss:$80 sps:$4 sm:$0xff]  }
 0x4f1   : > { %14834 = vmatprep.mubr.bf16.mxu1 %v31762_v35  ;;  %15090 = vmatpush1.bf16.msra.mxu0 %v28041_v5  ;;  %v28097_v5 = vld [vmem:[%s40002_s2 + $0x2dcc] ss:$80 sps:$4 sm:$0xff]  }
 0x4f2   : > { %15121 = vmatprep.mubr.bf16.mxu0 %v31762_v35  ;;  %14804 = vmatprep.subr.bf16.mxu1 %v28046_v47  ;;  %v28092_v47 = vld [vmem:[%s40002_s2 + $0x2dc0] ss:$80 sps:$4 sm:$0xff]  }
 0x4f3   : > { %15091 = vmatprep.subr.bf16.mxu0 %v28049_v8  ;;  %v28095_v8 = vld [vmem:[%s40002_s2 + $0x2dc8] ss:$80 sps:$4 sm:$0xff]  }
 0x4f4   : > { %14805 = vmatpush1.bf16.msra.mxu1 %v28044_v12  ;;  %v28100_v12 = vld [vmem:[%s40002_s2 + $0x2e64] ss:$80 sps:$4 sm:$0xff]  }
 0x4f5   : > { %15092 = vmatpush1.bf16.msra.mxu0 %v28047_v27  ;;  %14806 = vmatprep.subr.bf16.mxu1 %v28052_v59  ;;  %v28103_v27 = vld [vmem:[%s40002_s2 + $0x2e6c] ss:$80 sps:$4 sm:$0xff]   ;;  %v28098_v59 = vld [vmem:[%s40002_s2 + $0x2e60] ss:$80 sps:$4 sm:$0xff]  }
 0x4f6   : > { %15093 = vmatprep.subr.bf16.mxu0 %v28055_v19  ;;  %v28106_v19 = vld [vmem:[%s40002_s2 + $0x2f04] ss:$80 sps:$4 sm:$0xff]  }
 0x4f8   : > { %14807 = vmatpush1.bf16.msra.mxu1 %v28050_v15  ;;  %v28101_v15 = vld [vmem:[%s40002_s2 + $0x2e68] ss:$80 sps:$4 sm:$0xff]  }
 0x4f9   : > { %15094 = vmatpush1.bf16.msra.mxu0 %v28053_v20  ;;  %14808 = vmatprep.subr.bf16.mxu1 %v28058_v21  ;;  %v28104_v20 = vld [vmem:[%s40002_s2 + $0x2f00] ss:$80 sps:$4 sm:$0xff]   ;;  %v28109_v21 = vld [vmem:[%s40002_s2 + $0x2f0c] ss:$80 sps:$4 sm:$0xff]  }
 0x4fa   : > { %15095 = vmatprep.subr.bf16.mxu0 %v28061_v25  ;;  %v28112_v25 = vld [vmem:[%s40002_s2 + $0x2fa4] ss:$80 sps:$4 sm:$0xff]  }
 0x4fc   : > { %14809 = vmatpush1.bf16.msra.mxu1 %v28056_v22  ;;  %v28107_v22 = vld [vmem:[%s40002_s2 + $0x2f08] ss:$80 sps:$4 sm:$0xff]  }
 0x4fd   : > { %15096 = vmatpush1.bf16.msra.mxu0 %v28059_v23  ;;  %14810 = vmatprep.subr.bf16.mxu1 %v28064_v28  ;;  %v28110_v23 = vld [vmem:[%s40002_s2 + $0x2fa0] ss:$80 sps:$4 sm:$0xff]   ;;  %v28115_v28 = vld [vmem:[%s40002_s2 + $0x2fac] ss:$80 sps:$4 sm:$0xff]  }
 0x4fe   : > { %15097 = vmatprep.subr.bf16.mxu0 %v28067_v11  ;;  %v28118_v11 = vld [vmem:[%s40002_s2 + $0x3044] ss:$80 sps:$4 sm:$0xff]  }
 0x500   : > { %14811 = vmatpush1.bf16.msra.mxu1 %v28062_v40  ;;  %v28113_v40 = vld [vmem:[%s40002_s2 + $0x2fa8] ss:$80 sps:$4 sm:$0xff]  }
 0x501   : > { %15098 = vmatpush1.bf16.msra.mxu0 %v28065_v29  ;;  %14812 = vmatprep.subr.bf16.mxu1 %v28070_v30  ;;  %v28116_v29 = vld [vmem:[%s40002_s2 + $0x3040] ss:$80 sps:$4 sm:$0xff]   ;;  %v28121_v30 = vld [vmem:[%s40002_s2 + $0x304c] ss:$80 sps:$4 sm:$0xff]  }
 0x502   : > { %15099 = vmatprep.subr.bf16.mxu0 %v28073_v33  ;;  %v28124_v33 = vld [vmem:[%s40002_s2 + $0x30e4] ss:$80 sps:$4 sm:$0xff]  }
 0x504   : > { %14813 = vmatpush1.bf16.msra.mxu1 %v28068_v32  ;;  %v28119_v32 = vld [vmem:[%s40002_s2 + $0x3048] ss:$80 sps:$4 sm:$0xff]  }
 0x505   : > { %15100 = vmatpush1.bf16.msra.mxu0 %v28071_v36  ;;  %14814 = vmatprep.subr.bf16.mxu1 %v28076_v17  ;;  %v28122_v36 = vld [vmem:[%s40002_s2 + $0x30e0] ss:$80 sps:$4 sm:$0xff]   ;;  %v28127_v17 = vld [vmem:[%s40002_s2 + $0x30ec] ss:$80 sps:$4 sm:$0xff]  }
 0x506   : > { %15101 = vmatprep.subr.bf16.mxu0 %v28079_v26  ;;  %v28130_v26 = vld [vmem:[%s40002_s2 + $0x3184] ss:$80 sps:$4 sm:$0xff]  }
 0x508   : > { %14815 = vmatpush1.bf16.msra.mxu1 %v28074_v44  ;;  %v28125_v44 = vld [vmem:[%s40002_s2 + $0x30e8] ss:$80 sps:$4 sm:$0xff]  }
 0x509   : > { %15102 = vmatpush1.bf16.msra.mxu0 %v28077_v56  ;;  %14816 = vmatprep.subr.bf16.mxu1 %v28082_v57  ;;  %v28128_v56 = vld [vmem:[%s40002_s2 + $0x3180] ss:$80 sps:$4 sm:$0xff]   ;;  %v28133_v57 = vld [vmem:[%s40002_s2 + $0x318c] ss:$80 sps:$4 sm:$0xff]  }
 0x50a   : > { %15103 = vmatprep.subr.bf16.mxu0 %v28085_v49  ;;  %v28136_v49 = vld [vmem:[%s40002_s2 + $0x3224] ss:$80 sps:$4 sm:$0xff]  }
 0x50c   : > { %14817 = vmatpush1.bf16.msra.mxu1 %v28080_v58  ;;  %v28131_v58 = vld [vmem:[%s40002_s2 + $0x3188] ss:$80 sps:$4 sm:$0xff]  }
 0x50d   : > { %15104 = vmatpush1.bf16.msra.mxu0 %v28083_v1  ;;  %14818 = vmatprep.subr.bf16.mxu1 %v28088_v39  ;;  %v28134_v1 = vld [vmem:[%s40002_s2 + $0x3220] ss:$80 sps:$4 sm:$0xff]   ;;  %v28139_v39 = vld [vmem:[%s40002_s2 + $0x322c] ss:$80 sps:$4 sm:$0xff]  }
 0x50e   : > { %15105 = vmatprep.subr.bf16.mxu0 %v28091_v0  ;;  %v28142_v0 = vld [vmem:[%s40002_s2 + $0x32c4] ss:$80 sps:$4 sm:$0xff]  }
 0x510   : > { %14819 = vmatpush1.bf16.msra.mxu1 %v28086_v61  ;;  %v28137_v61 = vld [vmem:[%s40002_s2 + $0x3228] ss:$80 sps:$4 sm:$0xff]  }
 0x511   : > { %15106 = vmatpush1.bf16.msra.mxu0 %v28089_v3  ;;  %14820 = vmatprep.subr.bf16.mxu1 %v28094_v18  ;;  %v28140_v3 = vld [vmem:[%s40002_s2 + $0x32c0] ss:$80 sps:$4 sm:$0xff]   ;;  %v28145_v18 = vld [vmem:[%s40002_s2 + $0x32cc] ss:$80 sps:$4 sm:$0xff]  }
 0x512   : > { %15107 = vmatprep.subr.bf16.mxu0 %v28097_v5  ;;  %v28143_v5 = vld [vmem:[%s40002_s2 + $0x32c8] ss:$80 sps:$4 sm:$0xff]  }
 0x514   : > { %14821 = vmatpush1.bf16.msra.mxu1 %v28092_v47  ;;  %v28148_v47 = vld [vmem:[%s40002_s2 + $0x3364] ss:$80 sps:$4 sm:$0xff]  }
 0x515   : > { %15108 = vmatpush1.bf16.msra.mxu0 %v28095_v8  ;;  %14822 = vmatprep.subr.bf16.mxu1 %v28100_v12  ;;  %v28146_v8 = vld [vmem:[%s40002_s2 + $0x3360] ss:$80 sps:$4 sm:$0xff]   ;;  %v28151_v12 = vld [vmem:[%s40002_s2 + $0x336c] ss:$80 sps:$4 sm:$0xff]  }
 0x516   : > { %15109 = vmatprep.subr.bf16.mxu0 %v28103_v27  ;;  %v28149_v27 = vld [vmem:[%s40002_s2 + $0x3368] ss:$80 sps:$4 sm:$0xff]  }
 0x518   : > { %14823 = vmatpush1.bf16.msra.mxu1 %v28098_v59  ;;  %v28154_v59 = vld [vmem:[%s40002_s2 + $0x3404] ss:$80 sps:$4 sm:$0xff]  }
 0x519   : > { %15110 = vmatpush1.bf16.msra.mxu0 %v28101_v15  ;;  %14824 = vmatprep.subr.bf16.mxu1 %v28106_v19  ;;  %v28152_v15 = vld [vmem:[%s40002_s2 + $0x3400] ss:$80 sps:$4 sm:$0xff]   ;;  %v28157_v19 = vld [vmem:[%s40002_s2 + $0x340c] ss:$80 sps:$4 sm:$0xff]  }
 0x51a   : > { %15111 = vmatprep.subr.bf16.mxu0 %v28109_v21  ;;  %v28160_v21 = vld [vmem:[%s40002_s2 + $0x34a4] ss:$80 sps:$4 sm:$0xff]  }
 0x51c   : > { %14825 = vmatpush1.bf16.msra.mxu1 %v28104_v20  ;;  %v28155_v20 = vld [vmem:[%s40002_s2 + $0x3408] ss:$80 sps:$4 sm:$0xff]  }
 0x51d   : > { %15112 = vmatpush1.bf16.msra.mxu0 %v28107_v22  ;;  %14826 = vmatprep.subr.bf16.mxu1 %v28112_v25  ;;  %v28158_v22 = vld [vmem:[%s40002_s2 + $0x34a0] ss:$80 sps:$4 sm:$0xff]   ;;  %v28163_v25 = vld [vmem:[%s40002_s2 + $0x34ac] ss:$80 sps:$4 sm:$0xff]  }
 0x51e   : > { %15113 = vmatprep.subr.bf16.mxu0 %v28115_v28  ;;  %v28166_v28 = vld [vmem:[%s40002_s2 + $0x3544] ss:$80 sps:$4 sm:$0xff]  }
 0x520   : > { %14827 = vmatpush1.bf16.msra.mxu1 %v28110_v23  ;;  %v28161_v23 = vld [vmem:[%s40002_s2 + $0x34a8] ss:$80 sps:$4 sm:$0xff]  }
 0x521   : > { %15114 = vmatpush1.bf16.msra.mxu0 %v28113_v40  ;;  %14828 = vmatprep.subr.bf16.mxu1 %v28118_v11  ;;  %v28164_v40 = vld [vmem:[%s40002_s2 + $0x3540] ss:$80 sps:$4 sm:$0xff]   ;;  %v28169_v11 = vld [vmem:[%s40002_s2 + $0x354c] ss:$80 sps:$4 sm:$0xff]  }
 0x522   : > { %15115 = vmatprep.subr.bf16.mxu0 %v28121_v30  ;;  %v28172_v30 = vld [vmem:[%s40002_s2 + $0x35e4] ss:$80 sps:$4 sm:$0xff]  }
 0x524   : > { %14829 = vmatpush1.bf16.msra.mxu1 %v28116_v29  ;;  %v28167_v29 = vld [vmem:[%s40002_s2 + $0x3548] ss:$80 sps:$4 sm:$0xff]  }
 0x525   : > { %15116 = vmatpush1.bf16.msra.mxu0 %v28119_v32  ;;  %14830 = vmatprep.subr.bf16.mxu1 %v28124_v33  ;;  %v28170_v32 = vld [vmem:[%s40002_s2 + $0x35e0] ss:$80 sps:$4 sm:$0xff]   ;;  %v28175_v33 = vld [vmem:[%s40002_s2 + $0x35ec] ss:$80 sps:$4 sm:$0xff]  }
 0x526   : > { %15117 = vmatprep.subr.bf16.mxu0 %v28127_v17  ;;  %v28178_v17 = vld [vmem:[%s40002_s2 + $0x3684] ss:$80 sps:$4 sm:$0xff]  }
 0x528   : > { %14831 = vmatpush1.bf16.msra.mxu1 %v28122_v36  ;;  %v28173_v36 = vld [vmem:[%s40002_s2 + $0x35e8] ss:$80 sps:$4 sm:$0xff]  }
 0x529   : > { %15118 = vmatpush1.bf16.msra.mxu0 %v28125_v44  ;;  %14832 = vmatprep.subr.bf16.mxu1 %v28130_v26  ;;  %v28176_v44 = vld [vmem:[%s40002_s2 + $0x3680] ss:$80 sps:$4 sm:$0xff]   ;;  %v28181_v26 = vld [vmem:[%s40002_s2 + $0x368c] ss:$80 sps:$4 sm:$0xff]  }
 0x52a   : > { %15119 = vmatprep.subr.bf16.mxu0 %v28133_v57  ;;  %v28184_v57 = vld [vmem:[%s40002_s2 + $0x3724] ss:$80 sps:$4 sm:$0xff]  }
 0x52c   : > { %14833 = vmatpush1.bf16.msra.mxu1 %v28128_v56  ;;  %v28179_v56 = vld [vmem:[%s40002_s2 + $0x3688] ss:$80 sps:$4 sm:$0xff]  }
 0x52d   : > { %15120 = vmatpush1.bf16.msra.mxu0 %v28131_v58  ;;  %14843 = vmatprep.subr.bf16.mxu1 %v28136_v49  ;;  %v28182_v58 = vld [vmem:[%s40002_s2 + $0x3720] ss:$80 sps:$4 sm:$0xff]   ;;  %v28187_v49 = vld [vmem:[%s40002_s2 + $0x372c] ss:$80 sps:$4 sm:$0xff]  }
 0x52e   : > { %15130 = vmatprep.subr.bf16.mxu0 %v28139_v39  ;;  %v28190_v39 = vld [vmem:[%s40002_s2 + $0x37c4] ss:$80 sps:$4 sm:$0xff]  }
 0x52f   : > { %14835 = vmatmul.mubr.bf16.vlgmr.msra.gmra.mrb[20].mxu1 %v31955_v6 }
 0x530   : > { %15122 = vmatmul.mubr.bf16.vlgmr.msra.gmra.mrb[24].mxu0 %v31955_v6  ;;  %14844 = vmatpush1.bf16.msra.mxu1 %v28134_v1  ;;  %v28185_v1 = vld [vmem:[%s40002_s2 + $0x3728] ss:$80 sps:$4 sm:$0xff]  }
 0x531   : > { %14875 = vmatprep.mubr.bf16.mxu1 %v31969_v13  ;;  %15131 = vmatpush1.bf16.msra.mxu0 %v28137_v61  ;;  %v28193_v61 = vld [vmem:[%s40002_s2 + $0x37cc] ss:$80 sps:$4 sm:$0xff]  }
 0x532   : > { %15162 = vmatprep.mubr.bf16.mxu0 %v31969_v13  ;;  %14845 = vmatprep.subr.bf16.mxu1 %v28142_v0  ;;  %v28188_v0 = vld [vmem:[%s40002_s2 + $0x37c0] ss:$80 sps:$4 sm:$0xff]  }
 0x533   : > { %15132 = vmatprep.subr.bf16.mxu0 %v28145_v18  ;;  %v28196_v18 = vld [vmem:[%s40002_s2 + $0x3864] ss:$80 sps:$4 sm:$0xff]  }
 0x534   : > { %14846 = vmatpush1.bf16.msra.mxu1 %v28140_v3  ;;  %v28191_v3 = vld [vmem:[%s40002_s2 + $0x37c8] ss:$80 sps:$4 sm:$0xff]  }
 0x535   : > { %15133 = vmatpush1.bf16.msra.mxu0 %v28143_v5  ;;  %14847 = vmatprep.subr.bf16.mxu1 %v28148_v47  ;;  %v28199_v5 = vld [vmem:[%s40002_s2 + $0x386c] ss:$80 sps:$4 sm:$0xff]   ;;  %v28194_v47 = vld [vmem:[%s40002_s2 + $0x3860] ss:$80 sps:$4 sm:$0xff]  }
 0x536   : > { %15134 = vmatprep.subr.bf16.mxu0 %v28151_v12  ;;  %v28202_v12 = vld [vmem:[%s40002_s2 + $0x3904] ss:$80 sps:$4 sm:$0xff]  }
 0x538   : > { %14848 = vmatpush1.bf16.msra.mxu1 %v28146_v8  ;;  %v28197_v8 = vld [vmem:[%s40002_s2 + $0x3868] ss:$80 sps:$4 sm:$0xff]  }
 0x539   : > { %15135 = vmatpush1.bf16.msra.mxu0 %v28149_v27  ;;  %14849 = vmatprep.subr.bf16.mxu1 %v28154_v59  ;;  %v28200_v27 = vld [vmem:[%s40002_s2 + $0x3900] ss:$80 sps:$4 sm:$0xff]   ;;  %v28205_v59 = vld [vmem:[%s40002_s2 + $0x390c] ss:$80 sps:$4 sm:$0xff]  }
 0x53a   : > { %15136 = vmatprep.subr.bf16.mxu0 %v28157_v19  ;;  %v28208_v19 = vld [vmem:[%s40002_s2 + $0x39a4] ss:$80 sps:$4 sm:$0xff]  }
 0x53c   : > { %14850 = vmatpush1.bf16.msra.mxu1 %v28152_v15  ;;  %v28203_v15 = vld [vmem:[%s40002_s2 + $0x3908] ss:$80 sps:$4 sm:$0xff]  }
 0x53d   : > { %15137 = vmatpush1.bf16.msra.mxu0 %v28155_v20  ;;  %14851 = vmatprep.subr.bf16.mxu1 %v28160_v21  ;;  %v28206_v20 = vld [vmem:[%s40002_s2 + $0x39a0] ss:$80 sps:$4 sm:$0xff]   ;;  %v28211_v21 = vld [vmem:[%s40002_s2 + $0x39ac] ss:$80 sps:$4 sm:$0xff]  }
 0x53e   : > { %15138 = vmatprep.subr.bf16.mxu0 %v28163_v25  ;;  %v28214_v25 = vld [vmem:[%s40002_s2 + $0x3a44] ss:$80 sps:$4 sm:$0xff]  }
 0x540   : > { %14852 = vmatpush1.bf16.msra.mxu1 %v28158_v22  ;;  %v28209_v22 = vld [vmem:[%s40002_s2 + $0x39a8] ss:$80 sps:$4 sm:$0xff]  }
 0x541   : > { %15139 = vmatpush1.bf16.msra.mxu0 %v28161_v23  ;;  %14853 = vmatprep.subr.bf16.mxu1 %v28166_v28  ;;  %v28212_v23 = vld [vmem:[%s40002_s2 + $0x3a40] ss:$80 sps:$4 sm:$0xff]   ;;  %v28217_v28 = vld [vmem:[%s40002_s2 + $0x3a4c] ss:$80 sps:$4 sm:$0xff]  }
 0x542   : > { %15140 = vmatprep.subr.bf16.mxu0 %v28169_v11  ;;  %v28220_v11 = vld [vmem:[%s40002_s2 + $0x3ae4] ss:$80 sps:$4 sm:$0xff]  }
 0x544   : > { %14854 = vmatpush1.bf16.msra.mxu1 %v28164_v40  ;;  %v28215_v40 = vld [vmem:[%s40002_s2 + $0x3a48] ss:$80 sps:$4 sm:$0xff]  }
 0x545   : > { %15141 = vmatpush1.bf16.msra.mxu0 %v28167_v29  ;;  %14855 = vmatprep.subr.bf16.mxu1 %v28172_v30  ;;  %v28218_v29 = vld [vmem:[%s40002_s2 + $0x3ae0] ss:$80 sps:$4 sm:$0xff]   ;;  %v28223_v30 = vld [vmem:[%s40002_s2 + $0x3aec] ss:$80 sps:$4 sm:$0xff]  }
 0x546   : > { %15142 = vmatprep.subr.bf16.mxu0 %v28175_v33  ;;  %v28226_v33 = vld [vmem:[%s40002_s2 + $0x3b84] ss:$80 sps:$4 sm:$0xff]  }
 0x548   : > { %14856 = vmatpush1.bf16.msra.mxu1 %v28170_v32  ;;  %v28221_v32 = vld [vmem:[%s40002_s2 + $0x3ae8] ss:$80 sps:$4 sm:$0xff]  }
 0x549   : > { %15143 = vmatpush1.bf16.msra.mxu0 %v28173_v36  ;;  %14857 = vmatprep.subr.bf16.mxu1 %v28178_v17  ;;  %v28224_v36 = vld [vmem:[%s40002_s2 + $0x3b80] ss:$80 sps:$4 sm:$0xff]   ;;  %v28229_v17 = vld [vmem:[%s40002_s2 + $0x3b8c] ss:$80 sps:$4 sm:$0xff]  }
 0x54a   : > { %15144 = vmatprep.subr.bf16.mxu0 %v28181_v26  ;;  %v28232_v26 = vld [vmem:[%s40002_s2 + $0x3c24] ss:$80 sps:$4 sm:$0xff]  }
 0x54c   : > { %14858 = vmatpush1.bf16.msra.mxu1 %v28176_v44  ;;  %v28227_v44 = vld [vmem:[%s40002_s2 + $0x3b88] ss:$80 sps:$4 sm:$0xff]  }
 0x54d   : > { %15145 = vmatpush1.bf16.msra.mxu0 %v28179_v56  ;;  %14859 = vmatprep.subr.bf16.mxu1 %v28184_v57  ;;  %v28230_v56 = vld [vmem:[%s40002_s2 + $0x3c20] ss:$80 sps:$4 sm:$0xff]   ;;  %v28235_v57 = vld [vmem:[%s40002_s2 + $0x3c2c] ss:$80 sps:$4 sm:$0xff]  }
 0x54e   : > { %15146 = vmatprep.subr.bf16.mxu0 %v28187_v49  ;;  %v28238_v49 = vld [vmem:[%s40002_s2 + $0x3cc4] ss:$80 sps:$4 sm:$0xff]  }
 0x550   : > { %14860 = vmatpush1.bf16.msra.mxu1 %v28182_v58  ;;  %v28233_v58 = vld [vmem:[%s40002_s2 + $0x3c28] ss:$80 sps:$4 sm:$0xff]  }
 0x551   : > { %15147 = vmatpush1.bf16.msra.mxu0 %v28185_v1  ;;  %14861 = vmatprep.subr.bf16.mxu1 %v28190_v39  ;;  %v28236_v1 = vld [vmem:[%s40002_s2 + $0x3cc0] ss:$80 sps:$4 sm:$0xff]   ;;  %v28241_v39 = vld [vmem:[%s40002_s2 + $0x3ccc] ss:$80 sps:$4 sm:$0xff]  }
 0x552   : > { %15148 = vmatprep.subr.bf16.mxu0 %v28193_v61  ;;  %v28239_v61 = vld [vmem:[%s40002_s2 + $0x3cc8] ss:$80 sps:$4 sm:$0xff]  }
 0x554   : > { %14862 = vmatpush1.bf16.msra.mxu1 %v28188_v0  ;;  %v28244_v0 = vld [vmem:[%s40002_s2 + $0x3d64] ss:$80 sps:$4 sm:$0xff]  }
 0x555   : > { %15149 = vmatpush1.bf16.msra.mxu0 %v28191_v3  ;;  %14863 = vmatprep.subr.bf16.mxu1 %v28196_v18  ;;  %v28242_v3 = vld [vmem:[%s40002_s2 + $0x3d60] ss:$80 sps:$4 sm:$0xff]   ;;  %v28247_v18 = vld [vmem:[%s40002_s2 + $0x3d6c] ss:$80 sps:$4 sm:$0xff]  }
 0x556   : > { %15150 = vmatprep.subr.bf16.mxu0 %v28199_v5  ;;  %v28245_v5 = vld [vmem:[%s40002_s2 + $0x3d68] ss:$80 sps:$4 sm:$0xff]  }
 0x558   : > { %14864 = vmatpush1.bf16.msra.mxu1 %v28194_v47  ;;  %v28250_v47 = vld [vmem:[%s40002_s2 + $0x3e04] ss:$80 sps:$4 sm:$0xff]  }
 0x559   : > { %15151 = vmatpush1.bf16.msra.mxu0 %v28197_v8  ;;  %14865 = vmatprep.subr.bf16.mxu1 %v28202_v12  ;;  %v28248_v8 = vld [vmem:[%s40002_s2 + $0x3e00] ss:$80 sps:$4 sm:$0xff]   ;;  %v28253_v12 = vld [vmem:[%s40002_s2 + $0x3e0c] ss:$80 sps:$4 sm:$0xff]  }
 0x55a   : > { %15152 = vmatprep.subr.bf16.mxu0 %v28205_v59  ;;  %v28256_v59 = vld [vmem:[%s40002_s2 + $0x3ea4] ss:$80 sps:$4 sm:$0xff]  }
 0x55c   : > { %14866 = vmatpush1.bf16.msra.mxu1 %v28200_v27  ;;  %v28251_v27 = vld [vmem:[%s40002_s2 + $0x3e08] ss:$80 sps:$4 sm:$0xff]  }
 0x55d   : > { %15153 = vmatpush1.bf16.msra.mxu0 %v28203_v15  ;;  %14867 = vmatprep.subr.bf16.mxu1 %v28208_v19  ;;  %v28254_v15 = vld [vmem:[%s40002_s2 + $0x3ea0] ss:$80 sps:$4 sm:$0xff]   ;;  %v28259_v19 = vld [vmem:[%s40002_s2 + $0x3eac] ss:$80 sps:$4 sm:$0xff]  }
 0x55e   : > { %15154 = vmatprep.subr.bf16.mxu0 %v28211_v21  ;;  %v28262_v21 = vld [vmem:[%s40002_s2 + $0x3f44] ss:$80 sps:$4 sm:$0xff]  }
 0x560   : > { %14868 = vmatpush1.bf16.msra.mxu1 %v28206_v20  ;;  %v28257_v20 = vld [vmem:[%s40002_s2 + $0x3ea8] ss:$80 sps:$4 sm:$0xff]  }
 0x561   : > { %15155 = vmatpush1.bf16.msra.mxu0 %v28209_v22  ;;  %14869 = vmatprep.subr.bf16.mxu1 %v28214_v25  ;;  %v28260_v22 = vld [vmem:[%s40002_s2 + $0x3f40] ss:$80 sps:$4 sm:$0xff]   ;;  %v28265_v25 = vld [vmem:[%s40002_s2 + $0x3f4c] ss:$80 sps:$4 sm:$0xff]  }
 0x562   : > { %15156 = vmatprep.subr.bf16.mxu0 %v28217_v28  ;;  %v28268_v28 = vld [vmem:[%s40002_s2 + $0x3fe4] ss:$80 sps:$4 sm:$0xff]  }
 0x564   : > { %14870 = vmatpush1.bf16.msra.mxu1 %v28212_v23  ;;  %v28263_v23 = vld [vmem:[%s40002_s2 + $0x3f48] ss:$80 sps:$4 sm:$0xff]  }
 0x565   : > { %15157 = vmatpush1.bf16.msra.mxu0 %v28215_v40  ;;  %14871 = vmatprep.subr.bf16.mxu1 %v28220_v11  ;;  %v28266_v40 = vld [vmem:[%s40002_s2 + $0x3fe0] ss:$80 sps:$4 sm:$0xff]   ;;  %v28271_v11 = vld [vmem:[%s40002_s2 + $0x3fec] ss:$80 sps:$4 sm:$0xff]  }
 0x566   : > { %15158 = vmatprep.subr.bf16.mxu0 %v28223_v30  ;;  %v28274_v30 = vld [vmem:[%s40002_s2 + $0x4084] ss:$80 sps:$4 sm:$0xff]  }
 0x568   : > { %14872 = vmatpush1.bf16.msra.mxu1 %v28218_v29  ;;  %v28269_v29 = vld [vmem:[%s40002_s2 + $0x3fe8] ss:$80 sps:$4 sm:$0xff]  }
 0x569   : > { %15159 = vmatpush1.bf16.msra.mxu0 %v28221_v32  ;;  %14873 = vmatprep.subr.bf16.mxu1 %v28226_v33  ;;  %v28272_v32 = vld [vmem:[%s40002_s2 + $0x4080] ss:$80 sps:$4 sm:$0xff]   ;;  %v28277_v33 = vld [vmem:[%s40002_s2 + $0x408c] ss:$80 sps:$4 sm:$0xff]  }
 0x56a   : > { %15160 = vmatprep.subr.bf16.mxu0 %v28229_v17  ;;  %v28280_v17 = vld [vmem:[%s40002_s2 + $0x34] ss:$80 sps:$4 sm:$0xff]  }
 0x56c   : > { %14874 = vmatpush1.bf16.msra.mxu1 %v28224_v36  ;;  %v28275_v36 = vld [vmem:[%s40002_s2 + $0x4088] ss:$80 sps:$4 sm:$0xff]  }
 0x56d   : > { %15161 = vmatpush1.bf16.msra.mxu0 %v28227_v44  ;;  %14884 = vmatprep.subr.bf16.mxu1 %v28232_v26  ;;  %v28283_v44 = vld [vmem:[%s40002_s2 + $0x3c] ss:$80 sps:$4 sm:$0xff]   ;;  %v28278_v26 = vld [vmem:[%s40002_s2 + $0x30] ss:$80 sps:$4 sm:$0xff]  }
 0x56e   : > { %15171 = vmatprep.subr.bf16.mxu0 %v28235_v57  ;;  %v28286_v57 = vld [vmem:[%s40002_s2 + $0xd4] ss:$80 sps:$4 sm:$0xff]  }
 0x56f   : > { %14876 = vmatmul.mubr.bf16.vlgmr.msra.gmra.mrb[20].mxu1 %v32156_v55 }
 0x570   : > { %15163 = vmatmul.mubr.bf16.vlgmr.msra.gmra.mrb[24].mxu0 %v32156_v55  ;;  %14885 = vmatpush1.bf16.msra.mxu1 %v28230_v56  ;;  %v28281_v56 = vld [vmem:[%s40002_s2 + $0x38] ss:$80 sps:$4 sm:$0xff]  }
 0x571   : > { %15172 = vmatpush1.bf16.msra.mxu0 %v28233_v58  ;;  %14886 = vmatprep.subr.bf16.mxu1 %v28238_v49  ;;  %v28284_v58 = vld [vmem:[%s40002_s2 + $0xd0] ss:$80 sps:$4 sm:$0xff]   ;;  %v28287_v49 = vld [vmem:[%s40002_s2 + $0xd8] ss:$80 sps:$4 sm:$0xff]  }
 0x572   : > { %15173 = vmatprep.subr.bf16.mxu0 %v28241_v39  ;;  %14916 = vmatprep.mubr.bf16.mxu1 %v30659_v2  ;;  %v28292_v39 = vld [vmem:[%s40002_s2 + $0x174] ss:$80 sps:$4 sm:$0xff]  }
 0x573   : > { %15203 = vmatprep.mubr.bf16.mxu0 %v30659_v2 }
 0x574   : > { %14887 = vmatpush1.bf16.msra.mxu1 %v28236_v1  ;;  %v28289_v1 = vld [vmem:[%s40002_s2 + $0xdc] ss:$80 sps:$4 sm:$0xff]  }
 0x575   : > { %15174 = vmatpush1.bf16.msra.mxu0 %v28239_v61  ;;  %14888 = vmatprep.subr.bf16.mxu1 %v28244_v0  ;;  %v28295_v61 = vld [vmem:[%s40002_s2 + $0x17c] ss:$80 sps:$4 sm:$0xff]   ;;  %v28290_v0 = vld [vmem:[%s40002_s2 + $0x170] ss:$80 sps:$4 sm:$0xff]  }
 0x576   : > { %15175 = vmatprep.subr.bf16.mxu0 %v28247_v18  ;;  %v28298_v18 = vld [vmem:[%s40002_s2 + $0x214] ss:$80 sps:$4 sm:$0xff]  }
 0x578   : > { %14889 = vmatpush1.bf16.msra.mxu1 %v28242_v3  ;;  %v28293_v3 = vld [vmem:[%s40002_s2 + $0x178] ss:$80 sps:$4 sm:$0xff]  }
 0x579   : > { %15176 = vmatpush1.bf16.msra.mxu0 %v28245_v5  ;;  %14890 = vmatprep.subr.bf16.mxu1 %v28250_v47  ;;  %v28296_v5 = vld [vmem:[%s40002_s2 + $0x210] ss:$80 sps:$4 sm:$0xff]   ;;  %v28301_v47 = vld [vmem:[%s40002_s2 + $0x21c] ss:$80 sps:$4 sm:$0xff]  }
 0x57a   : > { %15177 = vmatprep.subr.bf16.mxu0 %v28253_v12  ;;  %v28304_v12 = vld [vmem:[%s40002_s2 + $0x2b4] ss:$80 sps:$4 sm:$0xff]  }
 0x57c   : > { %14891 = vmatpush1.bf16.msra.mxu1 %v28248_v8  ;;  %v28299_v8 = vld [vmem:[%s40002_s2 + $0x218] ss:$80 sps:$4 sm:$0xff]  }
 0x57d   : > { %15178 = vmatpush1.bf16.msra.mxu0 %v28251_v27  ;;  %14892 = vmatprep.subr.bf16.mxu1 %v28256_v59  ;;  %v28302_v27 = vld [vmem:[%s40002_s2 + $0x2b0] ss:$80 sps:$4 sm:$0xff]   ;;  %v28307_v59 = vld [vmem:[%s40002_s2 + $0x2bc] ss:$80 sps:$4 sm:$0xff]  }
 0x57e   : > { %15179 = vmatprep.subr.bf16.mxu0 %v28259_v19  ;;  %v28310_v19 = vld [vmem:[%s40002_s2 + $0x354] ss:$80 sps:$4 sm:$0xff]  }
 0x580   : > { %14893 = vmatpush1.bf16.msra.mxu1 %v28254_v15  ;;  %v28305_v15 = vld [vmem:[%s40002_s2 + $0x2b8] ss:$80 sps:$4 sm:$0xff]  }
 0x581   : > { %15180 = vmatpush1.bf16.msra.mxu0 %v28257_v20  ;;  %14894 = vmatprep.subr.bf16.mxu1 %v28262_v21  ;;  %v28308_v20 = vld [vmem:[%s40002_s2 + $0x350] ss:$80 sps:$4 sm:$0xff]   ;;  %v28313_v21 = vld [vmem:[%s40002_s2 + $0x35c] ss:$80 sps:$4 sm:$0xff]  }
 0x582   : > { %15181 = vmatprep.subr.bf16.mxu0 %v28265_v25  ;;  %v28316_v25 = vld [vmem:[%s40002_s2 + $0x3f4] ss:$80 sps:$4 sm:$0xff]  }
 0x584   : > { %14895 = vmatpush1.bf16.msra.mxu1 %v28260_v22  ;;  %v28311_v22 = vld [vmem:[%s40002_s2 + $0x358] ss:$80 sps:$4 sm:$0xff]  }
 0x585   : > { %15182 = vmatpush1.bf16.msra.mxu0 %v28263_v23  ;;  %14896 = vmatprep.subr.bf16.mxu1 %v28268_v28  ;;  %v28314_v23 = vld [vmem:[%s40002_s2 + $0x3f0] ss:$80 sps:$4 sm:$0xff]   ;;  %v28319_v28 = vld [vmem:[%s40002_s2 + $0x3fc] ss:$80 sps:$4 sm:$0xff]  }
 0x586   : > { %15183 = vmatprep.subr.bf16.mxu0 %v28271_v11  ;;  %v28322_v11 = vld [vmem:[%s40002_s2 + $0x494] ss:$80 sps:$4 sm:$0xff]  }
 0x588   : > { %14897 = vmatpush1.bf16.msra.mxu1 %v28266_v40  ;;  %v28317_v40 = vld [vmem:[%s40002_s2 + $0x3f8] ss:$80 sps:$4 sm:$0xff]  }
 0x589   : > { %15184 = vmatpush1.bf16.msra.mxu0 %v28269_v29  ;;  %14898 = vmatprep.subr.bf16.mxu1 %v28274_v30  ;;  %v28320_v29 = vld [vmem:[%s40002_s2 + $0x490] ss:$80 sps:$4 sm:$0xff]   ;;  %v28325_v30 = vld [vmem:[%s40002_s2 + $0x49c] ss:$80 sps:$4 sm:$0xff]  }
 0x58a   : > { %15185 = vmatprep.subr.bf16.mxu0 %v28277_v33  ;;  %v28328_v33 = vld [vmem:[%s40002_s2 + $0x534] ss:$80 sps:$4 sm:$0xff]  }
 0x58c   : > { %14899 = vmatpush1.bf16.msra.mxu1 %v28272_v32  ;;  %v28323_v32 = vld [vmem:[%s40002_s2 + $0x498] ss:$80 sps:$4 sm:$0xff]  }
 0x58d   : > { %15186 = vmatpush1.bf16.msra.mxu0 %v28275_v36  ;;  %15212 = vmatprep.subr.bf16.mxu1 %v28280_v17  ;;  %v28326_v36 = vld [vmem:[%s40002_s2 + $0x530] ss:$80 sps:$4 sm:$0xff]   ;;  %v28331_v17 = vld [vmem:[%s40002_s2 + $0x53c] ss:$80 sps:$4 sm:$0xff]  }
 0x58e   : > { %15499 = vmatprep.subr.bf16.mxu0 %v28283_v44  ;;  %v28329_v44 = vld [vmem:[%s40002_s2 + $0x538] ss:$80 sps:$4 sm:$0xff]  }
 0x58f   : > { %14917 = vmatmul.mubr.bf16.vlgmr.msra.gmra.mrb[20].mxu1 %v32265_v31 }
 0x590   : > { %15204 = vmatmul.mubr.bf16.vlgmr.msra.gmra.mrb[24].mxu0 %v32265_v31  ;;  %15213 = vmatpush1.bf16.msra.mxu1 %v28278_v26  ;;  %v28334_v26 = vld [vmem:[%s40002_s2 + $0x5d4] ss:$80 sps:$4 sm:$0xff]  }
 0x591   : > { %15244 = vmatprep.mubr.bf16.mxu1 %v31083_v4  ;;  %15500 = vmatpush1.bf16.msra.mxu0 %v28281_v56  ;;  %v28332_v56 = vld [vmem:[%s40002_s2 + $0x5d0] ss:$80 sps:$4 sm:$0xff]  }
 0x592   : > { %15531 = vmatprep.mubr.bf16.mxu0 %v31083_v4  ;;  %15214 = vmatprep.subr.bf16.mxu1 %v28286_v57  ;;  %v28337_v57 = vld [vmem:[%s40002_s2 + $0x5dc] ss:$80 sps:$4 sm:$0xff]  }
 0x593   : > { %15501 = vmatprep.subr.bf16.mxu0 %v28289_v1  ;;  %v28338_v1 = vld [vmem:[%s40002_s2 + $0x670] ss:$80 sps:$4 sm:$0xff]  }
 0x594   : > { %15215 = vmatpush1.bf16.msra.mxu1 %v28284_v58  ;;  %v28335_v58 = vld [vmem:[%s40002_s2 + $0x5d8] ss:$80 sps:$4 sm:$0xff]  }
 0x595   : > { %15502 = vmatpush1.bf16.msra.mxu0 %v28287_v49  ;;  %15216 = vmatprep.subr.bf16.mxu1 %v28292_v39  ;;  %v28340_v49 = vld [vmem:[%s40002_s2 + $0x674] ss:$80 sps:$4 sm:$0xff]   ;;  %v28343_v39 = vld [vmem:[%s40002_s2 + $0x67c] ss:$80 sps:$4 sm:$0xff]  }
 0x596   : > { %15503 = vmatprep.subr.bf16.mxu0 %v28295_v61  ;;  %v28341_v61 = vld [vmem:[%s40002_s2 + $0x678] ss:$80 sps:$4 sm:$0xff]  }
 0x598   : > { %15217 = vmatpush1.bf16.msra.mxu1 %v28290_v0  ;;  %v28346_v0 = vld [vmem:[%s40002_s2 + $0x714] ss:$80 sps:$4 sm:$0xff]  }
 0x599   : > { %15504 = vmatpush1.bf16.msra.mxu0 %v28293_v3  ;;  %15218 = vmatprep.subr.bf16.mxu1 %v28298_v18  ;;  %v28344_v3 = vld [vmem:[%s40002_s2 + $0x710] ss:$80 sps:$4 sm:$0xff]   ;;  %v28349_v18 = vld [vmem:[%s40002_s2 + $0x71c] ss:$80 sps:$4 sm:$0xff]  }
 0x59a   : > { %15505 = vmatprep.subr.bf16.mxu0 %v28301_v47  ;;  %v28352_v47 = vld [vmem:[%s40002_s2 + $0x7b4] ss:$80 sps:$4 sm:$0xff]  }
 0x59c   : > { %15219 = vmatpush1.bf16.msra.mxu1 %v28296_v5  ;;  %v28347_v5 = vld [vmem:[%s40002_s2 + $0x718] ss:$80 sps:$4 sm:$0xff]  }
 0x59d   : > { %15506 = vmatpush1.bf16.msra.mxu0 %v28299_v8  ;;  %15220 = vmatprep.subr.bf16.mxu1 %v28304_v12  ;;  %v28350_v8 = vld [vmem:[%s40002_s2 + $0x7b0] ss:$80 sps:$4 sm:$0xff]   ;;  %v28355_v12 = vld [vmem:[%s40002_s2 + $0x7bc] ss:$80 sps:$4 sm:$0xff]  }
 0x59e   : > { %15507 = vmatprep.subr.bf16.mxu0 %v28307_v59  ;;  %v28358_v59 = vld [vmem:[%s40002_s2 + $0x854] ss:$80 sps:$4 sm:$0xff]  }
 0x5a0   : > { %15221 = vmatpush1.bf16.msra.mxu1 %v28302_v27  ;;  %v28353_v27 = vld [vmem:[%s40002_s2 + $0x7b8] ss:$80 sps:$4 sm:$0xff]  }
 0x5a1   : > { %15508 = vmatpush1.bf16.msra.mxu0 %v28305_v15  ;;  %15222 = vmatprep.subr.bf16.mxu1 %v28310_v19  ;;  %v28356_v15 = vld [vmem:[%s40002_s2 + $0x850] ss:$80 sps:$4 sm:$0xff]   ;;  %v28361_v19 = vld [vmem:[%s40002_s2 + $0x85c] ss:$80 sps:$4 sm:$0xff]  }
 0x5a2   : > { %15509 = vmatprep.subr.bf16.mxu0 %v28313_v21  ;;  %v28364_v21 = vld [vmem:[%s40002_s2 + $0x8f4] ss:$80 sps:$4 sm:$0xff]  }
 0x5a4   : > { %15223 = vmatpush1.bf16.msra.mxu1 %v28308_v20  ;;  %v28359_v20 = vld [vmem:[%s40002_s2 + $0x858] ss:$80 sps:$4 sm:$0xff]  }
 0x5a5   : > { %15510 = vmatpush1.bf16.msra.mxu0 %v28311_v22  ;;  %15224 = vmatprep.subr.bf16.mxu1 %v28316_v25  ;;  %v28362_v22 = vld [vmem:[%s40002_s2 + $0x8f0] ss:$80 sps:$4 sm:$0xff]   ;;  %v28367_v25 = vld [vmem:[%s40002_s2 + $0x8fc] ss:$80 sps:$4 sm:$0xff]  }
 0x5a6   : > { %15511 = vmatprep.subr.bf16.mxu0 %v28319_v28  ;;  %v28370_v28 = vld [vmem:[%s40002_s2 + $0x994] ss:$80 sps:$4 sm:$0xff]  }
 0x5a8   : > { %15225 = vmatpush1.bf16.msra.mxu1 %v28314_v23  ;;  %v28365_v23 = vld [vmem:[%s40002_s2 + $0x8f8] ss:$80 sps:$4 sm:$0xff]  }
 0x5a9   : > { %15512 = vmatpush1.bf16.msra.mxu0 %v28317_v40  ;;  %15226 = vmatprep.subr.bf16.mxu1 %v28322_v11  ;;  %v28368_v40 = vld [vmem:[%s40002_s2 + $0x990] ss:$80 sps:$4 sm:$0xff]   ;;  %v28373_v11 = vld [vmem:[%s40002_s2 + $0x99c] ss:$80 sps:$4 sm:$0xff]  }
 0x5aa   : > { %15513 = vmatprep.subr.bf16.mxu0 %v28325_v30  ;;  %v28376_v30 = vld [vmem:[%s40002_s2 + $0xa34] ss:$80 sps:$4 sm:$0xff]  }
 0x5ac   : > { %15227 = vmatpush1.bf16.msra.mxu1 %v28320_v29  ;;  %v28371_v29 = vld [vmem:[%s40002_s2 + $0x998] ss:$80 sps:$4 sm:$0xff]  }
 0x5ad   : > { %15514 = vmatpush1.bf16.msra.mxu0 %v28323_v32  ;;  %15228 = vmatprep.subr.bf16.mxu1 %v28328_v33  ;;  %v28374_v32 = vld [vmem:[%s40002_s2 + $0xa30] ss:$80 sps:$4 sm:$0xff]   ;;  %v28379_v33 = vld [vmem:[%s40002_s2 + $0xa3c] ss:$80 sps:$4 sm:$0xff]  }
 0x5ae   : > { %15515 = vmatprep.subr.bf16.mxu0 %v28331_v17  ;;  %v28382_v17 = vld [vmem:[%s40002_s2 + $0xad4] ss:$80 sps:$4 sm:$0xff]  }
 0x5b0   : > { %15229 = vmatpush1.bf16.msra.mxu1 %v28326_v36  ;;  %v28377_v36 = vld [vmem:[%s40002_s2 + $0xa38] ss:$80 sps:$4 sm:$0xff]  }
 0x5b1   : > { %15516 = vmatpush1.bf16.msra.mxu0 %v28329_v44  ;;  %15230 = vmatprep.subr.bf16.mxu1 %v28334_v26  ;;  %v28380_v44 = vld [vmem:[%s40002_s2 + $0xad0] ss:$80 sps:$4 sm:$0xff]   ;;  %v28383_v26 = vld [vmem:[%s40002_s2 + $0xad8] ss:$80 sps:$4 sm:$0xff]  }
 0x5b2   : > { %15517 = vmatprep.subr.bf16.mxu0 %v28337_v57  ;;  %v28388_v57 = vld [vmem:[%s40002_s2 + $0xb74] ss:$80 sps:$4 sm:$0xff]  }
 0x5b4   : > { %15231 = vmatpush1.bf16.msra.mxu1 %v28332_v56  ;;  %v28385_v56 = vld [vmem:[%s40002_s2 + $0xadc] ss:$80 sps:$4 sm:$0xff]  }
 0x5b5   : > { %15518 = vmatpush1.bf16.msra.mxu0 %v28335_v58  ;;  %15232 = vmatprep.subr.bf16.mxu1 %v28340_v49  ;;  %v28391_v58 = vld [vmem:[%s40002_s2 + $0xb7c] ss:$80 sps:$4 sm:$0xff]   ;;  %v28386_v49 = vld [vmem:[%s40002_s2 + $0xb70] ss:$80 sps:$4 sm:$0xff]  }
 0x5b6   : > { %15519 = vmatprep.subr.bf16.mxu0 %v28343_v39  ;;  %v28394_v39 = vld [vmem:[%s40002_s2 + $0xc14] ss:$80 sps:$4 sm:$0xff]  }
 0x5b8   : > { %15233 = vmatpush1.bf16.msra.mxu1 %v28338_v1  ;;  %v28389_v1 = vld [vmem:[%s40002_s2 + $0xb78] ss:$80 sps:$4 sm:$0xff]  }
 0x5b9   : > { %15520 = vmatpush1.bf16.msra.mxu0 %v28341_v61  ;;  %15234 = vmatprep.subr.bf16.mxu1 %v28346_v0  ;;  %v28392_v61 = vld [vmem:[%s40002_s2 + $0xc10] ss:$80 sps:$4 sm:$0xff]   ;;  %v28397_v0 = vld [vmem:[%s40002_s2 + $0xc1c] ss:$80 sps:$4 sm:$0xff]  }
 0x5ba   : > { %15521 = vmatprep.subr.bf16.mxu0 %v28349_v18  ;;  %v28400_v18 = vld [vmem:[%s40002_s2 + $0xcb4] ss:$80 sps:$4 sm:$0xff]  }
 0x5bc   : > { %15235 = vmatpush1.bf16.msra.mxu1 %v28344_v3  ;;  %v28395_v3 = vld [vmem:[%s40002_s2 + $0xc18] ss:$80 sps:$4 sm:$0xff]  }
 0x5bd   : > { %15522 = vmatpush1.bf16.msra.mxu0 %v28347_v5  ;;  %15236 = vmatprep.subr.bf16.mxu1 %v28352_v47  ;;  %v28398_v5 = vld [vmem:[%s40002_s2 + $0xcb0] ss:$80 sps:$4 sm:$0xff]   ;;  %v28403_v47 = vld [vmem:[%s40002_s2 + $0xcbc] ss:$80 sps:$4 sm:$0xff]  }
 0x5be   : > { %15523 = vmatprep.subr.bf16.mxu0 %v28355_v12  ;;  %v28406_v12 = vld [vmem:[%s40002_s2 + $0xd54] ss:$80 sps:$4 sm:$0xff]  }
 0x5c0   : > { %15237 = vmatpush1.bf16.msra.mxu1 %v28350_v8  ;;  %v28401_v8 = vld [vmem:[%s40002_s2 + $0xcb8] ss:$80 sps:$4 sm:$0xff]  }
 0x5c1   : > { %15524 = vmatpush1.bf16.msra.mxu0 %v28353_v27  ;;  %15238 = vmatprep.subr.bf16.mxu1 %v28358_v59  ;;  %v28404_v27 = vld [vmem:[%s40002_s2 + $0xd50] ss:$80 sps:$4 sm:$0xff]   ;;  %v28409_v59 = vld [vmem:[%s40002_s2 + $0xd5c] ss:$80 sps:$4 sm:$0xff]  }
 0x5c2   : > { %15525 = vmatprep.subr.bf16.mxu0 %v28361_v19  ;;  %v28412_v19 = vld [vmem:[%s40002_s2 + $0xdf4] ss:$80 sps:$4 sm:$0xff]  }
 0x5c4   : > { %15239 = vmatpush1.bf16.msra.mxu1 %v28356_v15  ;;  %v28407_v15 = vld [vmem:[%s40002_s2 + $0xd58] ss:$80 sps:$4 sm:$0xff]  }
 0x5c5   : > { %15526 = vmatpush1.bf16.msra.mxu0 %v28359_v20  ;;  %15240 = vmatprep.subr.bf16.mxu1 %v28364_v21  ;;  %v28415_v20 = vld [vmem:[%s40002_s2 + $0xdfc] ss:$80 sps:$4 sm:$0xff]   ;;  %v28410_v21 = vld [vmem:[%s40002_s2 + $0xdf0] ss:$80 sps:$4 sm:$0xff]  }
 0x5c6   : > { %15527 = vmatprep.subr.bf16.mxu0 %v28367_v25  ;;  %v28418_v25 = vld [vmem:[%s40002_s2 + $0xe94] ss:$80 sps:$4 sm:$0xff]  }
 0x5c8   : > { %15241 = vmatpush1.bf16.msra.mxu1 %v28362_v22  ;;  %v28413_v22 = vld [vmem:[%s40002_s2 + $0xdf8] ss:$80 sps:$4 sm:$0xff]  }
 0x5c9   : > { %15528 = vmatpush1.bf16.msra.mxu0 %v28365_v23  ;;  %15242 = vmatprep.subr.bf16.mxu1 %v28370_v28  ;;  %v28421_v23 = vld [vmem:[%s40002_s2 + $0xe9c] ss:$80 sps:$4 sm:$0xff]   ;;  %v28416_v28 = vld [vmem:[%s40002_s2 + $0xe90] ss:$80 sps:$4 sm:$0xff]  }
 0x5ca   : > { %15529 = vmatprep.subr.bf16.mxu0 %v28373_v11  ;;  %v28424_v11 = vld [vmem:[%s40002_s2 + $0xf34] ss:$80 sps:$4 sm:$0xff]  }
 0x5cc   : > { %15243 = vmatpush1.bf16.msra.mxu1 %v28368_v40  ;;  %v28419_v40 = vld [vmem:[%s40002_s2 + $0xe98] ss:$80 sps:$4 sm:$0xff]  }
 0x5cd   : > { %15530 = vmatpush1.bf16.msra.mxu0 %v28371_v29  ;;  %15253 = vmatprep.subr.bf16.mxu1 %v28376_v30  ;;  %v28422_v29 = vld [vmem:[%s40002_s2 + $0xf30] ss:$80 sps:$4 sm:$0xff]   ;;  %v28427_v30 = vld [vmem:[%s40002_s2 + $0xf3c] ss:$80 sps:$4 sm:$0xff]  }
 0x5ce   : > { %15540 = vmatprep.subr.bf16.mxu0 %v28379_v33  ;;  %v28430_v33 = vld [vmem:[%s40002_s2 + $0xfd4] ss:$80 sps:$4 sm:$0xff]  }
 0x5cf   : > { %15245 = vmatmul.mubr.bf16.vlgmr.msra.gmra.mrb[24].mxu1 %v31085_v7 }
 0x5d0   : > { %15532 = vmatmul.mubr.bf16.vlgmr.msra.gmra.mrb[28].mxu0 %v31085_v7  ;;  %15254 = vmatpush1.bf16.msra.mxu1 %v28374_v32  ;;  %v28425_v32 = vld [vmem:[%s40002_s2 + $0xf38] ss:$80 sps:$4 sm:$0xff]  }
 0x5d1   : > { %15285 = vmatprep.mubr.bf16.mxu1 %v31103_v14  ;;  %15541 = vmatpush1.bf16.msra.mxu0 %v28377_v36  ;;  %v28428_v36 = vld [vmem:[%s40002_s2 + $0xfd0] ss:$80 sps:$4 sm:$0xff]  }
 0x5d2   : > { %15572 = vmatprep.mubr.bf16.mxu0 %v31103_v14  ;;  %15255 = vmatprep.subr.bf16.mxu1 %v28382_v17  ;;  %v28433_v17 = vld [vmem:[%s40002_s2 + $0xfdc] ss:$80 sps:$4 sm:$0xff]  }
 0x5d3   : > { %15542 = vmatprep.subr.bf16.mxu0 %v28385_v56  ;;  %v28434_v56 = vld [vmem:[%s40002_s2 + $0x1070] ss:$80 sps:$4 sm:$0xff]  }
 0x5d4   : > { %15256 = vmatpush1.bf16.msra.mxu1 %v28380_v44  ;;  %v28431_v44 = vld [vmem:[%s40002_s2 + $0xfd8] ss:$80 sps:$4 sm:$0xff]  }
 0x5d5   : > { %15543 = vmatpush1.bf16.msra.mxu0 %v28383_v26  ;;  %15257 = vmatprep.subr.bf16.mxu1 %v28388_v57  ;;  %v28436_v26 = vld [vmem:[%s40002_s2 + $0x1074] ss:$80 sps:$4 sm:$0xff]   ;;  %v28439_v57 = vld [vmem:[%s40002_s2 + $0x107c] ss:$80 sps:$4 sm:$0xff]  }
 0x5d6   : > { %15544 = vmatprep.subr.bf16.mxu0 %v28391_v58  ;;  %v28437_v58 = vld [vmem:[%s40002_s2 + $0x1078] ss:$80 sps:$4 sm:$0xff]  }
 0x5d8   : > { %15258 = vmatpush1.bf16.msra.mxu1 %v28386_v49  ;;  %v28442_v49 = vld [vmem:[%s40002_s2 + $0x1114] ss:$80 sps:$4 sm:$0xff]  }
 0x5d9   : > { %15545 = vmatpush1.bf16.msra.mxu0 %v28389_v1  ;;  %15259 = vmatprep.subr.bf16.mxu1 %v28394_v39  ;;  %v28440_v1 = vld [vmem:[%s40002_s2 + $0x1110] ss:$80 sps:$4 sm:$0xff]   ;;  %v28445_v39 = vld [vmem:[%s40002_s2 + $0x111c] ss:$80 sps:$4 sm:$0xff]  }
 0x5da   : > { %15546 = vmatprep.subr.bf16.mxu0 %v28397_v0  ;;  %v28448_v0 = vld [vmem:[%s40002_s2 + $0x11b4] ss:$80 sps:$4 sm:$0xff]  }
 0x5dc   : > { %15260 = vmatpush1.bf16.msra.mxu1 %v28392_v61  ;;  %v28443_v61 = vld [vmem:[%s40002_s2 + $0x1118] ss:$80 sps:$4 sm:$0xff]  }
 0x5dd   : > { %15547 = vmatpush1.bf16.msra.mxu0 %v28395_v3  ;;  %15261 = vmatprep.subr.bf16.mxu1 %v28400_v18  ;;  %v28446_v3 = vld [vmem:[%s40002_s2 + $0x11b0] ss:$80 sps:$4 sm:$0xff]   ;;  %v28451_v18 = vld [vmem:[%s40002_s2 + $0x11bc] ss:$80 sps:$4 sm:$0xff]  }
 0x5de   : > { %15548 = vmatprep.subr.bf16.mxu0 %v28403_v47  ;;  %v28454_v47 = vld [vmem:[%s40002_s2 + $0x1254] ss:$80 sps:$4 sm:$0xff]  }
 0x5e0   : > { %15262 = vmatpush1.bf16.msra.mxu1 %v28398_v5  ;;  %v28449_v5 = vld [vmem:[%s40002_s2 + $0x11b8] ss:$80 sps:$4 sm:$0xff]  }
 0x5e1   : > { %15549 = vmatpush1.bf16.msra.mxu0 %v28401_v8  ;;  %15263 = vmatprep.subr.bf16.mxu1 %v28406_v12  ;;  %v28452_v8 = vld [vmem:[%s40002_s2 + $0x1250] ss:$80 sps:$4 sm:$0xff]   ;;  %v28457_v12 = vld [vmem:[%s40002_s2 + $0x125c] ss:$80 sps:$4 sm:$0xff]  }
 0x5e2   : > { %15550 = vmatprep.subr.bf16.mxu0 %v28409_v59  ;;  %v28460_v59 = vld [vmem:[%s40002_s2 + $0x12f4] ss:$80 sps:$4 sm:$0xff]  }
 0x5e4   : > { %15264 = vmatpush1.bf16.msra.mxu1 %v28404_v27  ;;  %v28455_v27 = vld [vmem:[%s40002_s2 + $0x1258] ss:$80 sps:$4 sm:$0xff]  }
 0x5e5   : > { %15551 = vmatpush1.bf16.msra.mxu0 %v28407_v15  ;;  %15265 = vmatprep.subr.bf16.mxu1 %v28412_v19  ;;  %v28458_v15 = vld [vmem:[%s40002_s2 + $0x12f0] ss:$80 sps:$4 sm:$0xff]   ;;  %v28463_v19 = vld [vmem:[%s40002_s2 + $0x12fc] ss:$80 sps:$4 sm:$0xff]  }
 0x5e6   : > { %15552 = vmatprep.subr.bf16.mxu0 %v28415_v20  ;;  %v28461_v20 = vld [vmem:[%s40002_s2 + $0x12f8] ss:$80 sps:$4 sm:$0xff]  }
 0x5e8   : > { %15266 = vmatpush1.bf16.msra.mxu1 %v28410_v21  ;;  %v28466_v21 = vld [vmem:[%s40002_s2 + $0x1394] ss:$80 sps:$4 sm:$0xff]  }
 0x5e9   : > { %15553 = vmatpush1.bf16.msra.mxu0 %v28413_v22  ;;  %15267 = vmatprep.subr.bf16.mxu1 %v28418_v25  ;;  %v28464_v22 = vld [vmem:[%s40002_s2 + $0x1390] ss:$80 sps:$4 sm:$0xff]   ;;  %v28469_v25 = vld [vmem:[%s40002_s2 + $0x139c] ss:$80 sps:$4 sm:$0xff]  }
 0x5ea   : > { %15554 = vmatprep.subr.bf16.mxu0 %v28421_v23  ;;  %v28467_v23 = vld [vmem:[%s40002_s2 + $0x1398] ss:$80 sps:$4 sm:$0xff]  }
 0x5ec   : > { %15268 = vmatpush1.bf16.msra.mxu1 %v28416_v28  ;;  %v28472_v28 = vld [vmem:[%s40002_s2 + $0x1434] ss:$80 sps:$4 sm:$0xff]  }
 0x5ed   : > { %15555 = vmatpush1.bf16.msra.mxu0 %v28419_v40  ;;  %15269 = vmatprep.subr.bf16.mxu1 %v28424_v11  ;;  %v28470_v40 = vld [vmem:[%s40002_s2 + $0x1430] ss:$80 sps:$4 sm:$0xff]   ;;  %v28475_v11 = vld [vmem:[%s40002_s2 + $0x143c] ss:$80 sps:$4 sm:$0xff]  }
 0x5ee   : > { %15556 = vmatprep.subr.bf16.mxu0 %v28427_v30  ;;  %v28478_v30 = vld [vmem:[%s40002_s2 + $0x14d4] ss:$80 sps:$4 sm:$0xff]  }
 0x5f0   : > { %15270 = vmatpush1.bf16.msra.mxu1 %v28422_v29  ;;  %v28473_v29 = vld [vmem:[%s40002_s2 + $0x1438] ss:$80 sps:$4 sm:$0xff]  }
 0x5f1   : > { %15557 = vmatpush1.bf16.msra.mxu0 %v28425_v32  ;;  %15271 = vmatprep.subr.bf16.mxu1 %v28430_v33  ;;  %v28476_v32 = vld [vmem:[%s40002_s2 + $0x14d0] ss:$80 sps:$4 sm:$0xff]   ;;  %v28481_v33 = vld [vmem:[%s40002_s2 + $0x14dc] ss:$80 sps:$4 sm:$0xff]  }
 0x5f2   : > { %15558 = vmatprep.subr.bf16.mxu0 %v28433_v17  ;;  %v28484_v17 = vld [vmem:[%s40002_s2 + $0x1574] ss:$80 sps:$4 sm:$0xff]  }
 0x5f4   : > { %15272 = vmatpush1.bf16.msra.mxu1 %v28428_v36  ;;  %v28479_v36 = vld [vmem:[%s40002_s2 + $0x14d8] ss:$80 sps:$4 sm:$0xff]  }
 0x5f5   : > { %15559 = vmatpush1.bf16.msra.mxu0 %v28431_v44  ;;  %15273 = vmatprep.subr.bf16.mxu1 %v28436_v26  ;;  %v28487_v44 = vld [vmem:[%s40002_s2 + $0x157c] ss:$80 sps:$4 sm:$0xff]   ;;  %v28482_v26 = vld [vmem:[%s40002_s2 + $0x1570] ss:$80 sps:$4 sm:$0xff]  }
 0x5f6   : > { %15560 = vmatprep.subr.bf16.mxu0 %v28439_v57  ;;  %v28490_v57 = vld [vmem:[%s40002_s2 + $0x1614] ss:$80 sps:$4 sm:$0xff]  }
 0x5f8   : > { %15274 = vmatpush1.bf16.msra.mxu1 %v28434_v56  ;;  %v28485_v56 = vld [vmem:[%s40002_s2 + $0x1578] ss:$80 sps:$4 sm:$0xff]  }
 0x5f9   : > { %15561 = vmatpush1.bf16.msra.mxu0 %v28437_v58  ;;  %15275 = vmatprep.subr.bf16.mxu1 %v28442_v49  ;;  %v28493_v58 = vld [vmem:[%s40002_s2 + $0x161c] ss:$80 sps:$4 sm:$0xff]   ;;  %v28488_v49 = vld [vmem:[%s40002_s2 + $0x1610] ss:$80 sps:$4 sm:$0xff]  }
 0x5fa   : > { %15562 = vmatprep.subr.bf16.mxu0 %v28445_v39  ;;  %v28496_v39 = vld [vmem:[%s40002_s2 + $0x16b4] ss:$80 sps:$4 sm:$0xff]  }
 0x5fc   : > { %15276 = vmatpush1.bf16.msra.mxu1 %v28440_v1  ;;  %v28491_v1 = vld [vmem:[%s40002_s2 + $0x1618] ss:$80 sps:$4 sm:$0xff]  }
 0x5fd   : > { %15563 = vmatpush1.bf16.msra.mxu0 %v28443_v61  ;;  %15277 = vmatprep.subr.bf16.mxu1 %v28448_v0  ;;  %v28499_v61 = vld [vmem:[%s40002_s2 + $0x16bc] ss:$80 sps:$4 sm:$0xff]   ;;  %v28494_v0 = vld [vmem:[%s40002_s2 + $0x16b0] ss:$80 sps:$4 sm:$0xff]  }
 0x5fe   : > { %15564 = vmatprep.subr.bf16.mxu0 %v28451_v18  ;;  %v28502_v18 = vld [vmem:[%s40002_s2 + $0x1754] ss:$80 sps:$4 sm:$0xff]  }
 0x600   : > { %15278 = vmatpush1.bf16.msra.mxu1 %v28446_v3  ;;  %v28497_v3 = vld [vmem:[%s40002_s2 + $0x16b8] ss:$80 sps:$4 sm:$0xff]  }
 0x601   : > { %15565 = vmatpush1.bf16.msra.mxu0 %v28449_v5  ;;  %15279 = vmatprep.subr.bf16.mxu1 %v28454_v47  ;;  %v28505_v5 = vld [vmem:[%s40002_s2 + $0x175c] ss:$80 sps:$4 sm:$0xff]   ;;  %v28500_v47 = vld [vmem:[%s40002_s2 + $0x1750] ss:$80 sps:$4 sm:$0xff]  }
 0x602   : > { %15566 = vmatprep.subr.bf16.mxu0 %v28457_v12  ;;  %v28508_v12 = vld [vmem:[%s40002_s2 + $0x17f4] ss:$80 sps:$4 sm:$0xff]  }
 0x604   : > { %15280 = vmatpush1.bf16.msra.mxu1 %v28452_v8  ;;  %v28503_v8 = vld [vmem:[%s40002_s2 + $0x1758] ss:$80 sps:$4 sm:$0xff]  }
 0x605   : > { %15567 = vmatpush1.bf16.msra.mxu0 %v28455_v27  ;;  %15281 = vmatprep.subr.bf16.mxu1 %v28460_v59  ;;  %v28511_v27 = vld [vmem:[%s40002_s2 + $0x17fc] ss:$80 sps:$4 sm:$0xff]   ;;  %v28506_v59 = vld [vmem:[%s40002_s2 + $0x17f0] ss:$80 sps:$4 sm:$0xff]  }
 0x606   : > { %15568 = vmatprep.subr.bf16.mxu0 %v28463_v19  ;;  %v28514_v19 = vld [vmem:[%s40002_s2 + $0x1894] ss:$80 sps:$4 sm:$0xff]  }
 0x608   : > { %15282 = vmatpush1.bf16.msra.mxu1 %v28458_v15  ;;  %v28509_v15 = vld [vmem:[%s40002_s2 + $0x17f8] ss:$80 sps:$4 sm:$0xff]  }
 0x609   : > { %15569 = vmatpush1.bf16.msra.mxu0 %v28461_v20  ;;  %15283 = vmatprep.subr.bf16.mxu1 %v28466_v21  ;;  %v28517_v20 = vld [vmem:[%s40002_s2 + $0x189c] ss:$80 sps:$4 sm:$0xff]   ;;  %v28512_v21 = vld [vmem:[%s40002_s2 + $0x1890] ss:$80 sps:$4 sm:$0xff]  }
 0x60a   : > { %15570 = vmatprep.subr.bf16.mxu0 %v28469_v25  ;;  %v28520_v25 = vld [vmem:[%s40002_s2 + $0x1934] ss:$80 sps:$4 sm:$0xff]  }
 0x60c   : > { %15284 = vmatpush1.bf16.msra.mxu1 %v28464_v22  ;;  %v28515_v22 = vld [vmem:[%s40002_s2 + $0x1898] ss:$80 sps:$4 sm:$0xff]  }
 0x60d   : > { %15571 = vmatpush1.bf16.msra.mxu0 %v28467_v23  ;;  %15294 = vmatprep.subr.bf16.mxu1 %v28472_v28  ;;  %v28523_v23 = vld [vmem:[%s40002_s2 + $0x193c] ss:$80 sps:$4 sm:$0xff]   ;;  %v28518_v28 = vld [vmem:[%s40002_s2 + $0x1930] ss:$80 sps:$4 sm:$0xff]  }
 0x60e   : > { %15581 = vmatprep.subr.bf16.mxu0 %v28475_v11  ;;  %v28526_v11 = vld [vmem:[%s40002_s2 + $0x19d4] ss:$80 sps:$4 sm:$0xff]  }
 0x60f   : > { %15286 = vmatmul.mubr.bf16.vlgmr.msra.gmra.mrb[24].mxu1 %v31326_v9 }
 0x610   : > { %15573 = vmatmul.mubr.bf16.vlgmr.msra.gmra.mrb[28].mxu0 %v31326_v9  ;;  %15295 = vmatpush1.bf16.msra.mxu1 %v28470_v40  ;;  %v28521_v40 = vld [vmem:[%s40002_s2 + $0x1938] ss:$80 sps:$4 sm:$0xff]  }
 0x611   : > { %15326 = vmatprep.mubr.bf16.mxu1 %v31340_v16  ;;  %15582 = vmatpush1.bf16.msra.mxu0 %v28473_v29  ;;  %v28529_v29 = vld [vmem:[%s40002_s2 + $0x19dc] ss:$80 sps:$4 sm:$0xff]  }
 0x612   : > { %15613 = vmatprep.mubr.bf16.mxu0 %v31340_v16  ;;  %15296 = vmatprep.subr.bf16.mxu1 %v28478_v30  ;;  %v28524_v30 = vld [vmem:[%s40002_s2 + $0x19d0] ss:$80 sps:$4 sm:$0xff]  }
 0x613   : > { %15583 = vmatprep.subr.bf16.mxu0 %v28481_v33  ;;  %v28532_v33 = vld [vmem:[%s40002_s2 + $0x1a74] ss:$80 sps:$4 sm:$0xff]  }
 0x614   : > { %15297 = vmatpush1.bf16.msra.mxu1 %v28476_v32  ;;  %v28527_v32 = vld [vmem:[%s40002_s2 + $0x19d8] ss:$80 sps:$4 sm:$0xff]  }
 0x615   : > { %15584 = vmatpush1.bf16.msra.mxu0 %v28479_v36  ;;  %15298 = vmatprep.subr.bf16.mxu1 %v28484_v17  ;;  %v28535_v36 = vld [vmem:[%s40002_s2 + $0x1a7c] ss:$80 sps:$4 sm:$0xff]   ;;  %v28530_v17 = vld [vmem:[%s40002_s2 + $0x1a70] ss:$80 sps:$4 sm:$0xff]  }
 0x616   : > { %15585 = vmatprep.subr.bf16.mxu0 %v28487_v44  ;;  %v28533_v44 = vld [vmem:[%s40002_s2 + $0x1a78] ss:$80 sps:$4 sm:$0xff]  }
 0x618   : > { %15299 = vmatpush1.bf16.msra.mxu1 %v28482_v26  ;;  %v28538_v26 = vld [vmem:[%s40002_s2 + $0x1b14] ss:$80 sps:$4 sm:$0xff]  }
 0x619   : > { %15586 = vmatpush1.bf16.msra.mxu0 %v28485_v56  ;;  %15300 = vmatprep.subr.bf16.mxu1 %v28490_v57  ;;  %v28541_v56 = vld [vmem:[%s40002_s2 + $0x1b1c] ss:$80 sps:$4 sm:$0xff]   ;;  %v28536_v57 = vld [vmem:[%s40002_s2 + $0x1b10] ss:$80 sps:$4 sm:$0xff]  }
 0x61a   : > { %15587 = vmatprep.subr.bf16.mxu0 %v28493_v58  ;;  %v28539_v58 = vld [vmem:[%s40002_s2 + $0x1b18] ss:$80 sps:$4 sm:$0xff]  }
 0x61c   : > { %15301 = vmatpush1.bf16.msra.mxu1 %v28488_v49  ;;  %v28544_v49 = vld [vmem:[%s40002_s2 + $0x1bb4] ss:$80 sps:$4 sm:$0xff]  }
 0x61d   : > { %15588 = vmatpush1.bf16.msra.mxu0 %v28491_v1  ;;  %15302 = vmatprep.subr.bf16.mxu1 %v28496_v39  ;;  %v28547_v1 = vld [vmem:[%s40002_s2 + $0x1bbc] ss:$80 sps:$4 sm:$0xff]   ;;  %v28542_v39 = vld [vmem:[%s40002_s2 + $0x1bb0] ss:$80 sps:$4 sm:$0xff]  }
 0x61e   : > { %15589 = vmatprep.subr.bf16.mxu0 %v28499_v61  ;;  %v28545_v61 = vld [vmem:[%s40002_s2 + $0x1bb8] ss:$80 sps:$4 sm:$0xff]  }
 0x620   : > { %15303 = vmatpush1.bf16.msra.mxu1 %v28494_v0  ;;  %v28550_v0 = vld [vmem:[%s40002_s2 + $0x1c54] ss:$80 sps:$4 sm:$0xff]  }
 0x621   : > { %15590 = vmatpush1.bf16.msra.mxu0 %v28497_v3  ;;  %15304 = vmatprep.subr.bf16.mxu1 %v28502_v18  ;;  %v28553_v3 = vld [vmem:[%s40002_s2 + $0x1c5c] ss:$80 sps:$4 sm:$0xff]   ;;  %v28548_v18 = vld [vmem:[%s40002_s2 + $0x1c50] ss:$80 sps:$4 sm:$0xff]  }
 0x622   : > { %15591 = vmatprep.subr.bf16.mxu0 %v28505_v5  ;;  %v28551_v5 = vld [vmem:[%s40002_s2 + $0x1c58] ss:$80 sps:$4 sm:$0xff]  }
 0x624   : > { %15305 = vmatpush1.bf16.msra.mxu1 %v28500_v47  ;;  %v28556_v47 = vld [vmem:[%s40002_s2 + $0x1cf4] ss:$80 sps:$4 sm:$0xff]  }
 0x625   : > { %15592 = vmatpush1.bf16.msra.mxu0 %v28503_v8  ;;  %15306 = vmatprep.subr.bf16.mxu1 %v28508_v12  ;;  %v28559_v8 = vld [vmem:[%s40002_s2 + $0x1cfc] ss:$80 sps:$4 sm:$0xff]   ;;  %v28554_v12 = vld [vmem:[%s40002_s2 + $0x1cf0] ss:$80 sps:$4 sm:$0xff]  }
 0x626   : > { %15593 = vmatprep.subr.bf16.mxu0 %v28511_v27  ;;  %v28557_v27 = vld [vmem:[%s40002_s2 + $0x1cf8] ss:$80 sps:$4 sm:$0xff]  }
 0x628   : > { %15307 = vmatpush1.bf16.msra.mxu1 %v28506_v59  ;;  %v28562_v59 = vld [vmem:[%s40002_s2 + $0x1d94] ss:$80 sps:$4 sm:$0xff]  }
 0x629   : > { %15594 = vmatpush1.bf16.msra.mxu0 %v28509_v15  ;;  %15308 = vmatprep.subr.bf16.mxu1 %v28514_v19  ;;  %v28565_v15 = vld [vmem:[%s40002_s2 + $0x1d9c] ss:$80 sps:$4 sm:$0xff]   ;;  %v28560_v19 = vld [vmem:[%s40002_s2 + $0x1d90] ss:$80 sps:$4 sm:$0xff]  }
 0x62a   : > { %15595 = vmatprep.subr.bf16.mxu0 %v28517_v20  ;;  %v28563_v20 = vld [vmem:[%s40002_s2 + $0x1d98] ss:$80 sps:$4 sm:$0xff]  }
 0x62c   : > { %15309 = vmatpush1.bf16.msra.mxu1 %v28512_v21  ;;  %v28568_v21 = vld [vmem:[%s40002_s2 + $0x1e34] ss:$80 sps:$4 sm:$0xff]  }
 0x62d   : > { %15596 = vmatpush1.bf16.msra.mxu0 %v28515_v22  ;;  %15310 = vmatprep.subr.bf16.mxu1 %v28520_v25  ;;  %v28571_v22 = vld [vmem:[%s40002_s2 + $0x1e3c] ss:$80 sps:$4 sm:$0xff]   ;;  %v28566_v25 = vld [vmem:[%s40002_s2 + $0x1e30] ss:$80 sps:$4 sm:$0xff]  }
 0x62e   : > { %15597 = vmatprep.subr.bf16.mxu0 %v28523_v23  ;;  %v28569_v23 = vld [vmem:[%s40002_s2 + $0x1e38] ss:$80 sps:$4 sm:$0xff]  }
 0x630   : > { %15311 = vmatpush1.bf16.msra.mxu1 %v28518_v28  ;;  %v28574_v28 = vld [vmem:[%s40002_s2 + $0x1ed4] ss:$80 sps:$4 sm:$0xff]  }
 0x631   : > { %15598 = vmatpush1.bf16.msra.mxu0 %v28521_v40  ;;  %15312 = vmatprep.subr.bf16.mxu1 %v28526_v11  ;;  %v28577_v40 = vld [vmem:[%s40002_s2 + $0x1edc] ss:$80 sps:$4 sm:$0xff]   ;;  %v28572_v11 = vld [vmem:[%s40002_s2 + $0x1ed0] ss:$80 sps:$4 sm:$0xff]  }
 0x632   : > { %15599 = vmatprep.subr.bf16.mxu0 %v28529_v29  ;;  %v28575_v29 = vld [vmem:[%s40002_s2 + $0x1ed8] ss:$80 sps:$4 sm:$0xff]  }
 0x634   : > { %15313 = vmatpush1.bf16.msra.mxu1 %v28524_v30  ;;  %v28580_v30 = vld [vmem:[%s40002_s2 + $0x1f74] ss:$80 sps:$4 sm:$0xff]  }
 0x635   : > { %15600 = vmatpush1.bf16.msra.mxu0 %v28527_v32  ;;  %15314 = vmatprep.subr.bf16.mxu1 %v28532_v33  ;;  %v28583_v32 = vld [vmem:[%s40002_s2 + $0x1f7c] ss:$80 sps:$4 sm:$0xff]   ;;  %v28578_v33 = vld [vmem:[%s40002_s2 + $0x1f70] ss:$80 sps:$4 sm:$0xff]  }
 0x636   : > { %15601 = vmatprep.subr.bf16.mxu0 %v28535_v36  ;;  %v28581_v36 = vld [vmem:[%s40002_s2 + $0x1f78] ss:$80 sps:$4 sm:$0xff]  }
 0x638   : > { %15315 = vmatpush1.bf16.msra.mxu1 %v28530_v17  ;;  %v28586_v17 = vld [vmem:[%s40002_s2 + $0x2014] ss:$80 sps:$4 sm:$0xff]  }
 0x639   : > { %15602 = vmatpush1.bf16.msra.mxu0 %v28533_v44  ;;  %15316 = vmatprep.subr.bf16.mxu1 %v28538_v26  ;;  %v28589_v44 = vld [vmem:[%s40002_s2 + $0x201c] ss:$80 sps:$4 sm:$0xff]   ;;  %v28584_v26 = vld [vmem:[%s40002_s2 + $0x2010] ss:$80 sps:$4 sm:$0xff]  }
 0x63a   : > { %15603 = vmatprep.subr.bf16.mxu0 %v28541_v56  ;;  %v28587_v56 = vld [vmem:[%s40002_s2 + $0x2018] ss:$80 sps:$4 sm:$0xff]  }
 0x63c   : > { %15317 = vmatpush1.bf16.msra.mxu1 %v28536_v57  ;;  %v28592_v57 = vld [vmem:[%s40002_s2 + $0x20b4] ss:$80 sps:$4 sm:$0xff]  }
 0x63d   : > { %15604 = vmatpush1.bf16.msra.mxu0 %v28539_v58  ;;  %15318 = vmatprep.subr.bf16.mxu1 %v28544_v49  ;;  %v28595_v58 = vld [vmem:[%s40002_s2 + $0x20bc] ss:$80 sps:$4 sm:$0xff]   ;;  %v28590_v49 = vld [vmem:[%s40002_s2 + $0x20b0] ss:$80 sps:$4 sm:$0xff]  }
 0x63e   : > { %15605 = vmatprep.subr.bf16.mxu0 %v28547_v1  ;;  %v28593_v1 = vld [vmem:[%s40002_s2 + $0x20b8] ss:$80 sps:$4 sm:$0xff]  }
 0x640   : > { %15319 = vmatpush1.bf16.msra.mxu1 %v28542_v39  ;;  %v28598_v39 = vld [vmem:[%s40002_s2 + $0x2154] ss:$80 sps:$4 sm:$0xff]  }
 0x641   : > { %15606 = vmatpush1.bf16.msra.mxu0 %v28545_v61  ;;  %15320 = vmatprep.subr.bf16.mxu1 %v28550_v0  ;;  %v28601_v61 = vld [vmem:[%s40002_s2 + $0x215c] ss:$80 sps:$4 sm:$0xff]   ;;  %v28596_v0 = vld [vmem:[%s40002_s2 + $0x2150] ss:$80 sps:$4 sm:$0xff]  }
 0x642   : > { %15607 = vmatprep.subr.bf16.mxu0 %v28553_v3  ;;  %v28599_v3 = vld [vmem:[%s40002_s2 + $0x2158] ss:$80 sps:$4 sm:$0xff]  }
 0x644   : > { %15321 = vmatpush1.bf16.msra.mxu1 %v28548_v18  ;;  %v28604_v18 = vld [vmem:[%s40002_s2 + $0x21f4] ss:$80 sps:$4 sm:$0xff]  }
 0x645   : > { %15608 = vmatpush1.bf16.msra.mxu0 %v28551_v5  ;;  %15322 = vmatprep.subr.bf16.mxu1 %v28556_v47  ;;  %v28607_v47 = vld [vmem:[%s40002_s2 + $0x21fc] ss:$80 sps:$4 sm:$0xff]  }
 0x646   : > { %15609 = vmatprep.subr.bf16.mxu0 %v28559_v8 }
 0x648   : > { %15323 = vmatpush1.bf16.msra.mxu1 %v28554_v12 }
 0x649   : > { %15610 = vmatpush1.bf16.msra.mxu0 %v28557_v27  ;;  %15324 = vmatprep.subr.bf16.mxu1 %v28562_v59 }
 0x64a   : > { %15611 = vmatprep.subr.bf16.mxu0 %v28565_v15  ;;  %v28602_v15 = vld [vmem:[%s40002_s2 + $0x21f0] ss:$80 sps:$4 sm:$0xff]  }
 0x64c   : > { %15325 = vmatpush1.bf16.msra.mxu1 %v28560_v19 }
 0x64d   : > { %15612 = vmatpush1.bf16.msra.mxu0 %v28563_v20  ;;  %15335 = vmatprep.subr.bf16.mxu1 %v28568_v21  ;;  %v28605_v21 = vld [vmem:[%s40002_s2 + $0x21f8] ss:$80 sps:$4 sm:$0xff]  }
 0x64e   : > { %15622 = vmatprep.subr.bf16.mxu0 %v28571_v22  ;;  %v28610_v22 = vld [vmem:[%s40002_s2 + $0x2294] ss:$80 sps:$4 sm:$0xff]  }
 0x64f   : > { %15327 = vmatmul.mubr.bf16.vlgmr.msra.gmra.mrb[24].mxu1 %v31540_v52 }
 0x650   : > { %15614 = vmatmul.mubr.bf16.vlgmr.msra.gmra.mrb[28].mxu0 %v31540_v52  ;;  %15336 = vmatpush1.bf16.msra.mxu1 %v28566_v25 }
 0x651   : > { %15367 = vmatprep.mubr.bf16.mxu1 %v31554_v60  ;;  %15623 = vmatpush1.bf16.msra.mxu0 %v28569_v23  ;;  %v28613_v23 = vld [vmem:[%s40002_s2 + $0x229c] ss:$80 sps:$4 sm:$0xff]  }
 0x652   : > { %15654 = vmatprep.mubr.bf16.mxu0 %v31554_v60  ;;  %15337 = vmatprep.subr.bf16.mxu1 %v28574_v28  ;;  %v28608_v28 = vld [vmem:[%s40002_s2 + $0x2290] ss:$80 sps:$4 sm:$0xff]  }
 0x653   : > { %15624 = vmatprep.subr.bf16.mxu0 %v28577_v40  ;;  %v28611_v40 = vld [vmem:[%s40002_s2 + $0x2298] ss:$80 sps:$4 sm:$0xff]  }
 0x654   : > { %15338 = vmatpush1.bf16.msra.mxu1 %v28572_v11  ;;  %v28616_v11 = vld [vmem:[%s40002_s2 + $0x2334] ss:$80 sps:$4 sm:$0xff]  }
 0x655   : > { %15625 = vmatpush1.bf16.msra.mxu0 %v28575_v29  ;;  %15339 = vmatprep.subr.bf16.mxu1 %v28580_v30  ;;  %v28619_v29 = vld [vmem:[%s40002_s2 + $0x233c] ss:$80 sps:$4 sm:$0xff]   ;;  %v28614_v30 = vld [vmem:[%s40002_s2 + $0x2330] ss:$80 sps:$4 sm:$0xff]  }
 0x656   : > { %15626 = vmatprep.subr.bf16.mxu0 %v28583_v32  ;;  %v28617_v32 = vld [vmem:[%s40002_s2 + $0x2338] ss:$80 sps:$4 sm:$0xff]  }
 0x658   : > { %15340 = vmatpush1.bf16.msra.mxu1 %v28578_v33  ;;  %v28622_v33 = vld [vmem:[%s40002_s2 + $0x23d4] ss:$80 sps:$4 sm:$0xff]  }
 0x659   : > { %15627 = vmatpush1.bf16.msra.mxu0 %v28581_v36  ;;  %15341 = vmatprep.subr.bf16.mxu1 %v28586_v17  ;;  %v28625_v36 = vld [vmem:[%s40002_s2 + $0x23dc] ss:$80 sps:$4 sm:$0xff]   ;;  %v28620_v17 = vld [vmem:[%s40002_s2 + $0x23d0] ss:$80 sps:$4 sm:$0xff]  }
 0x65a   : > { %15628 = vmatprep.subr.bf16.mxu0 %v28589_v44  ;;  %v28623_v44 = vld [vmem:[%s40002_s2 + $0x23d8] ss:$80 sps:$4 sm:$0xff]  }
 0x65c   : > { %15342 = vmatpush1.bf16.msra.mxu1 %v28584_v26  ;;  %v28628_v26 = vld [vmem:[%s40002_s2 + $0x2474] ss:$80 sps:$4 sm:$0xff]  }
 0x65d   : > { %15629 = vmatpush1.bf16.msra.mxu0 %v28587_v56  ;;  %15343 = vmatprep.subr.bf16.mxu1 %v28592_v57  ;;  %v28631_v56 = vld [vmem:[%s40002_s2 + $0x247c] ss:$80 sps:$4 sm:$0xff]   ;;  %v28626_v57 = vld [vmem:[%s40002_s2 + $0x2470] ss:$80 sps:$4 sm:$0xff]  }
 0x65e   : > { %15630 = vmatprep.subr.bf16.mxu0 %v28595_v58  ;;  %v28629_v58 = vld [vmem:[%s40002_s2 + $0x2478] ss:$80 sps:$4 sm:$0xff]  }
 0x660   : > { %15344 = vmatpush1.bf16.msra.mxu1 %v28590_v49  ;;  %v28634_v49 = vld [vmem:[%s40002_s2 + $0x2514] ss:$80 sps:$4 sm:$0xff]  }
 0x661   : > { %15631 = vmatpush1.bf16.msra.mxu0 %v28593_v1  ;;  %15345 = vmatprep.subr.bf16.mxu1 %v28598_v39  ;;  %v28637_v1 = vld [vmem:[%s40002_s2 + $0x251c] ss:$80 sps:$4 sm:$0xff]   ;;  %v28632_v39 = vld [vmem:[%s40002_s2 + $0x2510] ss:$80 sps:$4 sm:$0xff]  }
 0x662   : > { %v35487_v5 = vpop.f32.mrb[20].mxu1  ;;  %15632 = vmatprep.subr.bf16.mxu0 %v28601_v61  ;;  %v28635_v61 = vld [vmem:[%s40002_s2 + $0x2518] ss:$80 sps:$4 sm:$0xff]  }
 0x663   : > { %v35492_v8 = vpop.f32.mrb[24].mxu0  ;;  %v35494_v12 = vpop.f32.mrb[21].mxu1 }
 0x664   : > { %v35496_v27 = vpop.f32.mrb[25].mxu0  ;;  %v14922_v59 = vpop.f32.mrb[22].mxu1  ;;  %15346 = vmatpush1.bf16.msra.mxu1 %v28596_v0  ;;  %v28640_v0 = vld [vmem:[%s40002_s2 + $0x25b4] ss:$80 sps:$4 sm:$0xff]  }
 0x665   : > { %v15209_v19 = vpop.f32.mrb[26].mxu0  ;;  %15633 = vmatpush1.bf16.msra.mxu0 %v28599_v3  ;;  %v14923_v20 = vpop.f32.mrb[23].mxu1  ;;  %15347 = vmatprep.subr.bf16.mxu1 %v28604_v18  ;;  %v28643_v3 = vld [vmem:[%s40002_s2 + $0x25bc] ss:$80 sps:$4 sm:$0xff]   ;;  %v28638_v18 = vld [vmem:[%s40002_s2 + $0x25b0] ss:$80 sps:$4 sm:$0xff]  }
 0x666   : > { %v15210_v25 = vpop.f32.mrb[27].mxu0  ;;  %15634 = vmatprep.subr.bf16.mxu0 %v28607_v47  ;;  %v28641_v47 = vld [vmem:[%s40002_s2 + $0x25b8] ss:$80 sps:$4 sm:$0xff]   ;;  %v28646_v59 = vld [vmem:[%s40002_s2 + $0x2654] ss:$80 sps:$4 sm:$0xff]  }
 0x667   : > { %v28644_v19 = vld [vmem:[%s40002_s2 + $0x2650] ss:$80 sps:$4 sm:$0xff]   ;;  %v28647_v20 = vld [vmem:[%s40002_s2 + $0x2658] ss:$80 sps:$4 sm:$0xff]  }
 0x668   : > { %15348 = vmatpush1.bf16.msra.mxu1 %v28602_v15  ;;  %v28649_v15 = vld [vmem:[%s40002_s2 + $0x265c] ss:$80 sps:$4 sm:$0xff]   ;;  %v28650_v25 = vld [vmem:[%s40002_s2 + $0x26f0] ss:$80 sps:$4 sm:$0xff]  }
 0x669   : > { %15635 = vmatpush1.bf16.msra.mxu0 %v28605_v21  ;;  %15349 = vmatprep.subr.bf16.mxu1 %v28610_v22  ;;  %v28652_v21 = vld [vmem:[%s40002_s2 + $0x26f4] ss:$80 sps:$4 sm:$0xff]   ;;  %v28655_v22 = vld [vmem:[%s40002_s2 + $0x26fc] ss:$80 sps:$4 sm:$0xff]  }
 0x66a   : > { %15636 = vmatprep.subr.bf16.mxu0 %v28613_v23  ;;  %v28653_v23 = vld [vmem:[%s40002_s2 + $0x26f8] ss:$80 sps:$4 sm:$0xff]  }
 0x66c   : > { %15350 = vmatpush1.bf16.msra.mxu1 %v28608_v28  ;;  %v28658_v28 = vld [vmem:[%s40002_s2 + $0x2794] ss:$80 sps:$4 sm:$0xff]  }
 0x66d   : > { %15637 = vmatpush1.bf16.msra.mxu0 %v28611_v40  ;;  %15351 = vmatprep.subr.bf16.mxu1 %v28616_v11  ;;  %v28661_v40 = vld [vmem:[%s40002_s2 + $0x279c] ss:$80 sps:$4 sm:$0xff]   ;;  %v28656_v11 = vld [vmem:[%s40002_s2 + $0x2790] ss:$80 sps:$4 sm:$0xff]  }
 0x66e   : > { %15638 = vmatprep.subr.bf16.mxu0 %v28619_v29  ;;  %v28659_v29 = vld [vmem:[%s40002_s2 + $0x2798] ss:$80 sps:$4 sm:$0xff]  }
 0x670   : > { %15352 = vmatpush1.bf16.msra.mxu1 %v28614_v30  ;;  %v28664_v30 = vld [vmem:[%s40002_s2 + $0x2834] ss:$80 sps:$4 sm:$0xff]  }
 0x671   : > { %15639 = vmatpush1.bf16.msra.mxu0 %v28617_v32  ;;  %15353 = vmatprep.subr.bf16.mxu1 %v28622_v33  ;;  %v28667_v32 = vld [vmem:[%s40002_s2 + $0x283c] ss:$80 sps:$4 sm:$0xff]   ;;  %v28662_v33 = vld [vmem:[%s40002_s2 + $0x2830] ss:$80 sps:$4 sm:$0xff]  }
 0x672   : > { %15640 = vmatprep.subr.bf16.mxu0 %v28625_v36  ;;  %v28665_v36 = vld [vmem:[%s40002_s2 + $0x2838] ss:$80 sps:$4 sm:$0xff]  }
 0x674   : > { %15354 = vmatpush1.bf16.msra.mxu1 %v28620_v17  ;;  %v28670_v17 = vld [vmem:[%s40002_s2 + $0x28d4] ss:$80 sps:$4 sm:$0xff]  }
 0x675   : > { %15641 = vmatpush1.bf16.msra.mxu0 %v28623_v44  ;;  %15355 = vmatprep.subr.bf16.mxu1 %v28628_v26  ;;  %v28673_v44 = vld [vmem:[%s40002_s2 + $0x28dc] ss:$80 sps:$4 sm:$0xff]   ;;  %v28668_v26 = vld [vmem:[%s40002_s2 + $0x28d0] ss:$80 sps:$4 sm:$0xff]  }
 0x676   : > { %15642 = vmatprep.subr.bf16.mxu0 %v28631_v56  ;;  %v28671_v56 = vld [vmem:[%s40002_s2 + $0x28d8] ss:$80 sps:$4 sm:$0xff]  }
 0x678   : > { %15356 = vmatpush1.bf16.msra.mxu1 %v28626_v57  ;;  %v28676_v57 = vld [vmem:[%s40002_s2 + $0x2974] ss:$80 sps:$4 sm:$0xff]  }
 0x679   : > { %15643 = vmatpush1.bf16.msra.mxu0 %v28629_v58  ;;  %15357 = vmatprep.subr.bf16.mxu1 %v28634_v49  ;;  %v28679_v58 = vld [vmem:[%s40002_s2 + $0x297c] ss:$80 sps:$4 sm:$0xff]   ;;  %v28674_v49 = vld [vmem:[%s40002_s2 + $0x2970] ss:$80 sps:$4 sm:$0xff]  }
 0x67a   : > { %15644 = vmatprep.subr.bf16.mxu0 %v28637_v1  ;;  %v28677_v1 = vld [vmem:[%s40002_s2 + $0x2978] ss:$80 sps:$4 sm:$0xff]  }
 0x67c   : > { %15358 = vmatpush1.bf16.msra.mxu1 %v28632_v39  ;;  %v28682_v39 = vld [vmem:[%s40002_s2 + $0x2a14] ss:$80 sps:$4 sm:$0xff]  }
 0x67d   : > { %15645 = vmatpush1.bf16.msra.mxu0 %v28635_v61  ;;  %15359 = vmatprep.subr.bf16.mxu1 %v28640_v0  ;;  %v28685_v61 = vld [vmem:[%s40002_s2 + $0x2a1c] ss:$80 sps:$4 sm:$0xff]   ;;  %v28680_v0 = vld [vmem:[%s40002_s2 + $0x2a10] ss:$80 sps:$4 sm:$0xff]  }
 0x67e   : > { %15646 = vmatprep.subr.bf16.mxu0 %v28643_v3  ;;  %v28683_v3 = vld [vmem:[%s40002_s2 + $0x2a18] ss:$80 sps:$4 sm:$0xff]  }
 0x680   : > { %15360 = vmatpush1.bf16.msra.mxu1 %v28638_v18  ;;  %v28688_v18 = vld [vmem:[%s40002_s2 + $0x2ab4] ss:$80 sps:$4 sm:$0xff]  }
 0x681   : > { %15647 = vmatpush1.bf16.msra.mxu0 %v28641_v47  ;;  %15361 = vmatprep.subr.bf16.mxu1 %v28646_v59  ;;  %v28691_v47 = vld [vmem:[%s40002_s2 + $0x2abc] ss:$80 sps:$4 sm:$0xff]   ;;  %v28686_v59 = vld [vmem:[%s40002_s2 + $0x2ab0] ss:$80 sps:$4 sm:$0xff]  }
 0x682   : > { %15648 = vmatprep.subr.bf16.mxu0 %v28649_v15  ;;  %v28689_v15 = vld [vmem:[%s40002_s2 + $0x2ab8] ss:$80 sps:$4 sm:$0xff]  }
 0x684   : > { %15362 = vmatpush1.bf16.msra.mxu1 %v28644_v19  ;;  %v28694_v19 = vld [vmem:[%s40002_s2 + $0x2b54] ss:$80 sps:$4 sm:$0xff]  }
 0x685   : > { %15649 = vmatpush1.bf16.msra.mxu0 %v28647_v20  ;;  %15363 = vmatprep.subr.bf16.mxu1 %v28652_v21  ;;  %v28697_v20 = vld [vmem:[%s40002_s2 + $0x2b5c] ss:$80 sps:$4 sm:$0xff]   ;;  %v28692_v21 = vld [vmem:[%s40002_s2 + $0x2b50] ss:$80 sps:$4 sm:$0xff]  }
 0x686   : > { %15650 = vmatprep.subr.bf16.mxu0 %v28655_v22  ;;  %v28695_v22 = vld [vmem:[%s40002_s2 + $0x2b58] ss:$80 sps:$4 sm:$0xff]  }
 0x688   : > { %15364 = vmatpush1.bf16.msra.mxu1 %v28650_v25  ;;  %v28700_v25 = vld [vmem:[%s40002_s2 + $0x2bf4] ss:$80 sps:$4 sm:$0xff]  }
 0x689   : > { %15651 = vmatpush1.bf16.msra.mxu0 %v28653_v23  ;;  %15365 = vmatprep.subr.bf16.mxu1 %v28658_v28  ;;  %v28703_v23 = vld [vmem:[%s40002_s2 + $0x2bfc] ss:$80 sps:$4 sm:$0xff]   ;;  %v28698_v28 = vld [vmem:[%s40002_s2 + $0x2bf0] ss:$80 sps:$4 sm:$0xff]  }
 0x68a   : > { %15652 = vmatprep.subr.bf16.mxu0 %v28661_v40  ;;  %v28701_v40 = vld [vmem:[%s40002_s2 + $0x2bf8] ss:$80 sps:$4 sm:$0xff]  }
 0x68c   : > { %15366 = vmatpush1.bf16.msra.mxu1 %v28656_v11  ;;  %v28706_v11 = vld [vmem:[%s40002_s2 + $0x2c94] ss:$80 sps:$4 sm:$0xff]  }
 0x68d   : > { %15653 = vmatpush1.bf16.msra.mxu0 %v28659_v29  ;;  %15376 = vmatprep.subr.bf16.mxu1 %v28664_v30  ;;  %v28709_v29 = vld [vmem:[%s40002_s2 + $0x2c9c] ss:$80 sps:$4 sm:$0xff]   ;;  %v28704_v30 = vld [vmem:[%s40002_s2 + $0x2c90] ss:$80 sps:$4 sm:$0xff]  }
 0x68e   : > { %15663 = vmatprep.subr.bf16.mxu0 %v28667_v32  ;;  %v28707_v32 = vld [vmem:[%s40002_s2 + $0x2c98] ss:$80 sps:$4 sm:$0xff]  }
 0x68f   : > { %15368 = vmatmul.mubr.bf16.vlgmr.msra.gmra.mrb[24].mxu1 %v31760_v34 }
 0x690   : > { %15655 = vmatmul.mubr.bf16.vlgmr.msra.gmra.mrb[28].mxu0 %v31760_v34  ;;  %15377 = vmatpush1.bf16.msra.mxu1 %v28662_v33  ;;  %v28712_v33 = vld [vmem:[%s40002_s2 + $0x2d34] ss:$80 sps:$4 sm:$0xff]  }
 0x691   : > { %15408 = vmatprep.mubr.bf16.mxu1 %v31762_v35  ;;  %15664 = vmatpush1.bf16.msra.mxu0 %v28665_v36  ;;  %v28715_v36 = vld [vmem:[%s40002_s2 + $0x2d3c] ss:$80 sps:$4 sm:$0xff]  }
 0x692   : > { %15695 = vmatprep.mubr.bf16.mxu0 %v31762_v35  ;;  %15378 = vmatprep.subr.bf16.mxu1 %v28670_v17  ;;  %v28710_v17 = vld [vmem:[%s40002_s2 + $0x2d30] ss:$80 sps:$4 sm:$0xff]  }
 0x693   : > { %15665 = vmatprep.subr.bf16.mxu0 %v28673_v44  ;;  %v28713_v44 = vld [vmem:[%s40002_s2 + $0x2d38] ss:$80 sps:$4 sm:$0xff]  }
 0x694   : > { %15379 = vmatpush1.bf16.msra.mxu1 %v28668_v26  ;;  %v28718_v26 = vld [vmem:[%s40002_s2 + $0x2dd4] ss:$80 sps:$4 sm:$0xff]  }
 0x695   : > { %15666 = vmatpush1.bf16.msra.mxu0 %v28671_v56  ;;  %15380 = vmatprep.subr.bf16.mxu1 %v28676_v57  ;;  %v28721_v56 = vld [vmem:[%s40002_s2 + $0x2ddc] ss:$80 sps:$4 sm:$0xff]   ;;  %v28716_v57 = vld [vmem:[%s40002_s2 + $0x2dd0] ss:$80 sps:$4 sm:$0xff]  }
 0x696   : > { %15667 = vmatprep.subr.bf16.mxu0 %v28679_v58  ;;  %v28719_v58 = vld [vmem:[%s40002_s2 + $0x2dd8] ss:$80 sps:$4 sm:$0xff]  }
 0x698   : > { %15381 = vmatpush1.bf16.msra.mxu1 %v28674_v49  ;;  %v28724_v49 = vld [vmem:[%s40002_s2 + $0x2e74] ss:$80 sps:$4 sm:$0xff]  }
 0x699   : > { %15668 = vmatpush1.bf16.msra.mxu0 %v28677_v1  ;;  %15382 = vmatprep.subr.bf16.mxu1 %v28682_v39  ;;  %v28727_v1 = vld [vmem:[%s40002_s2 + $0x2e7c] ss:$80 sps:$4 sm:$0xff]   ;;  %v28722_v39 = vld [vmem:[%s40002_s2 + $0x2e70] ss:$80 sps:$4 sm:$0xff]  }
 0x69a   : > { %15669 = vmatprep.subr.bf16.mxu0 %v28685_v61  ;;  %v28725_v61 = vld [vmem:[%s40002_s2 + $0x2e78] ss:$80 sps:$4 sm:$0xff]  }
 0x69c   : > { %15383 = vmatpush1.bf16.msra.mxu1 %v28680_v0  ;;  %v28730_v0 = vld [vmem:[%s40002_s2 + $0x2f14] ss:$80 sps:$4 sm:$0xff]  }
 0x69d   : > { %15670 = vmatpush1.bf16.msra.mxu0 %v28683_v3  ;;  %15384 = vmatprep.subr.bf16.mxu1 %v28688_v18  ;;  %v28733_v3 = vld [vmem:[%s40002_s2 + $0x2f1c] ss:$80 sps:$4 sm:$0xff]   ;;  %v28728_v18 = vld [vmem:[%s40002_s2 + $0x2f10] ss:$80 sps:$4 sm:$0xff]  }
 0x69e   : > { %15671 = vmatprep.subr.bf16.mxu0 %v28691_v47  ;;  %v28731_v47 = vld [vmem:[%s40002_s2 + $0x2f18] ss:$80 sps:$4 sm:$0xff]  }
 0x6a0   : > { %15385 = vmatpush1.bf16.msra.mxu1 %v28686_v59  ;;  %v28736_v59 = vld [vmem:[%s40002_s2 + $0x2fb4] ss:$80 sps:$4 sm:$0xff]  }
 0x6a1   : > { %15672 = vmatpush1.bf16.msra.mxu0 %v28689_v15  ;;  %15386 = vmatprep.subr.bf16.mxu1 %v28694_v19  ;;  %v28739_v15 = vld [vmem:[%s40002_s2 + $0x2fbc] ss:$80 sps:$4 sm:$0xff]   ;;  %v28734_v19 = vld [vmem:[%s40002_s2 + $0x2fb0] ss:$80 sps:$4 sm:$0xff]  }
 0x6a2   : > { %15673 = vmatprep.subr.bf16.mxu0 %v28697_v20  ;;  %v28737_v20 = vld [vmem:[%s40002_s2 + $0x2fb8] ss:$80 sps:$4 sm:$0xff]  }
 0x6a4   : > { %15387 = vmatpush1.bf16.msra.mxu1 %v28692_v21  ;;  %v28742_v21 = vld [vmem:[%s40002_s2 + $0x3054] ss:$80 sps:$4 sm:$0xff]  }
 0x6a5   : > { %15674 = vmatpush1.bf16.msra.mxu0 %v28695_v22  ;;  %15388 = vmatprep.subr.bf16.mxu1 %v28700_v25  ;;  %v28745_v22 = vld [vmem:[%s40002_s2 + $0x305c] ss:$80 sps:$4 sm:$0xff]   ;;  %v28740_v25 = vld [vmem:[%s40002_s2 + $0x3050] ss:$80 sps:$4 sm:$0xff]  }
 0x6a6   : > { %15675 = vmatprep.subr.bf16.mxu0 %v28703_v23  ;;  %v28743_v23 = vld [vmem:[%s40002_s2 + $0x3058] ss:$80 sps:$4 sm:$0xff]  }
 0x6a8   : > { %15389 = vmatpush1.bf16.msra.mxu1 %v28698_v28  ;;  %v28748_v28 = vld [vmem:[%s40002_s2 + $0x30f4] ss:$80 sps:$4 sm:$0xff]  }
 0x6a9   : > { %15676 = vmatpush1.bf16.msra.mxu0 %v28701_v40  ;;  %15390 = vmatprep.subr.bf16.mxu1 %v28706_v11  ;;  %v28751_v40 = vld [vmem:[%s40002_s2 + $0x30fc] ss:$80 sps:$4 sm:$0xff]   ;;  %v28746_v11 = vld [vmem:[%s40002_s2 + $0x30f0] ss:$80 sps:$4 sm:$0xff]  }
 0x6aa   : > { %15677 = vmatprep.subr.bf16.mxu0 %v28709_v29  ;;  %v28749_v29 = vld [vmem:[%s40002_s2 + $0x30f8] ss:$80 sps:$4 sm:$0xff]  }
 0x6ac   : > { %15391 = vmatpush1.bf16.msra.mxu1 %v28704_v30  ;;  %v28754_v30 = vld [vmem:[%s40002_s2 + $0x3194] ss:$80 sps:$4 sm:$0xff]  }
 0x6ad   : > { %15678 = vmatpush1.bf16.msra.mxu0 %v28707_v32  ;;  %15392 = vmatprep.subr.bf16.mxu1 %v28712_v33  ;;  %v28757_v32 = vld [vmem:[%s40002_s2 + $0x319c] ss:$80 sps:$4 sm:$0xff]   ;;  %v28752_v33 = vld [vmem:[%s40002_s2 + $0x3190] ss:$80 sps:$4 sm:$0xff]  }
 0x6ae   : > { %15679 = vmatprep.subr.bf16.mxu0 %v28715_v36  ;;  %v28755_v36 = vld [vmem:[%s40002_s2 + $0x3198] ss:$80 sps:$4 sm:$0xff]  }
 0x6b0   : > { %15393 = vmatpush1.bf16.msra.mxu1 %v28710_v17  ;;  %v28760_v17 = vld [vmem:[%s40002_s2 + $0x3234] ss:$80 sps:$4 sm:$0xff]  }
 0x6b1   : > { %15680 = vmatpush1.bf16.msra.mxu0 %v28713_v44  ;;  %15394 = vmatprep.subr.bf16.mxu1 %v28718_v26  ;;  %v28763_v44 = vld [vmem:[%s40002_s2 + $0x323c] ss:$80 sps:$4 sm:$0xff]   ;;  %v28758_v26 = vld [vmem:[%s40002_s2 + $0x3230] ss:$80 sps:$4 sm:$0xff]  }
 0x6b2   : > { %15681 = vmatprep.subr.bf16.mxu0 %v28721_v56  ;;  %v28761_v56 = vld [vmem:[%s40002_s2 + $0x3238] ss:$80 sps:$4 sm:$0xff]  }
 0x6b4   : > { %15395 = vmatpush1.bf16.msra.mxu1 %v28716_v57  ;;  %v28766_v57 = vld [vmem:[%s40002_s2 + $0x32d4] ss:$80 sps:$4 sm:$0xff]  }
 0x6b5   : > { %15682 = vmatpush1.bf16.msra.mxu0 %v28719_v58  ;;  %15396 = vmatprep.subr.bf16.mxu1 %v28724_v49  ;;  %v28769_v58 = vld [vmem:[%s40002_s2 + $0x32dc] ss:$80 sps:$4 sm:$0xff]   ;;  %v28764_v49 = vld [vmem:[%s40002_s2 + $0x32d0] ss:$80 sps:$4 sm:$0xff]  }
 0x6b6   : > { %15683 = vmatprep.subr.bf16.mxu0 %v28727_v1  ;;  %v28767_v1 = vld [vmem:[%s40002_s2 + $0x32d8] ss:$80 sps:$4 sm:$0xff]  }
 0x6b8   : > { %15397 = vmatpush1.bf16.msra.mxu1 %v28722_v39  ;;  %v28772_v39 = vld [vmem:[%s40002_s2 + $0x3374] ss:$80 sps:$4 sm:$0xff]  }
 0x6b9   : > { %15684 = vmatpush1.bf16.msra.mxu0 %v28725_v61  ;;  %15398 = vmatprep.subr.bf16.mxu1 %v28730_v0  ;;  %v28775_v61 = vld [vmem:[%s40002_s2 + $0x337c] ss:$80 sps:$4 sm:$0xff]   ;;  %v28770_v0 = vld [vmem:[%s40002_s2 + $0x3370] ss:$80 sps:$4 sm:$0xff]  }
 0x6ba   : > { %15685 = vmatprep.subr.bf16.mxu0 %v28733_v3  ;;  %v28773_v3 = vld [vmem:[%s40002_s2 + $0x3378] ss:$80 sps:$4 sm:$0xff]  }
 0x6bc   : > { %15399 = vmatpush1.bf16.msra.mxu1 %v28728_v18  ;;  %v28778_v18 = vld [vmem:[%s40002_s2 + $0x3414] ss:$80 sps:$4 sm:$0xff]  }
 0x6bd   : > { %15686 = vmatpush1.bf16.msra.mxu0 %v28731_v47  ;;  %15400 = vmatprep.subr.bf16.mxu1 %v28736_v59  ;;  %v28781_v47 = vld [vmem:[%s40002_s2 + $0x341c] ss:$80 sps:$4 sm:$0xff]   ;;  %v28776_v59 = vld [vmem:[%s40002_s2 + $0x3410] ss:$80 sps:$4 sm:$0xff]  }
 0x6be   : > { %15687 = vmatprep.subr.bf16.mxu0 %v28739_v15  ;;  %v28779_v15 = vld [vmem:[%s40002_s2 + $0x3418] ss:$80 sps:$4 sm:$0xff]  }
 0x6c0   : > { %15401 = vmatpush1.bf16.msra.mxu1 %v28734_v19  ;;  %v28784_v19 = vld [vmem:[%s40002_s2 + $0x34b4] ss:$80 sps:$4 sm:$0xff]  }
 0x6c1   : > { %15688 = vmatpush1.bf16.msra.mxu0 %v28737_v20  ;;  %15402 = vmatprep.subr.bf16.mxu1 %v28742_v21  ;;  %v28787_v20 = vld [vmem:[%s40002_s2 + $0x34bc] ss:$80 sps:$4 sm:$0xff]   ;;  %v28782_v21 = vld [vmem:[%s40002_s2 + $0x34b0] ss:$80 sps:$4 sm:$0xff]  }
 0x6c2   : > { %15689 = vmatprep.subr.bf16.mxu0 %v28745_v22  ;;  %v28785_v22 = vld [vmem:[%s40002_s2 + $0x34b8] ss:$80 sps:$4 sm:$0xff]  }
 0x6c4   : > { %15403 = vmatpush1.bf16.msra.mxu1 %v28740_v25  ;;  %v28790_v25 = vld [vmem:[%s40002_s2 + $0x3554] ss:$80 sps:$4 sm:$0xff]  }
 0x6c5   : > { %15690 = vmatpush1.bf16.msra.mxu0 %v28743_v23  ;;  %15404 = vmatprep.subr.bf16.mxu1 %v28748_v28  ;;  %v28793_v23 = vld [vmem:[%s40002_s2 + $0x355c] ss:$80 sps:$4 sm:$0xff]   ;;  %v28788_v28 = vld [vmem:[%s40002_s2 + $0x3550] ss:$80 sps:$4 sm:$0xff]  }
 0x6c6   : > { %15691 = vmatprep.subr.bf16.mxu0 %v28751_v40  ;;  %v28791_v40 = vld [vmem:[%s40002_s2 + $0x3558] ss:$80 sps:$4 sm:$0xff]  }
 0x6c8   : > { %15405 = vmatpush1.bf16.msra.mxu1 %v28746_v11  ;;  %v28796_v11 = vld [vmem:[%s40002_s2 + $0x35f4] ss:$80 sps:$4 sm:$0xff]  }
 0x6c9   : > { %15692 = vmatpush1.bf16.msra.mxu0 %v28749_v29  ;;  %15406 = vmatprep.subr.bf16.mxu1 %v28754_v30  ;;  %v28799_v29 = vld [vmem:[%s40002_s2 + $0x35fc] ss:$80 sps:$4 sm:$0xff]   ;;  %v28794_v30 = vld [vmem:[%s40002_s2 + $0x35f0] ss:$80 sps:$4 sm:$0xff]  }
 0x6ca   : > { %15693 = vmatprep.subr.bf16.mxu0 %v28757_v32  ;;  %v28797_v32 = vld [vmem:[%s40002_s2 + $0x35f8] ss:$80 sps:$4 sm:$0xff]  }
 0x6cc   : > { %15407 = vmatpush1.bf16.msra.mxu1 %v28752_v33  ;;  %v28802_v33 = vld [vmem:[%s40002_s2 + $0x3694] ss:$80 sps:$4 sm:$0xff]  }
 0x6cd   : > { %15694 = vmatpush1.bf16.msra.mxu0 %v28755_v36  ;;  %15417 = vmatprep.subr.bf16.mxu1 %v28760_v17  ;;  %v28805_v36 = vld [vmem:[%s40002_s2 + $0x369c] ss:$80 sps:$4 sm:$0xff]   ;;  %v28800_v17 = vld [vmem:[%s40002_s2 + $0x3690] ss:$80 sps:$4 sm:$0xff]  }
 0x6ce   : > { %15704 = vmatprep.subr.bf16.mxu0 %v28763_v44  ;;  %v28803_v44 = vld [vmem:[%s40002_s2 + $0x3698] ss:$80 sps:$4 sm:$0xff]  }
 0x6cf   : > { %15409 = vmatmul.mubr.bf16.vlgmr.msra.gmra.mrb[24].mxu1 %v31955_v6 }
 0x6d0   : > { %15696 = vmatmul.mubr.bf16.vlgmr.msra.gmra.mrb[28].mxu0 %v31955_v6  ;;  %15418 = vmatpush1.bf16.msra.mxu1 %v28758_v26  ;;  %v28808_v26 = vld [vmem:[%s40002_s2 + $0x3734] ss:$80 sps:$4 sm:$0xff]  }
 0x6d1   : > { %15449 = vmatprep.mubr.bf16.mxu1 %v31969_v13  ;;  %15705 = vmatpush1.bf16.msra.mxu0 %v28761_v56  ;;  %v28811_v56 = vld [vmem:[%s40002_s2 + $0x373c] ss:$80 sps:$4 sm:$0xff]  }
 0x6d2   : > { %15736 = vmatprep.mubr.bf16.mxu0 %v31969_v13  ;;  %15419 = vmatprep.subr.bf16.mxu1 %v28766_v57  ;;  %v28806_v57 = vld [vmem:[%s40002_s2 + $0x3730] ss:$80 sps:$4 sm:$0xff]  }
 0x6d3   : > { %15706 = vmatprep.subr.bf16.mxu0 %v28769_v58  ;;  %v28809_v58 = vld [vmem:[%s40002_s2 + $0x3738] ss:$80 sps:$4 sm:$0xff]  }
 0x6d4   : > { %15420 = vmatpush1.bf16.msra.mxu1 %v28764_v49  ;;  %v28814_v49 = vld [vmem:[%s40002_s2 + $0x37d4] ss:$80 sps:$4 sm:$0xff]  }
 0x6d5   : > { %15707 = vmatpush1.bf16.msra.mxu0 %v28767_v1  ;;  %15421 = vmatprep.subr.bf16.mxu1 %v28772_v39  ;;  %v28817_v1 = vld [vmem:[%s40002_s2 + $0x37dc] ss:$80 sps:$4 sm:$0xff]   ;;  %v28812_v39 = vld [vmem:[%s40002_s2 + $0x37d0] ss:$80 sps:$4 sm:$0xff]  }
 0x6d6   : > { %15708 = vmatprep.subr.bf16.mxu0 %v28775_v61  ;;  %v28815_v61 = vld [vmem:[%s40002_s2 + $0x37d8] ss:$80 sps:$4 sm:$0xff]  }
 0x6d8   : > { %15422 = vmatpush1.bf16.msra.mxu1 %v28770_v0  ;;  %v28820_v0 = vld [vmem:[%s40002_s2 + $0x3874] ss:$80 sps:$4 sm:$0xff]  }
 0x6d9   : > { %15709 = vmatpush1.bf16.msra.mxu0 %v28773_v3  ;;  %15423 = vmatprep.subr.bf16.mxu1 %v28778_v18  ;;  %v28823_v3 = vld [vmem:[%s40002_s2 + $0x387c] ss:$80 sps:$4 sm:$0xff]   ;;  %v28818_v18 = vld [vmem:[%s40002_s2 + $0x3870] ss:$80 sps:$4 sm:$0xff]  }
 0x6da   : > { %15710 = vmatprep.subr.bf16.mxu0 %v28781_v47  ;;  %v28821_v47 = vld [vmem:[%s40002_s2 + $0x3878] ss:$80 sps:$4 sm:$0xff]  }
 0x6dc   : > { %15424 = vmatpush1.bf16.msra.mxu1 %v28776_v59  ;;  %v28826_v59 = vld [vmem:[%s40002_s2 + $0x3914] ss:$80 sps:$4 sm:$0xff]  }
 0x6dd   : > { %15711 = vmatpush1.bf16.msra.mxu0 %v28779_v15  ;;  %15425 = vmatprep.subr.bf16.mxu1 %v28784_v19  ;;  %v28829_v15 = vld [vmem:[%s40002_s2 + $0x391c] ss:$80 sps:$4 sm:$0xff]   ;;  %v28824_v19 = vld [vmem:[%s40002_s2 + $0x3910] ss:$80 sps:$4 sm:$0xff]  }
 0x6de   : > { %15712 = vmatprep.subr.bf16.mxu0 %v28787_v20  ;;  %v28827_v20 = vld [vmem:[%s40002_s2 + $0x3918] ss:$80 sps:$4 sm:$0xff]  }
 0x6e0   : > { %15426 = vmatpush1.bf16.msra.mxu1 %v28782_v21  ;;  %v28832_v21 = vld [vmem:[%s40002_s2 + $0x39b4] ss:$80 sps:$4 sm:$0xff]  }
 0x6e1   : > { %15713 = vmatpush1.bf16.msra.mxu0 %v28785_v22  ;;  %15427 = vmatprep.subr.bf16.mxu1 %v28790_v25  ;;  %v28835_v22 = vld [vmem:[%s40002_s2 + $0x39bc] ss:$80 sps:$4 sm:$0xff]   ;;  %v28830_v25 = vld [vmem:[%s40002_s2 + $0x39b0] ss:$80 sps:$4 sm:$0xff]  }
 0x6e2   : > { %15714 = vmatprep.subr.bf16.mxu0 %v28793_v23  ;;  %v28833_v23 = vld [vmem:[%s40002_s2 + $0x39b8] ss:$80 sps:$4 sm:$0xff]  }
 0x6e4   : > { %15428 = vmatpush1.bf16.msra.mxu1 %v28788_v28  ;;  %v28838_v28 = vld [vmem:[%s40002_s2 + $0x3a54] ss:$80 sps:$4 sm:$0xff]  }
 0x6e5   : > { %15715 = vmatpush1.bf16.msra.mxu0 %v28791_v40  ;;  %15429 = vmatprep.subr.bf16.mxu1 %v28796_v11  ;;  %v28841_v40 = vld [vmem:[%s40002_s2 + $0x3a5c] ss:$80 sps:$4 sm:$0xff]   ;;  %v28836_v11 = vld [vmem:[%s40002_s2 + $0x3a50] ss:$80 sps:$4 sm:$0xff]  }
 0x6e6   : > { %15716 = vmatprep.subr.bf16.mxu0 %v28799_v29  ;;  %v28839_v29 = vld [vmem:[%s40002_s2 + $0x3a58] ss:$80 sps:$4 sm:$0xff]  }
 0x6e8   : > { %15430 = vmatpush1.bf16.msra.mxu1 %v28794_v30  ;;  %v28844_v30 = vld [vmem:[%s40002_s2 + $0x3af4] ss:$80 sps:$4 sm:$0xff]  }
 0x6e9   : > { %15717 = vmatpush1.bf16.msra.mxu0 %v28797_v32  ;;  %15431 = vmatprep.subr.bf16.mxu1 %v28802_v33  ;;  %v28847_v32 = vld [vmem:[%s40002_s2 + $0x3afc] ss:$80 sps:$4 sm:$0xff]   ;;  %v28842_v33 = vld [vmem:[%s40002_s2 + $0x3af0] ss:$80 sps:$4 sm:$0xff]  }
 0x6ea   : > { %15718 = vmatprep.subr.bf16.mxu0 %v28805_v36  ;;  %v28845_v36 = vld [vmem:[%s40002_s2 + $0x3af8] ss:$80 sps:$4 sm:$0xff]  }
 0x6ec   : > { %15432 = vmatpush1.bf16.msra.mxu1 %v28800_v17  ;;  %v28850_v17 = vld [vmem:[%s40002_s2 + $0x3b94] ss:$80 sps:$4 sm:$0xff]  }
 0x6ed   : > { %15719 = vmatpush1.bf16.msra.mxu0 %v28803_v44  ;;  %15433 = vmatprep.subr.bf16.mxu1 %v28808_v26  ;;  %v28853_v44 = vld [vmem:[%s40002_s2 + $0x3b9c] ss:$80 sps:$4 sm:$0xff]   ;;  %v28848_v26 = vld [vmem:[%s40002_s2 + $0x3b90] ss:$80 sps:$4 sm:$0xff]  }
 0x6ee   : > { %15720 = vmatprep.subr.bf16.mxu0 %v28811_v56  ;;  %v28851_v56 = vld [vmem:[%s40002_s2 + $0x3b98] ss:$80 sps:$4 sm:$0xff]  }
 0x6f0   : > { %15434 = vmatpush1.bf16.msra.mxu1 %v28806_v57  ;;  %v28856_v57 = vld [vmem:[%s40002_s2 + $0x3c34] ss:$80 sps:$4 sm:$0xff]  }
 0x6f1   : > { %15721 = vmatpush1.bf16.msra.mxu0 %v28809_v58  ;;  %15435 = vmatprep.subr.bf16.mxu1 %v28814_v49  ;;  %v28859_v58 = vld [vmem:[%s40002_s2 + $0x3c3c] ss:$80 sps:$4 sm:$0xff]   ;;  %v28854_v49 = vld [vmem:[%s40002_s2 + $0x3c30] ss:$80 sps:$4 sm:$0xff]  }
 0x6f2   : > { %15722 = vmatprep.subr.bf16.mxu0 %v28817_v1  ;;  %v28857_v1 = vld [vmem:[%s40002_s2 + $0x3c38] ss:$80 sps:$4 sm:$0xff]  }
 0x6f4   : > { %15436 = vmatpush1.bf16.msra.mxu1 %v28812_v39  ;;  %v28862_v39 = vld [vmem:[%s40002_s2 + $0x3cd4] ss:$80 sps:$4 sm:$0xff]  }
 0x6f5   : > { %15723 = vmatpush1.bf16.msra.mxu0 %v28815_v61  ;;  %15437 = vmatprep.subr.bf16.mxu1 %v28820_v0  ;;  %v28865_v61 = vld [vmem:[%s40002_s2 + $0x3cdc] ss:$80 sps:$4 sm:$0xff]   ;;  %v28860_v0 = vld [vmem:[%s40002_s2 + $0x3cd0] ss:$80 sps:$4 sm:$0xff]  }
 0x6f6   : > { %15724 = vmatprep.subr.bf16.mxu0 %v28823_v3  ;;  %v28863_v3 = vld [vmem:[%s40002_s2 + $0x3cd8] ss:$80 sps:$4 sm:$0xff]  }
 0x6f8   : > { %15438 = vmatpush1.bf16.msra.mxu1 %v28818_v18  ;;  %v28868_v18 = vld [vmem:[%s40002_s2 + $0x3d74] ss:$80 sps:$4 sm:$0xff]  }
 0x6f9   : > { %15725 = vmatpush1.bf16.msra.mxu0 %v28821_v47  ;;  %15439 = vmatprep.subr.bf16.mxu1 %v28826_v59  ;;  %v28871_v47 = vld [vmem:[%s40002_s2 + $0x3d7c] ss:$80 sps:$4 sm:$0xff]   ;;  %v28866_v59 = vld [vmem:[%s40002_s2 + $0x3d70] ss:$80 sps:$4 sm:$0xff]  }
 0x6fa   : > { %15726 = vmatprep.subr.bf16.mxu0 %v28829_v15  ;;  %v28869_v15 = vld [vmem:[%s40002_s2 + $0x3d78] ss:$80 sps:$4 sm:$0xff]  }
 0x6fc   : > { %15440 = vmatpush1.bf16.msra.mxu1 %v28824_v19  ;;  %v28874_v19 = vld [vmem:[%s40002_s2 + $0x3e14] ss:$80 sps:$4 sm:$0xff]  }
 0x6fd   : > { %15727 = vmatpush1.bf16.msra.mxu0 %v28827_v20  ;;  %15441 = vmatprep.subr.bf16.mxu1 %v28832_v21  ;;  %v28877_v20 = vld [vmem:[%s40002_s2 + $0x3e1c] ss:$80 sps:$4 sm:$0xff]   ;;  %v28872_v21 = vld [vmem:[%s40002_s2 + $0x3e10] ss:$80 sps:$4 sm:$0xff]  }
 0x6fe   : > { %15728 = vmatprep.subr.bf16.mxu0 %v28835_v22  ;;  %v28875_v22 = vld [vmem:[%s40002_s2 + $0x3e18] ss:$80 sps:$4 sm:$0xff]  }
 0x700   : > { %15442 = vmatpush1.bf16.msra.mxu1 %v28830_v25  ;;  %v28880_v25 = vld [vmem:[%s40002_s2 + $0x3eb4] ss:$80 sps:$4 sm:$0xff]  }
 0x701   : > { %15729 = vmatpush1.bf16.msra.mxu0 %v28833_v23  ;;  %15443 = vmatprep.subr.bf16.mxu1 %v28838_v28  ;;  %v28883_v23 = vld [vmem:[%s40002_s2 + $0x3ebc] ss:$80 sps:$4 sm:$0xff]   ;;  %v28878_v28 = vld [vmem:[%s40002_s2 + $0x3eb0] ss:$80 sps:$4 sm:$0xff]  }
 0x702   : > { %15730 = vmatprep.subr.bf16.mxu0 %v28841_v40  ;;  %v28881_v40 = vld [vmem:[%s40002_s2 + $0x3eb8] ss:$80 sps:$4 sm:$0xff]  }
 0x704   : > { %15444 = vmatpush1.bf16.msra.mxu1 %v28836_v11  ;;  %v28886_v11 = vld [vmem:[%s40002_s2 + $0x3f54] ss:$80 sps:$4 sm:$0xff]  }
 0x705   : > { %15731 = vmatpush1.bf16.msra.mxu0 %v28839_v29  ;;  %15445 = vmatprep.subr.bf16.mxu1 %v28844_v30  ;;  %v28889_v29 = vld [vmem:[%s40002_s2 + $0x3f5c] ss:$80 sps:$4 sm:$0xff]   ;;  %v28884_v30 = vld [vmem:[%s40002_s2 + $0x3f50] ss:$80 sps:$4 sm:$0xff]  }
 0x706   : > { %15732 = vmatprep.subr.bf16.mxu0 %v28847_v32  ;;  %v28887_v32 = vld [vmem:[%s40002_s2 + $0x3f58] ss:$80 sps:$4 sm:$0xff]  }
 0x708   : > { %15446 = vmatpush1.bf16.msra.mxu1 %v28842_v33  ;;  %v28892_v33 = vld [vmem:[%s40002_s2 + $0x3ff4] ss:$80 sps:$4 sm:$0xff]  }
 0x709   : > { %15733 = vmatpush1.bf16.msra.mxu0 %v28845_v36  ;;  %15447 = vmatprep.subr.bf16.mxu1 %v28850_v17  ;;  %v28895_v36 = vld [vmem:[%s40002_s2 + $0x3ffc] ss:$80 sps:$4 sm:$0xff]   ;;  %v28890_v17 = vld [vmem:[%s40002_s2 + $0x3ff0] ss:$80 sps:$4 sm:$0xff]  }
 0x70a   : > { %15734 = vmatprep.subr.bf16.mxu0 %v28853_v44  ;;  %v28893_v44 = vld [vmem:[%s40002_s2 + $0x3ff8] ss:$80 sps:$4 sm:$0xff]  }
 0x70c   : > { %15448 = vmatpush1.bf16.msra.mxu1 %v28848_v26  ;;  %v28898_v26 = vld [vmem:[%s40002_s2 + $0x4094] ss:$80 sps:$4 sm:$0xff]  }
 0x70d   : > { %15735 = vmatpush1.bf16.msra.mxu0 %v28851_v56  ;;  %15458 = vmatprep.subr.bf16.mxu1 %v28856_v57  ;;  %v28901_v56 = vld [vmem:[%s40002_s2 + $0x409c] ss:$80 sps:$4 sm:$0xff]   ;;  %v28896_v57 = vld [vmem:[%s40002_s2 + $0x4090] ss:$80 sps:$4 sm:$0xff]  }
 0x70e   : > { %15745 = vmatprep.subr.bf16.mxu0 %v28859_v58  ;;  %v28899_v58 = vld [vmem:[%s40002_s2 + $0x4098] ss:$80 sps:$4 sm:$0xff]  }
 0x70f   : > { %15450 = vmatmul.mubr.bf16.vlgmr.msra.gmra.mrb[24].mxu1 %v32156_v55 }
 0x710   : > { %15737 = vmatmul.mubr.bf16.vlgmr.msra.gmra.mrb[28].mxu0 %v32156_v55  ;;  %15459 = vmatpush1.bf16.msra.mxu1 %v28854_v49  ;;  %v28904_v49 = vld [vmem:[%s40002_s2 + $0x44] ss:$80 sps:$4 sm:$0xff]  }
 0x711   : > { %15746 = vmatpush1.bf16.msra.mxu0 %v28857_v1  ;;  %15460 = vmatprep.subr.bf16.mxu1 %v28862_v39  ;;  %v28907_v1 = vld [vmem:[%s40002_s2 + $0x4c] ss:$80 sps:$4 sm:$0xff]   ;;  %v28902_v39 = vld [vmem:[%s40002_s2 + $0x40] ss:$80 sps:$4 sm:$0xff]  }
 0x712   : > { %15747 = vmatprep.subr.bf16.mxu0 %v28865_v61  ;;  %15490 = vmatprep.mubr.bf16.mxu1 %v30659_v2  ;;  %v28905_v61 = vld [vmem:[%s40002_s2 + $0x48] ss:$80 sps:$4 sm:$0xff]  }
 0x713   : > { %15777 = vmatprep.mubr.bf16.mxu0 %v30659_v2 }
 0x714   : > { %15461 = vmatpush1.bf16.msra.mxu1 %v28860_v0  ;;  %v28910_v0 = vld [vmem:[%s40002_s2 + $0xe4] ss:$80 sps:$4 sm:$0xff]  }
 0x715   : > { %15748 = vmatpush1.bf16.msra.mxu0 %v28863_v3  ;;  %15462 = vmatprep.subr.bf16.mxu1 %v28868_v18  ;;  %v28913_v3 = vld [vmem:[%s40002_s2 + $0xec] ss:$80 sps:$4 sm:$0xff]   ;;  %v28908_v18 = vld [vmem:[%s40002_s2 + $0xe0] ss:$80 sps:$4 sm:$0xff]  }
 0x716   : > { %15749 = vmatprep.subr.bf16.mxu0 %v28871_v47  ;;  %v28911_v47 = vld [vmem:[%s40002_s2 + $0xe8] ss:$80 sps:$4 sm:$0xff]  }
 0x718   : > { %15463 = vmatpush1.bf16.msra.mxu1 %v28866_v59  ;;  %v28916_v59 = vld [vmem:[%s40002_s2 + $0x184] ss:$80 sps:$4 sm:$0xff]  }
 0x719   : > { %15750 = vmatpush1.bf16.msra.mxu0 %v28869_v15  ;;  %15464 = vmatprep.subr.bf16.mxu1 %v28874_v19  ;;  %v28919_v15 = vld [vmem:[%s40002_s2 + $0x18c] ss:$80 sps:$4 sm:$0xff]   ;;  %v28914_v19 = vld [vmem:[%s40002_s2 + $0x180] ss:$80 sps:$4 sm:$0xff]  }
 0x71a   : > { %15751 = vmatprep.subr.bf16.mxu0 %v28877_v20  ;;  %v28917_v20 = vld [vmem:[%s40002_s2 + $0x188] ss:$80 sps:$4 sm:$0xff]  }
 0x71c   : > { %15465 = vmatpush1.bf16.msra.mxu1 %v28872_v21  ;;  %v28925_v21 = vld [vmem:[%s40002_s2 + $0x22c] ss:$80 sps:$4 sm:$0xff]  }
 0x71d   : > { %15752 = vmatpush1.bf16.msra.mxu0 %v28875_v22  ;;  %15466 = vmatprep.subr.bf16.mxu1 %v28880_v25  ;;  %v28920_v22 = vld [vmem:[%s40002_s2 + $0x220] ss:$80 sps:$4 sm:$0xff]   ;;  %v28923_v25 = vld [vmem:[%s40002_s2 + $0x228] ss:$80 sps:$4 sm:$0xff]  }
 0x71e   : > { %15753 = vmatprep.subr.bf16.mxu0 %v28883_v23  ;;  %v28928_v23 = vld [vmem:[%s40002_s2 + $0x2c4] ss:$80 sps:$4 sm:$0xff]  }
 0x720   : > { %15467 = vmatpush1.bf16.msra.mxu1 %v28878_v28  ;;  %v28931_v28 = vld [vmem:[%s40002_s2 + $0x2cc] ss:$80 sps:$4 sm:$0xff]  }
 0x721   : > { %15754 = vmatpush1.bf16.msra.mxu0 %v28881_v40  ;;  %15468 = vmatprep.subr.bf16.mxu1 %v28886_v11  ;;  %v28926_v40 = vld [vmem:[%s40002_s2 + $0x2c0] ss:$80 sps:$4 sm:$0xff]   ;;  %v28929_v11 = vld [vmem:[%s40002_s2 + $0x2c8] ss:$80 sps:$4 sm:$0xff]  }
 0x722   : > { %15755 = vmatprep.subr.bf16.mxu0 %v28889_v29  ;;  %v28934_v29 = vld [vmem:[%s40002_s2 + $0x364] ss:$80 sps:$4 sm:$0xff]  }
 0x724   : > { %15469 = vmatpush1.bf16.msra.mxu1 %v28884_v30  ;;  %v28937_v30 = vld [vmem:[%s40002_s2 + $0x36c] ss:$80 sps:$4 sm:$0xff]  }
 0x725   : > { %15756 = vmatpush1.bf16.msra.mxu0 %v28887_v32  ;;  %15470 = vmatprep.subr.bf16.mxu1 %v28892_v33  ;;  %v28932_v32 = vld [vmem:[%s40002_s2 + $0x360] ss:$80 sps:$4 sm:$0xff]   ;;  %v28935_v33 = vld [vmem:[%s40002_s2 + $0x368] ss:$80 sps:$4 sm:$0xff]  }
 0x726   : > { %15757 = vmatprep.subr.bf16.mxu0 %v28895_v36  ;;  %v28940_v36 = vld [vmem:[%s40002_s2 + $0x404] ss:$80 sps:$4 sm:$0xff]  }
 0x728   : > { %15471 = vmatpush1.bf16.msra.mxu1 %v28890_v17  ;;  %v28943_v17 = vld [vmem:[%s40002_s2 + $0x40c] ss:$80 sps:$4 sm:$0xff]  }
 0x729   : > { %15758 = vmatpush1.bf16.msra.mxu0 %v28893_v44  ;;  %15472 = vmatprep.subr.bf16.mxu1 %v28898_v26  ;;  %v28938_v44 = vld [vmem:[%s40002_s2 + $0x400] ss:$80 sps:$4 sm:$0xff]   ;;  %v28941_v26 = vld [vmem:[%s40002_s2 + $0x408] ss:$80 sps:$4 sm:$0xff]  }
 0x72a   : > { %15759 = vmatprep.subr.bf16.mxu0 %v28901_v56  ;;  %v28946_v56 = vld [vmem:[%s40002_s2 + $0x4a4] ss:$80 sps:$4 sm:$0xff]  }
 0x72c   : > { %15473 = vmatpush1.bf16.msra.mxu1 %v28896_v57  ;;  %v28949_v57 = vld [vmem:[%s40002_s2 + $0x4ac] ss:$80 sps:$4 sm:$0xff]  }
 0x72d   : > { %15760 = vmatpush1.bf16.msra.mxu0 %v28899_v58  ;;  %15786 = vmatprep.subr.bf16.mxu1 %v28904_v49  ;;  %v28944_v58 = vld [vmem:[%s40002_s2 + $0x4a0] ss:$80 sps:$4 sm:$0xff]   ;;  %v28947_v49 = vld [vmem:[%s40002_s2 + $0x4a8] ss:$80 sps:$4 sm:$0xff]  }
 0x72e   : > { %16073 = vmatprep.subr.bf16.mxu0 %v28907_v1  ;;  %v28952_v1 = vld [vmem:[%s40002_s2 + $0x544] ss:$80 sps:$4 sm:$0xff]  }
 0x72f   : > { %15491 = vmatmul.mubr.bf16.vlgmr.msra.gmra.mrb[24].mxu1 %v32265_v31 }
 0x730   : > { %15778 = vmatmul.mubr.bf16.vlgmr.msra.gmra.mrb[28].mxu0 %v32265_v31  ;;  %15787 = vmatpush1.bf16.msra.mxu1 %v28902_v39  ;;  %v28955_v39 = vld [vmem:[%s40002_s2 + $0x54c] ss:$80 sps:$4 sm:$0xff]  }
 0x731   : > { %15818 = vmatprep.mubr.bf16.mxu1 %v31083_v4  ;;  %16074 = vmatpush1.bf16.msra.mxu0 %v28905_v61  ;;  %v28950_v61 = vld [vmem:[%s40002_s2 + $0x540] ss:$80 sps:$4 sm:$0xff]  }
 0x732   : > { %16105 = vmatprep.mubr.bf16.mxu0 %v31083_v4  ;;  %15788 = vmatprep.subr.bf16.mxu1 %v28910_v0  ;;  %v28922_v4 = vld [vmem:[%s40002_s2 + $0x224] ss:$80 sps:$4 sm:$0xff]   ;;  %v28953_v0 = vld [vmem:[%s40002_s2 + $0x548] ss:$80 sps:$4 sm:$0xff]  }
 0x733   : > { %16075 = vmatprep.subr.bf16.mxu0 %v28913_v3  ;;  %v28958_v3 = vld [vmem:[%s40002_s2 + $0x5e4] ss:$80 sps:$4 sm:$0xff]  }
 0x734   : > { %15789 = vmatpush1.bf16.msra.mxu1 %v28908_v18  ;;  %v28961_v18 = vld [vmem:[%s40002_s2 + $0x5ec] ss:$80 sps:$4 sm:$0xff]  }
 0x735   : > { %16076 = vmatpush1.bf16.msra.mxu0 %v28911_v47  ;;  %15790 = vmatprep.subr.bf16.mxu1 %v28916_v59  ;;  %v28956_v47 = vld [vmem:[%s40002_s2 + $0x5e0] ss:$80 sps:$4 sm:$0xff]   ;;  %v28959_v59 = vld [vmem:[%s40002_s2 + $0x5e8] ss:$80 sps:$4 sm:$0xff]  }
 0x736   : > { %16077 = vmatprep.subr.bf16.mxu0 %v28919_v15  ;;  %v28964_v15 = vld [vmem:[%s40002_s2 + $0x684] ss:$80 sps:$4 sm:$0xff]  }
 0x738   : > { %15791 = vmatpush1.bf16.msra.mxu1 %v28914_v19  ;;  %v28967_v19 = vld [vmem:[%s40002_s2 + $0x68c] ss:$80 sps:$4 sm:$0xff]  }
 0x739   : > { %16078 = vmatpush1.bf16.msra.mxu0 %v28917_v20  ;;  %15792 = vmatprep.subr.bf16.mxu1 %v28922_v4  ;;  %v28962_v20 = vld [vmem:[%s40002_s2 + $0x680] ss:$80 sps:$4 sm:$0xff]   ;;  %v28965_v4 = vld [vmem:[%s40002_s2 + $0x688] ss:$80 sps:$4 sm:$0xff]  }
 0x73a   : > { %16079 = vmatprep.subr.bf16.mxu0 %v28925_v21  ;;  %v28970_v21 = vld [vmem:[%s40002_s2 + $0x724] ss:$80 sps:$4 sm:$0xff]  }
 0x73c   : > { %15793 = vmatpush1.bf16.msra.mxu1 %v28920_v22  ;;  %v28973_v22 = vld [vmem:[%s40002_s2 + $0x72c] ss:$80 sps:$4 sm:$0xff]  }
 0x73d   : > { %16080 = vmatpush1.bf16.msra.mxu0 %v28923_v25  ;;  %15794 = vmatprep.subr.bf16.mxu1 %v28928_v23  ;;  %v28968_v25 = vld [vmem:[%s40002_s2 + $0x720] ss:$80 sps:$4 sm:$0xff]   ;;  %v28971_v23 = vld [vmem:[%s40002_s2 + $0x728] ss:$80 sps:$4 sm:$0xff]  }
 0x73e   : > { %16081 = vmatprep.subr.bf16.mxu0 %v28931_v28  ;;  %v28976_v28 = vld [vmem:[%s40002_s2 + $0x7c4] ss:$80 sps:$4 sm:$0xff]  }
 0x740   : > { %15795 = vmatpush1.bf16.msra.mxu1 %v28926_v40  ;;  %v28979_v40 = vld [vmem:[%s40002_s2 + $0x7cc] ss:$80 sps:$4 sm:$0xff]  }
 0x741   : > { %16082 = vmatpush1.bf16.msra.mxu0 %v28929_v11  ;;  %15796 = vmatprep.subr.bf16.mxu1 %v28934_v29  ;;  %v28974_v11 = vld [vmem:[%s40002_s2 + $0x7c0] ss:$80 sps:$4 sm:$0xff]   ;;  %v28977_v29 = vld [vmem:[%s40002_s2 + $0x7c8] ss:$80 sps:$4 sm:$0xff]  }
 0x742   : > { %16083 = vmatprep.subr.bf16.mxu0 %v28937_v30  ;;  %v28982_v30 = vld [vmem:[%s40002_s2 + $0x864] ss:$80 sps:$4 sm:$0xff]  }
 0x744   : > { %15797 = vmatpush1.bf16.msra.mxu1 %v28932_v32  ;;  %v28985_v32 = vld [vmem:[%s40002_s2 + $0x86c] ss:$80 sps:$4 sm:$0xff]  }
 0x745   : > { %16084 = vmatpush1.bf16.msra.mxu0 %v28935_v33  ;;  %15798 = vmatprep.subr.bf16.mxu1 %v28940_v36  ;;  %v28980_v33 = vld [vmem:[%s40002_s2 + $0x860] ss:$80 sps:$4 sm:$0xff]   ;;  %v28983_v36 = vld [vmem:[%s40002_s2 + $0x868] ss:$80 sps:$4 sm:$0xff]  }
 0x746   : > { %16085 = vmatprep.subr.bf16.mxu0 %v28943_v17  ;;  %v28988_v17 = vld [vmem:[%s40002_s2 + $0x904] ss:$80 sps:$4 sm:$0xff]  }
 0x748   : > { %15799 = vmatpush1.bf16.msra.mxu1 %v28938_v44  ;;  %v28991_v44 = vld [vmem:[%s40002_s2 + $0x90c] ss:$80 sps:$4 sm:$0xff]  }
 0x749   : > { %16086 = vmatpush1.bf16.msra.mxu0 %v28941_v26  ;;  %15800 = vmatprep.subr.bf16.mxu1 %v28946_v56  ;;  %v28986_v26 = vld [vmem:[%s40002_s2 + $0x900] ss:$80 sps:$4 sm:$0xff]   ;;  %v28989_v56 = vld [vmem:[%s40002_s2 + $0x908] ss:$80 sps:$4 sm:$0xff]  }
 0x74a   : > { %16087 = vmatprep.subr.bf16.mxu0 %v28949_v57  ;;  %v28994_v57 = vld [vmem:[%s40002_s2 + $0x9a4] ss:$80 sps:$4 sm:$0xff]  }
 0x74c   : > { %15801 = vmatpush1.bf16.msra.mxu1 %v28944_v58  ;;  %v28997_v58 = vld [vmem:[%s40002_s2 + $0x9ac] ss:$80 sps:$4 sm:$0xff]  }
 0x74d   : > { %16088 = vmatpush1.bf16.msra.mxu0 %v28947_v49  ;;  %15802 = vmatprep.subr.bf16.mxu1 %v28952_v1  ;;  %v28992_v49 = vld [vmem:[%s40002_s2 + $0x9a0] ss:$80 sps:$4 sm:$0xff]   ;;  %v28995_v1 = vld [vmem:[%s40002_s2 + $0x9a8] ss:$80 sps:$4 sm:$0xff]  }
 0x74e   : > { %16089 = vmatprep.subr.bf16.mxu0 %v28955_v39  ;;  %v29000_v39 = vld [vmem:[%s40002_s2 + $0xa44] ss:$80 sps:$4 sm:$0xff]  }
 0x750   : > { %15803 = vmatpush1.bf16.msra.mxu1 %v28950_v61  ;;  %v29003_v61 = vld [vmem:[%s40002_s2 + $0xa4c] ss:$80 sps:$4 sm:$0xff]  }
 0x751   : > { %16090 = vmatpush1.bf16.msra.mxu0 %v28953_v0  ;;  %15804 = vmatprep.subr.bf16.mxu1 %v28958_v3  ;;  %v28998_v0 = vld [vmem:[%s40002_s2 + $0xa40] ss:$80 sps:$4 sm:$0xff]   ;;  %v29001_v3 = vld [vmem:[%s40002_s2 + $0xa48] ss:$80 sps:$4 sm:$0xff]  }
 0x752   : > { %16091 = vmatprep.subr.bf16.mxu0 %v28961_v18  ;;  %v29006_v18 = vld [vmem:[%s40002_s2 + $0xae4] ss:$80 sps:$4 sm:$0xff]  }
 0x754   : > { %15805 = vmatpush1.bf16.msra.mxu1 %v28956_v47  ;;  %v29009_v47 = vld [vmem:[%s40002_s2 + $0xaec] ss:$80 sps:$4 sm:$0xff]  }
 0x755   : > { %16092 = vmatpush1.bf16.msra.mxu0 %v28959_v59  ;;  %15806 = vmatprep.subr.bf16.mxu1 %v28964_v15  ;;  %v29004_v59 = vld [vmem:[%s40002_s2 + $0xae0] ss:$80 sps:$4 sm:$0xff]   ;;  %v29007_v15 = vld [vmem:[%s40002_s2 + $0xae8] ss:$80 sps:$4 sm:$0xff]  }
 0x756   : > { %16093 = vmatprep.subr.bf16.mxu0 %v28967_v19  ;;  %v29012_v19 = vld [vmem:[%s40002_s2 + $0xb84] ss:$80 sps:$4 sm:$0xff]  }
 0x758   : > { %15807 = vmatpush1.bf16.msra.mxu1 %v28962_v20  ;;  %v29010_v20 = vld [vmem:[%s40002_s2 + $0xb80] ss:$80 sps:$4 sm:$0xff]  }
 0x759   : > { %16094 = vmatpush1.bf16.msra.mxu0 %v28965_v4  ;;  %15808 = vmatprep.subr.bf16.mxu1 %v28970_v21  ;;  %v29013_v4 = vld [vmem:[%s40002_s2 + $0xb88] ss:$80 sps:$4 sm:$0xff]   ;;  %v29021_v21 = vld [vmem:[%s40002_s2 + $0xc2c] ss:$80 sps:$4 sm:$0xff]  }
 0x75a   : > { %16095 = vmatprep.subr.bf16.mxu0 %v28973_v22  ;;  %v29016_v22 = vld [vmem:[%s40002_s2 + $0xc20] ss:$80 sps:$4 sm:$0xff]  }
 0x75c   : > { %15809 = vmatpush1.bf16.msra.mxu1 %v28968_v25  ;;  %v29019_v25 = vld [vmem:[%s40002_s2 + $0xc28] ss:$80 sps:$4 sm:$0xff]  }
 0x75d   : > { %16096 = vmatpush1.bf16.msra.mxu0 %v28971_v23  ;;  %15810 = vmatprep.subr.bf16.mxu1 %v28976_v28  ;;  %v29024_v23 = vld [vmem:[%s40002_s2 + $0xcc4] ss:$80 sps:$4 sm:$0xff]   ;;  %v29027_v28 = vld [vmem:[%s40002_s2 + $0xccc] ss:$80 sps:$4 sm:$0xff]  }
 0x75e   : > { %16097 = vmatprep.subr.bf16.mxu0 %v28979_v40  ;;  %v29022_v40 = vld [vmem:[%s40002_s2 + $0xcc0] ss:$80 sps:$4 sm:$0xff]  }
 0x760   : > { %15811 = vmatpush1.bf16.msra.mxu1 %v28974_v11  ;;  %v29025_v11 = vld [vmem:[%s40002_s2 + $0xcc8] ss:$80 sps:$4 sm:$0xff]  }
 0x761   : > { %16098 = vmatpush1.bf16.msra.mxu0 %v28977_v29  ;;  %15812 = vmatprep.subr.bf16.mxu1 %v28982_v30  ;;  %v29030_v29 = vld [vmem:[%s40002_s2 + $0xd64] ss:$80 sps:$4 sm:$0xff]   ;;  %v29033_v30 = vld [vmem:[%s40002_s2 + $0xd6c] ss:$80 sps:$4 sm:$0xff]  }
 0x762   : > { %16099 = vmatprep.subr.bf16.mxu0 %v28985_v32  ;;  %v29028_v32 = vld [vmem:[%s40002_s2 + $0xd60] ss:$80 sps:$4 sm:$0xff]  }
 0x764   : > { %15813 = vmatpush1.bf16.msra.mxu1 %v28980_v33  ;;  %v29031_v33 = vld [vmem:[%s40002_s2 + $0xd68] ss:$80 sps:$4 sm:$0xff]  }
 0x765   : > { %16100 = vmatpush1.bf16.msra.mxu0 %v28983_v36  ;;  %15814 = vmatprep.subr.bf16.mxu1 %v28988_v17  ;;  %v29036_v36 = vld [vmem:[%s40002_s2 + $0xe04] ss:$80 sps:$4 sm:$0xff]   ;;  %v29039_v17 = vld [vmem:[%s40002_s2 + $0xe0c] ss:$80 sps:$4 sm:$0xff]  }
 0x766   : > { %16101 = vmatprep.subr.bf16.mxu0 %v28991_v44  ;;  %v29034_v44 = vld [vmem:[%s40002_s2 + $0xe00] ss:$80 sps:$4 sm:$0xff]  }
 0x768   : > { %15815 = vmatpush1.bf16.msra.mxu1 %v28986_v26  ;;  %v29037_v26 = vld [vmem:[%s40002_s2 + $0xe08] ss:$80 sps:$4 sm:$0xff]  }
 0x769   : > { %16102 = vmatpush1.bf16.msra.mxu0 %v28989_v56  ;;  %15816 = vmatprep.subr.bf16.mxu1 %v28994_v57  ;;  %v29042_v56 = vld [vmem:[%s40002_s2 + $0xea4] ss:$80 sps:$4 sm:$0xff]   ;;  %v29045_v57 = vld [vmem:[%s40002_s2 + $0xeac] ss:$80 sps:$4 sm:$0xff]  }
 0x76a   : > { %16103 = vmatprep.subr.bf16.mxu0 %v28997_v58  ;;  %v29040_v58 = vld [vmem:[%s40002_s2 + $0xea0] ss:$80 sps:$4 sm:$0xff]  }
 0x76c   : > { %15817 = vmatpush1.bf16.msra.mxu1 %v28992_v49  ;;  %v29043_v49 = vld [vmem:[%s40002_s2 + $0xea8] ss:$80 sps:$4 sm:$0xff]  }
 0x76d   : > { %16104 = vmatpush1.bf16.msra.mxu0 %v28995_v1  ;;  %15827 = vmatprep.subr.bf16.mxu1 %v29000_v39  ;;  %v29048_v1 = vld [vmem:[%s40002_s2 + $0xf44] ss:$80 sps:$4 sm:$0xff]   ;;  %v29051_v39 = vld [vmem:[%s40002_s2 + $0xf4c] ss:$80 sps:$4 sm:$0xff]  }
 0x76e   : > { %16114 = vmatprep.subr.bf16.mxu0 %v29003_v61  ;;  %v29046_v61 = vld [vmem:[%s40002_s2 + $0xf40] ss:$80 sps:$4 sm:$0xff]  }
 0x76f   : > { %15819 = vmatmul.mubr.bf16.vlgmr.msra.gmra.mrb[28].mxu1 %v31085_v7 }
 0x770   : > { %16106 = vmatmul.mubr.bf16.vlgmr.msra.gmra.mrb[32].mxu0 %v31085_v7  ;;  %15828 = vmatpush1.bf16.msra.mxu1 %v28998_v0  ;;  %v29015_v7 = vld [vmem:[%s40002_s2 + $0xb8c] ss:$80 sps:$4 sm:$0xff]   ;;  %v29049_v0 = vld [vmem:[%s40002_s2 + $0xf48] ss:$80 sps:$4 sm:$0xff]  }
 0x771   : > { %15859 = vmatprep.mubr.bf16.mxu1 %v31103_v14  ;;  %16115 = vmatpush1.bf16.msra.mxu0 %v29001_v3  ;;  %v29054_v3 = vld [vmem:[%s40002_s2 + $0xfe4] ss:$80 sps:$4 sm:$0xff]  }
 0x772   : > { %16146 = vmatprep.mubr.bf16.mxu0 %v31103_v14  ;;  %15829 = vmatprep.subr.bf16.mxu1 %v29006_v18  ;;  %v29018_v14 = vld [vmem:[%s40002_s2 + $0xc24] ss:$80 sps:$4 sm:$0xff]   ;;  %v29057_v18 = vld [vmem:[%s40002_s2 + $0xfec] ss:$80 sps:$4 sm:$0xff]  }
 0x773   : > { %16116 = vmatprep.subr.bf16.mxu0 %v29009_v47  ;;  %v29052_v47 = vld [vmem:[%s40002_s2 + $0xfe0] ss:$80 sps:$4 sm:$0xff]  }
 0x774   : > { %15830 = vmatpush1.bf16.msra.mxu1 %v29004_v59  ;;  %v29055_v59 = vld [vmem:[%s40002_s2 + $0xfe8] ss:$80 sps:$4 sm:$0xff]  }
 0x775   : > { %16117 = vmatpush1.bf16.msra.mxu0 %v29007_v15  ;;  %15831 = vmatprep.subr.bf16.mxu1 %v29012_v19  ;;  %v29060_v15 = vld [vmem:[%s40002_s2 + $0x1084] ss:$80 sps:$4 sm:$0xff]   ;;  %v29063_v19 = vld [vmem:[%s40002_s2 + $0x108c] ss:$80 sps:$4 sm:$0xff]  }
 0x776   : > { %16118 = vmatprep.subr.bf16.mxu0 %v29015_v7  ;;  %v29058_v7 = vld [vmem:[%s40002_s2 + $0x1080] ss:$80 sps:$4 sm:$0xff]  }
 0x778   : > { %15832 = vmatpush1.bf16.msra.mxu1 %v29010_v20  ;;  %v29061_v20 = vld [vmem:[%s40002_s2 + $0x1088] ss:$80 sps:$4 sm:$0xff]  }
 0x779   : > { %16119 = vmatpush1.bf16.msra.mxu0 %v29013_v4  ;;  %15833 = vmatprep.subr.bf16.mxu1 %v29018_v14  ;;  %v29066_v4 = vld [vmem:[%s40002_s2 + $0x1124] ss:$80 sps:$4 sm:$0xff]   ;;  %v29069_v14 = vld [vmem:[%s40002_s2 + $0x112c] ss:$80 sps:$4 sm:$0xff]  }
 0x77a   : > { %16120 = vmatprep.subr.bf16.mxu0 %v29021_v21  ;;  %v29064_v21 = vld [vmem:[%s40002_s2 + $0x1120] ss:$80 sps:$4 sm:$0xff]  }
 0x77c   : > { %15834 = vmatpush1.bf16.msra.mxu1 %v29016_v22  ;;  %v29067_v22 = vld [vmem:[%s40002_s2 + $0x1128] ss:$80 sps:$4 sm:$0xff]  }
 0x77d   : > { %16121 = vmatpush1.bf16.msra.mxu0 %v29019_v25  ;;  %15835 = vmatprep.subr.bf16.mxu1 %v29024_v23  ;;  %v29072_v25 = vld [vmem:[%s40002_s2 + $0x11c4] ss:$80 sps:$4 sm:$0xff]   ;;  %v29075_v23 = vld [vmem:[%s40002_s2 + $0x11cc] ss:$80 sps:$4 sm:$0xff]  }
 0x77e   : > { %16122 = vmatprep.subr.bf16.mxu0 %v29027_v28  ;;  %v29070_v28 = vld [vmem:[%s40002_s2 + $0x11c0] ss:$80 sps:$4 sm:$0xff]  }
 0x780   : > { %15836 = vmatpush1.bf16.msra.mxu1 %v29022_v40  ;;  %v29073_v40 = vld [vmem:[%s40002_s2 + $0x11c8] ss:$80 sps:$4 sm:$0xff]  }
 0x781   : > { %16123 = vmatpush1.bf16.msra.mxu0 %v29025_v11  ;;  %15837 = vmatprep.subr.bf16.mxu1 %v29030_v29  ;;  %v29078_v11 = vld [vmem:[%s40002_s2 + $0x1264] ss:$80 sps:$4 sm:$0xff]   ;;  %v29081_v29 = vld [vmem:[%s40002_s2 + $0x126c] ss:$80 sps:$4 sm:$0xff]  }
 0x782   : > { %16124 = vmatprep.subr.bf16.mxu0 %v29033_v30  ;;  %v29076_v30 = vld [vmem:[%s40002_s2 + $0x1260] ss:$80 sps:$4 sm:$0xff]  }
 0x784   : > { %15838 = vmatpush1.bf16.msra.mxu1 %v29028_v32  ;;  %v29079_v32 = vld [vmem:[%s40002_s2 + $0x1268] ss:$80 sps:$4 sm:$0xff]  }
 0x785   : > { %16125 = vmatpush1.bf16.msra.mxu0 %v29031_v33  ;;  %15839 = vmatprep.subr.bf16.mxu1 %v29036_v36  ;;  %v29084_v33 = vld [vmem:[%s40002_s2 + $0x1304] ss:$80 sps:$4 sm:$0xff]   ;;  %v29087_v36 = vld [vmem:[%s40002_s2 + $0x130c] ss:$80 sps:$4 sm:$0xff]  }
 0x786   : > { %16126 = vmatprep.subr.bf16.mxu0 %v29039_v17  ;;  %v29082_v17 = vld [vmem:[%s40002_s2 + $0x1300] ss:$80 sps:$4 sm:$0xff]  }
 0x788   : > { %15840 = vmatpush1.bf16.msra.mxu1 %v29034_v44  ;;  %v29085_v44 = vld [vmem:[%s40002_s2 + $0x1308] ss:$80 sps:$4 sm:$0xff]  }
 0x789   : > { %16127 = vmatpush1.bf16.msra.mxu0 %v29037_v26  ;;  %15841 = vmatprep.subr.bf16.mxu1 %v29042_v56  ;;  %v29090_v26 = vld [vmem:[%s40002_s2 + $0x13a4] ss:$80 sps:$4 sm:$0xff]   ;;  %v29093_v56 = vld [vmem:[%s40002_s2 + $0x13ac] ss:$80 sps:$4 sm:$0xff]  }
 0x78a   : > { %16128 = vmatprep.subr.bf16.mxu0 %v29045_v57  ;;  %v29088_v57 = vld [vmem:[%s40002_s2 + $0x13a0] ss:$80 sps:$4 sm:$0xff]  }
 0x78c   : > { %15842 = vmatpush1.bf16.msra.mxu1 %v29040_v58  ;;  %v29091_v58 = vld [vmem:[%s40002_s2 + $0x13a8] ss:$80 sps:$4 sm:$0xff]  }
 0x78d   : > { %16129 = vmatpush1.bf16.msra.mxu0 %v29043_v49  ;;  %15843 = vmatprep.subr.bf16.mxu1 %v29048_v1  ;;  %v29096_v49 = vld [vmem:[%s40002_s2 + $0x1444] ss:$80 sps:$4 sm:$0xff]   ;;  %v29099_v1 = vld [vmem:[%s40002_s2 + $0x144c] ss:$80 sps:$4 sm:$0xff]  }
 0x78e   : > { %16130 = vmatprep.subr.bf16.mxu0 %v29051_v39  ;;  %v29094_v39 = vld [vmem:[%s40002_s2 + $0x1440] ss:$80 sps:$4 sm:$0xff]  }
 0x790   : > { %15844 = vmatpush1.bf16.msra.mxu1 %v29046_v61  ;;  %v29097_v61 = vld [vmem:[%s40002_s2 + $0x1448] ss:$80 sps:$4 sm:$0xff]  }
 0x791   : > { %16131 = vmatpush1.bf16.msra.mxu0 %v29049_v0  ;;  %15845 = vmatprep.subr.bf16.mxu1 %v29054_v3  ;;  %v29102_v0 = vld [vmem:[%s40002_s2 + $0x14e4] ss:$80 sps:$4 sm:$0xff]   ;;  %v29105_v3 = vld [vmem:[%s40002_s2 + $0x14ec] ss:$80 sps:$4 sm:$0xff]  }
 0x792   : > { %16132 = vmatprep.subr.bf16.mxu0 %v29057_v18  ;;  %v29100_v18 = vld [vmem:[%s40002_s2 + $0x14e0] ss:$80 sps:$4 sm:$0xff]  }
 0x794   : > { %15846 = vmatpush1.bf16.msra.mxu1 %v29052_v47  ;;  %v29103_v47 = vld [vmem:[%s40002_s2 + $0x14e8] ss:$80 sps:$4 sm:$0xff]  }
 0x795   : > { %16133 = vmatpush1.bf16.msra.mxu0 %v29055_v59  ;;  %15847 = vmatprep.subr.bf16.mxu1 %v29060_v15  ;;  %v29108_v59 = vld [vmem:[%s40002_s2 + $0x1584] ss:$80 sps:$4 sm:$0xff]   ;;  %v29106_v15 = vld [vmem:[%s40002_s2 + $0x1580] ss:$80 sps:$4 sm:$0xff]  }
 0x796   : > { %16134 = vmatprep.subr.bf16.mxu0 %v29063_v19  ;;  %v29109_v19 = vld [vmem:[%s40002_s2 + $0x1588] ss:$80 sps:$4 sm:$0xff]  }
 0x798   : > { %15848 = vmatpush1.bf16.msra.mxu1 %v29058_v7  ;;  %v29117_v7 = vld [vmem:[%s40002_s2 + $0x162c] ss:$80 sps:$4 sm:$0xff]  }
 0x799   : > { %16135 = vmatpush1.bf16.msra.mxu0 %v29061_v20  ;;  %15849 = vmatprep.subr.bf16.mxu1 %v29066_v4  ;;  %v29112_v20 = vld [vmem:[%s40002_s2 + $0x1620] ss:$80 sps:$4 sm:$0xff]   ;;  %v29115_v4 = vld [vmem:[%s40002_s2 + $0x1628] ss:$80 sps:$4 sm:$0xff]  }
 0x79a   : > { %16136 = vmatprep.subr.bf16.mxu0 %v29069_v14  ;;  %v29120_v14 = vld [vmem:[%s40002_s2 + $0x16c4] ss:$80 sps:$4 sm:$0xff]  }
 0x79c   : > { %15850 = vmatpush1.bf16.msra.mxu1 %v29064_v21  ;;  %v29123_v21 = vld [vmem:[%s40002_s2 + $0x16cc] ss:$80 sps:$4 sm:$0xff]  }
 0x79d   : > { %16137 = vmatpush1.bf16.msra.mxu0 %v29067_v22  ;;  %15851 = vmatprep.subr.bf16.mxu1 %v29072_v25  ;;  %v29118_v22 = vld [vmem:[%s40002_s2 + $0x16c0] ss:$80 sps:$4 sm:$0xff]   ;;  %v29121_v25 = vld [vmem:[%s40002_s2 + $0x16c8] ss:$80 sps:$4 sm:$0xff]  }
 0x79e   : > { %16138 = vmatprep.subr.bf16.mxu0 %v29075_v23  ;;  %v29126_v23 = vld [vmem:[%s40002_s2 + $0x1764] ss:$80 sps:$4 sm:$0xff]  }
 0x7a0   : > { %15852 = vmatpush1.bf16.msra.mxu1 %v29070_v28  ;;  %v29129_v28 = vld [vmem:[%s40002_s2 + $0x176c] ss:$80 sps:$4 sm:$0xff]  }
 0x7a1   : > { %16139 = vmatpush1.bf16.msra.mxu0 %v29073_v40  ;;  %15853 = vmatprep.subr.bf16.mxu1 %v29078_v11  ;;  %v29124_v40 = vld [vmem:[%s40002_s2 + $0x1760] ss:$80 sps:$4 sm:$0xff]   ;;  %v29127_v11 = vld [vmem:[%s40002_s2 + $0x1768] ss:$80 sps:$4 sm:$0xff]  }
 0x7a2   : > { %16140 = vmatprep.subr.bf16.mxu0 %v29081_v29  ;;  %v29132_v29 = vld [vmem:[%s40002_s2 + $0x1804] ss:$80 sps:$4 sm:$0xff]  }
 0x7a4   : > { %15854 = vmatpush1.bf16.msra.mxu1 %v29076_v30  ;;  %v29135_v30 = vld [vmem:[%s40002_s2 + $0x180c] ss:$80 sps:$4 sm:$0xff]  }
 0x7a5   : > { %16141 = vmatpush1.bf16.msra.mxu0 %v29079_v32  ;;  %15855 = vmatprep.subr.bf16.mxu1 %v29084_v33  ;;  %v29130_v32 = vld [vmem:[%s40002_s2 + $0x1800] ss:$80 sps:$4 sm:$0xff]   ;;  %v29133_v33 = vld [vmem:[%s40002_s2 + $0x1808] ss:$80 sps:$4 sm:$0xff]  }
 0x7a6   : > { %16142 = vmatprep.subr.bf16.mxu0 %v29087_v36  ;;  %v29138_v36 = vld [vmem:[%s40002_s2 + $0x18a4] ss:$80 sps:$4 sm:$0xff]  }
 0x7a8   : > { %15856 = vmatpush1.bf16.msra.mxu1 %v29082_v17  ;;  %v29141_v17 = vld [vmem:[%s40002_s2 + $0x18ac] ss:$80 sps:$4 sm:$0xff]  }
 0x7a9   : > { %16143 = vmatpush1.bf16.msra.mxu0 %v29085_v44  ;;  %15857 = vmatprep.subr.bf16.mxu1 %v29090_v26  ;;  %v29136_v44 = vld [vmem:[%s40002_s2 + $0x18a0] ss:$80 sps:$4 sm:$0xff]   ;;  %v29139_v26 = vld [vmem:[%s40002_s2 + $0x18a8] ss:$80 sps:$4 sm:$0xff]  }
 0x7aa   : > { %16144 = vmatprep.subr.bf16.mxu0 %v29093_v56  ;;  %v29144_v56 = vld [vmem:[%s40002_s2 + $0x1944] ss:$80 sps:$4 sm:$0xff]  }
 0x7ac   : > { %15858 = vmatpush1.bf16.msra.mxu1 %v29088_v57  ;;  %v29147_v57 = vld [vmem:[%s40002_s2 + $0x194c] ss:$80 sps:$4 sm:$0xff]  }
 0x7ad   : > { %16145 = vmatpush1.bf16.msra.mxu0 %v29091_v58  ;;  %15868 = vmatprep.subr.bf16.mxu1 %v29096_v49  ;;  %v29142_v58 = vld [vmem:[%s40002_s2 + $0x1940] ss:$80 sps:$4 sm:$0xff]   ;;  %v29145_v49 = vld [vmem:[%s40002_s2 + $0x1948] ss:$80 sps:$4 sm:$0xff]  }
 0x7ae   : > { %16155 = vmatprep.subr.bf16.mxu0 %v29099_v1  ;;  %v29150_v1 = vld [vmem:[%s40002_s2 + $0x19e4] ss:$80 sps:$4 sm:$0xff]  }
 0x7af   : > { %15860 = vmatmul.mubr.bf16.vlgmr.msra.gmra.mrb[28].mxu1 %v31326_v9 }
 0x7b0   : > { %16147 = vmatmul.mubr.bf16.vlgmr.msra.gmra.mrb[32].mxu0 %v31326_v9  ;;  %15869 = vmatpush1.bf16.msra.mxu1 %v29094_v39  ;;  %v29111_v9 = vld [vmem:[%s40002_s2 + $0x158c] ss:$80 sps:$4 sm:$0xff]  }
 0x7b1   : > { %15900 = vmatprep.mubr.bf16.mxu1 %v31340_v16  ;;  %16156 = vmatpush1.bf16.msra.mxu0 %v29097_v61  ;;  %v29153_v39 = vld [vmem:[%s40002_s2 + $0x19ec] ss:$80 sps:$4 sm:$0xff]   ;;  %v29148_v61 = vld [vmem:[%s40002_s2 + $0x19e0] ss:$80 sps:$4 sm:$0xff]  }
 0x7b2   : > { %16187 = vmatprep.mubr.bf16.mxu0 %v31340_v16  ;;  %15870 = vmatprep.subr.bf16.mxu1 %v29102_v0  ;;  %v29114_v16 = vld [vmem:[%s40002_s2 + $0x1624] ss:$80 sps:$4 sm:$0xff]   ;;  %v29151_v0 = vld [vmem:[%s40002_s2 + $0x19e8] ss:$80 sps:$4 sm:$0xff]  }
 0x7b3   : > { %16157 = vmatprep.subr.bf16.mxu0 %v29105_v3  ;;  %v29156_v3 = vld [vmem:[%s40002_s2 + $0x1a84] ss:$80 sps:$4 sm:$0xff]  }
 0x7b4   : > { %15871 = vmatpush1.bf16.msra.mxu1 %v29100_v18  ;;  %v29159_v18 = vld [vmem:[%s40002_s2 + $0x1a8c] ss:$80 sps:$4 sm:$0xff]  }
 0x7b5   : > { %16158 = vmatpush1.bf16.msra.mxu0 %v29103_v47  ;;  %15872 = vmatprep.subr.bf16.mxu1 %v29108_v59  ;;  %v29154_v47 = vld [vmem:[%s40002_s2 + $0x1a80] ss:$80 sps:$4 sm:$0xff]   ;;  %v29157_v59 = vld [vmem:[%s40002_s2 + $0x1a88] ss:$80 sps:$4 sm:$0xff]  }
 0x7b6   : > { %16159 = vmatprep.subr.bf16.mxu0 %v29111_v9  ;;  %v29162_v9 = vld [vmem:[%s40002_s2 + $0x1b24] ss:$80 sps:$4 sm:$0xff]  }
 0x7b8   : > { %15873 = vmatpush1.bf16.msra.mxu1 %v29106_v15  ;;  %v29165_v15 = vld [vmem:[%s40002_s2 + $0x1b2c] ss:$80 sps:$4 sm:$0xff]  }
 0x7b9   : > { %16160 = vmatpush1.bf16.msra.mxu0 %v29109_v19  ;;  %15874 = vmatprep.subr.bf16.mxu1 %v29114_v16  ;;  %v29160_v19 = vld [vmem:[%s40002_s2 + $0x1b20] ss:$80 sps:$4 sm:$0xff]   ;;  %v29163_v16 = vld [vmem:[%s40002_s2 + $0x1b28] ss:$80 sps:$4 sm:$0xff]  }
 0x7ba   : > { %16161 = vmatprep.subr.bf16.mxu0 %v29117_v7  ;;  %v29168_v7 = vld [vmem:[%s40002_s2 + $0x1bc4] ss:$80 sps:$4 sm:$0xff]  }
 0x7bc   : > { %15875 = vmatpush1.bf16.msra.mxu1 %v29112_v20  ;;  %v29171_v20 = vld [vmem:[%s40002_s2 + $0x1bcc] ss:$80 sps:$4 sm:$0xff]  }
 0x7bd   : > { %16162 = vmatpush1.bf16.msra.mxu0 %v29115_v4  ;;  %15876 = vmatprep.subr.bf16.mxu1 %v29120_v14  ;;  %v29166_v4 = vld [vmem:[%s40002_s2 + $0x1bc0] ss:$80 sps:$4 sm:$0xff]   ;;  %v29169_v14 = vld [vmem:[%s40002_s2 + $0x1bc8] ss:$80 sps:$4 sm:$0xff]  }
 0x7be   : > { %16163 = vmatprep.subr.bf16.mxu0 %v29123_v21  ;;  %v29174_v21 = vld [vmem:[%s40002_s2 + $0x1c64] ss:$80 sps:$4 sm:$0xff]  }
 0x7c0   : > { %15877 = vmatpush1.bf16.msra.mxu1 %v29118_v22  ;;  %v29177_v22 = vld [vmem:[%s40002_s2 + $0x1c6c] ss:$80 sps:$4 sm:$0xff]  }
 0x7c1   : > { %16164 = vmatpush1.bf16.msra.mxu0 %v29121_v25  ;;  %15878 = vmatprep.subr.bf16.mxu1 %v29126_v23  ;;  %v29172_v25 = vld [vmem:[%s40002_s2 + $0x1c60] ss:$80 sps:$4 sm:$0xff]   ;;  %v29175_v23 = vld [vmem:[%s40002_s2 + $0x1c68] ss:$80 sps:$4 sm:$0xff]  }
 0x7c2   : > { %16165 = vmatprep.subr.bf16.mxu0 %v29129_v28  ;;  %v29180_v28 = vld [vmem:[%s40002_s2 + $0x1d04] ss:$80 sps:$4 sm:$0xff]  }
 0x7c4   : > { %15879 = vmatpush1.bf16.msra.mxu1 %v29124_v40  ;;  %v29183_v40 = vld [vmem:[%s40002_s2 + $0x1d0c] ss:$80 sps:$4 sm:$0xff]  }
 0x7c5   : > { %16166 = vmatpush1.bf16.msra.mxu0 %v29127_v11  ;;  %15880 = vmatprep.subr.bf16.mxu1 %v29132_v29  ;;  %v29178_v11 = vld [vmem:[%s40002_s2 + $0x1d00] ss:$80 sps:$4 sm:$0xff]   ;;  %v29181_v29 = vld [vmem:[%s40002_s2 + $0x1d08] ss:$80 sps:$4 sm:$0xff]  }
 0x7c6   : > { %16167 = vmatprep.subr.bf16.mxu0 %v29135_v30  ;;  %v29186_v30 = vld [vmem:[%s40002_s2 + $0x1da4] ss:$80 sps:$4 sm:$0xff]  }
 0x7c8   : > { %15881 = vmatpush1.bf16.msra.mxu1 %v29130_v32  ;;  %v29189_v32 = vld [vmem:[%s40002_s2 + $0x1dac] ss:$80 sps:$4 sm:$0xff]  }
 0x7c9   : > { %16168 = vmatpush1.bf16.msra.mxu0 %v29133_v33  ;;  %15882 = vmatprep.subr.bf16.mxu1 %v29138_v36  ;;  %v29184_v33 = vld [vmem:[%s40002_s2 + $0x1da0] ss:$80 sps:$4 sm:$0xff]   ;;  %v29187_v36 = vld [vmem:[%s40002_s2 + $0x1da8] ss:$80 sps:$4 sm:$0xff]  }
 0x7ca   : > { %16169 = vmatprep.subr.bf16.mxu0 %v29141_v17  ;;  %v29192_v17 = vld [vmem:[%s40002_s2 + $0x1e44] ss:$80 sps:$4 sm:$0xff]  }
 0x7cc   : > { %15883 = vmatpush1.bf16.msra.mxu1 %v29136_v44  ;;  %v29195_v44 = vld [vmem:[%s40002_s2 + $0x1e4c] ss:$80 sps:$4 sm:$0xff]  }
 0x7cd   : > { %16170 = vmatpush1.bf16.msra.mxu0 %v29139_v26  ;;  %15884 = vmatprep.subr.bf16.mxu1 %v29144_v56  ;;  %v29190_v26 = vld [vmem:[%s40002_s2 + $0x1e40] ss:$80 sps:$4 sm:$0xff]   ;;  %v29193_v56 = vld [vmem:[%s40002_s2 + $0x1e48] ss:$80 sps:$4 sm:$0xff]  }
 0x7ce   : > { %16171 = vmatprep.subr.bf16.mxu0 %v29147_v57  ;;  %v29198_v57 = vld [vmem:[%s40002_s2 + $0x1ee4] ss:$80 sps:$4 sm:$0xff]  }
 0x7d0   : > { %15885 = vmatpush1.bf16.msra.mxu1 %v29142_v58  ;;  %v29201_v58 = vld [vmem:[%s40002_s2 + $0x1eec] ss:$80 sps:$4 sm:$0xff]  }
 0x7d1   : > { %16172 = vmatpush1.bf16.msra.mxu0 %v29145_v49  ;;  %15886 = vmatprep.subr.bf16.mxu1 %v29150_v1  ;;  %v29196_v49 = vld [vmem:[%s40002_s2 + $0x1ee0] ss:$80 sps:$4 sm:$0xff]   ;;  %v29199_v1 = vld [vmem:[%s40002_s2 + $0x1ee8] ss:$80 sps:$4 sm:$0xff]  }
 0x7d2   : > { %16173 = vmatprep.subr.bf16.mxu0 %v29153_v39  ;;  %v29204_v39 = vld [vmem:[%s40002_s2 + $0x1f84] ss:$80 sps:$4 sm:$0xff]  }
 0x7d4   : > { %15887 = vmatpush1.bf16.msra.mxu1 %v29148_v61  ;;  %v29202_v61 = vld [vmem:[%s40002_s2 + $0x1f80] ss:$80 sps:$4 sm:$0xff]  }
 0x7d5   : > { %16174 = vmatpush1.bf16.msra.mxu0 %v29151_v0  ;;  %15888 = vmatprep.subr.bf16.mxu1 %v29156_v3  ;;  %v29205_v0 = vld [vmem:[%s40002_s2 + $0x1f88] ss:$80 sps:$4 sm:$0xff]   ;;  %v29213_v3 = vld [vmem:[%s40002_s2 + $0x202c] ss:$80 sps:$4 sm:$0xff]  }
 0x7d6   : > { %16175 = vmatprep.subr.bf16.mxu0 %v29159_v18  ;;  %v29208_v18 = vld [vmem:[%s40002_s2 + $0x2020] ss:$80 sps:$4 sm:$0xff]  }
 0x7d8   : > { %15889 = vmatpush1.bf16.msra.mxu1 %v29154_v47  ;;  %v29211_v47 = vld [vmem:[%s40002_s2 + $0x2028] ss:$80 sps:$4 sm:$0xff]  }
 0x7d9   : > { %16176 = vmatpush1.bf16.msra.mxu0 %v29157_v59  ;;  %15890 = vmatprep.subr.bf16.mxu1 %v29162_v9  ;;  %v29216_v59 = vld [vmem:[%s40002_s2 + $0x20c4] ss:$80 sps:$4 sm:$0xff]   ;;  %v29219_v9 = vld [vmem:[%s40002_s2 + $0x20cc] ss:$80 sps:$4 sm:$0xff]  }
 0x7da   : > { %16177 = vmatprep.subr.bf16.mxu0 %v29165_v15  ;;  %v29214_v15 = vld [vmem:[%s40002_s2 + $0x20c0] ss:$80 sps:$4 sm:$0xff]  }
 0x7dc   : > { %15891 = vmatpush1.bf16.msra.mxu1 %v29160_v19  ;;  %v29217_v19 = vld [vmem:[%s40002_s2 + $0x20c8] ss:$80 sps:$4 sm:$0xff]  }
 0x7dd   : > { %16178 = vmatpush1.bf16.msra.mxu0 %v29163_v16  ;;  %15892 = vmatprep.subr.bf16.mxu1 %v29168_v7  ;;  %v29222_v16 = vld [vmem:[%s40002_s2 + $0x2164] ss:$80 sps:$4 sm:$0xff]   ;;  %v29225_v7 = vld [vmem:[%s40002_s2 + $0x216c] ss:$80 sps:$4 sm:$0xff]  }
 0x7de   : > { %16179 = vmatprep.subr.bf16.mxu0 %v29171_v20  ;;  %v29220_v20 = vld [vmem:[%s40002_s2 + $0x2160] ss:$80 sps:$4 sm:$0xff]  }
 0x7e0   : > { %15893 = vmatpush1.bf16.msra.mxu1 %v29166_v4  ;;  %v29223_v4 = vld [vmem:[%s40002_s2 + $0x2168] ss:$80 sps:$4 sm:$0xff]  }
 0x7e1   : > { %16180 = vmatpush1.bf16.msra.mxu0 %v29169_v14  ;;  %15894 = vmatprep.subr.bf16.mxu1 %v29174_v21  ;;  %v29228_v14 = vld [vmem:[%s40002_s2 + $0x2204] ss:$80 sps:$4 sm:$0xff]  }
 0x7e2   : > { %16181 = vmatprep.subr.bf16.mxu0 %v29177_v22  ;;  %v29231_v22 = vld [vmem:[%s40002_s2 + $0x220c] ss:$80 sps:$4 sm:$0xff]  }
 0x7e4   : > { %15895 = vmatpush1.bf16.msra.mxu1 %v29172_v25 }
 0x7e5   : > { %16182 = vmatpush1.bf16.msra.mxu0 %v29175_v23  ;;  %15896 = vmatprep.subr.bf16.mxu1 %v29180_v28 }
 0x7e6   : > { %16183 = vmatprep.subr.bf16.mxu0 %v29183_v40 }
 0x7e8   : > { %15897 = vmatpush1.bf16.msra.mxu1 %v29178_v11  ;;  %v29226_v11 = vld [vmem:[%s40002_s2 + $0x2200] ss:$80 sps:$4 sm:$0xff]  }
 0x7e9   : > { %16184 = vmatpush1.bf16.msra.mxu0 %v29181_v29  ;;  %15898 = vmatprep.subr.bf16.mxu1 %v29186_v30 }
 0x7ea   : > { %16185 = vmatprep.subr.bf16.mxu0 %v29189_v32  ;;  %v29229_v32 = vld [vmem:[%s40002_s2 + $0x2208] ss:$80 sps:$4 sm:$0xff]  }
 0x7ec   : > { %15899 = vmatpush1.bf16.msra.mxu1 %v29184_v33  ;;  %v29234_v33 = vld [vmem:[%s40002_s2 + $0x22a4] ss:$80 sps:$4 sm:$0xff]  }
 0x7ed   : > { %16186 = vmatpush1.bf16.msra.mxu0 %v29187_v36  ;;  %15909 = vmatprep.subr.bf16.mxu1 %v29192_v17  ;;  %v29237_v17 = vld [vmem:[%s40002_s2 + $0x22ac] ss:$80 sps:$4 sm:$0xff]  }
 0x7ee   : > { %16196 = vmatprep.subr.bf16.mxu0 %v29195_v44  ;;  %v29232_v44 = vld [vmem:[%s40002_s2 + $0x22a0] ss:$80 sps:$4 sm:$0xff]  }
 0x7ef   : > { %15901 = vmatmul.mubr.bf16.vlgmr.msra.gmra.mrb[28].mxu1 %v31540_v52 }
 0x7f0   : > { %16188 = vmatmul.mubr.bf16.vlgmr.msra.gmra.mrb[32].mxu0 %v31540_v52  ;;  %15910 = vmatpush1.bf16.msra.mxu1 %v29190_v26  ;;  %v29207_v52 = vld [vmem:[%s40002_s2 + $0x1f8c] ss:$80 sps:$4 sm:$0xff]   ;;  %v29235_v26 = vld [vmem:[%s40002_s2 + $0x22a8] ss:$80 sps:$4 sm:$0xff]  }
 0x7f1   : > { %15941 = vmatprep.mubr.bf16.mxu1 %v31554_v60  ;;  %16197 = vmatpush1.bf16.msra.mxu0 %v29193_v56  ;;  %v29240_v56 = vld [vmem:[%s40002_s2 + $0x2344] ss:$80 sps:$4 sm:$0xff]  }
 0x7f2   : > { %16228 = vmatprep.mubr.bf16.mxu0 %v31554_v60  ;;  %15911 = vmatprep.subr.bf16.mxu1 %v29198_v57  ;;  %v29210_v60 = vld [vmem:[%s40002_s2 + $0x2024] ss:$80 sps:$4 sm:$0xff]   ;;  %v29243_v57 = vld [vmem:[%s40002_s2 + $0x234c] ss:$80 sps:$4 sm:$0xff]  }
 0x7f3   : > { %16198 = vmatprep.subr.bf16.mxu0 %v29201_v58  ;;  %v29238_v58 = vld [vmem:[%s40002_s2 + $0x2340] ss:$80 sps:$4 sm:$0xff]  }
 0x7f4   : > { %15912 = vmatpush1.bf16.msra.mxu1 %v29196_v49  ;;  %v29241_v49 = vld [vmem:[%s40002_s2 + $0x2348] ss:$80 sps:$4 sm:$0xff]  }
 0x7f5   : > { %16199 = vmatpush1.bf16.msra.mxu0 %v29199_v1  ;;  %15913 = vmatprep.subr.bf16.mxu1 %v29204_v39  ;;  %v29246_v1 = vld [vmem:[%s40002_s2 + $0x23e4] ss:$80 sps:$4 sm:$0xff]   ;;  %v29249_v39 = vld [vmem:[%s40002_s2 + $0x23ec] ss:$80 sps:$4 sm:$0xff]  }
 0x7f6   : > { %16200 = vmatprep.subr.bf16.mxu0 %v29207_v52  ;;  %v29244_v52 = vld [vmem:[%s40002_s2 + $0x23e0] ss:$80 sps:$4 sm:$0xff]  }
 0x7f8   : > { %15914 = vmatpush1.bf16.msra.mxu1 %v29202_v61  ;;  %v29247_v61 = vld [vmem:[%s40002_s2 + $0x23e8] ss:$80 sps:$4 sm:$0xff]  }
 0x7f9   : > { %16201 = vmatpush1.bf16.msra.mxu0 %v29205_v0  ;;  %15915 = vmatprep.subr.bf16.mxu1 %v29210_v60  ;;  %v29252_v0 = vld [vmem:[%s40002_s2 + $0x2484] ss:$80 sps:$4 sm:$0xff]   ;;  %v29255_v60 = vld [vmem:[%s40002_s2 + $0x248c] ss:$80 sps:$4 sm:$0xff]  }
 0x7fa   : > { %16202 = vmatprep.subr.bf16.mxu0 %v29213_v3  ;;  %v29250_v3 = vld [vmem:[%s40002_s2 + $0x2480] ss:$80 sps:$4 sm:$0xff]  }
 0x7fc   : > { %15916 = vmatpush1.bf16.msra.mxu1 %v29208_v18  ;;  %v29253_v18 = vld [vmem:[%s40002_s2 + $0x2488] ss:$80 sps:$4 sm:$0xff]  }
 0x7fd   : > { %16203 = vmatpush1.bf16.msra.mxu0 %v29211_v47  ;;  %15917 = vmatprep.subr.bf16.mxu1 %v29216_v59  ;;  %v29258_v47 = vld [vmem:[%s40002_s2 + $0x2524] ss:$80 sps:$4 sm:$0xff]   ;;  %v29261_v59 = vld [vmem:[%s40002_s2 + $0x252c] ss:$80 sps:$4 sm:$0xff]  }
 0x7fe   : > { %16204 = vmatprep.subr.bf16.mxu0 %v29219_v9  ;;  %v29256_v9 = vld [vmem:[%s40002_s2 + $0x2520] ss:$80 sps:$4 sm:$0xff]  }
 0x800   : > { %15918 = vmatpush1.bf16.msra.mxu1 %v29214_v15  ;;  %v29259_v15 = vld [vmem:[%s40002_s2 + $0x2528] ss:$80 sps:$4 sm:$0xff]  }
 0x801   : > { %16205 = vmatpush1.bf16.msra.mxu0 %v29217_v19  ;;  %15919 = vmatprep.subr.bf16.mxu1 %v29222_v16  ;;  %v29264_v19 = vld [vmem:[%s40002_s2 + $0x25c4] ss:$80 sps:$4 sm:$0xff]   ;;  %v29267_v16 = vld [vmem:[%s40002_s2 + $0x25cc] ss:$80 sps:$4 sm:$0xff]  }
 0x802   : > { %v36771_v21 = vpop.f32.mrb[24].mxu1  ;;  %16206 = vmatprep.subr.bf16.mxu0 %v29225_v7  ;;  %v29262_v7 = vld [vmem:[%s40002_s2 + $0x25c0] ss:$80 sps:$4 sm:$0xff]  }
 0x803   : > { %v36776_v25 = vpop.f32.mrb[28].mxu0  ;;  %v36778_v23 = vpop.f32.mrb[25].mxu1 }
 0x804   : > { %v36780_v28 = vpop.f32.mrb[29].mxu0  ;;  %v15496_v40 = vpop.f32.mrb[26].mxu1  ;;  %15920 = vmatpush1.bf16.msra.mxu1 %v29220_v20  ;;  %v29265_v20 = vld [vmem:[%s40002_s2 + $0x25c8] ss:$80 sps:$4 sm:$0xff]  }
 0x805   : > { %v15783_v29 = vpop.f32.mrb[30].mxu0  ;;  %16207 = vmatpush1.bf16.msra.mxu0 %v29223_v4  ;;  %v15497_v30 = vpop.f32.mrb[27].mxu1  ;;  %15921 = vmatprep.subr.bf16.mxu1 %v29228_v14  ;;  %v29270_v4 = vld [vmem:[%s40002_s2 + $0x2664] ss:$80 sps:$4 sm:$0xff]   ;;  %v29273_v14 = vld [vmem:[%s40002_s2 + $0x266c] ss:$80 sps:$4 sm:$0xff]  }
 0x806   : > { %v15784_v36 = vpop.f32.mrb[31].mxu0  ;;  %16208 = vmatprep.subr.bf16.mxu0 %v29231_v22  ;;  %v29268_v22 = vld [vmem:[%s40002_s2 + $0x2660] ss:$80 sps:$4 sm:$0xff]   ;;  %v29271_v40 = vld [vmem:[%s40002_s2 + $0x2668] ss:$80 sps:$4 sm:$0xff]  }
 0x807   : > { %v29279_v29 = vld [vmem:[%s40002_s2 + $0x270c] ss:$80 sps:$4 sm:$0xff]   ;;  %v29274_v30 = vld [vmem:[%s40002_s2 + $0x2700] ss:$80 sps:$4 sm:$0xff]  }
 0x808   : > { %15922 = vmatpush1.bf16.msra.mxu1 %v29226_v11  ;;  %v29276_v11 = vld [vmem:[%s40002_s2 + $0x2704] ss:$80 sps:$4 sm:$0xff]   ;;  %v29285_v36 = vld [vmem:[%s40002_s2 + $0x27ac] ss:$80 sps:$4 sm:$0xff]  }
 0x809   : > { %16209 = vmatpush1.bf16.msra.mxu0 %v29229_v32  ;;  %15923 = vmatprep.subr.bf16.mxu1 %v29234_v33  ;;  %v29277_v32 = vld [vmem:[%s40002_s2 + $0x2708] ss:$80 sps:$4 sm:$0xff]   ;;  %v29282_v33 = vld [vmem:[%s40002_s2 + $0x27a4] ss:$80 sps:$4 sm:$0xff]  }
 0x80a   : > { %16210 = vmatprep.subr.bf16.mxu0 %v29237_v17  ;;  %v29280_v17 = vld [vmem:[%s40002_s2 + $0x27a0] ss:$80 sps:$4 sm:$0xff]  }
 0x80c   : > { %15924 = vmatpush1.bf16.msra.mxu1 %v29232_v44  ;;  %v29283_v44 = vld [vmem:[%s40002_s2 + $0x27a8] ss:$80 sps:$4 sm:$0xff]  }
 0x80d   : > { %16211 = vmatpush1.bf16.msra.mxu0 %v29235_v26  ;;  %15925 = vmatprep.subr.bf16.mxu1 %v29240_v56  ;;  %v29288_v26 = vld [vmem:[%s40002_s2 + $0x2844] ss:$80 sps:$4 sm:$0xff]   ;;  %v29291_v56 = vld [vmem:[%s40002_s2 + $0x284c] ss:$80 sps:$4 sm:$0xff]  }
 0x80e   : > { %16212 = vmatprep.subr.bf16.mxu0 %v29243_v57  ;;  %v29286_v57 = vld [vmem:[%s40002_s2 + $0x2840] ss:$80 sps:$4 sm:$0xff]  }
 0x810   : > { %15926 = vmatpush1.bf16.msra.mxu1 %v29238_v58  ;;  %v29289_v58 = vld [vmem:[%s40002_s2 + $0x2848] ss:$80 sps:$4 sm:$0xff]  }
 0x811   : > { %16213 = vmatpush1.bf16.msra.mxu0 %v29241_v49  ;;  %15927 = vmatprep.subr.bf16.mxu1 %v29246_v1  ;;  %v29294_v49 = vld [vmem:[%s40002_s2 + $0x28e4] ss:$80 sps:$4 sm:$0xff]   ;;  %v29297_v1 = vld [vmem:[%s40002_s2 + $0x28ec] ss:$80 sps:$4 sm:$0xff]  }
 0x812   : > { %16214 = vmatprep.subr.bf16.mxu0 %v29249_v39  ;;  %v29292_v39 = vld [vmem:[%s40002_s2 + $0x28e0] ss:$80 sps:$4 sm:$0xff]  }
 0x814   : > { %15928 = vmatpush1.bf16.msra.mxu1 %v29244_v52  ;;  %v29295_v52 = vld [vmem:[%s40002_s2 + $0x28e8] ss:$80 sps:$4 sm:$0xff]  }
 0x815   : > { %16215 = vmatpush1.bf16.msra.mxu0 %v29247_v61  ;;  %15929 = vmatprep.subr.bf16.mxu1 %v29252_v0  ;;  %v29300_v61 = vld [vmem:[%s40002_s2 + $0x2984] ss:$80 sps:$4 sm:$0xff]   ;;  %v29298_v0 = vld [vmem:[%s40002_s2 + $0x2980] ss:$80 sps:$4 sm:$0xff]  }
 0x816   : > { %16216 = vmatprep.subr.bf16.mxu0 %v29255_v60  ;;  %v29301_v60 = vld [vmem:[%s40002_s2 + $0x2988] ss:$80 sps:$4 sm:$0xff]  }
 0x818   : > { %15930 = vmatpush1.bf16.msra.mxu1 %v29250_v3  ;;  %v29309_v3 = vld [vmem:[%s40002_s2 + $0x2a2c] ss:$80 sps:$4 sm:$0xff]  }
 0x819   : > { %16217 = vmatpush1.bf16.msra.mxu0 %v29253_v18  ;;  %15931 = vmatprep.subr.bf16.mxu1 %v29258_v47  ;;  %v29304_v18 = vld [vmem:[%s40002_s2 + $0x2a20] ss:$80 sps:$4 sm:$0xff]   ;;  %v29307_v47 = vld [vmem:[%s40002_s2 + $0x2a28] ss:$80 sps:$4 sm:$0xff]  }
 0x81a   : > { %16218 = vmatprep.subr.bf16.mxu0 %v29261_v59  ;;  %v29312_v59 = vld [vmem:[%s40002_s2 + $0x2ac4] ss:$80 sps:$4 sm:$0xff]  }
 0x81c   : > { %15932 = vmatpush1.bf16.msra.mxu1 %v29256_v9  ;;  %v29315_v9 = vld [vmem:[%s40002_s2 + $0x2acc] ss:$80 sps:$4 sm:$0xff]  }
 0x81d   : > { %16219 = vmatpush1.bf16.msra.mxu0 %v29259_v15  ;;  %15933 = vmatprep.subr.bf16.mxu1 %v29264_v19  ;;  %v29310_v15 = vld [vmem:[%s40002_s2 + $0x2ac0] ss:$80 sps:$4 sm:$0xff]   ;;  %v29313_v19 = vld [vmem:[%s40002_s2 + $0x2ac8] ss:$80 sps:$4 sm:$0xff]  }
 0x81e   : > { %16220 = vmatprep.subr.bf16.mxu0 %v29267_v16  ;;  %v29318_v16 = vld [vmem:[%s40002_s2 + $0x2b64] ss:$80 sps:$4 sm:$0xff]  }
 0x820   : > { %15934 = vmatpush1.bf16.msra.mxu1 %v29262_v7  ;;  %v29321_v7 = vld [vmem:[%s40002_s2 + $0x2b6c] ss:$80 sps:$4 sm:$0xff]  }
 0x821   : > { %16221 = vmatpush1.bf16.msra.mxu0 %v29265_v20  ;;  %15935 = vmatprep.subr.bf16.mxu1 %v29270_v4  ;;  %v29316_v20 = vld [vmem:[%s40002_s2 + $0x2b60] ss:$80 sps:$4 sm:$0xff]   ;;  %v29319_v4 = vld [vmem:[%s40002_s2 + $0x2b68] ss:$80 sps:$4 sm:$0xff]  }
 0x822   : > { %16222 = vmatprep.subr.bf16.mxu0 %v29273_v14  ;;  %v29324_v14 = vld [vmem:[%s40002_s2 + $0x2c04] ss:$80 sps:$4 sm:$0xff]  }
 0x824   : > { %15936 = vmatpush1.bf16.msra.mxu1 %v29268_v22  ;;  %v29327_v22 = vld [vmem:[%s40002_s2 + $0x2c0c] ss:$80 sps:$4 sm:$0xff]  }
 0x825   : > { %16223 = vmatpush1.bf16.msra.mxu0 %v29271_v40  ;;  %15937 = vmatprep.subr.bf16.mxu1 %v29276_v11  ;;  %v29322_v40 = vld [vmem:[%s40002_s2 + $0x2c00] ss:$80 sps:$4 sm:$0xff]   ;;  %v29325_v11 = vld [vmem:[%s40002_s2 + $0x2c08] ss:$80 sps:$4 sm:$0xff]  }
 0x826   : > { %16224 = vmatprep.subr.bf16.mxu0 %v29279_v29  ;;  %v29330_v29 = vld [vmem:[%s40002_s2 + $0x2ca4] ss:$80 sps:$4 sm:$0xff]  }
 0x828   : > { %15938 = vmatpush1.bf16.msra.mxu1 %v29274_v30  ;;  %v29333_v30 = vld [vmem:[%s40002_s2 + $0x2cac] ss:$80 sps:$4 sm:$0xff]  }
 0x829   : > { %16225 = vmatpush1.bf16.msra.mxu0 %v29277_v32  ;;  %15939 = vmatprep.subr.bf16.mxu1 %v29282_v33  ;;  %v29328_v32 = vld [vmem:[%s40002_s2 + $0x2ca0] ss:$80 sps:$4 sm:$0xff]   ;;  %v29331_v33 = vld [vmem:[%s40002_s2 + $0x2ca8] ss:$80 sps:$4 sm:$0xff]  }
 0x82a   : > { %16226 = vmatprep.subr.bf16.mxu0 %v29285_v36  ;;  %v29336_v36 = vld [vmem:[%s40002_s2 + $0x2d44] ss:$80 sps:$4 sm:$0xff]  }
 0x82c   : > { %15940 = vmatpush1.bf16.msra.mxu1 %v29280_v17  ;;  %v29339_v17 = vld [vmem:[%s40002_s2 + $0x2d4c] ss:$80 sps:$4 sm:$0xff]  }
 0x82d   : > { %16227 = vmatpush1.bf16.msra.mxu0 %v29283_v44  ;;  %15950 = vmatprep.subr.bf16.mxu1 %v29288_v26  ;;  %v29334_v44 = vld [vmem:[%s40002_s2 + $0x2d40] ss:$80 sps:$4 sm:$0xff]   ;;  %v29337_v26 = vld [vmem:[%s40002_s2 + $0x2d48] ss:$80 sps:$4 sm:$0xff]  }
 0x82e   : > { %16237 = vmatprep.subr.bf16.mxu0 %v29291_v56  ;;  %v29342_v56 = vld [vmem:[%s40002_s2 + $0x2de4] ss:$80 sps:$4 sm:$0xff]  }
 0x82f   : > { %15942 = vmatmul.mubr.bf16.vlgmr.msra.gmra.mrb[28].mxu1 %v31760_v34 }
 0x830   : > { %16229 = vmatmul.mubr.bf16.vlgmr.msra.gmra.mrb[32].mxu0 %v31760_v34  ;;  %15951 = vmatpush1.bf16.msra.mxu1 %v29286_v57  ;;  %v29303_v34 = vld [vmem:[%s40002_s2 + $0x298c] ss:$80 sps:$4 sm:$0xff]  }
 0x831   : > { %15982 = vmatprep.mubr.bf16.mxu1 %v31762_v35  ;;  %16238 = vmatpush1.bf16.msra.mxu0 %v29289_v58  ;;  %v29345_v57 = vld [vmem:[%s40002_s2 + $0x2dec] ss:$80 sps:$4 sm:$0xff]   ;;  %v29340_v58 = vld [vmem:[%s40002_s2 + $0x2de0] ss:$80 sps:$4 sm:$0xff]  }
 0x832   : > { %16269 = vmatprep.mubr.bf16.mxu0 %v31762_v35  ;;  %15952 = vmatprep.subr.bf16.mxu1 %v29294_v49  ;;  %v29306_v35 = vld [vmem:[%s40002_s2 + $0x2a24] ss:$80 sps:$4 sm:$0xff]   ;;  %v29343_v49 = vld [vmem:[%s40002_s2 + $0x2de8] ss:$80 sps:$4 sm:$0xff]  }
 0x833   : > { %16239 = vmatprep.subr.bf16.mxu0 %v29297_v1  ;;  %v29348_v1 = vld [vmem:[%s40002_s2 + $0x2e84] ss:$80 sps:$4 sm:$0xff]  }
 0x834   : > { %15953 = vmatpush1.bf16.msra.mxu1 %v29292_v39  ;;  %v29351_v39 = vld [vmem:[%s40002_s2 + $0x2e8c] ss:$80 sps:$4 sm:$0xff]  }
 0x835   : > { %16240 = vmatpush1.bf16.msra.mxu0 %v29295_v52  ;;  %15954 = vmatprep.subr.bf16.mxu1 %v29300_v61  ;;  %v29346_v52 = vld [vmem:[%s40002_s2 + $0x2e80] ss:$80 sps:$4 sm:$0xff]   ;;  %v29349_v61 = vld [vmem:[%s40002_s2 + $0x2e88] ss:$80 sps:$4 sm:$0xff]  }
 0x836   : > { %16241 = vmatprep.subr.bf16.mxu0 %v29303_v34  ;;  %v29354_v34 = vld [vmem:[%s40002_s2 + $0x2f24] ss:$80 sps:$4 sm:$0xff]  }
 0x838   : > { %15955 = vmatpush1.bf16.msra.mxu1 %v29298_v0  ;;  %v29357_v0 = vld [vmem:[%s40002_s2 + $0x2f2c] ss:$80 sps:$4 sm:$0xff]  }
 0x839   : > { %16242 = vmatpush1.bf16.msra.mxu0 %v29301_v60  ;;  %15956 = vmatprep.subr.bf16.mxu1 %v29306_v35  ;;  %v29352_v60 = vld [vmem:[%s40002_s2 + $0x2f20] ss:$80 sps:$4 sm:$0xff]   ;;  %v29355_v35 = vld [vmem:[%s40002_s2 + $0x2f28] ss:$80 sps:$4 sm:$0xff]  }
 0x83a   : > { %16243 = vmatprep.subr.bf16.mxu0 %v29309_v3  ;;  %v29360_v3 = vld [vmem:[%s40002_s2 + $0x2fc4] ss:$80 sps:$4 sm:$0xff]  }
 0x83c   : > { %15957 = vmatpush1.bf16.msra.mxu1 %v29304_v18  ;;  %v29363_v18 = vld [vmem:[%s40002_s2 + $0x2fcc] ss:$80 sps:$4 sm:$0xff]  }
 0x83d   : > { %16244 = vmatpush1.bf16.msra.mxu0 %v29307_v47  ;;  %15958 = vmatprep.subr.bf16.mxu1 %v29312_v59  ;;  %v29358_v47 = vld [vmem:[%s40002_s2 + $0x2fc0] ss:$80 sps:$4 sm:$0xff]   ;;  %v29361_v59 = vld [vmem:[%s40002_s2 + $0x2fc8] ss:$80 sps:$4 sm:$0xff]  }
 0x83e   : > { %16245 = vmatprep.subr.bf16.mxu0 %v29315_v9  ;;  %v29366_v9 = vld [vmem:[%s40002_s2 + $0x3064] ss:$80 sps:$4 sm:$0xff]  }
 0x840   : > { %15959 = vmatpush1.bf16.msra.mxu1 %v29310_v15  ;;  %v29369_v15 = vld [vmem:[%s40002_s2 + $0x306c] ss:$80 sps:$4 sm:$0xff]  }
 0x841   : > { %16246 = vmatpush1.bf16.msra.mxu0 %v29313_v19  ;;  %15960 = vmatprep.subr.bf16.mxu1 %v29318_v16  ;;  %v29364_v19 = vld [vmem:[%s40002_s2 + $0x3060] ss:$80 sps:$4 sm:$0xff]   ;;  %v29367_v16 = vld [vmem:[%s40002_s2 + $0x3068] ss:$80 sps:$4 sm:$0xff]  }
 0x842   : > { %16247 = vmatprep.subr.bf16.mxu0 %v29321_v7  ;;  %v29372_v7 = vld [vmem:[%s40002_s2 + $0x3104] ss:$80 sps:$4 sm:$0xff]  }
 0x844   : > { %15961 = vmatpush1.bf16.msra.mxu1 %v29316_v20  ;;  %v29375_v20 = vld [vmem:[%s40002_s2 + $0x310c] ss:$80 sps:$4 sm:$0xff]  }
 0x845   : > { %16248 = vmatpush1.bf16.msra.mxu0 %v29319_v4  ;;  %15962 = vmatprep.subr.bf16.mxu1 %v29324_v14  ;;  %v29370_v4 = vld [vmem:[%s40002_s2 + $0x3100] ss:$80 sps:$4 sm:$0xff]   ;;  %v29373_v14 = vld [vmem:[%s40002_s2 + $0x3108] ss:$80 sps:$4 sm:$0xff]  }
 0x846   : > { %16249 = vmatprep.subr.bf16.mxu0 %v29327_v22  ;;  %v29378_v22 = vld [vmem:[%s40002_s2 + $0x31a4] ss:$80 sps:$4 sm:$0xff]  }
 0x848   : > { %15963 = vmatpush1.bf16.msra.mxu1 %v29322_v40  ;;  %v29381_v40 = vld [vmem:[%s40002_s2 + $0x31ac] ss:$80 sps:$4 sm:$0xff]  }
 0x849   : > { %16250 = vmatpush1.bf16.msra.mxu0 %v29325_v11  ;;  %15964 = vmatprep.subr.bf16.mxu1 %v29330_v29  ;;  %v29376_v11 = vld [vmem:[%s40002_s2 + $0x31a0] ss:$80 sps:$4 sm:$0xff]   ;;  %v29379_v29 = vld [vmem:[%s40002_s2 + $0x31a8] ss:$80 sps:$4 sm:$0xff]  }
 0x84a   : > { %16251 = vmatprep.subr.bf16.mxu0 %v29333_v30  ;;  %v29384_v30 = vld [vmem:[%s40002_s2 + $0x3244] ss:$80 sps:$4 sm:$0xff]  }
 0x84c   : > { %15965 = vmatpush1.bf16.msra.mxu1 %v29328_v32  ;;  %v29387_v32 = vld [vmem:[%s40002_s2 + $0x324c] ss:$80 sps:$4 sm:$0xff]  }
 0x84d   : > { %16252 = vmatpush1.bf16.msra.mxu0 %v29331_v33  ;;  %15966 = vmatprep.subr.bf16.mxu1 %v29336_v36  ;;  %v29382_v33 = vld [vmem:[%s40002_s2 + $0x3240] ss:$80 sps:$4 sm:$0xff]   ;;  %v29385_v36 = vld [vmem:[%s40002_s2 + $0x3248] ss:$80 sps:$4 sm:$0xff]  }
 0x84e   : > { %16253 = vmatprep.subr.bf16.mxu0 %v29339_v17  ;;  %v29390_v17 = vld [vmem:[%s40002_s2 + $0x32e4] ss:$80 sps:$4 sm:$0xff]  }
 0x850   : > { %15967 = vmatpush1.bf16.msra.mxu1 %v29334_v44  ;;  %v29393_v44 = vld [vmem:[%s40002_s2 + $0x32ec] ss:$80 sps:$4 sm:$0xff]  }
 0x851   : > { %16254 = vmatpush1.bf16.msra.mxu0 %v29337_v26  ;;  %15968 = vmatprep.subr.bf16.mxu1 %v29342_v56  ;;  %v29388_v26 = vld [vmem:[%s40002_s2 + $0x32e0] ss:$80 sps:$4 sm:$0xff]   ;;  %v29391_v56 = vld [vmem:[%s40002_s2 + $0x32e8] ss:$80 sps:$4 sm:$0xff]  }
 0x852   : > { %16255 = vmatprep.subr.bf16.mxu0 %v29345_v57  ;;  %v29396_v57 = vld [vmem:[%s40002_s2 + $0x3384] ss:$80 sps:$4 sm:$0xff]  }
 0x854   : > { %15969 = vmatpush1.bf16.msra.mxu1 %v29340_v58  ;;  %v29394_v58 = vld [vmem:[%s40002_s2 + $0x3380] ss:$80 sps:$4 sm:$0xff]  }
 0x855   : > { %16256 = vmatpush1.bf16.msra.mxu0 %v29343_v49  ;;  %15970 = vmatprep.subr.bf16.mxu1 %v29348_v1  ;;  %v29397_v49 = vld [vmem:[%s40002_s2 + $0x3388] ss:$80 sps:$4 sm:$0xff]   ;;  %v29405_v1 = vld [vmem:[%s40002_s2 + $0x342c] ss:$80 sps:$4 sm:$0xff]  }
 0x856   : > { %16257 = vmatprep.subr.bf16.mxu0 %v29351_v39  ;;  %v29400_v39 = vld [vmem:[%s40002_s2 + $0x3420] ss:$80 sps:$4 sm:$0xff]  }
 0x858   : > { %15971 = vmatpush1.bf16.msra.mxu1 %v29346_v52  ;;  %v29403_v52 = vld [vmem:[%s40002_s2 + $0x3428] ss:$80 sps:$4 sm:$0xff]  }
 0x859   : > { %16258 = vmatpush1.bf16.msra.mxu0 %v29349_v61  ;;  %15972 = vmatprep.subr.bf16.mxu1 %v29354_v34  ;;  %v29408_v61 = vld [vmem:[%s40002_s2 + $0x34c4] ss:$80 sps:$4 sm:$0xff]   ;;  %v29411_v34 = vld [vmem:[%s40002_s2 + $0x34cc] ss:$80 sps:$4 sm:$0xff]  }
 0x85a   : > { %16259 = vmatprep.subr.bf16.mxu0 %v29357_v0  ;;  %v29406_v0 = vld [vmem:[%s40002_s2 + $0x34c0] ss:$80 sps:$4 sm:$0xff]  }
 0x85c   : > { %15973 = vmatpush1.bf16.msra.mxu1 %v29352_v60  ;;  %v29409_v60 = vld [vmem:[%s40002_s2 + $0x34c8] ss:$80 sps:$4 sm:$0xff]  }
 0x85d   : > { %16260 = vmatpush1.bf16.msra.mxu0 %v29355_v35  ;;  %15974 = vmatprep.subr.bf16.mxu1 %v29360_v3  ;;  %v29414_v35 = vld [vmem:[%s40002_s2 + $0x3564] ss:$80 sps:$4 sm:$0xff]   ;;  %v29417_v3 = vld [vmem:[%s40002_s2 + $0x356c] ss:$80 sps:$4 sm:$0xff]  }
 0x85e   : > { %16261 = vmatprep.subr.bf16.mxu0 %v29363_v18  ;;  %v29412_v18 = vld [vmem:[%s40002_s2 + $0x3560] ss:$80 sps:$4 sm:$0xff]  }
 0x860   : > { %15975 = vmatpush1.bf16.msra.mxu1 %v29358_v47  ;;  %v29415_v47 = vld [vmem:[%s40002_s2 + $0x3568] ss:$80 sps:$4 sm:$0xff]  }
 0x861   : > { %16262 = vmatpush1.bf16.msra.mxu0 %v29361_v59  ;;  %15976 = vmatprep.subr.bf16.mxu1 %v29366_v9  ;;  %v29420_v59 = vld [vmem:[%s40002_s2 + $0x3604] ss:$80 sps:$4 sm:$0xff]   ;;  %v29423_v9 = vld [vmem:[%s40002_s2 + $0x360c] ss:$80 sps:$4 sm:$0xff]  }
 0x862   : > { %16263 = vmatprep.subr.bf16.mxu0 %v29369_v15  ;;  %v29418_v15 = vld [vmem:[%s40002_s2 + $0x3600] ss:$80 sps:$4 sm:$0xff]  }
 0x864   : > { %15977 = vmatpush1.bf16.msra.mxu1 %v29364_v19  ;;  %v29421_v19 = vld [vmem:[%s40002_s2 + $0x3608] ss:$80 sps:$4 sm:$0xff]  }
 0x865   : > { %16264 = vmatpush1.bf16.msra.mxu0 %v29367_v16  ;;  %15978 = vmatprep.subr.bf16.mxu1 %v29372_v7  ;;  %v29426_v16 = vld [vmem:[%s40002_s2 + $0x36a4] ss:$80 sps:$4 sm:$0xff]   ;;  %v29429_v7 = vld [vmem:[%s40002_s2 + $0x36ac] ss:$80 sps:$4 sm:$0xff]  }
 0x866   : > { %16265 = vmatprep.subr.bf16.mxu0 %v29375_v20  ;;  %v29424_v20 = vld [vmem:[%s40002_s2 + $0x36a0] ss:$80 sps:$4 sm:$0xff]  }
 0x868   : > { %15979 = vmatpush1.bf16.msra.mxu1 %v29370_v4  ;;  %v29427_v4 = vld [vmem:[%s40002_s2 + $0x36a8] ss:$80 sps:$4 sm:$0xff]  }
 0x869   : > { %16266 = vmatpush1.bf16.msra.mxu0 %v29373_v14  ;;  %15980 = vmatprep.subr.bf16.mxu1 %v29378_v22  ;;  %v29432_v14 = vld [vmem:[%s40002_s2 + $0x3744] ss:$80 sps:$4 sm:$0xff]   ;;  %v29435_v22 = vld [vmem:[%s40002_s2 + $0x374c] ss:$80 sps:$4 sm:$0xff]  }
 0x86a   : > { %16267 = vmatprep.subr.bf16.mxu0 %v29381_v40  ;;  %v29430_v40 = vld [vmem:[%s40002_s2 + $0x3740] ss:$80 sps:$4 sm:$0xff]  }
 0x86c   : > { %15981 = vmatpush1.bf16.msra.mxu1 %v29376_v11  ;;  %v29433_v11 = vld [vmem:[%s40002_s2 + $0x3748] ss:$80 sps:$4 sm:$0xff]  }
 0x86d   : > { %16268 = vmatpush1.bf16.msra.mxu0 %v29379_v29  ;;  %15991 = vmatprep.subr.bf16.mxu1 %v29384_v30  ;;  %v29438_v29 = vld [vmem:[%s40002_s2 + $0x37e4] ss:$80 sps:$4 sm:$0xff]   ;;  %v29441_v30 = vld [vmem:[%s40002_s2 + $0x37ec] ss:$80 sps:$4 sm:$0xff]  }
 0x86e   : > { %16278 = vmatprep.subr.bf16.mxu0 %v29387_v32  ;;  %v29436_v32 = vld [vmem:[%s40002_s2 + $0x37e0] ss:$80 sps:$4 sm:$0xff]  }
 0x86f   : > { %15983 = vmatmul.mubr.bf16.vlgmr.msra.gmra.mrb[28].mxu1 %v31955_v6 }
 0x870   : > { %16270 = vmatmul.mubr.bf16.vlgmr.msra.gmra.mrb[32].mxu0 %v31955_v6  ;;  %15992 = vmatpush1.bf16.msra.mxu1 %v29382_v33  ;;  %v29399_v6 = vld [vmem:[%s40002_s2 + $0x338c] ss:$80 sps:$4 sm:$0xff]   ;;  %v29439_v33 = vld [vmem:[%s40002_s2 + $0x37e8] ss:$80 sps:$4 sm:$0xff]  }
 0x871   : > { %16023 = vmatprep.mubr.bf16.mxu1 %v31969_v13  ;;  %16279 = vmatpush1.bf16.msra.mxu0 %v29385_v36  ;;  %v29444_v36 = vld [vmem:[%s40002_s2 + $0x3884] ss:$80 sps:$4 sm:$0xff]  }
 0x872   : > { %16310 = vmatprep.mubr.bf16.mxu0 %v31969_v13  ;;  %15993 = vmatprep.subr.bf16.mxu1 %v29390_v17  ;;  %v29402_v13 = vld [vmem:[%s40002_s2 + $0x3424] ss:$80 sps:$4 sm:$0xff]   ;;  %v29447_v17 = vld [vmem:[%s40002_s2 + $0x388c] ss:$80 sps:$4 sm:$0xff]  }
 0x873   : > { %16280 = vmatprep.subr.bf16.mxu0 %v29393_v44  ;;  %v29442_v44 = vld [vmem:[%s40002_s2 + $0x3880] ss:$80 sps:$4 sm:$0xff]  }
 0x874   : > { %15994 = vmatpush1.bf16.msra.mxu1 %v29388_v26  ;;  %v29445_v26 = vld [vmem:[%s40002_s2 + $0x3888] ss:$80 sps:$4 sm:$0xff]  }
 0x875   : > { %16281 = vmatpush1.bf16.msra.mxu0 %v29391_v56  ;;  %15995 = vmatprep.subr.bf16.mxu1 %v29396_v57  ;;  %v29450_v56 = vld [vmem:[%s40002_s2 + $0x3924] ss:$80 sps:$4 sm:$0xff]   ;;  %v29453_v57 = vld [vmem:[%s40002_s2 + $0x392c] ss:$80 sps:$4 sm:$0xff]  }
 0x876   : > { %16282 = vmatprep.subr.bf16.mxu0 %v29399_v6  ;;  %v29448_v6 = vld [vmem:[%s40002_s2 + $0x3920] ss:$80 sps:$4 sm:$0xff]  }
 0x878   : > { %15996 = vmatpush1.bf16.msra.mxu1 %v29394_v58  ;;  %v29451_v58 = vld [vmem:[%s40002_s2 + $0x3928] ss:$80 sps:$4 sm:$0xff]  }
 0x879   : > { %16283 = vmatpush1.bf16.msra.mxu0 %v29397_v49  ;;  %15997 = vmatprep.subr.bf16.mxu1 %v29402_v13  ;;  %v29456_v49 = vld [vmem:[%s40002_s2 + $0x39c4] ss:$80 sps:$4 sm:$0xff]   ;;  %v29459_v13 = vld [vmem:[%s40002_s2 + $0x39cc] ss:$80 sps:$4 sm:$0xff]  }
 0x87a   : > { %16284 = vmatprep.subr.bf16.mxu0 %v29405_v1  ;;  %v29454_v1 = vld [vmem:[%s40002_s2 + $0x39c0] ss:$80 sps:$4 sm:$0xff]  }
 0x87c   : > { %15998 = vmatpush1.bf16.msra.mxu1 %v29400_v39  ;;  %v29457_v39 = vld [vmem:[%s40002_s2 + $0x39c8] ss:$80 sps:$4 sm:$0xff]  }
 0x87d   : > { %16285 = vmatpush1.bf16.msra.mxu0 %v29403_v52  ;;  %15999 = vmatprep.subr.bf16.mxu1 %v29408_v61  ;;  %v29462_v52 = vld [vmem:[%s40002_s2 + $0x3a64] ss:$80 sps:$4 sm:$0xff]   ;;  %v29465_v61 = vld [vmem:[%s40002_s2 + $0x3a6c] ss:$80 sps:$4 sm:$0xff]  }
 0x87e   : > { %16286 = vmatprep.subr.bf16.mxu0 %v29411_v34  ;;  %v29460_v34 = vld [vmem:[%s40002_s2 + $0x3a60] ss:$80 sps:$4 sm:$0xff]  }
 0x880   : > { %16000 = vmatpush1.bf16.msra.mxu1 %v29406_v0  ;;  %v29463_v0 = vld [vmem:[%s40002_s2 + $0x3a68] ss:$80 sps:$4 sm:$0xff]  }
 0x881   : > { %16287 = vmatpush1.bf16.msra.mxu0 %v29409_v60  ;;  %16001 = vmatprep.subr.bf16.mxu1 %v29414_v35  ;;  %v29468_v60 = vld [vmem:[%s40002_s2 + $0x3b04] ss:$80 sps:$4 sm:$0xff]   ;;  %v29471_v35 = vld [vmem:[%s40002_s2 + $0x3b0c] ss:$80 sps:$4 sm:$0xff]  }
 0x882   : > { %16288 = vmatprep.subr.bf16.mxu0 %v29417_v3  ;;  %v29466_v3 = vld [vmem:[%s40002_s2 + $0x3b00] ss:$80 sps:$4 sm:$0xff]  }
 0x884   : > { %16002 = vmatpush1.bf16.msra.mxu1 %v29412_v18  ;;  %v29469_v18 = vld [vmem:[%s40002_s2 + $0x3b08] ss:$80 sps:$4 sm:$0xff]  }
 0x885   : > { %16289 = vmatpush1.bf16.msra.mxu0 %v29415_v47  ;;  %16003 = vmatprep.subr.bf16.mxu1 %v29420_v59  ;;  %v29474_v47 = vld [vmem:[%s40002_s2 + $0x3ba4] ss:$80 sps:$4 sm:$0xff]   ;;  %v29477_v59 = vld [vmem:[%s40002_s2 + $0x3bac] ss:$80 sps:$4 sm:$0xff]  }
 0x886   : > { %16290 = vmatprep.subr.bf16.mxu0 %v29423_v9  ;;  %v29472_v9 = vld [vmem:[%s40002_s2 + $0x3ba0] ss:$80 sps:$4 sm:$0xff]  }
 0x888   : > { %16004 = vmatpush1.bf16.msra.mxu1 %v29418_v15  ;;  %v29475_v15 = vld [vmem:[%s40002_s2 + $0x3ba8] ss:$80 sps:$4 sm:$0xff]  }
 0x889   : > { %16291 = vmatpush1.bf16.msra.mxu0 %v29421_v19  ;;  %16005 = vmatprep.subr.bf16.mxu1 %v29426_v16  ;;  %v29480_v19 = vld [vmem:[%s40002_s2 + $0x3c44] ss:$80 sps:$4 sm:$0xff]   ;;  %v29483_v16 = vld [vmem:[%s40002_s2 + $0x3c4c] ss:$80 sps:$4 sm:$0xff]  }
 0x88a   : > { %16292 = vmatprep.subr.bf16.mxu0 %v29429_v7  ;;  %v29478_v7 = vld [vmem:[%s40002_s2 + $0x3c40] ss:$80 sps:$4 sm:$0xff]  }
 0x88c   : > { %16006 = vmatpush1.bf16.msra.mxu1 %v29424_v20  ;;  %v29481_v20 = vld [vmem:[%s40002_s2 + $0x3c48] ss:$80 sps:$4 sm:$0xff]  }
 0x88d   : > { %16293 = vmatpush1.bf16.msra.mxu0 %v29427_v4  ;;  %16007 = vmatprep.subr.bf16.mxu1 %v29432_v14  ;;  %v29486_v4 = vld [vmem:[%s40002_s2 + $0x3ce4] ss:$80 sps:$4 sm:$0xff]   ;;  %v29489_v14 = vld [vmem:[%s40002_s2 + $0x3cec] ss:$80 sps:$4 sm:$0xff]  }
 0x88e   : > { %16294 = vmatprep.subr.bf16.mxu0 %v29435_v22  ;;  %v29484_v22 = vld [vmem:[%s40002_s2 + $0x3ce0] ss:$80 sps:$4 sm:$0xff]  }
 0x890   : > { %16008 = vmatpush1.bf16.msra.mxu1 %v29430_v40  ;;  %v29487_v40 = vld [vmem:[%s40002_s2 + $0x3ce8] ss:$80 sps:$4 sm:$0xff]  }
 0x891   : > { %16295 = vmatpush1.bf16.msra.mxu0 %v29433_v11  ;;  %16009 = vmatprep.subr.bf16.mxu1 %v29438_v29  ;;  %v29492_v11 = vld [vmem:[%s40002_s2 + $0x3d84] ss:$80 sps:$4 sm:$0xff]   ;;  %v29490_v29 = vld [vmem:[%s40002_s2 + $0x3d80] ss:$80 sps:$4 sm:$0xff]  }
 0x892   : > { %16296 = vmatprep.subr.bf16.mxu0 %v29441_v30  ;;  %v29493_v30 = vld [vmem:[%s40002_s2 + $0x3d88] ss:$80 sps:$4 sm:$0xff]  }
 0x894   : > { %16010 = vmatpush1.bf16.msra.mxu1 %v29436_v32  ;;  %v29498_v32 = vld [vmem:[%s40002_s2 + $0x3e24] ss:$80 sps:$4 sm:$0xff]  }
 0x895   : > { %16297 = vmatpush1.bf16.msra.mxu0 %v29439_v33  ;;  %16011 = vmatprep.subr.bf16.mxu1 %v29444_v36  ;;  %v29496_v33 = vld [vmem:[%s40002_s2 + $0x3e20] ss:$80 sps:$4 sm:$0xff]   ;;  %v29499_v36 = vld [vmem:[%s40002_s2 + $0x3e28] ss:$80 sps:$4 sm:$0xff]  }
 0x896   : > { %16298 = vmatprep.subr.bf16.mxu0 %v29447_v17  ;;  %v29504_v17 = vld [vmem:[%s40002_s2 + $0x3ec4] ss:$80 sps:$4 sm:$0xff]  }
 0x898   : > { %16012 = vmatpush1.bf16.msra.mxu1 %v29442_v44  ;;  %v29507_v44 = vld [vmem:[%s40002_s2 + $0x3ecc] ss:$80 sps:$4 sm:$0xff]  }
 0x899   : > { %16299 = vmatpush1.bf16.msra.mxu0 %v29445_v26  ;;  %16013 = vmatprep.subr.bf16.mxu1 %v29450_v56  ;;  %v29502_v26 = vld [vmem:[%s40002_s2 + $0x3ec0] ss:$80 sps:$4 sm:$0xff]   ;;  %v29505_v56 = vld [vmem:[%s40002_s2 + $0x3ec8] ss:$80 sps:$4 sm:$0xff]  }
 0x89a   : > { %16300 = vmatprep.subr.bf16.mxu0 %v29453_v57  ;;  %v29510_v57 = vld [vmem:[%s40002_s2 + $0x3f64] ss:$80 sps:$4 sm:$0xff]  }
 0x89c   : > { %16014 = vmatpush1.bf16.msra.mxu1 %v29448_v6  ;;  %v29513_v6 = vld [vmem:[%s40002_s2 + $0x3f6c] ss:$80 sps:$4 sm:$0xff]  }
 0x89d   : > { %16301 = vmatpush1.bf16.msra.mxu0 %v29451_v58  ;;  %16015 = vmatprep.subr.bf16.mxu1 %v29456_v49  ;;  %v37361_v58 = vld [vmem:[%s40003_s3] sm:$0xff] }
 0x89e   : > { %16302 = vmatprep.subr.bf16.mxu0 %v29459_v13  ;;  %v29508_v49 = vld [vmem:[%s40002_s2 + $0x3f60] ss:$80 sps:$4 sm:$0xff]   ;;  %v29511_v13 = vld [vmem:[%s40002_s2 + $0x3f68] ss:$80 sps:$4 sm:$0xff]  }
 0x8a0   : > { %16016 = vmatpush1.bf16.msra.mxu1 %v29454_v1  ;;  %v29516_v1 = vld [vmem:[%s40002_s2 + $0x4004] ss:$80 sps:$4 sm:$0xff]  }
 0x8a1   : > { %16303 = vmatpush1.bf16.msra.mxu0 %v29457_v39  ;;  %16017 = vmatprep.subr.bf16.mxu1 %v29462_v52  ;;  %v29519_v39 = vld [vmem:[%s40002_s2 + $0x400c] ss:$80 sps:$4 sm:$0xff]   ;;  %v2997_v52 = vrot.slane %v37361_v58, %v31064_v50 }
 0x8a2   : > { %16304 = vmatprep.subr.bf16.mxu0 %v29465_v61  ;;  %v29514_v61 = vld [vmem:[%s40002_s2 + $0x4000] ss:$80 sps:$4 sm:$0xff]  }
 0x8a4   : > { %16018 = vmatpush1.bf16.msra.mxu1 %v29460_v34  ;;  %v29517_v34 = vld [vmem:[%s40002_s2 + $0x4008] ss:$80 sps:$4 sm:$0xff]  }
 0x8a5   : > { %16305 = vmatpush1.bf16.msra.mxu0 %v29463_v0  ;;  %16019 = vmatprep.subr.bf16.mxu1 %v29468_v60  ;;  %v29522_v0 = vld [vmem:[%s40002_s2 + $0x40a4] ss:$80 sps:$4 sm:$0xff]   ;;  %v29525_v60 = vld [vmem:[%s40002_s2 + $0x40ac] ss:$80 sps:$4 sm:$0xff]  }
 0x8a6   : > { %16306 = vmatprep.subr.bf16.mxu0 %v29471_v35  ;;  %v26002_v35 = vadd.f32 %v32929_v42, %v2997_v52  ;;  %v29531_v42 = vld [vmem:[%s40004_s4 + $0xc] ss:$20 sps:$4 sm:$0xff]  }
 0x8a7   : > { %v29568_v52 = vld [vmem:[%s40004_s4 + $0x118] ss:$20 sps:$4 sm:$0xff]  }
 0x8a8   : > { %16020 = vmatpush1.bf16.msra.mxu1 %v29466_v3  ;;  %v29520_v3 = vld [vmem:[%s40002_s2 + $0x40a0] ss:$80 sps:$4 sm:$0xff]  }
 0x8a9   : > { %16307 = vmatpush1.bf16.msra.mxu0 %v29469_v18  ;;  %16021 = vmatprep.subr.bf16.mxu1 %v29474_v47  ;;  %v29523_v18 = vld [vmem:[%s40002_s2 + $0x40a8] ss:$80 sps:$4 sm:$0xff]  }
 0x8aa   : > { %16308 = vmatprep.subr.bf16.mxu0 %v29477_v59  ;;  %v29528_v47 = vld [vmem:[%s40004_s4 + $0x4] ss:$20 sps:$4 sm:$0xff]   ;;  %v16361_v59 = vmax.f32 %v26002_v35, 0.0  ;;  %v29577_v35 = vld [vmem:[%s40004_s4 + $0x148] ss:$20 sps:$4 sm:$0xff]  }
 0x8ac   : > { %16022 = vmatpush1.bf16.msra.mxu1 %v29472_v9  ;;  %v29526_v9 = vld [vmem:[%s40004_s4] ss:$20 sps:$4 sm:$0xff]  }
 0x8ad   : > { %16309 = vmatpush1.bf16.msra.mxu0 %v29475_v15  ;;  %16032 = vmatprep.subr.bf16.mxu1 %v29480_v19  ;;  %v29529_v15 = vld [vmem:[%s40004_s4 + $0x8] ss:$20 sps:$4 sm:$0xff]   ;;  %v29534_v19 = vld [vmem:[%s40004_s4 + $0x2c] ss:$20 sps:$4 sm:$0xff]  }
 0x8ae   : > { %16319 = vmatprep.subr.bf16.mxu0 %v29483_v16  ;;  %v37411_v16 = vpack.c.bf16 %v16361_v59, %v16361_v59  ;;  %v29588_v59 = vld [vmem:[%s40004_s4 + $0x194] ss:$20 sps:$4 sm:$0xff]  }
 0x8af   : > { %16024 = vmatmul.mubr.bf16.vlgmr.msra.gmra.mrb[28].mxu1 %v32156_v55 }
 0x8b0   : > { %16311 = vmatmul.mubr.bf16.vlgmr.msra.gmra.mrb[32].mxu0 %v32156_v55  ;;  %16033 = vmatpush1.bf16.msra.mxu1 %v29478_v7  ;;  %v29495_v55 = vld [vmem:[%s40002_s2 + $0x3d8c] ss:$80 sps:$4 sm:$0xff]   ;;  %v29537_v7 = vld [vmem:[%s40004_s4 + $0x34] ss:$20 sps:$4 sm:$0xff]  }
 0x8b1   : > { %16320 = vmatpush1.bf16.msra.mxu0 %v29481_v20  ;;  %16034 = vmatprep.subr.bf16.mxu1 %v29486_v4  ;;  %v29532_v20 = vld [vmem:[%s40004_s4 + $0x28] ss:$20 sps:$4 sm:$0xff]   ;;  %v29535_v4 = vld [vmem:[%s40004_s4 + $0x30] ss:$20 sps:$4 sm:$0xff]  }
 0x8b2   : > { %16321 = vmatprep.subr.bf16.mxu0 %v29489_v14  ;;  %16064 = vmatprep.mubr.bf16.mxu1 %v30659_v2  ;;  %v29540_v14 = vld [vmem:[%s40004_s4 + $0x54] ss:$20 sps:$4 sm:$0xff]  }
 0x8b3   : > { %16351 = vmatprep.mubr.bf16.mxu0 %v30659_v2  ;;  %v29501_v2 = vld [vmem:[%s40002_s2 + $0x3e2c] ss:$80 sps:$4 sm:$0xff]  }
 0x8b4   : > { %16035 = vmatpush1.bf16.msra.mxu1 %v29484_v22  ;;  %v29538_v22 = vld [vmem:[%s40004_s4 + $0x50] ss:$20 sps:$4 sm:$0xff]  }
 0x8b5   : > { %16322 = vmatpush1.bf16.msra.mxu0 %v29487_v40  ;;  %16036 = vmatprep.subr.bf16.mxu1 %v29492_v11  ;;  %v29541_v40 = vld [vmem:[%s40004_s4 + $0x58] ss:$20 sps:$4 sm:$0xff]   ;;  %v29546_v11 = vld [vmem:[%s40004_s4 + $0x7c] ss:$20 sps:$4 sm:$0xff]  }
 0x8b6   : > { %16323 = vmatprep.subr.bf16.mxu0 %v29495_v55  ;;  %v29549_v55 = vld [vmem:[%s40004_s4 + $0x84] ss:$20 sps:$4 sm:$0xff]  }
 0x8b8   : > { %16037 = vmatpush1.bf16.msra.mxu1 %v29490_v29  ;;  %v29544_v29 = vld [vmem:[%s40004_s4 + $0x78] ss:$20 sps:$4 sm:$0xff]  }
 0x8b9   : > { %16324 = vmatpush1.bf16.msra.mxu0 %v29493_v30  ;;  %16038 = vmatprep.subr.bf16.mxu1 %v29498_v32  ;;  %v29547_v30 = vld [vmem:[%s40004_s4 + $0x80] ss:$20 sps:$4 sm:$0xff]   ;;  %v29552_v32 = vld [vmem:[%s40004_s4 + $0xa4] ss:$20 sps:$4 sm:$0xff]  }
 0x8ba   : > { %16325 = vmatprep.subr.bf16.mxu0 %v29501_v2  ;;  %v29555_v2 = vld [vmem:[%s40004_s4 + $0xac] ss:$20 sps:$4 sm:$0xff]  }
 0x8bc   : > { %16039 = vmatpush1.bf16.msra.mxu1 %v29496_v33  ;;  %v29550_v33 = vld [vmem:[%s40004_s4 + $0xa0] ss:$20 sps:$4 sm:$0xff]  }
 0x8bd   : > { %16326 = vmatpush1.bf16.msra.mxu0 %v29499_v36  ;;  %16040 = vmatprep.subr.bf16.mxu1 %v29504_v17  ;;  %v29553_v36 = vld [vmem:[%s40004_s4 + $0xa8] ss:$20 sps:$4 sm:$0xff]   ;;  %v29558_v17 = vld [vmem:[%s40004_s4 + $0xcc] ss:$20 sps:$4 sm:$0xff]  }
 0x8be   : > { %16327 = vmatprep.subr.bf16.mxu0 %v29507_v44  ;;  %v29561_v44 = vld [vmem:[%s40004_s4 + $0xd4] ss:$20 sps:$4 sm:$0xff]  }
 0x8c0   : > { %16041 = vmatpush1.bf16.msra.mxu1 %v29502_v26  ;;  %v29556_v26 = vld [vmem:[%s40004_s4 + $0xc8] ss:$20 sps:$4 sm:$0xff]  }
 0x8c1   : > { %16328 = vmatpush1.bf16.msra.mxu0 %v29505_v56  ;;  %16042 = vmatprep.subr.bf16.mxu1 %v29510_v57  ;;  %v29559_v56 = vld [vmem:[%s40004_s4 + $0xd0] ss:$20 sps:$4 sm:$0xff]   ;;  %v29564_v57 = vld [vmem:[%s40004_s4 + $0xf4] ss:$20 sps:$4 sm:$0xff]  }
 0x8c2   : > { %16329 = vmatprep.subr.bf16.mxu0 %v29513_v6  ;;  %v29567_v6 = vld [vmem:[%s40004_s4 + $0xfc] ss:$20 sps:$4 sm:$0xff]  }
 0x8c4   : > { %16043 = vmatpush1.bf16.msra.mxu1 %v29508_v49  ;;  %v29562_v49 = vld [vmem:[%s40004_s4 + $0xf0] ss:$20 sps:$4 sm:$0xff]  }
 0x8c5   : > { %16330 = vmatpush1.bf16.msra.mxu0 %v29511_v13  ;;  %16044 = vmatprep.subr.bf16.mxu1 %v29516_v1  ;;  %v29565_v13 = vld [vmem:[%s40004_s4 + $0xf8] ss:$20 sps:$4 sm:$0xff]   ;;  %v29570_v1 = vld [vmem:[%s40004_s4 + $0x11c] ss:$20 sps:$4 sm:$0xff]  }
 0x8c6   : > { %16331 = vmatprep.subr.bf16.mxu0 %v29519_v39  ;;  %v29573_v39 = vld [vmem:[%s40004_s4 + $0x124] ss:$20 sps:$4 sm:$0xff]  }
 0x8c8   : > { %16045 = vmatpush1.bf16.msra.mxu1 %v29514_v61  ;;  %v29571_v61 = vld [vmem:[%s40004_s4 + $0x120] ss:$20 sps:$4 sm:$0xff]  }
 0x8c9   : > { %16332 = vmatpush1.bf16.msra.mxu0 %v29517_v34  ;;  %16046 = vmatprep.subr.bf16.mxu1 %v29522_v0  ;;  %v29576_v34 = vld [vmem:[%s40004_s4 + $0x144] ss:$20 sps:$4 sm:$0xff]   ;;  %v29579_v0 = vld [vmem:[%s40004_s4 + $0x14c] ss:$20 sps:$4 sm:$0xff]  }
 0x8ca   : > { %16333 = vmatprep.subr.bf16.mxu0 %v29525_v60  ;;  %v29574_v60 = vld [vmem:[%s40004_s4 + $0x140] ss:$20 sps:$4 sm:$0xff]  }
 0x8cc   : > { %16047 = vmatpush1.bf16.msra.mxu1 %v29520_v3  ;;  %v29582_v3 = vld [vmem:[%s40004_s4 + $0x16c] ss:$20 sps:$4 sm:$0xff]  }
 0x8cd   : > { %16334 = vmatpush1.bf16.msra.mxu0 %v29523_v18  ;;  %21547 = vmatprep.subr.bf16.mxu1 %v29528_v47  ;;  %v29585_v18 = vld [vmem:[%s40004_s4 + $0x174] ss:$20 sps:$4 sm:$0xff]  }
 0x8ce   : > { %21957 = vmatprep.subr.bf16.mxu0 %v29531_v42  ;;  %v29580_v47 = vld [vmem:[%s40004_s4 + $0x168] ss:$20 sps:$4 sm:$0xff]   ;;  %v29583_v42 = vld [vmem:[%s40004_s4 + $0x170] ss:$20 sps:$4 sm:$0xff]  }
 0x8cf   : > { %16065 = vmatmul.mubr.bf16.vlgmr.msra.gmra.mrb[28].mxu1 %v32265_v31 }
 0x8d0   : > { %16352 = vmatmul.mubr.bf16.vlgmr.msra.gmra.mrb[32].mxu0 %v32265_v31  ;;  %21548 = vmatpush1.bf16.msra.mxu1 %v29526_v9  ;;  %v29543_v31 = vld [vmem:[%s40004_s4 + $0x5c] ss:$20 sps:$4 sm:$0xff]  }
 0x8d1   : > { %21579 = vmatprep.mubr.bf16.mxu1 %v37411_v16  ;;  %21958 = vmatpush1.bf16.msra.mxu0 %v29529_v15  ;;  %v29591_v9 = vld [vmem:[%s40004_s4 + $0x19c] ss:$20 sps:$4 sm:$0xff]  }
 0x8d2   : > { %21989 = vmatprep.mubr.bf16.mxu0 %v37411_v16  ;;  %21549 = vmatprep.subr.bf16.mxu1 %v29534_v19  ;;  %v29586_v15 = vld [vmem:[%s40004_s4 + $0x190] ss:$20 sps:$4 sm:$0xff]   ;;  %v29589_v19 = vld [vmem:[%s40004_s4 + $0x198] ss:$20 sps:$4 sm:$0xff]  }
 0x8d3   : > { %21959 = vmatprep.subr.bf16.mxu0 %v29537_v7  ;;  %v29594_v7 = vld [vmem:[%s40004_s4 + $0x1bc] ss:$20 sps:$4 sm:$0xff]  }
 0x8d4   : > { %21550 = vmatpush1.bf16.msra.mxu1 %v29532_v20  ;;  %v29597_v20 = vld [vmem:[%s40004_s4 + $0x1c4] ss:$20 sps:$4 sm:$0xff]  }
 0x8d5   : > { %21960 = vmatpush1.bf16.msra.mxu0 %v29535_v4  ;;  %21551 = vmatprep.subr.bf16.mxu1 %v29540_v14  ;;  %v29592_v4 = vld [vmem:[%s40004_s4 + $0x1b8] ss:$20 sps:$4 sm:$0xff]   ;;  %v29595_v14 = vld [vmem:[%s40004_s4 + $0x1c0] ss:$20 sps:$4 sm:$0xff]  }
 0x8d6   : > { %21961 = vmatprep.subr.bf16.mxu0 %v29543_v31  ;;  %v29600_v31 = vld [vmem:[%s40004_s4 + $0x1e4] ss:$20 sps:$4 sm:$0xff]  }
 0x8d8   : > { %21552 = vmatpush1.bf16.msra.mxu1 %v29538_v22  ;;  %v29603_v22 = vld [vmem:[%s40004_s4 + $0x1ec] ss:$20 sps:$4 sm:$0xff]  }
 0x8d9   : > { %21962 = vmatpush1.bf16.msra.mxu0 %v29541_v40  ;;  %21553 = vmatprep.subr.bf16.mxu1 %v29546_v11  ;;  %v29598_v40 = vld [vmem:[%s40004_s4 + $0x1e0] ss:$20 sps:$4 sm:$0xff]   ;;  %v29601_v11 = vld [vmem:[%s40004_s4 + $0x1e8] ss:$20 sps:$4 sm:$0xff]  }
 0x8da   : > { %21963 = vmatprep.subr.bf16.mxu0 %v29549_v55  ;;  %v29606_v55 = vld [vmem:[%s40004_s4 + $0x20c] ss:$20 sps:$4 sm:$0xff]  }
 0x8dc   : > { %21554 = vmatpush1.bf16.msra.mxu1 %v29544_v29  ;;  %v29609_v29 = vld [vmem:[%s40004_s4 + $0x214] ss:$20 sps:$4 sm:$0xff]  }
 0x8dd   : > { %21964 = vmatpush1.bf16.msra.mxu0 %v29547_v30  ;;  %21555 = vmatprep.subr.bf16.mxu1 %v29552_v32  ;;  %v29604_v30 = vld [vmem:[%s40004_s4 + $0x208] ss:$20 sps:$4 sm:$0xff]   ;;  %v2993_v32 = vrot.slane %v37361_v58, %v31056_v48 }
 0x8de   : > { %21965 = vmatprep.subr.bf16.mxu0 %v29555_v2  ;;  %v29607_v2 = vld [vmem:[%s40004_s4 + $0x210] ss:$20 sps:$4 sm:$0xff]  }
 0x8e0   : > { %21556 = vmatpush1.bf16.msra.mxu1 %v29550_v33  ;;  %v29612_v33 = vld [vmem:[%s40004_s4 + $0x234] ss:$20 sps:$4 sm:$0xff]  }
 0x8e1   : > { %21966 = vmatpush1.bf16.msra.mxu0 %v29553_v36  ;;  %21557 = vmatprep.subr.bf16.mxu1 %v29558_v17  ;;  %v29615_v36 = vld [vmem:[%s40004_s4 + $0x23c] ss:$20 sps:$4 sm:$0xff]   ;;  %v3005_v17 = vrot.slane %v37361_v58, %v31071_v53 }
 0x8e2   : > { %21967 = vmatprep.subr.bf16.mxu0 %v29561_v44  ;;  %v29610_v44 = vld [vmem:[%s40004_s4 + $0x230] ss:$20 sps:$4 sm:$0xff]  }
 0x8e4   : > { %21558 = vmatpush1.bf16.msra.mxu1 %v29556_v26  ;;  %v26001_v26 = vadd.f32 %v32922_v38, %v2993_v32  ;;  %v29616_v38 = vld [vmem:[%s40004_s4 + $0x258] ss:$20 sps:$4 sm:$0xff]   ;;  %v29660_v32 = vld [vmem:[%s40004_s4 + $0x374] ss:$20 sps:$4 sm:$0xff]  }
 0x8e5   : > { %21968 = vmatpush1.bf16.msra.mxu0 %v29559_v56  ;;  %21559 = vmatprep.subr.bf16.mxu1 %v29564_v57  ;;  %v29613_v56 = vld [vmem:[%s40004_s4 + $0x238] ss:$20 sps:$4 sm:$0xff]   ;;  %v29618_v57 = vld [vmem:[%s40004_s4 + $0x25c] ss:$20 sps:$4 sm:$0xff]  }
 0x8e6   : > { %21969 = vmatprep.subr.bf16.mxu0 %v29567_v6  ;;  %v29621_v6 = vld [vmem:[%s40004_s4 + $0x264] ss:$20 sps:$4 sm:$0xff]  }
 0x8e8   : > { %21560 = vmatpush1.bf16.msra.mxu1 %v29562_v49  ;;  %v26004_v49 = vadd.f32 %v32934_v45, %v3005_v17  ;;  %v29627_v45 = vld [vmem:[%s40004_s4 + $0x28c] ss:$20 sps:$4 sm:$0xff]   ;;  %v29666_v17 = vld [vmem:[%s40004_s4 + $0x39c] ss:$20 sps:$4 sm:$0xff]  }
 0x8e9   : > { %21970 = vmatpush1.bf16.msra.mxu0 %v29565_v13  ;;  %21561 = vmatprep.subr.bf16.mxu1 %v29570_v1  ;;  %v16360_v13 = vmax.f32 %v26001_v26, 0.0  ;;  %v29619_v1 = vld [vmem:[%s40004_s4 + $0x260] ss:$20 sps:$4 sm:$0xff]   ;;  %v29664_v26 = vld [vmem:[%s40004_s4 + $0x398] ss:$20 sps:$4 sm:$0xff]  }
 0x8ea   : > { %21971 = vmatprep.subr.bf16.mxu0 %v29573_v39  ;;  %v29624_v39 = vld [vmem:[%s40004_s4 + $0x284] ss:$20 sps:$4 sm:$0xff]  }
 0x8ec   : > { %21562 = vmatpush1.bf16.msra.mxu1 %v29568_v52  ;;  %v16363_v52 = vmax.f32 %v26004_v49, 0.0  ;;  %v29670_v49 = vld [vmem:[%s40004_s4 + $0x3c0] ss:$20 sps:$4 sm:$0xff]  }
 0x8ed   : > { %21972 = vmatpush1.bf16.msra.mxu0 %v29571_v61  ;;  %21563 = vmatprep.subr.bf16.mxu1 %v29576_v34  ;;  %v29622_v61 = vld [vmem:[%s40004_s4 + $0x280] ss:$20 sps:$4 sm:$0xff]   ;;  %v37609_v34 = vpack.c.bf16 %v16360_v13, %v16360_v13 }
 0x8ee   : > { %21973 = vmatprep.subr.bf16.mxu0 %v29579_v0  ;;  %v29625_v0 = vld [vmem:[%s40004_s4 + $0x288] ss:$20 sps:$4 sm:$0xff]   ;;  %v29678_v13 = vld [vmem:[%s40004_s4 + $0x3ec] ss:$20 sps:$4 sm:$0xff]  }
 0x8f0   : > { %21564 = vmatpush1.bf16.msra.mxu1 %v29574_v60  ;;  %v29630_v60 = vld [vmem:[%s40004_s4 + $0x2ac] ss:$20 sps:$4 sm:$0xff]  }
 0x8f1   : > { %21974 = vmatpush1.bf16.msra.mxu0 %v29577_v35  ;;  %21565 = vmatprep.subr.bf16.mxu1 %v29582_v3  ;;  %v37617_v35 = vpack.c.bf16 %v16363_v52, %v16363_v52  ;;  %v29633_v3 = vld [vmem:[%s40004_s4 + $0x2b4] ss:$20 sps:$4 sm:$0xff]  }
 0x8f2   : > { %21975 = vmatprep.subr.bf16.mxu0 %v29585_v18  ;;  %v29628_v18 = vld [vmem:[%s40004_s4 + $0x2a8] ss:$20 sps:$4 sm:$0xff]  }
 0x8f3   : > { %v29684_v52 = vld [vmem:[%s40004_s4 + $0x414] ss:$20 sps:$4 sm:$0xff]  }
 0x8f4   : > { %21566 = vmatpush1.bf16.msra.mxu1 %v29580_v47  ;;  %v29631_v47 = vld [vmem:[%s40004_s4 + $0x2b0] ss:$20 sps:$4 sm:$0xff]  }
 0x8f5   : > { %21976 = vmatpush1.bf16.msra.mxu0 %v29583_v42  ;;  %21567 = vmatprep.subr.bf16.mxu1 %v29588_v59  ;;  %v29636_v42 = vld [vmem:[%s40004_s4 + $0x2d4] ss:$20 sps:$4 sm:$0xff]   ;;  %v29639_v59 = vld [vmem:[%s40004_s4 + $0x2dc] ss:$20 sps:$4 sm:$0xff]  }
 0x8f6   : > { %21977 = vmatprep.subr.bf16.mxu0 %v29591_v9  ;;  %v29634_v9 = vld [vmem:[%s40004_s4 + $0x2d0] ss:$20 sps:$4 sm:$0xff]  }
 0x8f8   : > { %21568 = vmatpush1.bf16.msra.mxu1 %v29586_v15  ;;  %v29637_v15 = vld [vmem:[%s40004_s4 + $0x2d8] ss:$20 sps:$4 sm:$0xff]  }
 0x8f9   : > { %21978 = vmatpush1.bf16.msra.mxu0 %v29589_v19  ;;  %21569 = vmatprep.subr.bf16.mxu1 %v29594_v7  ;;  %v29642_v19 = vld [vmem:[%s40004_s4 + $0x2fc] ss:$20 sps:$4 sm:$0xff]   ;;  %v29645_v7 = vld [vmem:[%s40004_s4 + $0x304] ss:$20 sps:$4 sm:$0xff]  }
 0x8fa   : > { %21979 = vmatprep.subr.bf16.mxu0 %v29597_v20  ;;  %v29640_v20 = vld [vmem:[%s40004_s4 + $0x2f8] ss:$20 sps:$4 sm:$0xff]  }
 0x8fc   : > { %21570 = vmatpush1.bf16.msra.mxu1 %v29592_v4  ;;  %v29643_v4 = vld [vmem:[%s40004_s4 + $0x300] ss:$20 sps:$4 sm:$0xff]  }
 0x8fd   : > { %21980 = vmatpush1.bf16.msra.mxu0 %v29595_v14  ;;  %21571 = vmatprep.subr.bf16.mxu1 %v29600_v31  ;;  %v29648_v14 = vld [vmem:[%s40004_s4 + $0x324] ss:$20 sps:$4 sm:$0xff]   ;;  %v29651_v31 = vld [vmem:[%s40004_s4 + $0x32c] ss:$20 sps:$4 sm:$0xff]  }
 0x8fe   : > { %21981 = vmatprep.subr.bf16.mxu0 %v29603_v22  ;;  %v29646_v22 = vld [vmem:[%s40004_s4 + $0x320] ss:$20 sps:$4 sm:$0xff]  }
 0x900   : > { %21572 = vmatpush1.bf16.msra.mxu1 %v29598_v40  ;;  %v29649_v40 = vld [vmem:[%s40004_s4 + $0x328] ss:$20 sps:$4 sm:$0xff]  }
 0x901   : > { %21982 = vmatpush1.bf16.msra.mxu0 %v29601_v11  ;;  %21573 = vmatprep.subr.bf16.mxu1 %v29606_v55  ;;  %v29654_v11 = vld [vmem:[%s40004_s4 + $0x34c] ss:$20 sps:$4 sm:$0xff]   ;;  %v29657_v55 = vld [vmem:[%s40004_s4 + $0x354] ss:$20 sps:$4 sm:$0xff]  }
 0x902   : > { %21983 = vmatprep.subr.bf16.mxu0 %v29609_v29  ;;  %v29652_v29 = vld [vmem:[%s40004_s4 + $0x348] ss:$20 sps:$4 sm:$0xff]  }
 0x904   : > { %21574 = vmatpush1.bf16.msra.mxu1 %v29604_v30  ;;  %v29655_v30 = vld [vmem:[%s40004_s4 + $0x350] ss:$20 sps:$4 sm:$0xff]  }
 0x905   : > { %21984 = vmatpush1.bf16.msra.mxu0 %v29607_v2  ;;  %21575 = vmatprep.subr.bf16.mxu1 %v29612_v33  ;;  %v29663_v2 = vld [vmem:[%s40004_s4 + $0x37c] ss:$20 sps:$4 sm:$0xff]  }
 0x906   : > { %21985 = vmatprep.subr.bf16.mxu0 %v29615_v36  ;;  %v29658_v33 = vld [vmem:[%s40004_s4 + $0x370] ss:$20 sps:$4 sm:$0xff]   ;;  %v29661_v36 = vld [vmem:[%s40004_s4 + $0x378] ss:$20 sps:$4 sm:$0xff]  }
 0x908   : > { %21576 = vmatpush1.bf16.msra.mxu1 %v29610_v44  ;;  %v29669_v44 = vld [vmem:[%s40004_s4 + $0x3a4] ss:$20 sps:$4 sm:$0xff]  }
 0x909   : > { %21986 = vmatpush1.bf16.msra.mxu0 %v29613_v56  ;;  %21577 = vmatprep.subr.bf16.mxu1 %v29618_v57  ;;  %v29667_v56 = vld [vmem:[%s40004_s4 + $0x3a0] ss:$20 sps:$4 sm:$0xff]   ;;  %v29672_v57 = vld [vmem:[%s40004_s4 + $0x3c4] ss:$20 sps:$4 sm:$0xff]  }
 0x90a   : > { %21987 = vmatprep.subr.bf16.mxu0 %v29621_v6  ;;  %v29675_v6 = vld [vmem:[%s40004_s4 + $0x3cc] ss:$20 sps:$4 sm:$0xff]  }
 0x90c   : > { %21578 = vmatpush1.bf16.msra.mxu1 %v29616_v38  ;;  %v29673_v38 = vld [vmem:[%s40004_s4 + $0x3c8] ss:$20 sps:$4 sm:$0xff]  }
 0x90d   : > { %21988 = vmatpush1.bf16.msra.mxu0 %v29619_v1  ;;  %21588 = vmatprep.subr.bf16.mxu1 %v29624_v39  ;;  %v29681_v1 = vld [vmem:[%s40004_s4 + $0x3f4] ss:$20 sps:$4 sm:$0xff]  }
 0x90e   : > { %21998 = vmatprep.subr.bf16.mxu0 %v29627_v45  ;;  %v29676_v39 = vld [vmem:[%s40004_s4 + $0x3e8] ss:$20 sps:$4 sm:$0xff]   ;;  %v29679_v45 = vld [vmem:[%s40004_s4 + $0x3f0] ss:$20 sps:$4 sm:$0xff]  }
 0x90f   : > { %21580 = vmatmul.mubr.bf16.vlgmr.msra.gmra.mrb[32].mxu1 %v37609_v34 }
 0x910   : > { %21990 = vmatmul.mubr.bf16.vlgmr.msra.gmra.mrb[36].mxu0 %v37609_v34  ;;  %21589 = vmatpush1.bf16.msra.mxu1 %v29622_v61  ;;  %v29687_v61 = vld [vmem:[%s40004_s4 + $0x41c] ss:$20 sps:$4 sm:$0xff]  }
 0x911   : > { %21620 = vmatprep.mubr.bf16.mxu1 %v37617_v35  ;;  %21999 = vmatpush1.bf16.msra.mxu0 %v29625_v0  ;;  %v29682_v0 = vld [vmem:[%s40004_s4 + $0x410] ss:$20 sps:$4 sm:$0xff]  }
 0x912   : > { %22030 = vmatprep.mubr.bf16.mxu0 %v37617_v35  ;;  %21590 = vmatprep.subr.bf16.mxu1 %v29630_v60  ;;  %v29685_v60 = vld [vmem:[%s40004_s4 + $0x418] ss:$20 sps:$4 sm:$0xff]  }
 0x913   : > { %22000 = vmatprep.subr.bf16.mxu0 %v29633_v3  ;;  %v29690_v3 = vld [vmem:[%s40004_s4 + $0x43c] ss:$20 sps:$4 sm:$0xff]  }
 0x914   : > { %21591 = vmatpush1.bf16.msra.mxu1 %v29628_v18  ;;  %v29693_v18 = vld [vmem:[%s40004_s4 + $0x444] ss:$20 sps:$4 sm:$0xff]  }
 0x915   : > { %22001 = vmatpush1.bf16.msra.mxu0 %v29631_v47  ;;  %21592 = vmatprep.subr.bf16.mxu1 %v29636_v42  ;;  %v29688_v47 = vld [vmem:[%s40004_s4 + $0x438] ss:$20 sps:$4 sm:$0xff]   ;;  %v29691_v42 = vld [vmem:[%s40004_s4 + $0x440] ss:$20 sps:$4 sm:$0xff]  }
 0x916   : > { %22002 = vmatprep.subr.bf16.mxu0 %v29639_v59  ;;  %v29696_v59 = vld [vmem:[%s40004_s4 + $0x464] ss:$20 sps:$4 sm:$0xff]  }
 0x918   : > { %21593 = vmatpush1.bf16.msra.mxu1 %v29634_v9  ;;  %v29699_v9 = vld [vmem:[%s40004_s4 + $0x46c] ss:$20 sps:$4 sm:$0xff]  }
 0x919   : > { %22003 = vmatpush1.bf16.msra.mxu0 %v29637_v15  ;;  %21594 = vmatprep.subr.bf16.mxu1 %v29642_v19  ;;  %v29694_v15 = vld [vmem:[%s40004_s4 + $0x460] ss:$20 sps:$4 sm:$0xff]   ;;  %v29697_v19 = vld [vmem:[%s40004_s4 + $0x468] ss:$20 sps:$4 sm:$0xff]  }
 0x91a   : > { %22004 = vmatprep.subr.bf16.mxu0 %v29645_v7  ;;  %v29702_v7 = vld [vmem:[%s40004_s4 + $0x48c] ss:$20 sps:$4 sm:$0xff]  }
 0x91c   : > { %21595 = vmatpush1.bf16.msra.mxu1 %v29640_v20  ;;  %v29705_v20 = vld [vmem:[%s40004_s4 + $0x494] ss:$20 sps:$4 sm:$0xff]  }
 0x91d   : > { %22005 = vmatpush1.bf16.msra.mxu0 %v29643_v4  ;;  %21596 = vmatprep.subr.bf16.mxu1 %v29648_v14  ;;  %v29700_v4 = vld [vmem:[%s40004_s4 + $0x488] ss:$20 sps:$4 sm:$0xff]   ;;  %v3001_v14 = vrot.slane %v37361_v58, %v31158_v37 }
 0x91e   : > { %22006 = vmatprep.subr.bf16.mxu0 %v29651_v31  ;;  %v29703_v31 = vld [vmem:[%s40004_s4 + $0x490] ss:$20 sps:$4 sm:$0xff]  }
 0x920   : > { %21597 = vmatpush1.bf16.msra.mxu1 %v29646_v22  ;;  %v29708_v22 = vld [vmem:[%s40004_s4 + $0x4b4] ss:$20 sps:$4 sm:$0xff]  }
 0x921   : > { %22007 = vmatpush1.bf16.msra.mxu0 %v29649_v40  ;;  %21598 = vmatprep.subr.bf16.mxu1 %v29654_v11  ;;  %v29711_v40 = vld [vmem:[%s40004_s4 + $0x4bc] ss:$20 sps:$4 sm:$0xff]   ;;  %v3013_v11 = vrot.slane %v37361_v58, %v31276_v43 }
 0x922   : > { %22008 = vmatprep.subr.bf16.mxu0 %v29657_v55  ;;  %v29706_v55 = vld [vmem:[%s40004_s4 + $0x4b0] ss:$20 sps:$4 sm:$0xff]  }
 0x924   : > { %21599 = vmatpush1.bf16.msra.mxu1 %v29652_v29  ;;  %v26003_v29 = vadd.f32 %v32927_v41, %v3001_v14  ;;  %v29712_v41 = vld [vmem:[%s40004_s4 + $0x4d8] ss:$20 sps:$4 sm:$0xff]   ;;  %v29756_v14 = vld [vmem:[%s40004_s4 + $0x5f4] ss:$20 sps:$4 sm:$0xff]  }
 0x925   : > { %22009 = vmatpush1.bf16.msra.mxu0 %v29655_v30  ;;  %21600 = vmatprep.subr.bf16.mxu1 %v29660_v32  ;;  %v29709_v30 = vld [vmem:[%s40004_s4 + $0x4b8] ss:$20 sps:$4 sm:$0xff]   ;;  %v29714_v32 = vld [vmem:[%s40004_s4 + $0x4dc] ss:$20 sps:$4 sm:$0xff]  }
 0x926   : > { %22010 = vmatprep.subr.bf16.mxu0 %v29663_v2  ;;  %v29717_v2 = vld [vmem:[%s40004_s4 + $0x4e4] ss:$20 sps:$4 sm:$0xff]  }
 0x928   : > { %21601 = vmatpush1.bf16.msra.mxu1 %v29658_v33  ;;  %v26006_v33 = vadd.f32 %v34213_v54, %v3013_v11  ;;  %v29723_v54 = vld [vmem:[%s40004_s4 + $0x50c] ss:$20 sps:$4 sm:$0xff]   ;;  %v29762_v11 = vld [vmem:[%s40004_s4 + $0x61c] ss:$20 sps:$4 sm:$0xff]  }
 0x929   : > { %22011 = vmatpush1.bf16.msra.mxu0 %v29661_v36  ;;  %21602 = vmatprep.subr.bf16.mxu1 %v29666_v17  ;;  %v16362_v36 = vmax.f32 %v26003_v29, 0.0  ;;  %v29715_v17 = vld [vmem:[%s40004_s4 + $0x4e0] ss:$20 sps:$4 sm:$0xff]   ;;  %v29760_v29 = vld [vmem:[%s40004_s4 + $0x618] ss:$20 sps:$4 sm:$0xff]  }
 0x92a   : > { %22012 = vmatprep.subr.bf16.mxu0 %v29669_v44  ;;  %v29720_v44 = vld [vmem:[%s40004_s4 + $0x504] ss:$20 sps:$4 sm:$0xff]  }
 0x92c   : > { %21603 = vmatpush1.bf16.msra.mxu1 %v29664_v26  ;;  %v16365_v26 = vmax.f32 %v26006_v33, 0.0  ;;  %v29766_v33 = vld [vmem:[%s40004_s4 + $0x640] ss:$20 sps:$4 sm:$0xff]  }
 0x92d   : > { %22013 = vmatpush1.bf16.msra.mxu0 %v29667_v56  ;;  %21604 = vmatprep.subr.bf16.mxu1 %v29672_v57  ;;  %v29718_v56 = vld [vmem:[%s40004_s4 + $0x500] ss:$20 sps:$4 sm:$0xff]   ;;  %v37815_v57 = vpack.c.bf16 %v16362_v36, %v16362_v36 }
 0x92e   : > { %22014 = vmatprep.subr.bf16.mxu0 %v29675_v6  ;;  %v29721_v6 = vld [vmem:[%s40004_s4 + $0x508] ss:$20 sps:$4 sm:$0xff]   ;;  %v29774_v36 = vld [vmem:[%s40004_s4 + $0x66c] ss:$20 sps:$4 sm:$0xff]  }
 0x930   : > { %21605 = vmatpush1.bf16.msra.mxu1 %v29670_v49  ;;  %v29726_v49 = vld [vmem:[%s40004_s4 + $0x52c] ss:$20 sps:$4 sm:$0xff]  }
 0x931   : > { %22015 = vmatpush1.bf16.msra.mxu0 %v29673_v38  ;;  %21606 = vmatprep.subr.bf16.mxu1 %v29678_v13  ;;  %v37823_v38 = vpack.c.bf16 %v16365_v26, %v16365_v26  ;;  %v29729_v13 = vld [vmem:[%s40004_s4 + $0x534] ss:$20 sps:$4 sm:$0xff]  }
 0x932   : > { %22016 = vmatprep.subr.bf16.mxu0 %v29681_v1  ;;  %v29724_v1 = vld [vmem:[%s40004_s4 + $0x528] ss:$20 sps:$4 sm:$0xff]  }
 0x933   : > { %v29780_v26 = vld [vmem:[%s40004_s4 + $0x694] ss:$20 sps:$4 sm:$0xff]  }
 0x934   : > { %21607 = vmatpush1.bf16.msra.mxu1 %v29676_v39  ;;  %v29727_v39 = vld [vmem:[%s40004_s4 + $0x530] ss:$20 sps:$4 sm:$0xff]  }
 0x935   : > { %22017 = vmatpush1.bf16.msra.mxu0 %v29679_v45  ;;  %21608 = vmatprep.subr.bf16.mxu1 %v29684_v52  ;;  %v29732_v45 = vld [vmem:[%s40004_s4 + $0x554] ss:$20 sps:$4 sm:$0xff]   ;;  %v29735_v52 = vld [vmem:[%s40004_s4 + $0x55c] ss:$20 sps:$4 sm:$0xff]  }
 0x936   : > { %22018 = vmatprep.subr.bf16.mxu0 %v29687_v61  ;;  %v29730_v61 = vld [vmem:[%s40004_s4 + $0x550] ss:$20 sps:$4 sm:$0xff]  }
 0x938   : > { %21609 = vmatpush1.bf16.msra.mxu1 %v29682_v0  ;;  %v29733_v0 = vld [vmem:[%s40004_s4 + $0x558] ss:$20 sps:$4 sm:$0xff]  }
 0x939   : > { %22019 = vmatpush1.bf16.msra.mxu0 %v29685_v60  ;;  %21610 = vmatprep.subr.bf16.mxu1 %v29690_v3  ;;  %v29738_v60 = vld [vmem:[%s40004_s4 + $0x57c] ss:$20 sps:$4 sm:$0xff]   ;;  %v29741_v3 = vld [vmem:[%s40004_s4 + $0x584] ss:$20 sps:$4 sm:$0xff]  }
 0x93a   : > { %22020 = vmatprep.subr.bf16.mxu0 %v29693_v18  ;;  %v29736_v18 = vld [vmem:[%s40004_s4 + $0x578] ss:$20 sps:$4 sm:$0xff]  }
 0x93c   : > { %21611 = vmatpush1.bf16.msra.mxu1 %v29688_v47  ;;  %v29739_v47 = vld [vmem:[%s40004_s4 + $0x580] ss:$20 sps:$4 sm:$0xff]  }
 0x93d   : > { %22021 = vmatpush1.bf16.msra.mxu0 %v29691_v42  ;;  %21612 = vmatprep.subr.bf16.mxu1 %v29696_v59  ;;  %v29744_v42 = vld [vmem:[%s40004_s4 + $0x5a4] ss:$20 sps:$4 sm:$0xff]   ;;  %v29747_v59 = vld [vmem:[%s40004_s4 + $0x5ac] ss:$20 sps:$4 sm:$0xff]  }
 0x93e   : > { %22022 = vmatprep.subr.bf16.mxu0 %v29699_v9  ;;  %v29742_v9 = vld [vmem:[%s40004_s4 + $0x5a0] ss:$20 sps:$4 sm:$0xff]  }
 0x940   : > { %21613 = vmatpush1.bf16.msra.mxu1 %v29694_v15  ;;  %v29745_v15 = vld [vmem:[%s40004_s4 + $0x5a8] ss:$20 sps:$4 sm:$0xff]  }
 0x941   : > { %22023 = vmatpush1.bf16.msra.mxu0 %v29697_v19  ;;  %21614 = vmatprep.subr.bf16.mxu1 %v29702_v7  ;;  %v29750_v19 = vld [vmem:[%s40004_s4 + $0x5cc] ss:$20 sps:$4 sm:$0xff]   ;;  %v29753_v7 = vld [vmem:[%s40004_s4 + $0x5d4] ss:$20 sps:$4 sm:$0xff]  }
 0x942   : > { %22024 = vmatprep.subr.bf16.mxu0 %v29705_v20  ;;  %v29748_v20 = vld [vmem:[%s40004_s4 + $0x5c8] ss:$20 sps:$4 sm:$0xff]  }
 0x944   : > { %21615 = vmatpush1.bf16.msra.mxu1 %v29700_v4  ;;  %v29751_v4 = vld [vmem:[%s40004_s4 + $0x5d0] ss:$20 sps:$4 sm:$0xff]  }
 0x945   : > { %22025 = vmatpush1.bf16.msra.mxu0 %v29703_v31  ;;  %21616 = vmatprep.subr.bf16.mxu1 %v29708_v22  ;;  %v29759_v31 = vld [vmem:[%s40004_s4 + $0x5fc] ss:$20 sps:$4 sm:$0xff]  }
 0x946   : > { %22026 = vmatprep.subr.bf16.mxu0 %v29711_v40  ;;  %v29754_v22 = vld [vmem:[%s40004_s4 + $0x5f0] ss:$20 sps:$4 sm:$0xff]   ;;  %v29757_v40 = vld [vmem:[%s40004_s4 + $0x5f8] ss:$20 sps:$4 sm:$0xff]  }
 0x948   : > { %21617 = vmatpush1.bf16.msra.mxu1 %v29706_v55  ;;  %v29765_v55 = vld [vmem:[%s40004_s4 + $0x624] ss:$20 sps:$4 sm:$0xff]  }
 0x949   : > { %22027 = vmatpush1.bf16.msra.mxu0 %v29709_v30  ;;  %21618 = vmatprep.subr.bf16.mxu1 %v29714_v32  ;;  %v29763_v30 = vld [vmem:[%s40004_s4 + $0x620] ss:$20 sps:$4 sm:$0xff]   ;;  %v29768_v32 = vld [vmem:[%s40004_s4 + $0x644] ss:$20 sps:$4 sm:$0xff]  }
 0x94a   : > { %22028 = vmatprep.subr.bf16.mxu0 %v29717_v2  ;;  %v29771_v2 = vld [vmem:[%s40004_s4 + $0x64c] ss:$20 sps:$4 sm:$0xff]  }
 0x94c   : > { %21619 = vmatpush1.bf16.msra.mxu1 %v29712_v41  ;;  %v29769_v41 = vld [vmem:[%s40004_s4 + $0x648] ss:$20 sps:$4 sm:$0xff]  }
 0x94d   : > { %22029 = vmatpush1.bf16.msra.mxu0 %v29715_v17  ;;  %21629 = vmatprep.subr.bf16.mxu1 %v29720_v44  ;;  %v29777_v17 = vld [vmem:[%s40004_s4 + $0x674] ss:$20 sps:$4 sm:$0xff]  }
 0x94e   : > { %22039 = vmatprep.subr.bf16.mxu0 %v29723_v54  ;;  %v29772_v44 = vld [vmem:[%s40004_s4 + $0x668] ss:$20 sps:$4 sm:$0xff]   ;;  %v29775_v54 = vld [vmem:[%s40004_s4 + $0x670] ss:$20 sps:$4 sm:$0xff]  }
 0x94f   : > { %21621 = vmatmul.mubr.bf16.vlgmr.msra.gmra.mrb[32].mxu1 %v37815_v57 }
 0x950   : > { %22031 = vmatmul.mubr.bf16.vlgmr.msra.gmra.mrb[36].mxu0 %v37815_v57  ;;  %21630 = vmatpush1.bf16.msra.mxu1 %v29718_v56  ;;  %v29783_v56 = vld [vmem:[%s40004_s4 + $0x69c] ss:$20 sps:$4 sm:$0xff]  }
 0x951   : > { %21661 = vmatprep.mubr.bf16.mxu1 %v37823_v38  ;;  %22040 = vmatpush1.bf16.msra.mxu0 %v29721_v6  ;;  %v29778_v6 = vld [vmem:[%s40004_s4 + $0x690] ss:$20 sps:$4 sm:$0xff]  }
 0x952   : > { %22071 = vmatprep.mubr.bf16.mxu0 %v37823_v38  ;;  %21631 = vmatprep.subr.bf16.mxu1 %v29726_v49  ;;  %v29781_v49 = vld [vmem:[%s40004_s4 + $0x698] ss:$20 sps:$4 sm:$0xff]  }
 0x953   : > { %22041 = vmatprep.subr.bf16.mxu0 %v29729_v13  ;;  %v29786_v13 = vld [vmem:[%s40004_s4 + $0x6bc] ss:$20 sps:$4 sm:$0xff]  }
 0x954   : > { %21632 = vmatpush1.bf16.msra.mxu1 %v29724_v1  ;;  %v29789_v1 = vld [vmem:[%s40004_s4 + $0x6c4] ss:$20 sps:$4 sm:$0xff]  }
 0x955   : > { %22042 = vmatpush1.bf16.msra.mxu0 %v29727_v39  ;;  %21633 = vmatprep.subr.bf16.mxu1 %v29732_v45  ;;  %v29784_v39 = vld [vmem:[%s40004_s4 + $0x6b8] ss:$20 sps:$4 sm:$0xff]   ;;  %v29787_v45 = vld [vmem:[%s40004_s4 + $0x6c0] ss:$20 sps:$4 sm:$0xff]  }
 0x956   : > { %22043 = vmatprep.subr.bf16.mxu0 %v29735_v52  ;;  %v29792_v52 = vld [vmem:[%s40004_s4 + $0x6e4] ss:$20 sps:$4 sm:$0xff]  }
 0x958   : > { %21634 = vmatpush1.bf16.msra.mxu1 %v29730_v61  ;;  %v29795_v61 = vld [vmem:[%s40004_s4 + $0x6ec] ss:$20 sps:$4 sm:$0xff]  }
 0x959   : > { %22044 = vmatpush1.bf16.msra.mxu0 %v29733_v0  ;;  %21635 = vmatprep.subr.bf16.mxu1 %v29738_v60  ;;  %v29790_v0 = vld [vmem:[%s40004_s4 + $0x6e0] ss:$20 sps:$4 sm:$0xff]   ;;  %v29793_v60 = vld [vmem:[%s40004_s4 + $0x6e8] ss:$20 sps:$4 sm:$0xff]  }
 0x95a   : > { %22045 = vmatprep.subr.bf16.mxu0 %v29741_v3  ;;  %v29798_v3 = vld [vmem:[%s40004_s4 + $0x70c] ss:$20 sps:$4 sm:$0xff]  }
 0x95c   : > { %21636 = vmatpush1.bf16.msra.mxu1 %v29736_v18  ;;  %v29801_v18 = vld [vmem:[%s40004_s4 + $0x714] ss:$20 sps:$4 sm:$0xff]  }
 0x95d   : > { %22046 = vmatpush1.bf16.msra.mxu0 %v29739_v47  ;;  %21637 = vmatprep.subr.bf16.mxu1 %v29744_v42  ;;  %v29796_v47 = vld [vmem:[%s40004_s4 + $0x708] ss:$20 sps:$4 sm:$0xff]   ;;  %v3009_v42 = vrot.slane %v37361_v58, %v31198_v63 }
 0x95e   : > { %22047 = vmatprep.subr.bf16.mxu0 %v29747_v59  ;;  %v29799_v59 = vld [vmem:[%s40004_s4 + $0x710] ss:$20 sps:$4 sm:$0xff]  }
 0x960   : > { %21638 = vmatpush1.bf16.msra.mxu1 %v29742_v9  ;;  %v29804_v9 = vld [vmem:[%s40004_s4 + $0x734] ss:$20 sps:$4 sm:$0xff]  }
 0x961   : > { %22048 = vmatpush1.bf16.msra.mxu0 %v29745_v15  ;;  %21639 = vmatprep.subr.bf16.mxu1 %v29750_v19  ;;  %v29807_v15 = vld [vmem:[%s40004_s4 + $0x73c] ss:$20 sps:$4 sm:$0xff]   ;;  %v3021_v19 = vrot.slane %v37361_v58, %v31491_v24  ;;  %v29813_v58 = vld [vmem:[%s40004_s4 + $0x764] ss:$20 sps:$4 sm:$0xff]  }
 0x962   : > { %22049 = vmatprep.subr.bf16.mxu0 %v29753_v7  ;;  %v29802_v7 = vld [vmem:[%s40004_s4 + $0x730] ss:$20 sps:$4 sm:$0xff]  }
 0x964   : > { %21640 = vmatpush1.bf16.msra.mxu1 %v29748_v20  ;;  %v26005_v20 = vadd.f32 %v34206_v46, %v3009_v42  ;;  %v29808_v46 = vld [vmem:[%s40004_s4 + $0x758] ss:$20 sps:$4 sm:$0xff]  }
 0x965   : > { %22050 = vmatpush1.bf16.msra.mxu0 %v29751_v4  ;;  %21641 = vmatprep.subr.bf16.mxu1 %v29756_v14  ;;  %v29805_v4 = vld [vmem:[%s40004_s4 + $0x738] ss:$20 sps:$4 sm:$0xff]   ;;  %v29810_v14 = vld [vmem:[%s40004_s4 + $0x75c] ss:$20 sps:$4 sm:$0xff]  }
 0x966   : > { %22051 = vmatprep.subr.bf16.mxu0 %v29759_v31  ;;  %v26008_v31 = vadd.f32 %v34218_v10, %v3021_v19  ;;  %v29819_v10 = vld [vmem:[%s40004_s4 + $0x78c] ss:$20 sps:$4 sm:$0xff]   ;;  %v29855_v19 = vld [vmem:[%s40004_s4 + $0x87c] ss:$20 sps:$4 sm:$0xff]  }
 0x968   : > { %21642 = vmatpush1.bf16.msra.mxu1 %v29754_v22  ;;  %v16364_v22 = vmax.f32 %v26005_v20, 0.0 }
 0x969   : > { %22052 = vmatpush1.bf16.msra.mxu0 %v29757_v40  ;;  %21643 = vmatprep.subr.bf16.mxu1 %v29762_v11  ;;  %v29811_v40 = vld [vmem:[%s40004_s4 + $0x760] ss:$20 sps:$4 sm:$0xff]   ;;  %v29816_v11 = vld [vmem:[%s40004_s4 + $0x784] ss:$20 sps:$4 sm:$0xff]  }
 0x96a   : > { %22053 = vmatprep.subr.bf16.mxu0 %v29765_v55  ;;  %v16367_v55 = vmax.f32 %v26008_v31, 0.0  ;;  %v29850_v31 = vld [vmem:[%s40004_s4 + $0x870] ss:$20 sps:$4 sm:$0xff]  }
 0x96c   : > { %21644 = vmatpush1.bf16.msra.mxu1 %v29760_v29  ;;  %v29814_v29 = vld [vmem:[%s40004_s4 + $0x780] ss:$20 sps:$4 sm:$0xff]  }
 0x96d   : > { %22054 = vmatpush1.bf16.msra.mxu0 %v29763_v30  ;;  %21645 = vmatprep.subr.bf16.mxu1 %v29768_v32  ;;  %v38021_v30 = vpack.c.bf16 %v16364_v22, %v16364_v22  ;;  %v29817_v32 = vld [vmem:[%s40004_s4 + $0x788] ss:$20 sps:$4 sm:$0xff]  }
 0x96e   : > { %22055 = vmatprep.subr.bf16.mxu0 %v29771_v2  ;;  %v29822_v2 = vld [vmem:[%s40004_s4 + $0x7ac] ss:$20 sps:$4 sm:$0xff]  }
 0x970   : > { %21646 = vmatpush1.bf16.msra.mxu1 %v29766_v33  ;;  %v38029_v33 = vpack.c.bf16 %v16367_v55, %v16367_v55 }
 0x971   : > { %22056 = vmatpush1.bf16.msra.mxu0 %v29769_v41  ;;  %21647 = vmatprep.subr.bf16.mxu1 %v29774_v36  ;;  %v29825_v41 = vld [vmem:[%s40004_s4 + $0x7b4] ss:$20 sps:$4 sm:$0xff]  }
 0x972   : > { %22057 = vmatprep.subr.bf16.mxu0 %v29777_v17  ;;  %v29820_v36 = vld [vmem:[%s40004_s4 + $0x7a8] ss:$20 sps:$4 sm:$0xff]   ;;  %v29823_v17 = vld [vmem:[%s40004_s4 + $0x7b0] ss:$20 sps:$4 sm:$0xff]  }
 0x974   : > { %21648 = vmatpush1.bf16.msra.mxu1 %v29772_v44  ;;  %v29828_v44 = vld [vmem:[%s40004_s4 + $0x7d4] ss:$20 sps:$4 sm:$0xff]  }
 0x975   : > { %22058 = vmatpush1.bf16.msra.mxu0 %v29775_v54  ;;  %21649 = vmatprep.subr.bf16.mxu1 %v29780_v26  ;;  %v29831_v54 = vld [vmem:[%s40004_s4 + $0x7dc] ss:$20 sps:$4 sm:$0xff]  }
 0x976   : > { %22059 = vmatprep.subr.bf16.mxu0 %v29783_v56  ;;  %v29826_v26 = vld [vmem:[%s40004_s4 + $0x7d0] ss:$20 sps:$4 sm:$0xff]   ;;  %v29829_v56 = vld [vmem:[%s40004_s4 + $0x7d8] ss:$20 sps:$4 sm:$0xff]  }
 0x978   : > { %21650 = vmatpush1.bf16.msra.mxu1 %v29778_v6  ;;  %v29834_v6 = vld [vmem:[%s40004_s4 + $0x7fc] ss:$20 sps:$4 sm:$0xff]  }
 0x979   : > { %22060 = vmatpush1.bf16.msra.mxu0 %v29781_v49  ;;  %21651 = vmatprep.subr.bf16.mxu1 %v29786_v13  ;;  %v29837_v49 = vld [vmem:[%s40004_s4 + $0x804] ss:$20 sps:$4 sm:$0xff]  }
 0x97a   : > { %22061 = vmatprep.subr.bf16.mxu0 %v29789_v1  ;;  %v29832_v13 = vld [vmem:[%s40004_s4 + $0x7f8] ss:$20 sps:$4 sm:$0xff]   ;;  %v29835_v1 = vld [vmem:[%s40004_s4 + $0x800] ss:$20 sps:$4 sm:$0xff]  }
 0x97c   : > { %21652 = vmatpush1.bf16.msra.mxu1 %v29784_v39  ;;  %v29840_v39 = vld [vmem:[%s40004_s4 + $0x824] ss:$20 sps:$4 sm:$0xff]  }
 0x97d   : > { %22062 = vmatpush1.bf16.msra.mxu0 %v29787_v45  ;;  %21653 = vmatprep.subr.bf16.mxu1 %v29792_v52  ;;  %v29843_v45 = vld [vmem:[%s40004_s4 + $0x82c] ss:$20 sps:$4 sm:$0xff]  }
 0x97e   : > { %22063 = vmatprep.subr.bf16.mxu0 %v29795_v61  ;;  %v29838_v52 = vld [vmem:[%s40004_s4 + $0x820] ss:$20 sps:$4 sm:$0xff]   ;;  %v29841_v61 = vld [vmem:[%s40004_s4 + $0x828] ss:$20 sps:$4 sm:$0xff]  }
 0x980   : > { %21654 = vmatpush1.bf16.msra.mxu1 %v29790_v0  ;;  %v2986_v0 = vld [vmem:[%s40003_s3 + $0x10] sm:$0xf] }
 0x981   : > { %22064 = vmatpush1.bf16.msra.mxu0 %v29793_v60  ;;  %21655 = vmatprep.subr.bf16.mxu1 %v29798_v3  ;;  %v29846_v60 = vld [vmem:[%s40004_s4 + $0x84c] ss:$20 sps:$4 sm:$0xff]   ;;  %v29849_v3 = vld [vmem:[%s40004_s4 + $0x854] ss:$20 sps:$4 sm:$0xff]   ;;  %v3069_v42 = vrot.slane %v2986_v0, %v31071_v53 }
 0x982   : > { %22065 = vmatprep.subr.bf16.mxu0 %v29801_v18  ;;  %v3065_v18 = vrot.slane %v2986_v0, %v31158_v37  ;;  %v29883_v0 = vld [vmem:[%s40004_s4 + $0x940] ss:$20 sps:$4 sm:$0xff]  }
 0x984   : > { %21656 = vmatpush1.bf16.msra.mxu1 %v29796_v47  ;;  %v29844_v47 = vld [vmem:[%s40004_s4 + $0x848] ss:$20 sps:$4 sm:$0xff]  }
 0x985   : > { %22066 = vmatpush1.bf16.msra.mxu0 %v29799_v59  ;;  %21657 = vmatprep.subr.bf16.mxu1 %v29804_v9  ;;  %v29847_v59 = vld [vmem:[%s40004_s4 + $0x850] ss:$20 sps:$4 sm:$0xff]   ;;  %v29852_v9 = vld [vmem:[%s40004_s4 + $0x874] ss:$20 sps:$4 sm:$0xff]  }
 0x986   : > { %22067 = vmatprep.subr.bf16.mxu0 %v29807_v15 }
 0x988   : > { %21658 = vmatpush1.bf16.msra.mxu1 %v29802_v7 }
 0x989   : > { %22068 = vmatpush1.bf16.msra.mxu0 %v29805_v4  ;;  %21659 = vmatprep.subr.bf16.mxu1 %v29810_v14 }
 0x98a   : > { %22069 = vmatprep.subr.bf16.mxu0 %v29813_v58 }
 0x98c   : > { %21660 = vmatpush1.bf16.msra.mxu1 %v29808_v46 }
 0x98d   : > { %22070 = vmatpush1.bf16.msra.mxu0 %v29811_v40  ;;  %21670 = vmatprep.subr.bf16.mxu1 %v29816_v11  ;;  %v29853_v11 = vld [vmem:[%s40004_s4 + $0x878] ss:$20 sps:$4 sm:$0xff]  }
 0x98e   : > { %22080 = vmatprep.subr.bf16.mxu0 %v29819_v10  ;;  %v29858_v10 = vld [vmem:[%s40004_s4 + $0x89c] ss:$20 sps:$4 sm:$0xff]  }
 0x98f   : > { %21662 = vmatmul.mubr.bf16.vlgmr.msra.gmra.mrb[32].mxu1 %v38021_v30 }
 0x990   : > { %22072 = vmatmul.mubr.bf16.vlgmr.msra.gmra.mrb[36].mxu0 %v38021_v30  ;;  %21671 = vmatpush1.bf16.msra.mxu1 %v29814_v29  ;;  %v29861_v29 = vld [vmem:[%s40004_s4 + $0x8a4] ss:$20 sps:$4 sm:$0xff]  }
 0x991   : > { %21702 = vmatprep.mubr.bf16.mxu1 %v38029_v33  ;;  %22081 = vmatpush1.bf16.msra.mxu0 %v29817_v32  ;;  %v29856_v32 = vld [vmem:[%s40004_s4 + $0x898] ss:$20 sps:$4 sm:$0xff]  }
 0x992   : > { %22112 = vmatprep.mubr.bf16.mxu0 %v38029_v33  ;;  %21672 = vmatprep.subr.bf16.mxu1 %v29822_v2  ;;  %v29859_v2 = vld [vmem:[%s40004_s4 + $0x8a0] ss:$20 sps:$4 sm:$0xff]  }
 0x993   : > { %22082 = vmatprep.subr.bf16.mxu0 %v29825_v41  ;;  %v29864_v41 = vld [vmem:[%s40004_s4 + $0x8c4] ss:$20 sps:$4 sm:$0xff]  }
 0x994   : > { %21673 = vmatpush1.bf16.msra.mxu1 %v29820_v36  ;;  %v29867_v36 = vld [vmem:[%s40004_s4 + $0x8cc] ss:$20 sps:$4 sm:$0xff]  }
 0x995   : > { %22083 = vmatpush1.bf16.msra.mxu0 %v29823_v17  ;;  %21674 = vmatprep.subr.bf16.mxu1 %v29828_v44  ;;  %v29862_v17 = vld [vmem:[%s40004_s4 + $0x8c0] ss:$20 sps:$4 sm:$0xff]   ;;  %v29865_v44 = vld [vmem:[%s40004_s4 + $0x8c8] ss:$20 sps:$4 sm:$0xff]  }
 0x996   : > { %22084 = vmatprep.subr.bf16.mxu0 %v29831_v54  ;;  %v29870_v54 = vld [vmem:[%s40004_s4 + $0x8ec] ss:$20 sps:$4 sm:$0xff]  }
 0x998   : > { %21675 = vmatpush1.bf16.msra.mxu1 %v29826_v26  ;;  %v29873_v26 = vld [vmem:[%s40004_s4 + $0x8f4] ss:$20 sps:$4 sm:$0xff]  }
 0x999   : > { %22085 = vmatpush1.bf16.msra.mxu0 %v29829_v56  ;;  %21676 = vmatprep.subr.bf16.mxu1 %v29834_v6  ;;  %v29868_v56 = vld [vmem:[%s40004_s4 + $0x8e8] ss:$20 sps:$4 sm:$0xff]   ;;  %v29871_v6 = vld [vmem:[%s40004_s4 + $0x8f0] ss:$20 sps:$4 sm:$0xff]  }
 0x99a   : > { %22086 = vmatprep.subr.bf16.mxu0 %v29837_v49  ;;  %v29876_v49 = vld [vmem:[%s40004_s4 + $0x914] ss:$20 sps:$4 sm:$0xff]  }
 0x99c   : > { %21677 = vmatpush1.bf16.msra.mxu1 %v29832_v13  ;;  %v29879_v13 = vld [vmem:[%s40004_s4 + $0x91c] ss:$20 sps:$4 sm:$0xff]  }
 0x99d   : > { %22087 = vmatpush1.bf16.msra.mxu0 %v29835_v1  ;;  %21678 = vmatprep.subr.bf16.mxu1 %v29840_v39  ;;  %v29874_v1 = vld [vmem:[%s40004_s4 + $0x910] ss:$20 sps:$4 sm:$0xff]   ;;  %v29877_v39 = vld [vmem:[%s40004_s4 + $0x918] ss:$20 sps:$4 sm:$0xff]  }
 0x99e   : > { %22088 = vmatprep.subr.bf16.mxu0 %v29843_v45  ;;  %v29882_v45 = vld [vmem:[%s40004_s4 + $0x93c] ss:$20 sps:$4 sm:$0xff]  }
 0x9a0   : > { %21679 = vmatpush1.bf16.msra.mxu1 %v29838_v52  ;;  %v29885_v52 = vld [vmem:[%s40004_s4 + $0x944] ss:$20 sps:$4 sm:$0xff]  }
 0x9a1   : > { %22089 = vmatpush1.bf16.msra.mxu0 %v29841_v61  ;;  %21680 = vmatprep.subr.bf16.mxu1 %v29846_v60  ;;  %v29880_v61 = vld [vmem:[%s40004_s4 + $0x938] ss:$20 sps:$4 sm:$0xff]  }
 0x9a2   : > { %v38100_v15 = vpop.f32.mrb[28].mxu1  ;;  %22090 = vmatprep.subr.bf16.mxu0 %v29849_v3  ;;  %v29888_v60 = vld [vmem:[%s40004_s4 + $0x964] ss:$20 sps:$4 sm:$0xff]   ;;  %v29891_v3 = vld [vmem:[%s40004_s4 + $0x96c] ss:$20 sps:$4 sm:$0xff]  }
 0x9a3   : > { %v16353_v7 = vpop.f32.mrb[32].mxu0  ;;  %v38105_v20 = vpop.f32.mrb[29].mxu1 }
 0x9a4   : > { %v38107_v4 = vadd.f32 %v16353_v7, %v3065_v18  ;;  %v16355_v14 = vpop.f32.mrb[33].mxu0  ;;  %v16070_v58 = vpop.f32.mrb[30].mxu1  ;;  %21681 = vmatpush1.bf16.msra.mxu1 %v29844_v47  ;;  %v29886_v18 = vld [vmem:[%s40004_s4 + $0x960] ss:$20 sps:$4 sm:$0xff]   ;;  %v29889_v47 = vld [vmem:[%s40004_s4 + $0x968] ss:$20 sps:$4 sm:$0xff]  }
 0x9a5   : > { %v38112_v46 = vadd.f32 %v16355_v14, %v3069_v42  ;;  %v16357_v22 = vpop.f32.mrb[34].mxu0  ;;  %22091 = vmatpush1.bf16.msra.mxu0 %v29847_v59  ;;  %v16071_v40 = vpop.f32.mrb[31].mxu1  ;;  %21682 = vmatprep.subr.bf16.mxu1 %v29852_v9  ;;  %v29894_v42 = vld [vmem:[%s40004_s4 + $0x98c] ss:$20 sps:$4 sm:$0xff]   ;;  %v29897_v59 = vld [vmem:[%s40004_s4 + $0x994] ss:$20 sps:$4 sm:$0xff]  }
 0x9a6   : > { %v16358_v55 = vpop.f32.mrb[35].mxu0  ;;  %22092 = vmatprep.subr.bf16.mxu0 %v29855_v19  ;;  %v38198_v9 = vld [vmem:[%s40003_s3 + $0x8] sm:$0xff]  ;;  %v30648_v7 = vld [vmem:[%s40003_s3] sm:$0xff]  ;;  %v29903_v22 = vld [vmem:[%s40004_s4 + $0x9bc] ss:$20 sps:$4 sm:$0xff]  }
 0x9a7   : > { %v29892_v19 = vld [vmem:[%s40004_s4 + $0x988] ss:$20 sps:$4 sm:$0xff]   ;;  %v3017_v14 = vrot.slane %v30648_v7, %v31693_v62  ;;  %v29895_v58 = vld [vmem:[%s40004_s4 + $0x990] ss:$20 sps:$4 sm:$0xff]   ;;  %v3029_v40 = vrot.slane %v38198_v9, %v31064_v50  ;;  %v29901_v55 = vld [vmem:[%s40004_s4 + $0x9b8] ss:$20 sps:$4 sm:$0xff]  }
 0x9a8   : > { %21683 = vmatpush1.bf16.msra.mxu1 %v29850_v31  ;;  %v29900_v31 = vld [vmem:[%s40004_s4 + $0x9b4] ss:$20 sps:$4 sm:$0xff]  }
 0x9a9   : > { %22093 = vmatpush1.bf16.msra.mxu0 %v29853_v11  ;;  %21684 = vmatprep.subr.bf16.mxu1 %v29858_v10  ;;  %v29898_v11 = vld [vmem:[%s40004_s4 + $0x9b0] ss:$20 sps:$4 sm:$0xff]   ;;  %v26007_v10 = vadd.f32 %v34211_v51, %v3017_v14  ;;  %v29904_v51 = vld [vmem:[%s40004_s4 + $0x9d8] ss:$20 sps:$4 sm:$0xff]   ;;  %v29937_v7 = vld [vmem:[%s40004_s4 + $0xaa8] ss:$20 sps:$4 sm:$0xff]  }
 0x9aa   : > { %22094 = vmatprep.subr.bf16.mxu0 %v29861_v29  ;;  %v29906_v29 = vld [vmem:[%s40004_s4 + $0x9dc] ss:$20 sps:$4 sm:$0xff]   ;;  %v29942_v14 = vld [vmem:[%s40004_s4 + $0xacc] ss:$20 sps:$4 sm:$0xff]  }
 0x9ac   : > { %21685 = vmatpush1.bf16.msra.mxu1 %v29856_v32  ;;  %v29909_v32 = vld [vmem:[%s40004_s4 + $0x9e4] ss:$20 sps:$4 sm:$0xff]  }
 0x9ad   : > { %22095 = vmatpush1.bf16.msra.mxu0 %v29859_v2  ;;  %21686 = vmatprep.subr.bf16.mxu1 %v29864_v41  ;;  %v26010_v2 = vadd.f32 %v35494_v12, %v3029_v40  ;;  %v16366_v41 = vmax.f32 %v26007_v10, 0.0  ;;  %v29915_v12 = vld [vmem:[%s40004_s4 + $0xa0c] ss:$20 sps:$4 sm:$0xff]   ;;  %v29948_v40 = vld [vmem:[%s40004_s4 + $0xaf4] ss:$20 sps:$4 sm:$0xff]  }
 0x9ae   : > { %22096 = vmatprep.subr.bf16.mxu0 %v29867_v36  ;;  %v29907_v36 = vld [vmem:[%s40004_s4 + $0x9e0] ss:$20 sps:$4 sm:$0xff]   ;;  %v29946_v10 = vld [vmem:[%s40004_s4 + $0xaf0] ss:$20 sps:$4 sm:$0xff]  }
 0x9b0   : > { %21687 = vmatpush1.bf16.msra.mxu1 %v29862_v17  ;;  %v29912_v17 = vld [vmem:[%s40004_s4 + $0xa04] ss:$20 sps:$4 sm:$0xff]  }
 0x9b1   : > { %22097 = vmatpush1.bf16.msra.mxu0 %v29865_v44  ;;  %21688 = vmatprep.subr.bf16.mxu1 %v29870_v54  ;;  %v16369_v44 = vmax.f32 %v26010_v2, 0.0  ;;  %v29910_v54 = vld [vmem:[%s40004_s4 + $0xa00] ss:$20 sps:$4 sm:$0xff]   ;;  %v29952_v2 = vld [vmem:[%s40004_s4 + $0xb18] ss:$20 sps:$4 sm:$0xff]  }
 0x9b2   : > { %22098 = vmatprep.subr.bf16.mxu0 %v29873_v26  ;;  %v38247_v26 = vpack.c.bf16 %v16366_v41, %v16366_v41  ;;  %v29960_v41 = vld [vmem:[%s40004_s4 + $0xb44] ss:$20 sps:$4 sm:$0xff]  }
 0x9b4   : > { %21689 = vmatpush1.bf16.msra.mxu1 %v29868_v56  ;;  %v29913_v56 = vld [vmem:[%s40004_s4 + $0xa08] ss:$20 sps:$4 sm:$0xff]  }
 0x9b5   : > { %22099 = vmatpush1.bf16.msra.mxu0 %v29871_v6  ;;  %21690 = vmatprep.subr.bf16.mxu1 %v29876_v49  ;;  %v29918_v6 = vld [vmem:[%s40004_s4 + $0xa2c] ss:$20 sps:$4 sm:$0xff]   ;;  %v38255_v49 = vpack.c.bf16 %v16369_v44, %v16369_v44 }
 0x9b6   : > { %22100 = vmatprep.subr.bf16.mxu0 %v29879_v13  ;;  %v29921_v13 = vld [vmem:[%s40004_s4 + $0xa34] ss:$20 sps:$4 sm:$0xff]   ;;  %v29966_v44 = vld [vmem:[%s40004_s4 + $0xb6c] ss:$20 sps:$4 sm:$0xff]  }
 0x9b8   : > { %21691 = vmatpush1.bf16.msra.mxu1 %v29874_v1  ;;  %v29916_v1 = vld [vmem:[%s40004_s4 + $0xa28] ss:$20 sps:$4 sm:$0xff]  }
 0x9b9   : > { %22101 = vmatpush1.bf16.msra.mxu0 %v29877_v39  ;;  %21692 = vmatprep.subr.bf16.mxu1 %v29882_v45  ;;  %v29919_v39 = vld [vmem:[%s40004_s4 + $0xa30] ss:$20 sps:$4 sm:$0xff]   ;;  %v29924_v45 = vld [vmem:[%s40004_s4 + $0xa54] ss:$20 sps:$4 sm:$0xff]  }
 0x9ba   : > { %22102 = vmatprep.subr.bf16.mxu0 %v29885_v52  ;;  %v29927_v52 = vld [vmem:[%s40004_s4 + $0xa5c] ss:$20 sps:$4 sm:$0xff]  }
 0x9bc   : > { %21693 = vmatpush1.bf16.msra.mxu1 %v29880_v61  ;;  %v29922_v61 = vld [vmem:[%s40004_s4 + $0xa50] ss:$20 sps:$4 sm:$0xff]  }
 0x9bd   : > { %22103 = vmatpush1.bf16.msra.mxu0 %v29883_v0  ;;  %21694 = vmatprep.subr.bf16.mxu1 %v29888_v60  ;;  %v29925_v0 = vld [vmem:[%s40004_s4 + $0xa58] ss:$20 sps:$4 sm:$0xff]   ;;  %v29930_v60 = vld [vmem:[%s40004_s4 + $0xa7c] ss:$20 sps:$4 sm:$0xff]  }
 0x9be   : > { %22104 = vmatprep.subr.bf16.mxu0 %v29891_v3  ;;  %v29933_v3 = vld [vmem:[%s40004_s4 + $0xa84] ss:$20 sps:$4 sm:$0xff]  }
 0x9c0   : > { %21695 = vmatpush1.bf16.msra.mxu1 %v29886_v18  ;;  %v29928_v18 = vld [vmem:[%s40004_s4 + $0xa78] ss:$20 sps:$4 sm:$0xff]  }
 0x9c1   : > { %22105 = vmatpush1.bf16.msra.mxu0 %v29889_v47  ;;  %21696 = vmatprep.subr.bf16.mxu1 %v29894_v42  ;;  %v29931_v47 = vld [vmem:[%s40004_s4 + $0xa80] ss:$20 sps:$4 sm:$0xff]   ;;  %v29936_v42 = vld [vmem:[%s40004_s4 + $0xaa4] ss:$20 sps:$4 sm:$0xff]  }
 0x9c2   : > { %22106 = vmatprep.subr.bf16.mxu0 %v29897_v59  ;;  %v29939_v59 = vld [vmem:[%s40004_s4 + $0xaac] ss:$20 sps:$4 sm:$0xff]  }
 0x9c4   : > { %21697 = vmatpush1.bf16.msra.mxu1 %v29892_v19  ;;  %v29934_v19 = vld [vmem:[%s40004_s4 + $0xaa0] ss:$20 sps:$4 sm:$0xff]  }
 0x9c5   : > { %22107 = vmatpush1.bf16.msra.mxu0 %v29895_v58  ;;  %21698 = vmatprep.subr.bf16.mxu1 %v29900_v31  ;;  %v29945_v58 = vld [vmem:[%s40004_s4 + $0xad4] ss:$20 sps:$4 sm:$0xff]  }
 0x9c6   : > { %22108 = vmatprep.subr.bf16.mxu0 %v29903_v22  ;;  %v29940_v31 = vld [vmem:[%s40004_s4 + $0xac8] ss:$20 sps:$4 sm:$0xff]   ;;  %v29943_v22 = vld [vmem:[%s40004_s4 + $0xad0] ss:$20 sps:$4 sm:$0xff]  }
 0x9c8   : > { %21699 = vmatpush1.bf16.msra.mxu1 %v29898_v11  ;;  %v29951_v11 = vld [vmem:[%s40004_s4 + $0xafc] ss:$20 sps:$4 sm:$0xff]  }
 0x9c9   : > { %22109 = vmatpush1.bf16.msra.mxu0 %v29901_v55  ;;  %21700 = vmatprep.subr.bf16.mxu1 %v29906_v29  ;;  %v29949_v55 = vld [vmem:[%s40004_s4 + $0xaf8] ss:$20 sps:$4 sm:$0xff]   ;;  %v29954_v29 = vld [vmem:[%s40004_s4 + $0xb1c] ss:$20 sps:$4 sm:$0xff]  }
 0x9ca   : > { %22110 = vmatprep.subr.bf16.mxu0 %v29909_v32  ;;  %v29957_v32 = vld [vmem:[%s40004_s4 + $0xb24] ss:$20 sps:$4 sm:$0xff]  }
 0x9cc   : > { %21701 = vmatpush1.bf16.msra.mxu1 %v29904_v51  ;;  %v29955_v51 = vld [vmem:[%s40004_s4 + $0xb20] ss:$20 sps:$4 sm:$0xff]  }
 0x9cd   : > { %22111 = vmatpush1.bf16.msra.mxu0 %v29907_v36  ;;  %21711 = vmatprep.subr.bf16.mxu1 %v29912_v17  ;;  %v29963_v36 = vld [vmem:[%s40004_s4 + $0xb4c] ss:$20 sps:$4 sm:$0xff]  }
 0x9ce   : > { %22121 = vmatprep.subr.bf16.mxu0 %v29915_v12  ;;  %v29958_v17 = vld [vmem:[%s40004_s4 + $0xb40] ss:$20 sps:$4 sm:$0xff]   ;;  %v29961_v12 = vld [vmem:[%s40004_s4 + $0xb48] ss:$20 sps:$4 sm:$0xff]  }
 0x9cf   : > { %21703 = vmatmul.mubr.bf16.vlgmr.msra.gmra.mrb[32].mxu1 %v38247_v26 }
 0x9d0   : > { %22113 = vmatmul.mubr.bf16.vlgmr.msra.gmra.mrb[36].mxu0 %v38247_v26  ;;  %21712 = vmatpush1.bf16.msra.mxu1 %v29910_v54  ;;  %v29969_v54 = vld [vmem:[%s40004_s4 + $0xb74] ss:$20 sps:$4 sm:$0xff]  }
 0x9d1   : > { %21743 = vmatprep.mubr.bf16.mxu1 %v38255_v49  ;;  %22122 = vmatpush1.bf16.msra.mxu0 %v29913_v56  ;;  %v29964_v56 = vld [vmem:[%s40004_s4 + $0xb68] ss:$20 sps:$4 sm:$0xff]  }
 0x9d2   : > { %22153 = vmatprep.mubr.bf16.mxu0 %v38255_v49  ;;  %21713 = vmatprep.subr.bf16.mxu1 %v29918_v6  ;;  %v29967_v6 = vld [vmem:[%s40004_s4 + $0xb70] ss:$20 sps:$4 sm:$0xff]  }
 0x9d3   : > { %22123 = vmatprep.subr.bf16.mxu0 %v29921_v13  ;;  %v29972_v13 = vld [vmem:[%s40004_s4 + $0xb94] ss:$20 sps:$4 sm:$0xff]  }
 0x9d4   : > { %21714 = vmatpush1.bf16.msra.mxu1 %v29916_v1  ;;  %v29975_v1 = vld [vmem:[%s40004_s4 + $0xb9c] ss:$20 sps:$4 sm:$0xff]  }
 0x9d5   : > { %22124 = vmatpush1.bf16.msra.mxu0 %v29919_v39  ;;  %21715 = vmatprep.subr.bf16.mxu1 %v29924_v45  ;;  %v29970_v39 = vld [vmem:[%s40004_s4 + $0xb90] ss:$20 sps:$4 sm:$0xff]   ;;  %v29973_v45 = vld [vmem:[%s40004_s4 + $0xb98] ss:$20 sps:$4 sm:$0xff]  }
 0x9d6   : > { %22125 = vmatprep.subr.bf16.mxu0 %v29927_v52  ;;  %v29978_v52 = vld [vmem:[%s40004_s4 + $0xbbc] ss:$20 sps:$4 sm:$0xff]  }
 0x9d8   : > { %21716 = vmatpush1.bf16.msra.mxu1 %v29922_v61  ;;  %v29981_v61 = vld [vmem:[%s40004_s4 + $0xbc4] ss:$20 sps:$4 sm:$0xff]  }
 0x9d9   : > { %22126 = vmatpush1.bf16.msra.mxu0 %v29925_v0  ;;  %21717 = vmatprep.subr.bf16.mxu1 %v29930_v60  ;;  %v29976_v0 = vld [vmem:[%s40004_s4 + $0xbb8] ss:$20 sps:$4 sm:$0xff]   ;;  %v29979_v60 = vld [vmem:[%s40004_s4 + $0xbc0] ss:$20 sps:$4 sm:$0xff]  }
 0x9da   : > { %22127 = vmatprep.subr.bf16.mxu0 %v29933_v3  ;;  %v29984_v3 = vld [vmem:[%s40004_s4 + $0xbe4] ss:$20 sps:$4 sm:$0xff]  }
 0x9dc   : > { %21718 = vmatpush1.bf16.msra.mxu1 %v29928_v18  ;;  %v29987_v18 = vld [vmem:[%s40004_s4 + $0xbec] ss:$20 sps:$4 sm:$0xff]  }
 0x9dd   : > { %22128 = vmatpush1.bf16.msra.mxu0 %v29931_v47  ;;  %21719 = vmatprep.subr.bf16.mxu1 %v29936_v42  ;;  %v29982_v47 = vld [vmem:[%s40004_s4 + $0xbe0] ss:$20 sps:$4 sm:$0xff]   ;;  %v29985_v42 = vld [vmem:[%s40004_s4 + $0xbe8] ss:$20 sps:$4 sm:$0xff]  }
 0x9de   : > { %22129 = vmatprep.subr.bf16.mxu0 %v29939_v59  ;;  %v29990_v59 = vld [vmem:[%s40004_s4 + $0xc0c] ss:$20 sps:$4 sm:$0xff]  }
 0x9e0   : > { %21720 = vmatpush1.bf16.msra.mxu1 %v29934_v19  ;;  %v29993_v19 = vld [vmem:[%s40004_s4 + $0xc14] ss:$20 sps:$4 sm:$0xff]  }
 0x9e1   : > { %22130 = vmatpush1.bf16.msra.mxu0 %v29937_v7  ;;  %21721 = vmatprep.subr.bf16.mxu1 %v29942_v14  ;;  %v29988_v7 = vld [vmem:[%s40004_s4 + $0xc08] ss:$20 sps:$4 sm:$0xff]   ;;  %v3025_v14 = vrot.slane %v38198_v9, %v31056_v48 }
 0x9e2   : > { %22131 = vmatprep.subr.bf16.mxu0 %v29945_v58  ;;  %v29991_v58 = vld [vmem:[%s40004_s4 + $0xc10] ss:$20 sps:$4 sm:$0xff]  }
 0x9e4   : > { %21722 = vmatpush1.bf16.msra.mxu1 %v29940_v31  ;;  %v29996_v31 = vld [vmem:[%s40004_s4 + $0xc34] ss:$20 sps:$4 sm:$0xff]  }
 0x9e5   : > { %22132 = vmatpush1.bf16.msra.mxu0 %v29943_v22  ;;  %21723 = vmatprep.subr.bf16.mxu1 %v29948_v40  ;;  %v29999_v22 = vld [vmem:[%s40004_s4 + $0xc3c] ss:$20 sps:$4 sm:$0xff]   ;;  %v3037_v40 = vrot.slane %v38198_v9, %v31071_v53 }
 0x9e6   : > { %22133 = vmatprep.subr.bf16.mxu0 %v29951_v11  ;;  %v29994_v11 = vld [vmem:[%s40004_s4 + $0xc30] ss:$20 sps:$4 sm:$0xff]  }
 0x9e8   : > { %21724 = vmatpush1.bf16.msra.mxu1 %v29946_v10  ;;  %v26009_v10 = vadd.f32 %v35487_v5, %v3025_v14  ;;  %v30000_v5 = vld [vmem:[%s40004_s4 + $0xc58] ss:$20 sps:$4 sm:$0xff]  }
 0x9e9   : > { %22134 = vmatpush1.bf16.msra.mxu0 %v29949_v55  ;;  %21725 = vmatprep.subr.bf16.mxu1 %v29954_v29  ;;  %v29997_v55 = vld [vmem:[%s40004_s4 + $0xc38] ss:$20 sps:$4 sm:$0xff]   ;;  %v30002_v29 = vld [vmem:[%s40004_s4 + $0xc5c] ss:$20 sps:$4 sm:$0xff]  }
 0x9ea   : > { %22135 = vmatprep.subr.bf16.mxu0 %v29957_v32  ;;  %v30005_v32 = vld [vmem:[%s40004_s4 + $0xc64] ss:$20 sps:$4 sm:$0xff]   ;;  %v30038_v14 = vld [vmem:[%s40004_s4 + $0xd4c] ss:$20 sps:$4 sm:$0xff]  }
 0x9ec   : > { %21726 = vmatpush1.bf16.msra.mxu1 %v29952_v2  ;;  %v26012_v2 = vadd.f32 %v35496_v27, %v3037_v40  ;;  %v30011_v27 = vld [vmem:[%s40004_s4 + $0xc8c] ss:$20 sps:$4 sm:$0xff]   ;;  %v30044_v40 = vld [vmem:[%s40004_s4 + $0xd74] ss:$20 sps:$4 sm:$0xff]  }
 0x9ed   : > { %22136 = vmatpush1.bf16.msra.mxu0 %v29955_v51  ;;  %21727 = vmatprep.subr.bf16.mxu1 %v29960_v41  ;;  %v16368_v51 = vmax.f32 %v26009_v10, 0.0  ;;  %v30003_v41 = vld [vmem:[%s40004_s4 + $0xc60] ss:$20 sps:$4 sm:$0xff]   ;;  %v30042_v10 = vld [vmem:[%s40004_s4 + $0xd70] ss:$20 sps:$4 sm:$0xff]  }
 0x9ee   : > { %22137 = vmatprep.subr.bf16.mxu0 %v29963_v36  ;;  %v30008_v36 = vld [vmem:[%s40004_s4 + $0xc84] ss:$20 sps:$4 sm:$0xff]  }
 0x9f0   : > { %21728 = vmatpush1.bf16.msra.mxu1 %v29958_v17  ;;  %v16371_v17 = vmax.f32 %v26012_v2, 0.0  ;;  %v30048_v2 = vld [vmem:[%s40004_s4 + $0xd98] ss:$20 sps:$4 sm:$0xff]  }
 0x9f1   : > { %22138 = vmatpush1.bf16.msra.mxu0 %v29961_v12  ;;  %21729 = vmatprep.subr.bf16.mxu1 %v29966_v44  ;;  %v30006_v12 = vld [vmem:[%s40004_s4 + $0xc80] ss:$20 sps:$4 sm:$0xff]   ;;  %v38453_v44 = vpack.c.bf16 %v16368_v51, %v16368_v51  ;;  %v30056_v51 = vld [vmem:[%s40004_s4 + $0xdc4] ss:$20 sps:$4 sm:$0xff]  }
 0x9f2   : > { %22139 = vmatprep.subr.bf16.mxu0 %v29969_v54  ;;  %v30009_v54 = vld [vmem:[%s40004_s4 + $0xc88] ss:$20 sps:$4 sm:$0xff]  }
 0x9f4   : > { %21730 = vmatpush1.bf16.msra.mxu1 %v29964_v56  ;;  %v30014_v56 = vld [vmem:[%s40004_s4 + $0xcac] ss:$20 sps:$4 sm:$0xff]  }
 0x9f5   : > { %22140 = vmatpush1.bf16.msra.mxu0 %v29967_v6  ;;  %21731 = vmatprep.subr.bf16.mxu1 %v29972_v13  ;;  %v38461_v6 = vpack.c.bf16 %v16371_v17, %v16371_v17  ;;  %v30017_v13 = vld [vmem:[%s40004_s4 + $0xcb4] ss:$20 sps:$4 sm:$0xff]   ;;  %v30062_v17 = vld [vmem:[%s40004_s4 + $0xdec] ss:$20 sps:$4 sm:$0xff]  }
 0x9f6   : > { %22141 = vmatprep.subr.bf16.mxu0 %v29975_v1  ;;  %v30012_v1 = vld [vmem:[%s40004_s4 + $0xca8] ss:$20 sps:$4 sm:$0xff]  }
 0x9f8   : > { %21732 = vmatpush1.bf16.msra.mxu1 %v29970_v39  ;;  %v30015_v39 = vld [vmem:[%s40004_s4 + $0xcb0] ss:$20 sps:$4 sm:$0xff]  }
 0x9f9   : > { %22142 = vmatpush1.bf16.msra.mxu0 %v29973_v45  ;;  %21733 = vmatprep.subr.bf16.mxu1 %v29978_v52  ;;  %v30020_v45 = vld [vmem:[%s40004_s4 + $0xcd4] ss:$20 sps:$4 sm:$0xff]   ;;  %v30023_v52 = vld [vmem:[%s40004_s4 + $0xcdc] ss:$20 sps:$4 sm:$0xff]  }
 0x9fa   : > { %22143 = vmatprep.subr.bf16.mxu0 %v29981_v61  ;;  %v30018_v61 = vld [vmem:[%s40004_s4 + $0xcd0] ss:$20 sps:$4 sm:$0xff]  }
 0x9fc   : > { %21734 = vmatpush1.bf16.msra.mxu1 %v29976_v0  ;;  %v30021_v0 = vld [vmem:[%s40004_s4 + $0xcd8] ss:$20 sps:$4 sm:$0xff]  }
 0x9fd   : > { %22144 = vmatpush1.bf16.msra.mxu0 %v29979_v60  ;;  %21735 = vmatprep.subr.bf16.mxu1 %v29984_v3  ;;  %v30026_v60 = vld [vmem:[%s40004_s4 + $0xcfc] ss:$20 sps:$4 sm:$0xff]   ;;  %v30029_v3 = vld [vmem:[%s40004_s4 + $0xd04] ss:$20 sps:$4 sm:$0xff]  }
 0x9fe   : > { %22145 = vmatprep.subr.bf16.mxu0 %v29987_v18  ;;  %v30024_v18 = vld [vmem:[%s40004_s4 + $0xcf8] ss:$20 sps:$4 sm:$0xff]  }
 0xa00   : > { %21736 = vmatpush1.bf16.msra.mxu1 %v29982_v47  ;;  %v30027_v47 = vld [vmem:[%s40004_s4 + $0xd00] ss:$20 sps:$4 sm:$0xff]  }
 0xa01   : > { %22146 = vmatpush1.bf16.msra.mxu0 %v29985_v42  ;;  %21737 = vmatprep.subr.bf16.mxu1 %v29990_v59  ;;  %v30032_v42 = vld [vmem:[%s40004_s4 + $0xd24] ss:$20 sps:$4 sm:$0xff]   ;;  %v30035_v59 = vld [vmem:[%s40004_s4 + $0xd2c] ss:$20 sps:$4 sm:$0xff]  }
 0xa02   : > { %22147 = vmatprep.subr.bf16.mxu0 %v29993_v19  ;;  %v30030_v19 = vld [vmem:[%s40004_s4 + $0xd20] ss:$20 sps:$4 sm:$0xff]  }
 0xa04   : > { %21738 = vmatpush1.bf16.msra.mxu1 %v29988_v7  ;;  %v30033_v7 = vld [vmem:[%s40004_s4 + $0xd28] ss:$20 sps:$4 sm:$0xff]  }
 0xa05   : > { %22148 = vmatpush1.bf16.msra.mxu0 %v29991_v58  ;;  %21739 = vmatprep.subr.bf16.mxu1 %v29996_v31  ;;  %v30041_v58 = vld [vmem:[%s40004_s4 + $0xd54] ss:$20 sps:$4 sm:$0xff]  }
 0xa06   : > { %22149 = vmatprep.subr.bf16.mxu0 %v29999_v22  ;;  %v30036_v31 = vld [vmem:[%s40004_s4 + $0xd48] ss:$20 sps:$4 sm:$0xff]   ;;  %v30039_v22 = vld [vmem:[%s40004_s4 + $0xd50] ss:$20 sps:$4 sm:$0xff]  }
 0xa08   : > { %21740 = vmatpush1.bf16.msra.mxu1 %v29994_v11  ;;  %v30047_v11 = vld [vmem:[%s40004_s4 + $0xd7c] ss:$20 sps:$4 sm:$0xff]  }
 0xa09   : > { %22150 = vmatpush1.bf16.msra.mxu0 %v29997_v55  ;;  %21741 = vmatprep.subr.bf16.mxu1 %v30002_v29  ;;  %v30045_v55 = vld [vmem:[%s40004_s4 + $0xd78] ss:$20 sps:$4 sm:$0xff]   ;;  %v30050_v29 = vld [vmem:[%s40004_s4 + $0xd9c] ss:$20 sps:$4 sm:$0xff]  }
 0xa0a   : > { %22151 = vmatprep.subr.bf16.mxu0 %v30005_v32  ;;  %v30053_v32 = vld [vmem:[%s40004_s4 + $0xda4] ss:$20 sps:$4 sm:$0xff]  }
 0xa0c   : > { %21742 = vmatpush1.bf16.msra.mxu1 %v30000_v5  ;;  %v30051_v5 = vld [vmem:[%s40004_s4 + $0xda0] ss:$20 sps:$4 sm:$0xff]  }
 0xa0d   : > { %22152 = vmatpush1.bf16.msra.mxu0 %v30003_v41  ;;  %21752 = vmatprep.subr.bf16.mxu1 %v30008_v36  ;;  %v30059_v41 = vld [vmem:[%s40004_s4 + $0xdcc] ss:$20 sps:$4 sm:$0xff]  }
 0xa0e   : > { %22162 = vmatprep.subr.bf16.mxu0 %v30011_v27  ;;  %v30054_v36 = vld [vmem:[%s40004_s4 + $0xdc0] ss:$20 sps:$4 sm:$0xff]   ;;  %v30057_v27 = vld [vmem:[%s40004_s4 + $0xdc8] ss:$20 sps:$4 sm:$0xff]  }
 0xa0f   : > { %21744 = vmatmul.mubr.bf16.vlgmr.msra.gmra.mrb[32].mxu1 %v38453_v44 }
 0xa10   : > { %22154 = vmatmul.mubr.bf16.vlgmr.msra.gmra.mrb[36].mxu0 %v38453_v44  ;;  %21753 = vmatpush1.bf16.msra.mxu1 %v30006_v12  ;;  %v30065_v12 = vld [vmem:[%s40004_s4 + $0xdf4] ss:$20 sps:$4 sm:$0xff]  }
 0xa11   : > { %21784 = vmatprep.mubr.bf16.mxu1 %v38461_v6  ;;  %22163 = vmatpush1.bf16.msra.mxu0 %v30009_v54  ;;  %v30060_v54 = vld [vmem:[%s40004_s4 + $0xde8] ss:$20 sps:$4 sm:$0xff]  }
 0xa12   : > { %22194 = vmatprep.mubr.bf16.mxu0 %v38461_v6  ;;  %21754 = vmatprep.subr.bf16.mxu1 %v30014_v56  ;;  %v30063_v56 = vld [vmem:[%s40004_s4 + $0xdf0] ss:$20 sps:$4 sm:$0xff]  }
 0xa13   : > { %22164 = vmatprep.subr.bf16.mxu0 %v30017_v13  ;;  %v30068_v13 = vld [vmem:[%s40004_s4 + $0xe14] ss:$20 sps:$4 sm:$0xff]  }
 0xa14   : > { %21755 = vmatpush1.bf16.msra.mxu1 %v30012_v1  ;;  %v30071_v1 = vld [vmem:[%s40004_s4 + $0xe1c] ss:$20 sps:$4 sm:$0xff]  }
 0xa15   : > { %22165 = vmatpush1.bf16.msra.mxu0 %v30015_v39  ;;  %21756 = vmatprep.subr.bf16.mxu1 %v30020_v45  ;;  %v30066_v39 = vld [vmem:[%s40004_s4 + $0xe10] ss:$20 sps:$4 sm:$0xff]   ;;  %v30069_v45 = vld [vmem:[%s40004_s4 + $0xe18] ss:$20 sps:$4 sm:$0xff]  }
 0xa16   : > { %22166 = vmatprep.subr.bf16.mxu0 %v30023_v52  ;;  %v30074_v52 = vld [vmem:[%s40004_s4 + $0xe3c] ss:$20 sps:$4 sm:$0xff]  }
 0xa18   : > { %21757 = vmatpush1.bf16.msra.mxu1 %v30018_v61  ;;  %v30077_v61 = vld [vmem:[%s40004_s4 + $0xe44] ss:$20 sps:$4 sm:$0xff]  }
 0xa19   : > { %22167 = vmatpush1.bf16.msra.mxu0 %v30021_v0  ;;  %21758 = vmatprep.subr.bf16.mxu1 %v30026_v60  ;;  %v30072_v0 = vld [vmem:[%s40004_s4 + $0xe38] ss:$20 sps:$4 sm:$0xff]   ;;  %v30075_v60 = vld [vmem:[%s40004_s4 + $0xe40] ss:$20 sps:$4 sm:$0xff]  }
 0xa1a   : > { %22168 = vmatprep.subr.bf16.mxu0 %v30029_v3  ;;  %v30080_v3 = vld [vmem:[%s40004_s4 + $0xe64] ss:$20 sps:$4 sm:$0xff]  }
 0xa1c   : > { %21759 = vmatpush1.bf16.msra.mxu1 %v30024_v18  ;;  %v30083_v18 = vld [vmem:[%s40004_s4 + $0xe6c] ss:$20 sps:$4 sm:$0xff]  }
 0xa1d   : > { %22169 = vmatpush1.bf16.msra.mxu0 %v30027_v47  ;;  %21760 = vmatprep.subr.bf16.mxu1 %v30032_v42  ;;  %v30078_v47 = vld [vmem:[%s40004_s4 + $0xe60] ss:$20 sps:$4 sm:$0xff]   ;;  %v30081_v42 = vld [vmem:[%s40004_s4 + $0xe68] ss:$20 sps:$4 sm:$0xff]  }
 0xa1e   : > { %22170 = vmatprep.subr.bf16.mxu0 %v30035_v59  ;;  %v30086_v59 = vld [vmem:[%s40004_s4 + $0xe8c] ss:$20 sps:$4 sm:$0xff]  }
 0xa20   : > { %21761 = vmatpush1.bf16.msra.mxu1 %v30030_v19  ;;  %v30089_v19 = vld [vmem:[%s40004_s4 + $0xe94] ss:$20 sps:$4 sm:$0xff]  }
 0xa21   : > { %22171 = vmatpush1.bf16.msra.mxu0 %v30033_v7  ;;  %21762 = vmatprep.subr.bf16.mxu1 %v30038_v14  ;;  %v30084_v7 = vld [vmem:[%s40004_s4 + $0xe88] ss:$20 sps:$4 sm:$0xff]   ;;  %v3033_v14 = vrot.slane %v38198_v9, %v31158_v37 }
 0xa22   : > { %22172 = vmatprep.subr.bf16.mxu0 %v30041_v58  ;;  %v30087_v58 = vld [vmem:[%s40004_s4 + $0xe90] ss:$20 sps:$4 sm:$0xff]  }
 0xa24   : > { %21763 = vmatpush1.bf16.msra.mxu1 %v30036_v31  ;;  %v30092_v31 = vld [vmem:[%s40004_s4 + $0xeb4] ss:$20 sps:$4 sm:$0xff]  }
 0xa25   : > { %22173 = vmatpush1.bf16.msra.mxu0 %v30039_v22  ;;  %21764 = vmatprep.subr.bf16.mxu1 %v30044_v40  ;;  %v30095_v22 = vld [vmem:[%s40004_s4 + $0xebc] ss:$20 sps:$4 sm:$0xff]   ;;  %v3045_v40 = vrot.slane %v38198_v9, %v31276_v43  ;;  %v30101_v43 = vld [vmem:[%s40004_s4 + $0xee4] ss:$20 sps:$4 sm:$0xff]  }
 0xa26   : > { %22174 = vmatprep.subr.bf16.mxu0 %v30047_v11  ;;  %v30090_v11 = vld [vmem:[%s40004_s4 + $0xeb0] ss:$20 sps:$4 sm:$0xff]  }
 0xa28   : > { %21765 = vmatpush1.bf16.msra.mxu1 %v30042_v10  ;;  %v26011_v10 = vadd.f32 %v35492_v8, %v3033_v14  ;;  %v30096_v8 = vld [vmem:[%s40004_s4 + $0xed8] ss:$20 sps:$4 sm:$0xff]   ;;  %v30137_v14 = vld [vmem:[%s40004_s4 + $0xfd4] ss:$20 sps:$4 sm:$0xff]  }
 0xa29   : > { %22175 = vmatpush1.bf16.msra.mxu0 %v30045_v55  ;;  %21766 = vmatprep.subr.bf16.mxu1 %v30050_v29  ;;  %v30093_v55 = vld [vmem:[%s40004_s4 + $0xeb8] ss:$20 sps:$4 sm:$0xff]   ;;  %v30098_v29 = vld [vmem:[%s40004_s4 + $0xedc] ss:$20 sps:$4 sm:$0xff]  }
 0xa2a   : > { %22176 = vmatprep.subr.bf16.mxu0 %v30053_v32  ;;  %v26014_v32 = vadd.f32 %v36778_v23, %v3045_v40  ;;  %v30107_v23 = vld [vmem:[%s40004_s4 + $0xf0c] ss:$20 sps:$4 sm:$0xff]   ;;  %v30143_v40 = vld [vmem:[%s40004_s4 + $0xffc] ss:$20 sps:$4 sm:$0xff]  }
 0xa2c   : > { %21767 = vmatpush1.bf16.msra.mxu1 %v30048_v2  ;;  %v16370_v2 = vmax.f32 %v26011_v10, 0.0  ;;  %v30141_v10 = vld [vmem:[%s40004_s4 + $0xff8] ss:$20 sps:$4 sm:$0xff]  }
 0xa2d   : > { %22177 = vmatpush1.bf16.msra.mxu0 %v30051_v5  ;;  %21768 = vmatprep.subr.bf16.mxu1 %v30056_v51  ;;  %v30099_v5 = vld [vmem:[%s40004_s4 + $0xee0] ss:$20 sps:$4 sm:$0xff]   ;;  %v30104_v51 = vld [vmem:[%s40004_s4 + $0xf04] ss:$20 sps:$4 sm:$0xff]  }
 0xa2e   : > { %22178 = vmatprep.subr.bf16.mxu0 %v30059_v41  ;;  %v16373_v41 = vmax.f32 %v26014_v32, 0.0  ;;  %v30147_v32 = vld [vmem:[%s40004_s4 + $0x1020] ss:$20 sps:$4 sm:$0xff]  }
 0xa30   : > { %21769 = vmatpush1.bf16.msra.mxu1 %v30054_v36  ;;  %v30102_v36 = vld [vmem:[%s40004_s4 + $0xf00] ss:$20 sps:$4 sm:$0xff]  }
 0xa31   : > { %22179 = vmatpush1.bf16.msra.mxu0 %v30057_v27  ;;  %21770 = vmatprep.subr.bf16.mxu1 %v30062_v17  ;;  %v38659_v27 = vpack.c.bf16 %v16370_v2, %v16370_v2  ;;  %v30105_v17 = vld [vmem:[%s40004_s4 + $0xf08] ss:$20 sps:$4 sm:$0xff]   ;;  %v30155_v2 = vld [vmem:[%s40004_s4 + $0x104c] ss:$20 sps:$4 sm:$0xff]  }
 0xa32   : > { %22180 = vmatprep.subr.bf16.mxu0 %v30065_v12  ;;  %v30110_v12 = vld [vmem:[%s40004_s4 + $0xf2c] ss:$20 sps:$4 sm:$0xff]  }
 0xa34   : > { %21771 = vmatpush1.bf16.msra.mxu1 %v30060_v54  ;;  %v38667_v54 = vpack.c.bf16 %v16373_v41, %v16373_v41  ;;  %v30161_v41 = vld [vmem:[%s40004_s4 + $0x1074] ss:$20 sps:$4 sm:$0xff]  }
 0xa35   : > { %22181 = vmatpush1.bf16.msra.mxu0 %v30063_v56  ;;  %21772 = vmatprep.subr.bf16.mxu1 %v30068_v13  ;;  %v30113_v56 = vld [vmem:[%s40004_s4 + $0xf34] ss:$20 sps:$4 sm:$0xff]  }
 0xa36   : > { %22182 = vmatprep.subr.bf16.mxu0 %v30071_v1  ;;  %v30108_v13 = vld [vmem:[%s40004_s4 + $0xf28] ss:$20 sps:$4 sm:$0xff]   ;;  %v30111_v1 = vld [vmem:[%s40004_s4 + $0xf30] ss:$20 sps:$4 sm:$0xff]  }
 0xa38   : > { %21773 = vmatpush1.bf16.msra.mxu1 %v30066_v39  ;;  %v30116_v39 = vld [vmem:[%s40004_s4 + $0xf54] ss:$20 sps:$4 sm:$0xff]  }
 0xa39   : > { %22183 = vmatpush1.bf16.msra.mxu0 %v30069_v45  ;;  %21774 = vmatprep.subr.bf16.mxu1 %v30074_v52  ;;  %v30119_v45 = vld [vmem:[%s40004_s4 + $0xf5c] ss:$20 sps:$4 sm:$0xff]  }
 0xa3a   : > { %22184 = vmatprep.subr.bf16.mxu0 %v30077_v61  ;;  %v30114_v52 = vld [vmem:[%s40004_s4 + $0xf50] ss:$20 sps:$4 sm:$0xff]   ;;  %v30117_v61 = vld [vmem:[%s40004_s4 + $0xf58] ss:$20 sps:$4 sm:$0xff]  }
 0xa3c   : > { %21775 = vmatpush1.bf16.msra.mxu1 %v30072_v0  ;;  %v30122_v0 = vld [vmem:[%s40004_s4 + $0xf7c] ss:$20 sps:$4 sm:$0xff]  }
 0xa3d   : > { %22185 = vmatpush1.bf16.msra.mxu0 %v30075_v60  ;;  %21776 = vmatprep.subr.bf16.mxu1 %v30080_v3  ;;  %v30125_v60 = vld [vmem:[%s40004_s4 + $0xf84] ss:$20 sps:$4 sm:$0xff]  }
 0xa3e   : > { %22186 = vmatprep.subr.bf16.mxu0 %v30083_v18  ;;  %v30120_v3 = vld [vmem:[%s40004_s4 + $0xf78] ss:$20 sps:$4 sm:$0xff]   ;;  %v30123_v18 = vld [vmem:[%s40004_s4 + $0xf80] ss:$20 sps:$4 sm:$0xff]  }
 0xa40   : > { %21777 = vmatpush1.bf16.msra.mxu1 %v30078_v47  ;;  %v30128_v47 = vld [vmem:[%s40004_s4 + $0xfa4] ss:$20 sps:$4 sm:$0xff]  }
 0xa41   : > { %22187 = vmatpush1.bf16.msra.mxu0 %v30081_v42  ;;  %21778 = vmatprep.subr.bf16.mxu1 %v30086_v59  ;;  %v30131_v42 = vld [vmem:[%s40004_s4 + $0xfac] ss:$20 sps:$4 sm:$0xff]  }
 0xa42   : > { %22188 = vmatprep.subr.bf16.mxu0 %v30089_v19  ;;  %v30126_v59 = vld [vmem:[%s40004_s4 + $0xfa0] ss:$20 sps:$4 sm:$0xff]   ;;  %v30129_v19 = vld [vmem:[%s40004_s4 + $0xfa8] ss:$20 sps:$4 sm:$0xff]  }
 0xa44   : > { %21779 = vmatpush1.bf16.msra.mxu1 %v30084_v7  ;;  %v30134_v7 = vld [vmem:[%s40004_s4 + $0xfcc] ss:$20 sps:$4 sm:$0xff]  }
 0xa45   : > { %22189 = vmatpush1.bf16.msra.mxu0 %v30087_v58  ;;  %21780 = vmatprep.subr.bf16.mxu1 %v30092_v31  ;;  %v30132_v58 = vld [vmem:[%s40004_s4 + $0xfc8] ss:$20 sps:$4 sm:$0xff]   ;;  %v30135_v31 = vld [vmem:[%s40004_s4 + $0xfd0] ss:$20 sps:$4 sm:$0xff]  }
 0xa46   : > { %22190 = vmatprep.subr.bf16.mxu0 %v30095_v22  ;;  %v30140_v22 = vld [vmem:[%s40004_s4 + $0xff4] ss:$20 sps:$4 sm:$0xff]  }
 0xa48   : > { %21781 = vmatpush1.bf16.msra.mxu1 %v30090_v11  ;;  %v30138_v11 = vld [vmem:[%s40004_s4 + $0xff0] ss:$20 sps:$4 sm:$0xff]  }
 0xa49   : > { %22191 = vmatpush1.bf16.msra.mxu0 %v30093_v55  ;;  %21782 = vmatprep.subr.bf16.mxu1 %v30098_v29  ;;  %v30146_v55 = vld [vmem:[%s40004_s4 + $0x101c] ss:$20 sps:$4 sm:$0xff]   ;;  %v30149_v29 = vld [vmem:[%s40004_s4 + $0x1024] ss:$20 sps:$4 sm:$0xff]  }
 0xa4a   : > { %22192 = vmatprep.subr.bf16.mxu0 %v30101_v43  ;;  %v30144_v43 = vld [vmem:[%s40004_s4 + $0x1018] ss:$20 sps:$4 sm:$0xff]  }
 0xa4c   : > { %21783 = vmatpush1.bf16.msra.mxu1 %v30096_v8  ;;  %v30152_v8 = vld [vmem:[%s40004_s4 + $0x1044] ss:$20 sps:$4 sm:$0xff]  }
 0xa4d   : > { %22193 = vmatpush1.bf16.msra.mxu0 %v30099_v5  ;;  %21793 = vmatprep.subr.bf16.mxu1 %v30104_v51  ;;  %v30150_v5 = vld [vmem:[%s40004_s4 + $0x1040] ss:$20 sps:$4 sm:$0xff]   ;;  %v30153_v51 = vld [vmem:[%s40004_s4 + $0x1048] ss:$20 sps:$4 sm:$0xff]  }
 0xa4e   : > { %22203 = vmatprep.subr.bf16.mxu0 %v30107_v23  ;;  %v30158_v23 = vld [vmem:[%s40004_s4 + $0x106c] ss:$20 sps:$4 sm:$0xff]  }
 0xa4f   : > { %21785 = vmatmul.mubr.bf16.vlgmr.msra.gmra.mrb[32].mxu1 %v38659_v27 }
 0xa50   : > { %22195 = vmatmul.mubr.bf16.vlgmr.msra.gmra.mrb[36].mxu0 %v38659_v27  ;;  %21794 = vmatpush1.bf16.msra.mxu1 %v30102_v36  ;;  %v30156_v36 = vld [vmem:[%s40004_s4 + $0x1068] ss:$20 sps:$4 sm:$0xff]  }
 0xa51   : > { %21825 = vmatprep.mubr.bf16.mxu1 %v38667_v54  ;;  %22204 = vmatpush1.bf16.msra.mxu0 %v30105_v17  ;;  %v30159_v17 = vld [vmem:[%s40004_s4 + $0x1070] ss:$20 sps:$4 sm:$0xff]  }
 0xa52   : > { %22235 = vmatprep.mubr.bf16.mxu0 %v38667_v54  ;;  %21795 = vmatprep.subr.bf16.mxu1 %v30110_v12  ;;  %v30164_v12 = vld [vmem:[%s40004_s4 + $0x1094] ss:$20 sps:$4 sm:$0xff]  }
 0xa53   : > { %22205 = vmatprep.subr.bf16.mxu0 %v30113_v56  ;;  %v30167_v56 = vld [vmem:[%s40004_s4 + $0x109c] ss:$20 sps:$4 sm:$0xff]  }
 0xa54   : > { %21796 = vmatpush1.bf16.msra.mxu1 %v30108_v13  ;;  %v30162_v13 = vld [vmem:[%s40004_s4 + $0x1090] ss:$20 sps:$4 sm:$0xff]  }
 0xa55   : > { %22206 = vmatpush1.bf16.msra.mxu0 %v30111_v1  ;;  %21797 = vmatprep.subr.bf16.mxu1 %v30116_v39  ;;  %v30165_v1 = vld [vmem:[%s40004_s4 + $0x1098] ss:$20 sps:$4 sm:$0xff]   ;;  %v30170_v39 = vld [vmem:[%s40004_s4 + $0x10bc] ss:$20 sps:$4 sm:$0xff]  }
 0xa56   : > { %22207 = vmatprep.subr.bf16.mxu0 %v30119_v45  ;;  %v30173_v45 = vld [vmem:[%s40004_s4 + $0x10c4] ss:$20 sps:$4 sm:$0xff]  }
 0xa58   : > { %21798 = vmatpush1.bf16.msra.mxu1 %v30114_v52  ;;  %v30168_v52 = vld [vmem:[%s40004_s4 + $0x10b8] ss:$20 sps:$4 sm:$0xff]  }
 0xa59   : > { %22208 = vmatpush1.bf16.msra.mxu0 %v30117_v61  ;;  %21799 = vmatprep.subr.bf16.mxu1 %v30122_v0  ;;  %v30171_v61 = vld [vmem:[%s40004_s4 + $0x10c0] ss:$20 sps:$4 sm:$0xff]   ;;  %v30176_v0 = vld [vmem:[%s40004_s4 + $0x10e4] ss:$20 sps:$4 sm:$0xff]  }
 0xa5a   : > { %22209 = vmatprep.subr.bf16.mxu0 %v30125_v60  ;;  %v30179_v60 = vld [vmem:[%s40004_s4 + $0x10ec] ss:$20 sps:$4 sm:$0xff]  }
 0xa5c   : > { %21800 = vmatpush1.bf16.msra.mxu1 %v30120_v3  ;;  %v30174_v3 = vld [vmem:[%s40004_s4 + $0x10e0] ss:$20 sps:$4 sm:$0xff]  }
 0xa5d   : > { %22210 = vmatpush1.bf16.msra.mxu0 %v30123_v18  ;;  %21801 = vmatprep.subr.bf16.mxu1 %v30128_v47  ;;  %v30177_v18 = vld [vmem:[%s40004_s4 + $0x10e8] ss:$20 sps:$4 sm:$0xff]   ;;  %v30182_v47 = vld [vmem:[%s40004_s4 + $0x110c] ss:$20 sps:$4 sm:$0xff]  }
 0xa5e   : > { %22211 = vmatprep.subr.bf16.mxu0 %v30131_v42  ;;  %v30185_v42 = vld [vmem:[%s40004_s4 + $0x1114] ss:$20 sps:$4 sm:$0xff]  }
 0xa60   : > { %21802 = vmatpush1.bf16.msra.mxu1 %v30126_v59  ;;  %v30180_v59 = vld [vmem:[%s40004_s4 + $0x1108] ss:$20 sps:$4 sm:$0xff]  }
 0xa61   : > { %22212 = vmatpush1.bf16.msra.mxu0 %v30129_v19  ;;  %21803 = vmatprep.subr.bf16.mxu1 %v30134_v7  ;;  %v3041_v19 = vrot.slane %v38198_v9, %v31198_v63  ;;  %v30183_v7 = vld [vmem:[%s40004_s4 + $0x1110] ss:$20 sps:$4 sm:$0xff]  }
 0xa62   : > { %22213 = vmatprep.subr.bf16.mxu0 %v30137_v14  ;;  %v30188_v14 = vld [vmem:[%s40004_s4 + $0x1134] ss:$20 sps:$4 sm:$0xff]  }
 0xa64   : > { %21804 = vmatpush1.bf16.msra.mxu1 %v30132_v58  ;;  %v30191_v58 = vld [vmem:[%s40004_s4 + $0x113c] ss:$20 sps:$4 sm:$0xff]  }
 0xa65   : > { %22214 = vmatpush1.bf16.msra.mxu0 %v30135_v31  ;;  %21805 = vmatprep.subr.bf16.mxu1 %v30140_v22  ;;  %v3053_v31 = vrot.slane %v38198_v9, %v31491_v24  ;;  %v30186_v22 = vld [vmem:[%s40004_s4 + $0x1130] ss:$20 sps:$4 sm:$0xff]  }
 0xa66   : > { %22215 = vmatprep.subr.bf16.mxu0 %v30143_v40  ;;  %v26013_v40 = vadd.f32 %v36771_v21, %v3041_v19  ;;  %v30197_v24 = vld [vmem:[%s40004_s4 + $0x1164] ss:$20 sps:$4 sm:$0xff]  }
 0xa67   : > { %v26016_v9 = vadd.f32 %v36780_v28, %v3053_v31  ;;  %v30192_v21 = vld [vmem:[%s40004_s4 + $0x1158] ss:$20 sps:$4 sm:$0xff]   ;;  %v30231_v19 = vld [vmem:[%s40004_s4 + $0x1250] ss:$20 sps:$4 sm:$0xff]  }
 0xa68   : > { %21806 = vmatpush1.bf16.msra.mxu1 %v30138_v11  ;;  %v30189_v11 = vld [vmem:[%s40004_s4 + $0x1138] ss:$20 sps:$4 sm:$0xff]  }
 0xa69   : > { %22216 = vmatpush1.bf16.msra.mxu0 %v30141_v10  ;;  %21807 = vmatprep.subr.bf16.mxu1 %v30146_v55  ;;  %v30194_v10 = vld [vmem:[%s40004_s4 + $0x115c] ss:$20 sps:$4 sm:$0xff]   ;;  %v16372_v55 = vmax.f32 %v26013_v40, 0.0  ;;  %v30203_v28 = vld [vmem:[%s40004_s4 + $0x118c] ss:$20 sps:$4 sm:$0xff]  }
 0xa6a   : > { %22217 = vmatprep.subr.bf16.mxu0 %v30149_v29  ;;  %v30195_v29 = vld [vmem:[%s40004_s4 + $0x1160] ss:$20 sps:$4 sm:$0xff]   ;;  %v30237_v31 = vld [vmem:[%s40004_s4 + $0x1278] ss:$20 sps:$4 sm:$0xff]  }
 0xa6b   : > { %v30245_v40 = vld [vmem:[%s40004_s4 + $0x12a4] ss:$20 sps:$4 sm:$0xff]  }
 0xa6c   : > { %21808 = vmatpush1.bf16.msra.mxu1 %v30144_v43  ;;  %v30200_v43 = vld [vmem:[%s40004_s4 + $0x1184] ss:$20 sps:$4 sm:$0xff]  }
 0xa6d   : > { %22218 = vmatpush1.bf16.msra.mxu0 %v30147_v32  ;;  %21809 = vmatprep.subr.bf16.mxu1 %v30152_v8  ;;  %v16375_v32 = vmax.f32 %v26016_v9, 0.0  ;;  %v30198_v8 = vld [vmem:[%s40004_s4 + $0x1180] ss:$20 sps:$4 sm:$0xff]  }
 0xa6e   : > { %22219 = vmatprep.subr.bf16.mxu0 %v30155_v2  ;;  %v38865_v2 = vpack.c.bf16 %v16372_v55, %v16372_v55  ;;  %v30251_v9 = vld [vmem:[%s40004_s4 + $0x12cc] ss:$20 sps:$4 sm:$0xff]   ;;  %v30249_v55 = vld [vmem:[%s40004_s4 + $0x12c8] ss:$20 sps:$4 sm:$0xff]  }
 0xa70   : > { %21810 = vmatpush1.bf16.msra.mxu1 %v30150_v5  ;;  %v30201_v5 = vld [vmem:[%s40004_s4 + $0x1188] ss:$20 sps:$4 sm:$0xff]  }
 0xa71   : > { %22220 = vmatpush1.bf16.msra.mxu0 %v30153_v51  ;;  %21811 = vmatprep.subr.bf16.mxu1 %v30158_v23  ;;  %v30206_v51 = vld [vmem:[%s40004_s4 + $0x11ac] ss:$20 sps:$4 sm:$0xff]   ;;  %v38873_v23 = vpack.c.bf16 %v16375_v32, %v16375_v32  ;;  %v30255_v32 = vld [vmem:[%s40004_s4 + $0x12f0] ss:$20 sps:$4 sm:$0xff]  }
 0xa72   : > { %22221 = vmatprep.subr.bf16.mxu0 %v30161_v41  ;;  %v30209_v41 = vld [vmem:[%s40004_s4 + $0x11b4] ss:$20 sps:$4 sm:$0xff]  }
 0xa74   : > { %21812 = vmatpush1.bf16.msra.mxu1 %v30156_v36  ;;  %v30204_v36 = vld [vmem:[%s40004_s4 + $0x11a8] ss:$20 sps:$4 sm:$0xff]  }
 0xa75   : > { %22222 = vmatpush1.bf16.msra.mxu0 %v30159_v17  ;;  %21813 = vmatprep.subr.bf16.mxu1 %v30164_v12  ;;  %v30207_v17 = vld [vmem:[%s40004_s4 + $0x11b0] ss:$20 sps:$4 sm:$0xff]   ;;  %v30212_v12 = vld [vmem:[%s40004_s4 + $0x11d4] ss:$20 sps:$4 sm:$0xff]  }
 0xa76   : > { %22223 = vmatprep.subr.bf16.mxu0 %v30167_v56  ;;  %v30215_v56 = vld [vmem:[%s40004_s4 + $0x11dc] ss:$20 sps:$4 sm:$0xff]  }
 0xa78   : > { %21814 = vmatpush1.bf16.msra.mxu1 %v30162_v13  ;;  %v30210_v13 = vld [vmem:[%s40004_s4 + $0x11d0] ss:$20 sps:$4 sm:$0xff]  }
 0xa79   : > { %22224 = vmatpush1.bf16.msra.mxu0 %v30165_v1  ;;  %21815 = vmatprep.subr.bf16.mxu1 %v30170_v39  ;;  %v30213_v1 = vld [vmem:[%s40004_s4 + $0x11d8] ss:$20 sps:$4 sm:$0xff]   ;;  %v30218_v39 = vld [vmem:[%s40004_s4 + $0x11fc] ss:$20 sps:$4 sm:$0xff]  }
 0xa7a   : > { %22225 = vmatprep.subr.bf16.mxu0 %v30173_v45  ;;  %v30221_v45 = vld [vmem:[%s40004_s4 + $0x1204] ss:$20 sps:$4 sm:$0xff]  }
 0xa7c   : > { %21816 = vmatpush1.bf16.msra.mxu1 %v30168_v52  ;;  %v30216_v52 = vld [vmem:[%s40004_s4 + $0x11f8] ss:$20 sps:$4 sm:$0xff]  }
 0xa7d   : > { %22226 = vmatpush1.bf16.msra.mxu0 %v30171_v61  ;;  %21817 = vmatprep.subr.bf16.mxu1 %v30176_v0  ;;  %v30219_v61 = vld [vmem:[%s40004_s4 + $0x1200] ss:$20 sps:$4 sm:$0xff]   ;;  %v30224_v0 = vld [vmem:[%s40004_s4 + $0x1224] ss:$20 sps:$4 sm:$0xff]  }
 0xa7e   : > { %22227 = vmatprep.subr.bf16.mxu0 %v30179_v60  ;;  %v30227_v60 = vld [vmem:[%s40004_s4 + $0x122c] ss:$20 sps:$4 sm:$0xff]  }
 0xa80   : > { %21818 = vmatpush1.bf16.msra.mxu1 %v30174_v3  ;;  %v30222_v3 = vld [vmem:[%s40004_s4 + $0x1220] ss:$20 sps:$4 sm:$0xff]  }
 0xa81   : > { %22228 = vmatpush1.bf16.msra.mxu0 %v30177_v18  ;;  %21819 = vmatprep.subr.bf16.mxu1 %v30182_v47  ;;  %v30225_v18 = vld [vmem:[%s40004_s4 + $0x1228] ss:$20 sps:$4 sm:$0xff]   ;;  %v30230_v47 = vld [vmem:[%s40004_s4 + $0x124c] ss:$20 sps:$4 sm:$0xff]  }
 0xa82   : > { %22229 = vmatprep.subr.bf16.mxu0 %v30185_v42  ;;  %v30233_v42 = vld [vmem:[%s40004_s4 + $0x1254] ss:$20 sps:$4 sm:$0xff]  }
 0xa84   : > { %21820 = vmatpush1.bf16.msra.mxu1 %v30180_v59  ;;  %v30228_v59 = vld [vmem:[%s40004_s4 + $0x1248] ss:$20 sps:$4 sm:$0xff]  }
 0xa85   : > { %22230 = vmatpush1.bf16.msra.mxu0 %v30183_v7  ;;  %21821 = vmatprep.subr.bf16.mxu1 %v30188_v14  ;;  %v30236_v7 = vld [vmem:[%s40004_s4 + $0x1274] ss:$20 sps:$4 sm:$0xff]   ;;  %v30239_v14 = vld [vmem:[%s40004_s4 + $0x127c] ss:$20 sps:$4 sm:$0xff]  }
 0xa86   : > { %22231 = vmatprep.subr.bf16.mxu0 %v30191_v58  ;;  %v30234_v58 = vld [vmem:[%s40004_s4 + $0x1270] ss:$20 sps:$4 sm:$0xff]  }
 0xa88   : > { %21822 = vmatpush1.bf16.msra.mxu1 %v30186_v22  ;;  %v30242_v22 = vld [vmem:[%s40004_s4 + $0x129c] ss:$20 sps:$4 sm:$0xff]  }
 0xa89   : > { %22232 = vmatpush1.bf16.msra.mxu0 %v30189_v11  ;;  %21823 = vmatprep.subr.bf16.mxu1 %v30194_v10  ;;  %v30240_v11 = vld [vmem:[%s40004_s4 + $0x1298] ss:$20 sps:$4 sm:$0xff]   ;;  %v30243_v10 = vld [vmem:[%s40004_s4 + $0x12a0] ss:$20 sps:$4 sm:$0xff]  }
 0xa8a   : > { %22233 = vmatprep.subr.bf16.mxu0 %v30197_v24  ;;  %v30248_v24 = vld [vmem:[%s40004_s4 + $0x12c4] ss:$20 sps:$4 sm:$0xff]  }
 0xa8c   : > { %21824 = vmatpush1.bf16.msra.mxu1 %v30192_v21  ;;  %v30246_v21 = vld [vmem:[%s40004_s4 + $0x12c0] ss:$20 sps:$4 sm:$0xff]  }
 0xa8d   : > { %22234 = vmatpush1.bf16.msra.mxu0 %v30195_v29  ;;  %21834 = vmatprep.subr.bf16.mxu1 %v30200_v43  ;;  %v30254_v29 = vld [vmem:[%s40004_s4 + $0x12ec] ss:$20 sps:$4 sm:$0xff]   ;;  %v30257_v43 = vld [vmem:[%s40004_s4 + $0x12f4] ss:$20 sps:$4 sm:$0xff]  }
 0xa8e   : > { %22244 = vmatprep.subr.bf16.mxu0 %v30203_v28  ;;  %v30252_v28 = vld [vmem:[%s40004_s4 + $0x12e8] ss:$20 sps:$4 sm:$0xff]  }
 0xa8f   : > { %21826 = vmatmul.mubr.bf16.vlgmr.msra.gmra.mrb[32].mxu1 %v38865_v2 }
 0xa90   : > { %22236 = vmatmul.mubr.bf16.vlgmr.msra.gmra.mrb[36].mxu0 %v38865_v2  ;;  %21835 = vmatpush1.bf16.msra.mxu1 %v30198_v8  ;;  %v30260_v8 = vld [vmem:[%s40004_s4 + $0x1314] ss:$20 sps:$4 sm:$0xff]  }
 0xa91   : > { %21866 = vmatprep.mubr.bf16.mxu1 %v38873_v23  ;;  %22245 = vmatpush1.bf16.msra.mxu0 %v30201_v5  ;;  %v30263_v5 = vld [vmem:[%s40004_s4 + $0x131c] ss:$20 sps:$4 sm:$0xff]  }
 0xa92   : > { %22276 = vmatprep.mubr.bf16.mxu0 %v38873_v23  ;;  %21836 = vmatprep.subr.bf16.mxu1 %v30206_v51  ;;  %v30258_v51 = vld [vmem:[%s40004_s4 + $0x1310] ss:$20 sps:$4 sm:$0xff]  }
 0xa93   : > { %22246 = vmatprep.subr.bf16.mxu0 %v30209_v41  ;;  %v30261_v41 = vld [vmem:[%s40004_s4 + $0x1318] ss:$20 sps:$4 sm:$0xff]  }
 0xa94   : > { %21837 = vmatpush1.bf16.msra.mxu1 %v30204_v36  ;;  %v30266_v36 = vld [vmem:[%s40004_s4 + $0x133c] ss:$20 sps:$4 sm:$0xff]  }
 0xa95   : > { %22247 = vmatpush1.bf16.msra.mxu0 %v30207_v17  ;;  %21838 = vmatprep.subr.bf16.mxu1 %v30212_v12  ;;  %v30269_v17 = vld [vmem:[%s40004_s4 + $0x1344] ss:$20 sps:$4 sm:$0xff]  }
 0xa96   : > { %22248 = vmatprep.subr.bf16.mxu0 %v30215_v56  ;;  %v30264_v12 = vld [vmem:[%s40004_s4 + $0x1338] ss:$20 sps:$4 sm:$0xff]   ;;  %v30267_v56 = vld [vmem:[%s40004_s4 + $0x1340] ss:$20 sps:$4 sm:$0xff]  }
 0xa98   : > { %21839 = vmatpush1.bf16.msra.mxu1 %v30210_v13  ;;  %v30272_v13 = vld [vmem:[%s40004_s4 + $0x1364] ss:$20 sps:$4 sm:$0xff]  }
 0xa99   : > { %22249 = vmatpush1.bf16.msra.mxu0 %v30213_v1  ;;  %21840 = vmatprep.subr.bf16.mxu1 %v30218_v39  ;;  %v30275_v1 = vld [vmem:[%s40004_s4 + $0x136c] ss:$20 sps:$4 sm:$0xff]  }
 0xa9a   : > { %22250 = vmatprep.subr.bf16.mxu0 %v30221_v45  ;;  %v30270_v39 = vld [vmem:[%s40004_s4 + $0x1360] ss:$20 sps:$4 sm:$0xff]   ;;  %v30273_v45 = vld [vmem:[%s40004_s4 + $0x1368] ss:$20 sps:$4 sm:$0xff]  }
 0xa9c   : > { %21841 = vmatpush1.bf16.msra.mxu1 %v30216_v52  ;;  %v30278_v52 = vld [vmem:[%s40004_s4 + $0x138c] ss:$20 sps:$4 sm:$0xff]  }
 0xa9d   : > { %22251 = vmatpush1.bf16.msra.mxu0 %v30219_v61  ;;  %21842 = vmatprep.subr.bf16.mxu1 %v30224_v0  ;;  %v30281_v61 = vld [vmem:[%s40004_s4 + $0x1394] ss:$20 sps:$4 sm:$0xff]  }
 0xa9e   : > { %22252 = vmatprep.subr.bf16.mxu0 %v30227_v60  ;;  %v30276_v0 = vld [vmem:[%s40004_s4 + $0x1388] ss:$20 sps:$4 sm:$0xff]  }
 0xa9f   : > { %v30649_v60 = vld [vmem:[%s40003_s3 + $0x8] sm:$0xff] }
 0xaa0   : > { %21843 = vmatpush1.bf16.msra.mxu1 %v30222_v3  ;;  %v3049_v3 = vrot.slane %v30649_v60, %v31693_v62  ;;  %v30324_v60 = vld [vmem:[%s40004_s4 + $0x14c8] ss:$20 sps:$4 sm:$0xff]  }
 0xaa1   : > { %22253 = vmatpush1.bf16.msra.mxu0 %v30225_v18  ;;  %21844 = vmatprep.subr.bf16.mxu1 %v30230_v47  ;;  %v30279_v18 = vld [vmem:[%s40004_s4 + $0x1390] ss:$20 sps:$4 sm:$0xff]   ;;  %v30284_v47 = vld [vmem:[%s40004_s4 + $0x13b4] ss:$20 sps:$4 sm:$0xff]  }
 0xaa2   : > { %22254 = vmatprep.subr.bf16.mxu0 %v30233_v42  ;;  %v30287_v42 = vld [vmem:[%s40004_s4 + $0x13bc] ss:$20 sps:$4 sm:$0xff]  }
 0xaa4   : > { %21845 = vmatpush1.bf16.msra.mxu1 %v30228_v59  ;;  %v39045_v59 = vld [vmem:[%s40003_s3 + $0x10] sm:$0xf] }
 0xaa5   : > { %22255 = vmatpush1.bf16.msra.mxu0 %v30231_v19  ;;  %21846 = vmatprep.subr.bf16.mxu1 %v30236_v7  ;;  %v3061_v62 = vrot.slane %v39045_v59, %v31064_v50  ;;  %v30282_v19 = vld [vmem:[%s40004_s4 + $0x13b0] ss:$20 sps:$4 sm:$0xff]   ;;  %v26015_v7 = vadd.f32 %v36776_v25, %v3049_v3  ;;  %v30288_v25 = vld [vmem:[%s40004_s4 + $0x13d8] ss:$20 sps:$4 sm:$0xff]  }
 0xaa6   : > { %22256 = vmatprep.subr.bf16.mxu0 %v30239_v14  ;;  %v30285_v14 = vld [vmem:[%s40004_s4 + $0x13b8] ss:$20 sps:$4 sm:$0xff]   ;;  %v30327_v3 = vld [vmem:[%s40004_s4 + $0x14d0] ss:$20 sps:$4 sm:$0xff]  }
 0xaa8   : > { %21847 = vmatpush1.bf16.msra.mxu1 %v30234_v58  ;;  %v30290_v58 = vld [vmem:[%s40004_s4 + $0x13dc] ss:$20 sps:$4 sm:$0xff]  }
 0xaa9   : > { %22257 = vmatpush1.bf16.msra.mxu0 %v30237_v31  ;;  %21848 = vmatprep.subr.bf16.mxu1 %v30242_v22  ;;  %v30293_v31 = vld [vmem:[%s40004_s4 + $0x13e4] ss:$20 sps:$4 sm:$0xff]   ;;  %v26018_v22 = vadd.f32 %v38105_v20, %v3061_v62  ;;  %v30299_v20 = vld [vmem:[%s40004_s4 + $0x140c] ss:$20 sps:$4 sm:$0xff]  }
 0xaaa   : > { %22258 = vmatprep.subr.bf16.mxu0 %v30245_v40  ;;  %v16374_v40 = vmax.f32 %v26015_v7, 0.0  ;;  %v30333_v62 = vld [vmem:[%s40004_s4 + $0x14f8] ss:$20 sps:$4 sm:$0xff]  }
 0xaab   : > { %v30341_v7 = vld [vmem:[%s40004_s4 + $0x1524] ss:$20 sps:$4 sm:$0xff]  }
 0xaac   : > { %21849 = vmatpush1.bf16.msra.mxu1 %v30240_v11  ;;  %v30291_v11 = vld [vmem:[%s40004_s4 + $0x13e0] ss:$20 sps:$4 sm:$0xff]  }
 0xaad   : > { %22259 = vmatpush1.bf16.msra.mxu0 %v30243_v10  ;;  %21850 = vmatprep.subr.bf16.mxu1 %v30248_v24  ;;  %v30296_v10 = vld [vmem:[%s40004_s4 + $0x1404] ss:$20 sps:$4 sm:$0xff]   ;;  %v16377_v24 = vmax.f32 %v26018_v22, 0.0  ;;  %v30347_v22 = vld [vmem:[%s40004_s4 + $0x154c] ss:$20 sps:$4 sm:$0xff]  }
 0xaae   : > { %22260 = vmatprep.subr.bf16.mxu0 %v30251_v9  ;;  %v30294_v9 = vld [vmem:[%s40004_s4 + $0x1400] ss:$20 sps:$4 sm:$0xff]  }
 0xab0   : > { %21851 = vmatpush1.bf16.msra.mxu1 %v30246_v21  ;;  %v39078_v21 = vpack.c.bf16 %v16374_v40, %v16374_v40  ;;  %v30345_v40 = vld [vmem:[%s40004_s4 + $0x1548] ss:$20 sps:$4 sm:$0xff]  }
 0xab1   : > { %22261 = vmatpush1.bf16.msra.mxu0 %v30249_v55  ;;  %21852 = vmatprep.subr.bf16.mxu1 %v30254_v29  ;;  %v30297_v55 = vld [vmem:[%s40004_s4 + $0x1408] ss:$20 sps:$4 sm:$0xff]   ;;  %v30302_v29 = vld [vmem:[%s40004_s4 + $0x142c] ss:$20 sps:$4 sm:$0xff]  }
 0xab2   : > { %22262 = vmatprep.subr.bf16.mxu0 %v30257_v43  ;;  %v39086_v43 = vpack.c.bf16 %v16377_v24, %v16377_v24  ;;  %v30351_v24 = vld [vmem:[%s40004_s4 + $0x1570] ss:$20 sps:$4 sm:$0xff]  }
 0xab4   : > { %21853 = vmatpush1.bf16.msra.mxu1 %v30252_v28  ;;  %v30305_v28 = vld [vmem:[%s40004_s4 + $0x1434] ss:$20 sps:$4 sm:$0xff]  }
 0xab5   : > { %22263 = vmatpush1.bf16.msra.mxu0 %v30255_v32  ;;  %21854 = vmatprep.subr.bf16.mxu1 %v30260_v8  ;;  %v30300_v32 = vld [vmem:[%s40004_s4 + $0x1428] ss:$20 sps:$4 sm:$0xff]   ;;  %v30303_v8 = vld [vmem:[%s40004_s4 + $0x1430] ss:$20 sps:$4 sm:$0xff]  }
 0xab6   : > { %22264 = vmatprep.subr.bf16.mxu0 %v30263_v5  ;;  %v30308_v5 = vld [vmem:[%s40004_s4 + $0x1454] ss:$20 sps:$4 sm:$0xff]  }
 0xab8   : > { %21855 = vmatpush1.bf16.msra.mxu1 %v30258_v51  ;;  %v30311_v51 = vld [vmem:[%s40004_s4 + $0x145c] ss:$20 sps:$4 sm:$0xff]  }
 0xab9   : > { %22265 = vmatpush1.bf16.msra.mxu0 %v30261_v41  ;;  %21856 = vmatprep.subr.bf16.mxu1 %v30266_v36  ;;  %v30306_v41 = vld [vmem:[%s40004_s4 + $0x1450] ss:$20 sps:$4 sm:$0xff]   ;;  %v30309_v36 = vld [vmem:[%s40004_s4 + $0x1458] ss:$20 sps:$4 sm:$0xff]  }
 0xaba   : > { %22266 = vmatprep.subr.bf16.mxu0 %v30269_v17  ;;  %v30314_v17 = vld [vmem:[%s40004_s4 + $0x147c] ss:$20 sps:$4 sm:$0xff]  }
 0xabc   : > { %21857 = vmatpush1.bf16.msra.mxu1 %v30264_v12  ;;  %v30317_v12 = vld [vmem:[%s40004_s4 + $0x1484] ss:$20 sps:$4 sm:$0xff]  }
 0xabd   : > { %22267 = vmatpush1.bf16.msra.mxu0 %v30267_v56  ;;  %21858 = vmatprep.subr.bf16.mxu1 %v30272_v13  ;;  %v30312_v56 = vld [vmem:[%s40004_s4 + $0x1478] ss:$20 sps:$4 sm:$0xff]   ;;  %v30315_v13 = vld [vmem:[%s40004_s4 + $0x1480] ss:$20 sps:$4 sm:$0xff]  }
 0xabe   : > { %22268 = vmatprep.subr.bf16.mxu0 %v30275_v1  ;;  %v30320_v1 = vld [vmem:[%s40004_s4 + $0x14a4] ss:$20 sps:$4 sm:$0xff]  }
 0xac0   : > { %21859 = vmatpush1.bf16.msra.mxu1 %v30270_v39  ;;  %v30323_v39 = vld [vmem:[%s40004_s4 + $0x14ac] ss:$20 sps:$4 sm:$0xff]  }
 0xac1   : > { %22269 = vmatpush1.bf16.msra.mxu0 %v30273_v45  ;;  %21860 = vmatprep.subr.bf16.mxu1 %v30278_v52  ;;  %v30318_v45 = vld [vmem:[%s40004_s4 + $0x14a0] ss:$20 sps:$4 sm:$0xff]   ;;  %v30321_v52 = vld [vmem:[%s40004_s4 + $0x14a8] ss:$20 sps:$4 sm:$0xff]  }
 0xac2   : > { %22270 = vmatprep.subr.bf16.mxu0 %v30281_v61  ;;  %v30326_v61 = vld [vmem:[%s40004_s4 + $0x14cc] ss:$20 sps:$4 sm:$0xff]  }
 0xac4   : > { %21861 = vmatpush1.bf16.msra.mxu1 %v30276_v0  ;;  %v30329_v0 = vld [vmem:[%s40004_s4 + $0x14d4] ss:$20 sps:$4 sm:$0xff]  }
 0xac5   : > { %22271 = vmatpush1.bf16.msra.mxu0 %v30279_v18  ;;  %21862 = vmatprep.subr.bf16.mxu1 %v30284_v47  ;;  %v30332_v18 = vld [vmem:[%s40004_s4 + $0x14f4] ss:$20 sps:$4 sm:$0xff]   ;;  %v30335_v47 = vld [vmem:[%s40004_s4 + $0x14fc] ss:$20 sps:$4 sm:$0xff]  }
 0xac6   : > { %22272 = vmatprep.subr.bf16.mxu0 %v30287_v42  ;;  %v30330_v42 = vld [vmem:[%s40004_s4 + $0x14f0] ss:$20 sps:$4 sm:$0xff]  }
 0xac8   : > { %21863 = vmatpush1.bf16.msra.mxu1 %v30282_v19  ;;  %v30338_v19 = vld [vmem:[%s40004_s4 + $0x151c] ss:$20 sps:$4 sm:$0xff]  }
 0xac9   : > { %22273 = vmatpush1.bf16.msra.mxu0 %v30285_v14  ;;  %21864 = vmatprep.subr.bf16.mxu1 %v30290_v58  ;;  %v30336_v14 = vld [vmem:[%s40004_s4 + $0x1518] ss:$20 sps:$4 sm:$0xff]   ;;  %v30339_v58 = vld [vmem:[%s40004_s4 + $0x1520] ss:$20 sps:$4 sm:$0xff]  }
 0xaca   : > { %22274 = vmatprep.subr.bf16.mxu0 %v30293_v31  ;;  %v30344_v31 = vld [vmem:[%s40004_s4 + $0x1544] ss:$20 sps:$4 sm:$0xff]  }
 0xacc   : > { %21865 = vmatpush1.bf16.msra.mxu1 %v30288_v25  ;;  %v30342_v25 = vld [vmem:[%s40004_s4 + $0x1540] ss:$20 sps:$4 sm:$0xff]  }
 0xacd   : > { %22275 = vmatpush1.bf16.msra.mxu0 %v30291_v11  ;;  %21875 = vmatprep.subr.bf16.mxu1 %v30296_v10  ;;  %v30350_v11 = vld [vmem:[%s40004_s4 + $0x156c] ss:$20 sps:$4 sm:$0xff]   ;;  %v30353_v10 = vld [vmem:[%s40004_s4 + $0x1574] ss:$20 sps:$4 sm:$0xff]  }
 0xace   : > { %22285 = vmatprep.subr.bf16.mxu0 %v30299_v20  ;;  %v30348_v20 = vld [vmem:[%s40004_s4 + $0x1568] ss:$20 sps:$4 sm:$0xff]  }
 0xacf   : > { %21867 = vmatmul.mubr.bf16.vlgmr.msra.gmra.mrb[32].mxu1 %v39078_v21 }
 0xad0   : > { %22277 = vmatmul.mubr.bf16.vlgmr.msra.gmra.mrb[36].mxu0 %v39078_v21  ;;  %21876 = vmatpush1.bf16.msra.mxu1 %v30294_v9  ;;  %v30356_v9 = vld [vmem:[%s40004_s4 + $0x1594] ss:$20 sps:$4 sm:$0xff]  }
 0xad1   : > { %21907 = vmatprep.mubr.bf16.mxu1 %v39086_v43  ;;  %22286 = vmatpush1.bf16.msra.mxu0 %v30297_v55  ;;  %v30359_v55 = vld [vmem:[%s40004_s4 + $0x159c] ss:$20 sps:$4 sm:$0xff]  }
 0xad2   : > { %22317 = vmatprep.mubr.bf16.mxu0 %v39086_v43  ;;  %21877 = vmatprep.subr.bf16.mxu1 %v30302_v29  ;;  %v30354_v29 = vld [vmem:[%s40004_s4 + $0x1590] ss:$20 sps:$4 sm:$0xff]  }
 0xad3   : > { %22287 = vmatprep.subr.bf16.mxu0 %v30305_v28  ;;  %v30357_v28 = vld [vmem:[%s40004_s4 + $0x1598] ss:$20 sps:$4 sm:$0xff]  }
 0xad4   : > { %21878 = vmatpush1.bf16.msra.mxu1 %v30300_v32  ;;  %v30362_v32 = vld [vmem:[%s40004_s4 + $0x15bc] ss:$20 sps:$4 sm:$0xff]  }
 0xad5   : > { %22288 = vmatpush1.bf16.msra.mxu0 %v30303_v8  ;;  %21879 = vmatprep.subr.bf16.mxu1 %v30308_v5  ;;  %v30365_v8 = vld [vmem:[%s40004_s4 + $0x15c4] ss:$20 sps:$4 sm:$0xff]  }
 0xad6   : > { %22289 = vmatprep.subr.bf16.mxu0 %v30311_v51  ;;  %v30360_v5 = vld [vmem:[%s40004_s4 + $0x15b8] ss:$20 sps:$4 sm:$0xff]   ;;  %v30363_v51 = vld [vmem:[%s40004_s4 + $0x15c0] ss:$20 sps:$4 sm:$0xff]  }
 0xad8   : > { %21880 = vmatpush1.bf16.msra.mxu1 %v30306_v41  ;;  %v30368_v41 = vld [vmem:[%s40004_s4 + $0x15e4] ss:$20 sps:$4 sm:$0xff]  }
 0xad9   : > { %22290 = vmatpush1.bf16.msra.mxu0 %v30309_v36  ;;  %21881 = vmatprep.subr.bf16.mxu1 %v30314_v17  ;;  %v30371_v36 = vld [vmem:[%s40004_s4 + $0x15ec] ss:$20 sps:$4 sm:$0xff]  }
 0xada   : > { %22291 = vmatprep.subr.bf16.mxu0 %v30317_v12  ;;  %v30366_v17 = vld [vmem:[%s40004_s4 + $0x15e0] ss:$20 sps:$4 sm:$0xff]   ;;  %v30369_v12 = vld [vmem:[%s40004_s4 + $0x15e8] ss:$20 sps:$4 sm:$0xff]  }
 0xadc   : > { %21882 = vmatpush1.bf16.msra.mxu1 %v30312_v56  ;;  %v30374_v56 = vld [vmem:[%s40004_s4 + $0x160c] ss:$20 sps:$4 sm:$0xff]  }
 0xadd   : > { %22292 = vmatpush1.bf16.msra.mxu0 %v30315_v13  ;;  %21883 = vmatprep.subr.bf16.mxu1 %v30320_v1  ;;  %v30377_v13 = vld [vmem:[%s40004_s4 + $0x1614] ss:$20 sps:$4 sm:$0xff]  }
 0xade   : > { %22293 = vmatprep.subr.bf16.mxu0 %v30323_v39  ;;  %v30372_v1 = vld [vmem:[%s40004_s4 + $0x1608] ss:$20 sps:$4 sm:$0xff]   ;;  %v3057_v39 = vrot.slane %v39045_v59, %v31056_v48  ;;  %v30378_v59 = vld [vmem:[%s40004_s4 + $0x1630] ss:$20 sps:$4 sm:$0xff]  }
 0xae0   : > { %21884 = vmatpush1.bf16.msra.mxu1 %v30318_v45  ;;  %v30375_v45 = vld [vmem:[%s40004_s4 + $0x1610] ss:$20 sps:$4 sm:$0xff]  }
 0xae1   : > { %22294 = vmatpush1.bf16.msra.mxu0 %v30321_v52  ;;  %21885 = vmatprep.subr.bf16.mxu1 %v30326_v61  ;;  %v30380_v52 = vld [vmem:[%s40004_s4 + $0x1634] ss:$20 sps:$4 sm:$0xff]   ;;  %v30383_v61 = vld [vmem:[%s40004_s4 + $0x163c] ss:$20 sps:$4 sm:$0xff]  }
 0xae2   : > { %22295 = vmatprep.subr.bf16.mxu0 %v30329_v0  ;;  %v26017_v0 = vadd.f32 %v38100_v15, %v3057_v39  ;;  %v30384_v15 = vld [vmem:[%s40004_s4 + $0x1658] ss:$20 sps:$4 sm:$0xff]   ;;  %v30426_v39 = vld [vmem:[%s40004_s4 + $0x1770] ss:$20 sps:$4 sm:$0xff]  }
 0xae4   : > { %21886 = vmatpush1.bf16.msra.mxu1 %v30324_v60  ;;  %v30381_v60 = vld [vmem:[%s40004_s4 + $0x1638] ss:$20 sps:$4 sm:$0xff]  }
 0xae5   : > { %22296 = vmatpush1.bf16.msra.mxu0 %v30327_v3  ;;  %21887 = vmatprep.subr.bf16.mxu1 %v30332_v18  ;;  %v30386_v3 = vld [vmem:[%s40004_s4 + $0x165c] ss:$20 sps:$4 sm:$0xff]   ;;  %v30389_v18 = vld [vmem:[%s40004_s4 + $0x1664] ss:$20 sps:$4 sm:$0xff]  }
 0xae6   : > { %22297 = vmatprep.subr.bf16.mxu0 %v30335_v47  ;;  %v16376_v47 = vmax.f32 %v26017_v0, 0.0  ;;  %v30435_v0 = vld [vmem:[%s40004_s4 + $0x17a0] ss:$20 sps:$4 sm:$0xff]  }
 0xae8   : > { %21888 = vmatpush1.bf16.msra.mxu1 %v30330_v42  ;;  %v30387_v42 = vld [vmem:[%s40004_s4 + $0x1660] ss:$20 sps:$4 sm:$0xff]  }
 0xae9   : > { %22298 = vmatpush1.bf16.msra.mxu0 %v30333_v62  ;;  %21889 = vmatprep.subr.bf16.mxu1 %v30338_v19  ;;  %v30392_v62 = vld [vmem:[%s40004_s4 + $0x1684] ss:$20 sps:$4 sm:$0xff]   ;;  %v30395_v19 = vld [vmem:[%s40004_s4 + $0x168c] ss:$20 sps:$4 sm:$0xff]  }
 0xaea   : > { %22299 = vmatprep.subr.bf16.mxu0 %v30341_v7  ;;  %v16379_v7 = vmax.f32 %v38112_v46, 0.0  ;;  %v30401_v46 = vld [vmem:[%s40004_s4 + $0x16b4] ss:$20 sps:$4 sm:$0xff]  }
 0xaec   : > { %21890 = vmatpush1.bf16.msra.mxu1 %v30336_v14  ;;  %v30390_v14 = vld [vmem:[%s40004_s4 + $0x1680] ss:$20 sps:$4 sm:$0xff]  }
 0xaed   : > { %22300 = vmatpush1.bf16.msra.mxu0 %v30339_v58  ;;  %21891 = vmatprep.subr.bf16.mxu1 %v30344_v31  ;;  %v39282_v58 = vpack.c.bf16 %v16376_v47, %v16376_v47  ;;  %v30393_v31 = vld [vmem:[%s40004_s4 + $0x1688] ss:$20 sps:$4 sm:$0xff]   ;;  %v30446_v47 = vld [vmem:[%s40004_s4 + $0x17ec] ss:$20 sps:$4 sm:$0xff]  }
 0xaee   : > { %22301 = vmatprep.subr.bf16.mxu0 %v30347_v22  ;;  %v30398_v22 = vld [vmem:[%s40004_s4 + $0x16ac] ss:$20 sps:$4 sm:$0xff]  }
 0xaf0   : > { %21892 = vmatpush1.bf16.msra.mxu1 %v30342_v25  ;;  %v39290_v25 = vpack.c.bf16 %v16379_v7, %v16379_v7  ;;  %v30452_v7 = vld [vmem:[%s40004_s4 + $0x1814] ss:$20 sps:$4 sm:$0xff]  }
 0xaf1   : > { %22302 = vmatpush1.bf16.msra.mxu0 %v30345_v40  ;;  %21893 = vmatprep.subr.bf16.mxu1 %v30350_v11  ;;  %v30396_v40 = vld [vmem:[%s40004_s4 + $0x16a8] ss:$20 sps:$4 sm:$0xff]   ;;  %v30399_v11 = vld [vmem:[%s40004_s4 + $0x16b0] ss:$20 sps:$4 sm:$0xff]  }
 0xaf2   : > { %22303 = vmatprep.subr.bf16.mxu0 %v30353_v10  ;;  %v30404_v10 = vld [vmem:[%s40004_s4 + $0x16d4] ss:$20 sps:$4 sm:$0xff]  }
 0xaf4   : > { %21894 = vmatpush1.bf16.msra.mxu1 %v30348_v20  ;;  %v30407_v20 = vld [vmem:[%s40004_s4 + $0x16dc] ss:$20 sps:$4 sm:$0xff]  }
 0xaf5   : > { %22304 = vmatpush1.bf16.msra.mxu0 %v30351_v24  ;;  %21895 = vmatprep.subr.bf16.mxu1 %v30356_v9  ;;  %v30402_v24 = vld [vmem:[%s40004_s4 + $0x16d0] ss:$20 sps:$4 sm:$0xff]   ;;  %v30405_v9 = vld [vmem:[%s40004_s4 + $0x16d8] ss:$20 sps:$4 sm:$0xff]  }
 0xaf6   : > { %22305 = vmatprep.subr.bf16.mxu0 %v30359_v55  ;;  %v30410_v55 = vld [vmem:[%s40004_s4 + $0x16fc] ss:$20 sps:$4 sm:$0xff]  }
 0xaf8   : > { %21896 = vmatpush1.bf16.msra.mxu1 %v30354_v29  ;;  %v30413_v29 = vld [vmem:[%s40004_s4 + $0x1704] ss:$20 sps:$4 sm:$0xff]  }
 0xaf9   : > { %22306 = vmatpush1.bf16.msra.mxu0 %v30357_v28  ;;  %21897 = vmatprep.subr.bf16.mxu1 %v30362_v32  ;;  %v30408_v28 = vld [vmem:[%s40004_s4 + $0x16f8] ss:$20 sps:$4 sm:$0xff]   ;;  %v30411_v32 = vld [vmem:[%s40004_s4 + $0x1700] ss:$20 sps:$4 sm:$0xff]  }
 0xafa   : > { %22307 = vmatprep.subr.bf16.mxu0 %v30365_v8  ;;  %v30416_v8 = vld [vmem:[%s40004_s4 + $0x1724] ss:$20 sps:$4 sm:$0xff]  }
 0xafc   : > { %21898 = vmatpush1.bf16.msra.mxu1 %v30360_v5  ;;  %v30419_v5 = vld [vmem:[%s40004_s4 + $0x172c] ss:$20 sps:$4 sm:$0xff]  }
 0xafd   : > { %22308 = vmatpush1.bf16.msra.mxu0 %v30363_v51  ;;  %21899 = vmatprep.subr.bf16.mxu1 %v30368_v41  ;;  %v30414_v51 = vld [vmem:[%s40004_s4 + $0x1720] ss:$20 sps:$4 sm:$0xff]   ;;  %v30417_v41 = vld [vmem:[%s40004_s4 + $0x1728] ss:$20 sps:$4 sm:$0xff]  }
 0xafe   : > { %22309 = vmatprep.subr.bf16.mxu0 %v30371_v36  ;;  %v30422_v36 = vld [vmem:[%s40004_s4 + $0x174c] ss:$20 sps:$4 sm:$0xff]  }
 0xb00   : > { %21900 = vmatpush1.bf16.msra.mxu1 %v30366_v17  ;;  %v30425_v17 = vld [vmem:[%s40004_s4 + $0x1754] ss:$20 sps:$4 sm:$0xff]  }
 0xb01   : > { %22310 = vmatpush1.bf16.msra.mxu0 %v30369_v12  ;;  %21901 = vmatprep.subr.bf16.mxu1 %v30374_v56  ;;  %v30420_v12 = vld [vmem:[%s40004_s4 + $0x1748] ss:$20 sps:$4 sm:$0xff]   ;;  %v30423_v56 = vld [vmem:[%s40004_s4 + $0x1750] ss:$20 sps:$4 sm:$0xff]  }
 0xb02   : > { %22311 = vmatprep.subr.bf16.mxu0 %v30377_v13  ;;  %v30428_v13 = vld [vmem:[%s40004_s4 + $0x1774] ss:$20 sps:$4 sm:$0xff]  }
 0xb04   : > { %21902 = vmatpush1.bf16.msra.mxu1 %v30372_v1  ;;  %v30431_v1 = vld [vmem:[%s40004_s4 + $0x177c] ss:$20 sps:$4 sm:$0xff]  }
 0xb05   : > { %22312 = vmatpush1.bf16.msra.mxu0 %v30375_v45  ;;  %21903 = vmatprep.subr.bf16.mxu1 %v30380_v52  ;;  %v30429_v45 = vld [vmem:[%s40004_s4 + $0x1778] ss:$20 sps:$4 sm:$0xff]   ;;  %v30434_v52 = vld [vmem:[%s40004_s4 + $0x179c] ss:$20 sps:$4 sm:$0xff]  }
 0xb06   : > { %22313 = vmatprep.subr.bf16.mxu0 %v30383_v61  ;;  %v30437_v61 = vld [vmem:[%s40004_s4 + $0x17a4] ss:$20 sps:$4 sm:$0xff]  }
 0xb08   : > { %21904 = vmatpush1.bf16.msra.mxu1 %v30378_v59  ;;  %v30432_v59 = vld [vmem:[%s40004_s4 + $0x1798] ss:$20 sps:$4 sm:$0xff]  }
 0xb09   : > { %22314 = vmatpush1.bf16.msra.mxu0 %v30381_v60  ;;  %21905 = vmatprep.subr.bf16.mxu1 %v30386_v3  ;;  %v30440_v60 = vld [vmem:[%s40004_s4 + $0x17c4] ss:$20 sps:$4 sm:$0xff]   ;;  %v30443_v3 = vld [vmem:[%s40004_s4 + $0x17cc] ss:$20 sps:$4 sm:$0xff]  }
 0xb0a   : > { %22315 = vmatprep.subr.bf16.mxu0 %v30389_v18  ;;  %v30438_v18 = vld [vmem:[%s40004_s4 + $0x17c0] ss:$20 sps:$4 sm:$0xff]  }
 0xb0c   : > { %21906 = vmatpush1.bf16.msra.mxu1 %v30384_v15  ;;  %v30441_v15 = vld [vmem:[%s40004_s4 + $0x17c8] ss:$20 sps:$4 sm:$0xff]  }
 0xb0d   : > { %22316 = vmatpush1.bf16.msra.mxu0 %v30387_v42  ;;  %21916 = vmatprep.subr.bf16.mxu1 %v30392_v62  ;;  %v30449_v42 = vld [vmem:[%s40004_s4 + $0x17f4] ss:$20 sps:$4 sm:$0xff]  }
 0xb0e   : > { %22326 = vmatprep.subr.bf16.mxu0 %v30395_v19  ;;  %v30444_v62 = vld [vmem:[%s40004_s4 + $0x17e8] ss:$20 sps:$4 sm:$0xff]   ;;  %v30447_v19 = vld [vmem:[%s40004_s4 + $0x17f0] ss:$20 sps:$4 sm:$0xff]  }
 0xb0f   : > { %21908 = vmatmul.mubr.bf16.vlgmr.msra.gmra.mrb[32].mxu1 %v39282_v58 }
 0xb10   : > { %22318 = vmatmul.mubr.bf16.vlgmr.msra.gmra.mrb[36].mxu0 %v39282_v58  ;;  %21917 = vmatpush1.bf16.msra.mxu1 %v30390_v14  ;;  %v30455_v14 = vld [vmem:[%s40004_s4 + $0x181c] ss:$20 sps:$4 sm:$0xff]  }
 0xb11   : > { %21948 = vmatprep.mubr.bf16.mxu1 %v39290_v25  ;;  %22327 = vmatpush1.bf16.msra.mxu0 %v30393_v31  ;;  %v30450_v31 = vld [vmem:[%s40004_s4 + $0x1810] ss:$20 sps:$4 sm:$0xff]  }
 0xb12   : > { %22358 = vmatprep.mubr.bf16.mxu0 %v39290_v25  ;;  %21918 = vmatprep.subr.bf16.mxu1 %v30398_v22  ;;  %v30453_v22 = vld [vmem:[%s40004_s4 + $0x1818] ss:$20 sps:$4 sm:$0xff]  }
 0xb13   : > { %22328 = vmatprep.subr.bf16.mxu0 %v30401_v46  ;;  %v30458_v46 = vld [vmem:[%s40004_s4 + $0x183c] ss:$20 sps:$4 sm:$0xff]  }
 0xb14   : > { %21919 = vmatpush1.bf16.msra.mxu1 %v30396_v40  ;;  %v30461_v40 = vld [vmem:[%s40004_s4 + $0x1844] ss:$20 sps:$4 sm:$0xff]  }
 0xb15   : > { %22329 = vmatpush1.bf16.msra.mxu0 %v30399_v11  ;;  %21920 = vmatprep.subr.bf16.mxu1 %v30404_v10  ;;  %v30456_v11 = vld [vmem:[%s40004_s4 + $0x1838] ss:$20 sps:$4 sm:$0xff]   ;;  %v30459_v10 = vld [vmem:[%s40004_s4 + $0x1840] ss:$20 sps:$4 sm:$0xff]  }
 0xb16   : > { %22330 = vmatprep.subr.bf16.mxu0 %v30407_v20  ;;  %v30464_v20 = vld [vmem:[%s40004_s4 + $0x1864] ss:$20 sps:$4 sm:$0xff]  }
 0xb18   : > { %21921 = vmatpush1.bf16.msra.mxu1 %v30402_v24  ;;  %v30467_v24 = vld [vmem:[%s40004_s4 + $0x186c] ss:$20 sps:$4 sm:$0xff]  }
 0xb19   : > { %22331 = vmatpush1.bf16.msra.mxu0 %v30405_v9  ;;  %21922 = vmatprep.subr.bf16.mxu1 %v30410_v55  ;;  %v30462_v9 = vld [vmem:[%s40004_s4 + $0x1860] ss:$20 sps:$4 sm:$0xff]   ;;  %v30465_v55 = vld [vmem:[%s40004_s4 + $0x1868] ss:$20 sps:$4 sm:$0xff]  }
 0xb1a   : > { %22332 = vmatprep.subr.bf16.mxu0 %v30413_v29  ;;  %v30470_v29 = vld [vmem:[%s40004_s4 + $0x188c] ss:$20 sps:$4 sm:$0xff]  }
 0xb1c   : > { %21923 = vmatpush1.bf16.msra.mxu1 %v30408_v28  ;;  %v30473_v28 = vld [vmem:[%s40004_s4 + $0x1894] ss:$20 sps:$4 sm:$0xff]  }
 0xb1d   : > { %22333 = vmatpush1.bf16.msra.mxu0 %v30411_v32  ;;  %21924 = vmatprep.subr.bf16.mxu1 %v30416_v8  ;;  %v30468_v32 = vld [vmem:[%s40004_s4 + $0x1888] ss:$20 sps:$4 sm:$0xff]   ;;  %v30471_v8 = vld [vmem:[%s40004_s4 + $0x1890] ss:$20 sps:$4 sm:$0xff]  }
 0xb1e   : > { %22334 = vmatprep.subr.bf16.mxu0 %v30419_v5  ;;  %v30476_v5 = vld [vmem:[%s40004_s4 + $0x18b4] ss:$20 sps:$4 sm:$0xff]  }
 0xb20   : > { %21925 = vmatpush1.bf16.msra.mxu1 %v30414_v51  ;;  %v30479_v51 = vld [vmem:[%s40004_s4 + $0x18bc] ss:$20 sps:$4 sm:$0xff]  }
 0xb21   : > { %22335 = vmatpush1.bf16.msra.mxu0 %v30417_v41  ;;  %21926 = vmatprep.subr.bf16.mxu1 %v30422_v36  ;;  %v30474_v41 = vld [vmem:[%s40004_s4 + $0x18b0] ss:$20 sps:$4 sm:$0xff]   ;;  %v30477_v36 = vld [vmem:[%s40004_s4 + $0x18b8] ss:$20 sps:$4 sm:$0xff]  }
 0xb22   : > { %22336 = vmatprep.subr.bf16.mxu0 %v30425_v17  ;;  %v30482_v17 = vld [vmem:[%s40004_s4 + $0x18dc] ss:$20 sps:$4 sm:$0xff]  }
 0xb24   : > { %21927 = vmatpush1.bf16.msra.mxu1 %v30420_v12  ;;  %v30485_v12 = vld [vmem:[%s40004_s4 + $0x18e4] ss:$20 sps:$4 sm:$0xff]  }
 0xb25   : > { %22337 = vmatpush1.bf16.msra.mxu0 %v30423_v56  ;;  %21928 = vmatprep.subr.bf16.mxu1 %v30428_v13  ;;  %v30480_v56 = vld [vmem:[%s40004_s4 + $0x18d8] ss:$20 sps:$4 sm:$0xff]   ;;  %v16378_v13 = vmax.f32 %v38107_v4, 0.0  ;;  %v30488_v4 = vld [vmem:[%s40004_s4 + $0x10] ss:$20 sps:$4 sm:$0xff]  }
 0xb26   : > { %22338 = vmatprep.subr.bf16.mxu0 %v30431_v1  ;;  %v30483_v1 = vld [vmem:[%s40004_s4 + $0x18e0] ss:$20 sps:$4 sm:$0xff]  }
 0xb28   : > { %21929 = vmatpush1.bf16.msra.mxu1 %v30426_v39  ;;  %v30486_v39 = vld [vmem:[%s40004_s4 + $0x150] ss:$20 sps:$4 sm:$0xff]  }
 0xb29   : > { %22339 = vmatpush1.bf16.msra.mxu0 %v30429_v45  ;;  %21930 = vmatprep.subr.bf16.mxu1 %v30434_v52  ;;  %v30487_v45 = vld [vmem:[%s40004_s4 + $0x3d0] ss:$20 sps:$4 sm:$0xff]   ;;  %v39483_v52 = vpack.c.bf16 %v16378_v13, %v16378_v13  ;;  %v30525_v13 = vld [vmem:[%s40004_s4 + $0x7b8] ss:$20 sps:$4 sm:$0xff]  }
 0xb2a   : > { %22340 = vmatprep.subr.bf16.mxu0 %v30437_v61  ;;  %v30489_v61 = vld [vmem:[%s40004_s4 + $0x290] ss:$20 sps:$4 sm:$0xff]  }
 0xb2c   : > { %21931 = vmatpush1.bf16.msra.mxu1 %v30432_v59  ;;  %v30490_v59 = vld [vmem:[%s40004_s4 + $0x178] ss:$20 sps:$4 sm:$0xff]  }
 0xb2d   : > { %22341 = vmatpush1.bf16.msra.mxu0 %v30435_v0  ;;  %21932 = vmatprep.subr.bf16.mxu1 %v30440_v60  ;;  %v30491_v0 = vld [vmem:[%s40004_s4 + $0x3f8] ss:$20 sps:$4 sm:$0xff]  }
 0xb2e   : > { %22342 = vmatprep.subr.bf16.mxu0 %v30443_v3  ;;  %v30492_v60 = vld [vmem:[%s40004_s4 + $0x38] ss:$20 sps:$4 sm:$0xff]  }
 0xb2f   : > { %v30493_v3 = vld [vmem:[%s40004_s4 + $0x2b8] ss:$20 sps:$4 sm:$0xff]  }
 0xb30   : > { %21933 = vmatpush1.bf16.msra.mxu1 %v30438_v18  ;;  %v30494_v18 = vld [vmem:[%s40004_s4 + $0x1a0] ss:$20 sps:$4 sm:$0xff]  }
 0xb31   : > { %22343 = vmatpush1.bf16.msra.mxu0 %v30441_v15  ;;  %21934 = vmatprep.subr.bf16.mxu1 %v30446_v47  ;;  %v30495_v15 = vld [vmem:[%s40004_s4 + $0x420] ss:$20 sps:$4 sm:$0xff]  }
 0xb32   : > { %22344 = vmatprep.subr.bf16.mxu0 %v30449_v42  ;;  %v30497_v47 = vld [vmem:[%s40004_s4 + $0x2e0] ss:$20 sps:$4 sm:$0xff]   ;;  %v30499_v42 = vld [vmem:[%s40004_s4 + $0x448] ss:$20 sps:$4 sm:$0xff]  }
 0xb34   : > { %21935 = vmatpush1.bf16.msra.mxu1 %v30444_v62  ;;  %v30500_v62 = vld [vmem:[%s40004_s4 + $0x88] ss:$20 sps:$4 sm:$0xff]  }
 0xb35   : > { %22345 = vmatpush1.bf16.msra.mxu0 %v30447_v19  ;;  %21936 = vmatprep.subr.bf16.mxu1 %v30452_v7  ;;  %v30501_v19 = vld [vmem:[%s40004_s4 + $0x308] ss:$20 sps:$4 sm:$0xff]   ;;  %v30502_v7 = vld [vmem:[%s40004_s4 + $0x1f0] ss:$20 sps:$4 sm:$0xff]  }
 0xb36   : > { %22346 = vmatprep.subr.bf16.mxu0 %v30455_v14  ;;  %v30503_v14 = vld [vmem:[%s40004_s4 + $0x470] ss:$20 sps:$4 sm:$0xff]  }
 0xb38   : > { %21937 = vmatpush1.bf16.msra.mxu1 %v30450_v31  ;;  %v30504_v31 = vld [vmem:[%s40004_s4 + $0xb0] ss:$20 sps:$4 sm:$0xff]  }
 0xb39   : > { %22347 = vmatpush1.bf16.msra.mxu0 %v30453_v22  ;;  %21938 = vmatprep.subr.bf16.mxu1 %v30458_v46  ;;  %v30505_v22 = vld [vmem:[%s40004_s4 + $0x330] ss:$20 sps:$4 sm:$0xff]   ;;  %v30506_v46 = vld [vmem:[%s40004_s4 + $0x218] ss:$20 sps:$4 sm:$0xff]  }
 0xb3a   : > { %22348 = vmatprep.subr.bf16.mxu0 %v30461_v40  ;;  %v30507_v40 = vld [vmem:[%s40004_s4 + $0x498] ss:$20 sps:$4 sm:$0xff]  }
 0xb3c   : > { %21939 = vmatpush1.bf16.msra.mxu1 %v30456_v11  ;;  %v30508_v11 = vld [vmem:[%s40004_s4 + $0xd8] ss:$20 sps:$4 sm:$0xff]  }
 0xb3d   : > { %22349 = vmatpush1.bf16.msra.mxu0 %v30459_v10  ;;  %21940 = vmatprep.subr.bf16.mxu1 %v30464_v20  ;;  %v30509_v10 = vld [vmem:[%s40004_s4 + $0x358] ss:$20 sps:$4 sm:$0xff]   ;;  %v30510_v20 = vld [vmem:[%s40004_s4 + $0x240] ss:$20 sps:$4 sm:$0xff]  }
 0xb3e   : > { %22350 = vmatprep.subr.bf16.mxu0 %v30467_v24  ;;  %v30511_v24 = vld [vmem:[%s40004_s4 + $0x4c0] ss:$20 sps:$4 sm:$0xff]  }
 0xb40   : > { %21941 = vmatpush1.bf16.msra.mxu1 %v30462_v9  ;;  %v30512_v9 = vld [vmem:[%s40004_s4 + $0x100] ss:$20 sps:$4 sm:$0xff]  }
 0xb41   : > { %22351 = vmatpush1.bf16.msra.mxu0 %v30465_v55  ;;  %21942 = vmatprep.subr.bf16.mxu1 %v30470_v29  ;;  %v30513_v55 = vld [vmem:[%s40004_s4 + $0x380] ss:$20 sps:$4 sm:$0xff]   ;;  %v30514_v29 = vld [vmem:[%s40004_s4 + $0x268] ss:$20 sps:$4 sm:$0xff]  }
 0xb42   : > { %22352 = vmatprep.subr.bf16.mxu0 %v30473_v28  ;;  %v30515_v28 = vld [vmem:[%s40004_s4 + $0x4e8] ss:$20 sps:$4 sm:$0xff]  }
 0xb44   : > { %21943 = vmatpush1.bf16.msra.mxu1 %v30468_v32  ;;  %v30516_v32 = vld [vmem:[%s40004_s4 + $0x128] ss:$20 sps:$4 sm:$0xff]  }
 0xb45   : > { %22353 = vmatpush1.bf16.msra.mxu0 %v30471_v8  ;;  %21944 = vmatprep.subr.bf16.mxu1 %v30476_v5  ;;  %v30517_v8 = vld [vmem:[%s40004_s4 + $0x3a8] ss:$20 sps:$4 sm:$0xff]   ;;  %v30518_v5 = vld [vmem:[%s40004_s4 + $0x650] ss:$20 sps:$4 sm:$0xff]  }
 0xb46   : > { %22354 = vmatprep.subr.bf16.mxu0 %v30479_v51  ;;  %v30519_v51 = vld [vmem:[%s40004_s4 + $0x8d0] ss:$20 sps:$4 sm:$0xff]  }
 0xb48   : > { %21945 = vmatpush1.bf16.msra.mxu1 %v30474_v41  ;;  %v30520_v41 = vld [vmem:[%s40004_s4 + $0x510] ss:$20 sps:$4 sm:$0xff]  }
 0xb49   : > { %22355 = vmatpush1.bf16.msra.mxu0 %v30477_v36  ;;  %21946 = vmatprep.subr.bf16.mxu1 %v30482_v17  ;;  %v30521_v36 = vld [vmem:[%s40004_s4 + $0x790] ss:$20 sps:$4 sm:$0xff]   ;;  %v30522_v17 = vld [vmem:[%s40004_s4 + $0x678] ss:$20 sps:$4 sm:$0xff]  }
 0xb4a   : > { %22356 = vmatprep.subr.bf16.mxu0 %v30485_v12  ;;  %v30523_v12 = vld [vmem:[%s40004_s4 + $0x8f8] ss:$20 sps:$4 sm:$0xff]  }
 0xb4c   : > { %21947 = vmatpush1.bf16.msra.mxu1 %v30480_v56  ;;  %v30524_v56 = vld [vmem:[%s40004_s4 + $0x538] ss:$20 sps:$4 sm:$0xff]  }
 0xb4d   : > { %22357 = vmatpush1.bf16.msra.mxu0 %v30483_v1  ;;  %25771 = vmatprep.subr.bf16.mxu1 %v30486_v39  ;;  %v30529_v1 = vld [vmem:[%s40004_s4 + $0x7e0] ss:$20 sps:$4 sm:$0xff]   ;;  %v30531_v39 = vld [vmem:[%s40004_s4 + $0x948] ss:$20 sps:$4 sm:$0xff]  }
 0xb4e   : > { %25793 = vmatprep.subr.bf16.mxu0 %v30487_v45  ;;  %v30532_v45 = vld [vmem:[%s40004_s4 + $0x588] ss:$20 sps:$4 sm:$0xff]  }
 0xb4f   : > { %21949 = vmatmul.mubr.bf16.vlgmr.msra.gmra.mrb[32].mxu1 %v39483_v52 }
 0xb50   : > { %22359 = vmatmul.mubr.bf16.vlgmr.msra.gmra.mrb[36].mxu0 %v39483_v52  ;;  %25772 = vmatpush3.bf16.msra.mxu1 %v30488_v4  ;;  %v30533_v4 = vld [vmem:[%s40004_s4 + $0x808] ss:$20 sps:$4 sm:$0xff]  }
 0xb51   : > { %22399 = vmatprep.mubr.bf16.mxu1 %v37411_v16  ;;  %25794 = vmatpush3.bf16.msra.mxu0 %v30489_v61  ;;  %v30496_v16 = vld [vmem:[%s40004_s4 + $0x60] ss:$20 sps:$4 sm:$0xff]   ;;  %v30534_v61 = vld [vmem:[%s40004_s4 + $0x6f0] ss:$20 sps:$4 sm:$0xff]  }
 0xb52   : > { %22439 = vmatprep.mubr.bf16.mxu0 %v37617_v35  ;;  %25773 = vmatprep.subr.bf16.mxu1 %v30490_v59  ;;  %v30498_v35 = vld [vmem:[%s40004_s4 + $0x1c8] ss:$20 sps:$4 sm:$0xff]   ;;  %v30535_v59 = vld [vmem:[%s40004_s4 + $0x970] ss:$20 sps:$4 sm:$0xff]  }
 0xb53   : > { %25795 = vmatprep.subr.bf16.mxu0 %v30491_v0  ;;  %v30536_v0 = vld [vmem:[%s40004_s4 + $0x5b0] ss:$20 sps:$4 sm:$0xff]  }
 0xb54   : > { %25774 = vmatpush3.bf16.msra.mxu1 %v30492_v60  ;;  %v30537_v60 = vld [vmem:[%s40004_s4 + $0x830] ss:$20 sps:$4 sm:$0xff]  }
 0xb55   : > { %25796 = vmatpush3.bf16.msra.mxu0 %v30493_v3  ;;  %25775 = vmatprep.subr.bf16.mxu1 %v30494_v18  ;;  %v30538_v3 = vld [vmem:[%s40004_s4 + $0x718] ss:$20 sps:$4 sm:$0xff]  }
 0xb56   : > { %25797 = vmatprep.subr.bf16.mxu0 %v30495_v15  ;;  %v30539_v18 = vld [vmem:[%s40004_s4 + $0x998] ss:$20 sps:$4 sm:$0xff]  }
 0xb57   : > { %v30540_v15 = vld [vmem:[%s40004_s4 + $0x5d8] ss:$20 sps:$4 sm:$0xff]  }
 0xb58   : > { %25776 = vmatpush3.bf16.msra.mxu1 %v30496_v16  ;;  %v30541_v16 = vld [vmem:[%s40004_s4 + $0x858] ss:$20 sps:$4 sm:$0xff]  }
 0xb59   : > { %25798 = vmatpush3.bf16.msra.mxu0 %v30497_v47  ;;  %25777 = vmatprep.subr.bf16.mxu1 %v30498_v35  ;;  %v30542_v47 = vld [vmem:[%s40004_s4 + $0x740] ss:$20 sps:$4 sm:$0xff]  }
 0xb5a   : > { %25799 = vmatprep.subr.bf16.mxu0 %v30499_v42  ;;  %v30543_v35 = vld [vmem:[%s40004_s4 + $0x9c0] ss:$20 sps:$4 sm:$0xff]  }
 0xb5b   : > { %v30544_v42 = vld [vmem:[%s40004_s4 + $0x600] ss:$20 sps:$4 sm:$0xff]  }
 0xb5c   : > { %25778 = vmatpush3.bf16.msra.mxu1 %v30500_v62  ;;  %v30545_v62 = vld [vmem:[%s40004_s4 + $0x880] ss:$20 sps:$4 sm:$0xff]  }
 0xb5d   : > { %25800 = vmatpush3.bf16.msra.mxu0 %v30501_v19  ;;  %25779 = vmatprep.subr.bf16.mxu1 %v30502_v7  ;;  %v30546_v19 = vld [vmem:[%s40004_s4 + $0x768] ss:$20 sps:$4 sm:$0xff]  }
 0xb5e   : > { %25801 = vmatprep.subr.bf16.mxu0 %v30503_v14  ;;  %v30547_v7 = vld [vmem:[%s40004_s4 + $0x9e8] ss:$20 sps:$4 sm:$0xff]  }
 0xb5f   : > { %v30548_v14 = vld [vmem:[%s40004_s4 + $0x628] ss:$20 sps:$4 sm:$0xff]  }
 0xb60   : > { %25780 = vmatpush3.bf16.msra.mxu1 %v30504_v31  ;;  %v30549_v31 = vld [vmem:[%s40004_s4 + $0x8a8] ss:$20 sps:$4 sm:$0xff]  }
 0xb61   : > { %25802 = vmatpush3.bf16.msra.mxu0 %v30505_v22  ;;  %25781 = vmatprep.subr.bf16.mxu1 %v30506_v46  ;;  %v30550_v22 = vld [vmem:[%s40004_s4 + $0xb50] ss:$20 sps:$4 sm:$0xff]  }
 0xb62   : > { %25803 = vmatprep.subr.bf16.mxu0 %v30507_v40  ;;  %v30551_v46 = vld [vmem:[%s40004_s4 + $0xdd0] ss:$20 sps:$4 sm:$0xff]  }
 0xb63   : > { %v30552_v40 = vld [vmem:[%s40004_s4 + $0xa10] ss:$20 sps:$4 sm:$0xff]  }
 0xb64   : > { %25782 = vmatpush3.bf16.msra.mxu1 %v30508_v11  ;;  %v30553_v11 = vld [vmem:[%s40004_s4 + $0xc90] ss:$20 sps:$4 sm:$0xff]  }
 0xb65   : > { %25804 = vmatpush3.bf16.msra.mxu0 %v30509_v10  ;;  %25783 = vmatprep.subr.bf16.mxu1 %v30510_v20  ;;  %v30554_v10 = vld [vmem:[%s40004_s4 + $0xb78] ss:$20 sps:$4 sm:$0xff]  }
 0xb66   : > { %25805 = vmatprep.subr.bf16.mxu0 %v30511_v24  ;;  %v30555_v20 = vld [vmem:[%s40004_s4 + $0xdf8] ss:$20 sps:$4 sm:$0xff]  }
 0xb67   : > { %v30556_v24 = vld [vmem:[%s40004_s4 + $0xa38] ss:$20 sps:$4 sm:$0xff]  }
 0xb68   : > { %25784 = vmatpush3.bf16.msra.mxu1 %v30512_v9  ;;  %v30557_v9 = vld [vmem:[%s40004_s4 + $0xcb8] ss:$20 sps:$4 sm:$0xff]  }
 0xb69   : > { %25806 = vmatpush3.bf16.msra.mxu0 %v30513_v55  ;;  %25785 = vmatprep.subr.bf16.mxu1 %v30514_v29  ;;  %v30561_v55 = vld [vmem:[%s40004_s4 + $0xce0] ss:$20 sps:$4 sm:$0xff]   ;;  %v30563_v29 = vld [vmem:[%s40004_s4 + $0xe48] ss:$20 sps:$4 sm:$0xff]  }
 0xb6a   : > { %25807 = vmatprep.subr.bf16.mxu0 %v30515_v28  ;;  %v30564_v28 = vld [vmem:[%s40004_s4 + $0xa88] ss:$20 sps:$4 sm:$0xff]  }
 0xb6c   : > { %25786 = vmatpush3.bf16.msra.mxu1 %v30516_v32  ;;  %v30565_v32 = vld [vmem:[%s40004_s4 + $0xd08] ss:$20 sps:$4 sm:$0xff]  }
 0xb6d   : > { %25808 = vmatpush3.bf16.msra.mxu0 %v30517_v8  ;;  %25815 = vmatprep.subr.bf16.mxu1 %v30518_v5  ;;  %v30566_v8 = vld [vmem:[%s40004_s4 + $0xbf0] ss:$20 sps:$4 sm:$0xff]  }
 0xb6e   : > { %25837 = vmatprep.subr.bf16.mxu0 %v30519_v51  ;;  %v30567_v5 = vld [vmem:[%s40004_s4 + $0xe70] ss:$20 sps:$4 sm:$0xff]  }
 0xb6f   : > { %22400 = vmatmul.mubr.bf16.vlgmr.msra.gmra.mrb[36].mxu1 %v37609_v34  ;;  %v30526_v34 = vld [vmem:[%s40004_s4 + $0x6a0] ss:$20 sps:$4 sm:$0xff]   ;;  %v30568_v51 = vld [vmem:[%s40004_s4 + $0xab0] ss:$20 sps:$4 sm:$0xff]  }
 0xb70   : > { %22440 = vmatmul.mubr.bf16.vlgmr.msra.gmra.mrb[40].mxu0 %v37815_v57  ;;  %25816 = vmatpush3.bf16.msra.mxu1 %v30520_v41  ;;  %v30527_v57 = vld [vmem:[%s40004_s4 + $0x920] ss:$20 sps:$4 sm:$0xff]   ;;  %v30569_v41 = vld [vmem:[%s40004_s4 + $0xd30] ss:$20 sps:$4 sm:$0xff]  }
 0xb71   : > { %22479 = vmatprep.mubr.bf16.mxu1 %v37823_v38  ;;  %25838 = vmatpush3.bf16.msra.mxu0 %v30521_v36  ;;  %v30528_v38 = vld [vmem:[%s40004_s4 + $0x560] ss:$20 sps:$4 sm:$0xff]   ;;  %v30570_v36 = vld [vmem:[%s40004_s4 + $0xc18] ss:$20 sps:$4 sm:$0xff]  }
 0xb72   : > { %22519 = vmatprep.mubr.bf16.mxu0 %v38029_v33  ;;  %25817 = vmatprep.subr.bf16.mxu1 %v30522_v17  ;;  %v30530_v33 = vld [vmem:[%s40004_s4 + $0x6c8] ss:$20 sps:$4 sm:$0xff]   ;;  %v30571_v17 = vld [vmem:[%s40004_s4 + $0xe98] ss:$20 sps:$4 sm:$0xff]  }
 0xb73   : > { %25839 = vmatprep.subr.bf16.mxu0 %v30523_v12  ;;  %v30572_v12 = vld [vmem:[%s40004_s4 + $0xad8] ss:$20 sps:$4 sm:$0xff]  }
 0xb74   : > { %25818 = vmatpush3.bf16.msra.mxu1 %v30524_v56  ;;  %v30573_v56 = vld [vmem:[%s40004_s4 + $0xd58] ss:$20 sps:$4 sm:$0xff]  }
 0xb75   : > { %25840 = vmatpush3.bf16.msra.mxu0 %v30525_v13  ;;  %25819 = vmatprep.subr.bf16.mxu1 %v30526_v34  ;;  %v30574_v13 = vld [vmem:[%s40004_s4 + $0xc40] ss:$20 sps:$4 sm:$0xff]  }
 0xb76   : > { %25841 = vmatprep.subr.bf16.mxu0 %v30527_v57  ;;  %v30575_v34 = vld [vmem:[%s40004_s4 + $0xec0] ss:$20 sps:$4 sm:$0xff]  }
 0xb77   : > { %v30576_v57 = vld [vmem:[%s40004_s4 + $0xb00] ss:$20 sps:$4 sm:$0xff]  }
 0xb78   : > { %25820 = vmatpush3.bf16.msra.mxu1 %v30528_v38  ;;  %v30577_v38 = vld [vmem:[%s40004_s4 + $0xd80] ss:$20 sps:$4 sm:$0xff]  }
 0xb79   : > { %25842 = vmatpush3.bf16.msra.mxu0 %v30529_v1  ;;  %25821 = vmatprep.subr.bf16.mxu1 %v30530_v33  ;;  %v30578_v1 = vld [vmem:[%s40004_s4 + $0xc68] ss:$20 sps:$4 sm:$0xff]  }
 0xb7a   : > { %25843 = vmatprep.subr.bf16.mxu0 %v30531_v39  ;;  %v30579_v33 = vld [vmem:[%s40004_s4 + $0xee8] ss:$20 sps:$4 sm:$0xff]  }
 0xb7b   : > { %v30580_v39 = vld [vmem:[%s40004_s4 + $0xb28] ss:$20 sps:$4 sm:$0xff]  }
 0xb7c   : > { %25822 = vmatpush3.bf16.msra.mxu1 %v30532_v45  ;;  %v30581_v45 = vld [vmem:[%s40004_s4 + $0xda8] ss:$20 sps:$4 sm:$0xff]  }
 0xb7d   : > { %25844 = vmatpush3.bf16.msra.mxu0 %v30533_v4  ;;  %25823 = vmatprep.subr.bf16.mxu1 %v30534_v61  ;;  %v30582_v4 = vld [vmem:[%s40004_s4 + $0x1050] ss:$20 sps:$4 sm:$0xff]  }
 0xb7e   : > { %25845 = vmatprep.subr.bf16.mxu0 %v30535_v59  ;;  %v30583_v61 = vld [vmem:[%s40004_s4 + $0x12d0] ss:$20 sps:$4 sm:$0xff]  }
 0xb7f   : > { %v30584_v59 = vld [vmem:[%s40004_s4 + $0xf10] ss:$20 sps:$4 sm:$0xff]  }
 0xb80   : > { %25824 = vmatpush3.bf16.msra.mxu1 %v30536_v0  ;;  %v30585_v0 = vld [vmem:[%s40004_s4 + $0x1190] ss:$20 sps:$4 sm:$0xff]  }
 0xb81   : > { %25846 = vmatpush3.bf16.msra.mxu0 %v30537_v60  ;;  %25825 = vmatprep.subr.bf16.mxu1 %v30538_v3  ;;  %v30586_v60 = vld [vmem:[%s40004_s4 + $0x1078] ss:$20 sps:$4 sm:$0xff]  }
 0xb82   : > { %25847 = vmatprep.subr.bf16.mxu0 %v30539_v18  ;;  %v30587_v3 = vld [vmem:[%s40004_s4 + $0x12f8] ss:$20 sps:$4 sm:$0xff]  }
 0xb83   : > { %v30588_v18 = vld [vmem:[%s40004_s4 + $0xf38] ss:$20 sps:$4 sm:$0xff]  }
 0xb84   : > { %25826 = vmatpush3.bf16.msra.mxu1 %v30540_v15  ;;  %v30589_v15 = vld [vmem:[%s40004_s4 + $0x11b8] ss:$20 sps:$4 sm:$0xff]  }
 0xb85   : > { %25848 = vmatpush3.bf16.msra.mxu0 %v30541_v16  ;;  %25827 = vmatprep.subr.bf16.mxu1 %v30542_v47  ;;  %v30593_v16 = vld [vmem:[%s40004_s4 + $0x11e0] ss:$20 sps:$4 sm:$0xff]   ;;  %v30595_v47 = vld [vmem:[%s40004_s4 + $0x1348] ss:$20 sps:$4 sm:$0xff]  }
 0xb86   : > { %25849 = vmatprep.subr.bf16.mxu0 %v30543_v35  ;;  %v30596_v35 = vld [vmem:[%s40004_s4 + $0xf88] ss:$20 sps:$4 sm:$0xff]  }
 0xb88   : > { %25828 = vmatpush3.bf16.msra.mxu1 %v30544_v42  ;;  %v30597_v42 = vld [vmem:[%s40004_s4 + $0x1208] ss:$20 sps:$4 sm:$0xff]  }
 0xb89   : > { %25850 = vmatpush3.bf16.msra.mxu0 %v30545_v62  ;;  %25829 = vmatprep.subr.bf16.mxu1 %v30546_v19  ;;  %v30598_v62 = vld [vmem:[%s40004_s4 + $0x10f0] ss:$20 sps:$4 sm:$0xff]  }
 0xb8a   : > { %25851 = vmatprep.subr.bf16.mxu0 %v30547_v7  ;;  %v30599_v19 = vld [vmem:[%s40004_s4 + $0x1370] ss:$20 sps:$4 sm:$0xff]  }
 0xb8b   : > { %v30600_v7 = vld [vmem:[%s40004_s4 + $0xfb0] ss:$20 sps:$4 sm:$0xff]  }
 0xb8c   : > { %25830 = vmatpush3.bf16.msra.mxu1 %v30548_v14  ;;  %v30601_v14 = vld [vmem:[%s40004_s4 + $0x1230] ss:$20 sps:$4 sm:$0xff]  }
 0xb8d   : > { %25852 = vmatpush3.bf16.msra.mxu0 %v30549_v31  ;;  %25859 = vmatprep.subr.bf16.mxu1 %v30550_v22  ;;  %v30602_v31 = vld [vmem:[%s40004_s4 + $0x1118] ss:$20 sps:$4 sm:$0xff]  }
 0xb8e   : > { %25881 = vmatprep.subr.bf16.mxu0 %v30551_v46  ;;  %v30603_v22 = vld [vmem:[%s40004_s4 + $0x1398] ss:$20 sps:$4 sm:$0xff]  }
 0xb8f   : > { %22480 = vmatmul.mubr.bf16.vlgmr.msra.gmra.mrb[40].mxu1 %v38021_v30  ;;  %v30558_v30 = vld [vmem:[%s40004_s4 + $0xba0] ss:$20 sps:$4 sm:$0xff]   ;;  %v30604_v46 = vld [vmem:[%s40004_s4 + $0xfd8] ss:$20 sps:$4 sm:$0xff]  }
 0xb90   : > { %22520 = vmatmul.mubr.bf16.vlgmr.msra.gmra.mrb[44].mxu0 %v38247_v26  ;;  %25860 = vmatpush3.bf16.msra.mxu1 %v30552_v40  ;;  %v30559_v26 = vld [vmem:[%s40004_s4 + $0xe20] ss:$20 sps:$4 sm:$0xff]   ;;  %v30605_v40 = vld [vmem:[%s40004_s4 + $0x1258] ss:$20 sps:$4 sm:$0xff]  }
 0xb91   : > { %22559 = vmatprep.mubr.bf16.mxu1 %v38255_v49  ;;  %25882 = vmatpush3.bf16.msra.mxu0 %v30553_v11  ;;  %v30560_v49 = vld [vmem:[%s40004_s4 + $0xa60] ss:$20 sps:$4 sm:$0xff]  }
 0xb92   : > { %22599 = vmatprep.mubr.bf16.mxu0 %v38461_v6  ;;  %25861 = vmatprep.subr.bf16.mxu1 %v30554_v10  ;;  %v30562_v6 = vld [vmem:[%s40004_s4 + $0xbc8] ss:$20 sps:$4 sm:$0xff]   ;;  %v30606_v11 = vld [vmem:[%s40004_s4 + $0x1140] ss:$20 sps:$4 sm:$0xff]  }
 0xb93   : > { %25883 = vmatprep.subr.bf16.mxu0 %v30555_v20  ;;  %v30607_v10 = vld [vmem:[%s40004_s4 + $0x13c0] ss:$20 sps:$4 sm:$0xff]  }
 0xb94   : > { %25862 = vmatpush3.bf16.msra.mxu1 %v30556_v24  ;;  %v30608_v20 = vld [vmem:[%s40004_s4 + $0x1000] ss:$20 sps:$4 sm:$0xff]  }
 0xb95   : > { %25884 = vmatpush3.bf16.msra.mxu0 %v30557_v9  ;;  %25863 = vmatprep.subr.bf16.mxu1 %v30558_v30  ;;  %v30609_v24 = vld [vmem:[%s40004_s4 + $0x1280] ss:$20 sps:$4 sm:$0xff]   ;;  %v30610_v9 = vld [vmem:[%s40004_s4 + $0x1168] ss:$20 sps:$4 sm:$0xff]  }
 0xb96   : > { %25885 = vmatprep.subr.bf16.mxu0 %v30559_v26  ;;  %v30611_v30 = vld [vmem:[%s40004_s4 + $0x13e8] ss:$20 sps:$4 sm:$0xff]  }
 0xb97   : > { %v30612_v26 = vld [vmem:[%s40004_s4 + $0x1028] ss:$20 sps:$4 sm:$0xff]  }
 0xb98   : > { %25864 = vmatpush3.bf16.msra.mxu1 %v30560_v49  ;;  %v30613_v49 = vld [vmem:[%s40004_s4 + $0x12a8] ss:$20 sps:$4 sm:$0xff]  }
 0xb99   : > { %25886 = vmatpush3.bf16.msra.mxu0 %v30561_v55  ;;  %25865 = vmatprep.subr.bf16.mxu1 %v30562_v6  ;;  %v30614_v55 = vld [vmem:[%s40004_s4 + $0x1550] ss:$20 sps:$4 sm:$0xff]  }
 0xb9a   : > { %25887 = vmatprep.subr.bf16.mxu0 %v30563_v29  ;;  %v30615_v6 = vld [vmem:[%s40004_s4 + $0x17d0] ss:$20 sps:$4 sm:$0xff]  }
 0xb9b   : > { %v30616_v29 = vld [vmem:[%s40004_s4 + $0x1410] ss:$20 sps:$4 sm:$0xff]  }
 0xb9c   : > { %25866 = vmatpush3.bf16.msra.mxu1 %v30564_v28  ;;  %v30617_v28 = vld [vmem:[%s40004_s4 + $0x1690] ss:$20 sps:$4 sm:$0xff]  }
 0xb9d   : > { %25888 = vmatpush3.bf16.msra.mxu0 %v30565_v32  ;;  %25867 = vmatprep.subr.bf16.mxu1 %v30566_v8  ;;  %v30618_v32 = vld [vmem:[%s40004_s4 + $0x1578] ss:$20 sps:$4 sm:$0xff]  }
 0xb9e   : > { %25889 = vmatprep.subr.bf16.mxu0 %v30567_v5  ;;  %v30619_v8 = vld [vmem:[%s40004_s4 + $0x17f8] ss:$20 sps:$4 sm:$0xff]  }
 0xb9f   : > { %v30620_v5 = vld [vmem:[%s40004_s4 + $0x1438] ss:$20 sps:$4 sm:$0xff]  }
 0xba0   : > { %25868 = vmatpush3.bf16.msra.mxu1 %v30568_v51  ;;  %v30621_v51 = vld [vmem:[%s40004_s4 + $0x16b8] ss:$20 sps:$4 sm:$0xff]  }
 0xba1   : > { %25890 = vmatpush3.bf16.msra.mxu0 %v30569_v41  ;;  %25869 = vmatprep.subr.bf16.mxu1 %v30570_v36  ;;  %v30625_v41 = vld [vmem:[%s40004_s4 + $0x16e0] ss:$20 sps:$4 sm:$0xff]   ;;  %v30627_v36 = vld [vmem:[%s40004_s4 + $0x1848] ss:$20 sps:$4 sm:$0xff]  }
 0xba2   : > { %25891 = vmatprep.subr.bf16.mxu0 %v30571_v17  ;;  %v30628_v17 = vld [vmem:[%s40004_s4 + $0x1488] ss:$20 sps:$4 sm:$0xff]  }
 0xba4   : > { %25870 = vmatpush3.bf16.msra.mxu1 %v30572_v12  ;;  %v30629_v12 = vld [vmem:[%s40004_s4 + $0x1708] ss:$20 sps:$4 sm:$0xff]  }
 0xba5   : > { %25892 = vmatpush3.bf16.msra.mxu0 %v30573_v56  ;;  %25871 = vmatprep.subr.bf16.mxu1 %v30574_v13  ;;  %v30630_v56 = vld [vmem:[%s40004_s4 + $0x15f0] ss:$20 sps:$4 sm:$0xff]  }
 0xba6   : > { %25893 = vmatprep.subr.bf16.mxu0 %v30575_v34  ;;  %v30631_v13 = vld [vmem:[%s40004_s4 + $0x1870] ss:$20 sps:$4 sm:$0xff]  }
 0xba7   : > { %v30632_v34 = vld [vmem:[%s40004_s4 + $0x14b0] ss:$20 sps:$4 sm:$0xff]  }
 0xba8   : > { %25872 = vmatpush3.bf16.msra.mxu1 %v30576_v57  ;;  %v30633_v57 = vld [vmem:[%s40004_s4 + $0x1730] ss:$20 sps:$4 sm:$0xff]  }
 0xba9   : > { %25894 = vmatpush3.bf16.msra.mxu0 %v30577_v38  ;;  %25873 = vmatprep.subr.bf16.mxu1 %v30578_v1  ;;  %v30634_v38 = vld [vmem:[%s40004_s4 + $0x1618] ss:$20 sps:$4 sm:$0xff]  }
 0xbaa   : > { %25895 = vmatprep.subr.bf16.mxu0 %v30579_v33  ;;  %v30635_v1 = vld [vmem:[%s40004_s4 + $0x1898] ss:$20 sps:$4 sm:$0xff]  }
 0xbab   : > { %v30636_v33 = vld [vmem:[%s40004_s4 + $0x14d8] ss:$20 sps:$4 sm:$0xff]  }
 0xbac   : > { %25874 = vmatpush3.bf16.msra.mxu1 %v30580_v39  ;;  %v30637_v39 = vld [vmem:[%s40004_s4 + $0x1758] ss:$20 sps:$4 sm:$0xff]  }
 0xbad   : > { %25896 = vmatpush3.bf16.msra.mxu0 %v30581_v45  ;;  %25903 = vmatprep.subr.bf16.mxu1 %v30582_v4  ;;  %v30638_v45 = vld [vmem:[%s40004_s4 + $0x1640] ss:$20 sps:$4 sm:$0xff]  }
 0xbae   : > { %25925 = vmatprep.subr.bf16.mxu0 %v30583_v61  ;;  %v30639_v4 = vld [vmem:[%s40004_s4 + $0x18c0] ss:$20 sps:$4 sm:$0xff]  }
 0xbaf   : > { %22560 = vmatmul.mubr.bf16.vlgmr.msra.gmra.mrb[44].mxu1 %v38453_v44  ;;  %v30590_v44 = vld [vmem:[%s40004_s4 + $0x10a0] ss:$20 sps:$4 sm:$0xff]  }
 0xbb0   : > { %22600 = vmatmul.mubr.bf16.vlgmr.msra.gmra.mrb[48].mxu0 %v38659_v27  ;;  %25904 = vmatpush3.bf16.msra.mxu1 %v30584_v59  ;;  %v30591_v27 = vld [vmem:[%s40004_s4 + $0x1320] ss:$20 sps:$4 sm:$0xff]  }
 0xbb1   : > { %22639 = vmatprep.mubr.bf16.mxu1 %v38667_v54  ;;  %25926 = vmatpush3.bf16.msra.mxu0 %v30585_v0  ;;  %v30592_v54 = vld [vmem:[%s40004_s4 + $0xf60] ss:$20 sps:$4 sm:$0xff]   ;;  %v30642_v0 = vld [vmem:[%s40004_s4 + $0x1668] ss:$20 sps:$4 sm:$0xff]  }
 0xbb2   : > { %22679 = vmatprep.mubr.bf16.mxu0 %v38873_v23  ;;  %25905 = vmatprep.subr.bf16.mxu1 %v30586_v60  ;;  %v30594_v23 = vld [vmem:[%s40004_s4 + $0x10c8] ss:$20 sps:$4 sm:$0xff]   ;;  %v30640_v61 = vld [vmem:[%s40004_s4 + $0x1500] ss:$20 sps:$4 sm:$0xff]  }
 0xbb3   : > { %25927 = vmatprep.subr.bf16.mxu0 %v30587_v3  ;;  %v30641_v59 = vld [vmem:[%s40004_s4 + $0x1780] ss:$20 sps:$4 sm:$0xff]   ;;  %v30643_v60 = vld [vmem:[%s40004_s4 + $0x18e8] ss:$20 sps:$4 sm:$0xff]  }
 0xbb4   : > { %25906 = vmatpush3.bf16.msra.mxu1 %v30588_v18  ;;  %v30644_v3 = vld [vmem:[%s40004_s4 + $0x1528] ss:$20 sps:$4 sm:$0xff]  }
 0xbb5   : > { %25928 = vmatpush3.bf16.msra.mxu0 %v30589_v15  ;;  %25907 = vmatprep.subr.bf16.mxu1 %v30590_v44  ;;  %v30645_v18 = vld [vmem:[%s40004_s4 + $0x17a8] ss:$20 sps:$4 sm:$0xff]   ;;  %v17360_v15 = vld [vmem:[%s40005_s5] sm:$0x1f] }
 0xbb6   : > { %25929 = vmatprep.subr.bf16.mxu0 %v30591_v27  ;;  %v17365_v44 = vrot.slane %v17360_v15, %v31056_v48  ;;  %v17373_v27 = vrot.slane %v17360_v15, %v31158_v37 }
 0xbb8   : > { %25908 = vmatpush3.bf16.msra.mxu1 %v30592_v54  ;;  %v17369_v54 = vrot.slane %v17360_v15, %v31064_v50 }
 0xbb9   : > { %25930 = vmatpush3.bf16.msra.mxu0 %v30593_v16  ;;  %25909 = vmatprep.subr.bf16.mxu1 %v30594_v23  ;;  %v17377_v16 = vrot.slane %v17360_v15, %v31071_v53 }
 0xbba   : > { %25931 = vmatprep.subr.bf16.mxu0 %v30595_v47 }
 0xbbc   : > { %25910 = vmatpush3.bf16.msra.mxu1 %v30596_v35 }
 0xbbd   : > { %25932 = vmatpush3.bf16.msra.mxu0 %v30597_v42  ;;  %25911 = vmatprep.subr.bf16.mxu1 %v30598_v62 }
 0xbbe   : > { %25933 = vmatprep.subr.bf16.mxu0 %v30599_v19 }
 0xbc0   : > { %25912 = vmatpush3.bf16.msra.mxu1 %v30600_v7 }
 0xbc1   : > { %25934 = vmatpush3.bf16.msra.mxu0 %v30601_v14  ;;  %25913 = vmatprep.subr.bf16.mxu1 %v30602_v31 }
 0xbc2   : > { %25935 = vmatprep.subr.bf16.mxu0 %v30603_v22 }
 0xbc4   : > { %25914 = vmatpush3.bf16.msra.mxu1 %v30604_v46 }
 0xbc5   : > { %25936 = vmatpush3.bf16.msra.mxu0 %v30605_v40  ;;  %25915 = vmatprep.subr.bf16.mxu1 %v30606_v11  ;;  %v17381_v40 = vrot.slane %v17360_v15, %v31198_v63 }
 0xbc6   : > { %25937 = vmatprep.subr.bf16.mxu0 %v30607_v10 }
 0xbc8   : > { %25916 = vmatpush3.bf16.msra.mxu1 %v30608_v20 }
 0xbc9   : > { %25938 = vmatpush3.bf16.msra.mxu0 %v30609_v24  ;;  %25917 = vmatprep.subr.bf16.mxu1 %v30610_v9 }
 0xbca   : > { %25939 = vmatprep.subr.bf16.mxu0 %v30611_v30 }
 0xbcc   : > { %25918 = vmatpush3.bf16.msra.mxu1 %v30612_v26 }
 0xbcd   : > { %25940 = vmatpush3.bf16.msra.mxu0 %v30613_v49  ;;  %25947 = vmatprep.subr.bf16.mxu1 %v30614_v55 }
 0xbce   : > { %25969 = vmatprep.subr.bf16.mxu0 %v30615_v6 }
 0xbcf   : > { %22640 = vmatmul.mubr.bf16.vlgmr.msra.gmra.mrb[48].mxu1 %v38865_v2  ;;  %v30622_v2 = vld [vmem:[%s40004_s4 + $0x15a0] ss:$20 sps:$4 sm:$0xff]  }
 0xbd0   : > { %22680 = vmatmul.mubr.bf16.vlgmr.msra.gmra.mrb[52].mxu0 %v39078_v21  ;;  %25948 = vmatpush3.bf16.msra.mxu1 %v30616_v29  ;;  %v30623_v21 = vld [vmem:[%s40004_s4 + $0x1820] ss:$20 sps:$4 sm:$0xff]  }
 0xbd1   : > { %22719 = vmatprep.mubr.bf16.mxu1 %v39086_v43  ;;  %25970 = vmatpush3.bf16.msra.mxu0 %v30617_v28  ;;  %v30624_v43 = vld [vmem:[%s40004_s4 + $0x1460] ss:$20 sps:$4 sm:$0xff]  }
 0xbd2   : > { %22759 = vmatprep.mubr.bf16.mxu0 %v39290_v25  ;;  %25949 = vmatprep.subr.bf16.mxu1 %v30618_v32  ;;  %v30626_v25 = vld [vmem:[%s40004_s4 + $0x15c8] ss:$20 sps:$4 sm:$0xff]  }
 0xbd3   : > { %25971 = vmatprep.subr.bf16.mxu0 %v30619_v8 }
 0xbd4   : > { %25950 = vmatpush3.bf16.msra.mxu1 %v30620_v5 }
 0xbd5   : > { %25972 = vmatpush3.bf16.msra.mxu0 %v30621_v51  ;;  %25951 = vmatprep.subr.bf16.mxu1 %v30622_v2 }
 0xbd6   : > { %25973 = vmatprep.subr.bf16.mxu0 %v30623_v21 }
 0xbd8   : > { %25952 = vmatpush3.bf16.msra.mxu1 %v30624_v43 }
 0xbd9   : > { %25974 = vmatpush3.bf16.msra.mxu0 %v30625_v41  ;;  %25953 = vmatprep.subr.bf16.mxu1 %v30626_v25 }
 0xbda   : > { %25975 = vmatprep.subr.bf16.mxu0 %v30627_v36 }
 0xbdc   : > { %25954 = vmatpush3.bf16.msra.mxu1 %v30628_v17 }
 0xbdd   : > { %25976 = vmatpush3.bf16.msra.mxu0 %v30629_v12  ;;  %25955 = vmatprep.subr.bf16.mxu1 %v30630_v56 }
 0xbde   : > { %25977 = vmatprep.subr.bf16.mxu0 %v30631_v13 }
 0xbe0   : > { %25956 = vmatpush3.bf16.msra.mxu1 %v30632_v34 }
 0xbe1   : > { %25978 = vmatpush3.bf16.msra.mxu0 %v30633_v57  ;;  %25957 = vmatprep.subr.bf16.mxu1 %v30634_v38 }
 0xbe2   : > { %25979 = vmatprep.subr.bf16.mxu0 %v30635_v1 }
 0xbe4   : > { %25958 = vmatpush3.bf16.msra.mxu1 %v30636_v33 }
 0xbe5   : > { %25980 = vmatpush3.bf16.msra.mxu0 %v30637_v39  ;;  %25959 = vmatprep.subr.bf16.mxu1 %v30638_v45 }
 0xbe6   : > { %25981 = vmatprep.subr.bf16.mxu0 %v30639_v4 }
 0xbe8   : > { %25960 = vmatpush3.bf16.msra.mxu1 %v30640_v61 }
 0xbe9   : > { %25982 = vmatpush3.bf16.msra.mxu0 %v30641_v59  ;;  %25961 = vmatprep.subr.bf16.mxu1 %v30642_v0 }
 0xbea   : > { %25983 = vmatprep.subr.bf16.mxu0 %v30643_v60 }
 0xbec   : > { %25962 = vmatpush3.bf16.msra.mxu1 %v30644_v3 }
 0xbed   : > { %25984 = vmatpush3.bf16.msra.mxu0 %v30645_v18 }
 0xbef   : > { %22720 = vmatmul.mubr.bf16.vlgmr.msra.gmra.mrb[52].mxu1 %v39282_v58 }
 0xbf0   : > { %22760 = vmatmul.mubr.bf16.vlgmr.msra.gmra.mrb[56].mxu0 %v39483_v52 }
 0xc22   : > { %v21950_v23 = vpop.f32.mrb[32].mxu1 }
 0xc23   : > { %v26021_v47 = vadd.f32 %v21950_v23, %v17365_v44  ;;  %v22360_v35 = vpop.f32.mrb[36].mxu0  ;;  %v21952_v42 = vpop.f32.mrb[33].mxu1 }
 0xc24   : > { %v26023_v48 = vadd.f32 %v22360_v35, %v17373_v27  ;;  %v26022_v58 = vadd.f32 %v21952_v42, %v17369_v54  ;;  %v22362_v37 = vpop.f32.mrb[37].mxu0  ;;  %v21954_v52 = vpop.f32.mrb[34].mxu1 }
 0xc25   : > { %v22767_v50 = vmax.f32 %v26021_v47, 0.0  ;;  %v26024_v62 = vadd.f32 %v22362_v37, %v17377_v16  ;;  %v22364_v53 = vpop.f32.mrb[38].mxu0  ;;  %v21955_v19 = vpop.f32.mrb[35].mxu1 }
 0xc26   : > { %v22769_v7 = vmax.f32 %v26023_v48, 0.0  ;;  %v22768_v14 = vmax.f32 %v26022_v58, 0.0  ;;  %v22365_v31 = vpop.f32.mrb[39].mxu0 }
 0xc27   : > { %22772 = vst [vmem:[%s39989_s11] sm:$0xff] %v22767_v50  ;;  %v22770_v22 = vmax.f32 %v26024_v62, 0.0 }
 0xc28   : > { %22774 = vst [vmem:[%s39989_s11 + $0x10] sm:$0xff] %v22769_v7  ;;  %22773 = vst [vmem:[%s39989_s11 + $0x8] sm:$0xff] %v22768_v14 }
 0xc29   : > { %22775 = vst [vmem:[%s39989_s11 + $0x18] sm:$0xff] %v22770_v22 }
 0xc42   : > { %v25787_v46 = vpop.f32.mrb[36].mxu1 }
 0xc43   : > { %v25809_v11 = vpop.f32.mrb[40].mxu0  ;;  %v25788_v10 = vpop.f32.mrb[37].mxu1 }
 0xc44   : > { %v25789_v20 = vadd.f32 %v25788_v10, %v25787_v46  ;;  %v25810_v24 = vpop.f32.mrb[41].mxu0  ;;  %v25790_v9 = vpop.f32.mrb[38].mxu1 }
 0xc45   : > { %v25811_v30 = vadd.f32 %v25810_v24, %v25809_v11  ;;  %v25812_v26 = vpop.f32.mrb[42].mxu0  ;;  %v25791_v49 = vpop.f32.mrb[39].mxu1 }
 0xc46   : > { %v22402_v55 = vadd.f32 %v25789_v20, %v17381_v40  ;;  %v25813_v6 = vpop.f32.mrb[43].mxu0 }
 0xc48   : > { %v22442_v29 = vadd.f32 %v25811_v30, %v22402_v55 }
 0xc62   : > { %v25831_v28 = vpop.f32.mrb[40].mxu1 }
 0xc63   : > { %v25853_v32 = vpop.f32.mrb[44].mxu0  ;;  %v25832_v8 = vpop.f32.mrb[41].mxu1 }
 0xc64   : > { %v25833_v5 = vadd.f32 %v25832_v8, %v25831_v28  ;;  %v25854_v51 = vpop.f32.mrb[45].mxu0  ;;  %v25834_v2 = vpop.f32.mrb[42].mxu1 }
 0xc65   : > { %v25855_v21 = vadd.f32 %v25854_v51, %v25853_v32  ;;  %v25856_v43 = vpop.f32.mrb[46].mxu0  ;;  %v25835_v63 = vpop.f32.mrb[43].mxu1 }
 0xc66   : > { %v22482_v41 = vadd.f32 %v25833_v5, %v22442_v29  ;;  %v25857_v25 = vpop.f32.mrb[47].mxu0 }
 0xc68   : > { %v22522_v36 = vadd.f32 %v25855_v21, %v22482_v41 }
 0xc82   : > { %v25875_v17 = vpop.f32.mrb[44].mxu1 }
 0xc83   : > { %v25897_v12 = vpop.f32.mrb[48].mxu0  ;;  %v25876_v56 = vpop.f32.mrb[45].mxu1 }
 0xc84   : > { %v25877_v13 = vadd.f32 %v25876_v56, %v25875_v17  ;;  %v25898_v34 = vpop.f32.mrb[49].mxu0  ;;  %v25878_v57 = vpop.f32.mrb[46].mxu1 }
 0xc85   : > { %v25899_v38 = vadd.f32 %v25898_v34, %v25897_v12  ;;  %v25900_v1 = vpop.f32.mrb[50].mxu0  ;;  %v25879_v33 = vpop.f32.mrb[47].mxu1 }
 0xc86   : > { %v22562_v39 = vadd.f32 %v25877_v13, %v22522_v36  ;;  %v25901_v45 = vpop.f32.mrb[51].mxu0 }
 0xc88   : > { %v22602_v4 = vadd.f32 %v25899_v38, %v22562_v39 }
 0xca2   : > { %v25919_v61 = vpop.f32.mrb[48].mxu1 }
 0xca3   : > { %v25941_v59 = vpop.f32.mrb[52].mxu0  ;;  %v25920_v0 = vpop.f32.mrb[49].mxu1 }
 0xca4   : > { %v25921_v60 = vadd.f32 %v25920_v0, %v25919_v61  ;;  %v25942_v3 = vpop.f32.mrb[53].mxu0  ;;  %v25922_v18 = vpop.f32.mrb[50].mxu1 }
 0xca5   : > { %v25943_v15 = vadd.f32 %v25942_v3, %v25941_v59  ;;  %v25944_v44 = vpop.f32.mrb[54].mxu0  ;;  %v25923_v27 = vpop.f32.mrb[51].mxu1 }
 0xca6   : > { %v22642_v54 = vadd.f32 %v25921_v60, %v22602_v4  ;;  %v25945_v16 = vpop.f32.mrb[55].mxu0 }
 0xca8   : > { %v22682_v23 = vadd.f32 %v25943_v15, %v22642_v54 }
 0xcc2   : > { %v25963_v47 = vpop.f32.mrb[52].mxu1 }
 0xcc3   : > { %v25985_v35 = vpop.f32.mrb[56].mxu0  ;;  %v25964_v42 = vpop.f32.mrb[53].mxu1 }
 0xcc4   : > { %v25965_v48 = vadd.f32 %v25964_v42, %v25963_v47  ;;  %v25986_v58 = vpop.f32.mrb[57].mxu0  ;;  %v25966_v37 = vpop.f32.mrb[54].mxu1 }
 0xcc5   : > { %v25987_v52 = vadd.f32 %v25986_v58, %v25985_v35  ;;  %v25988_v50 = vpop.f32.mrb[58].mxu0  ;;  %v25967_v62 = vpop.f32.mrb[55].mxu1 }
 0xcc6   : > { %v22722_v53 = vadd.f32 %v25965_v48, %v22682_v23  ;;  %v25989_v19 = vpop.f32.mrb[59].mxu0 }
 0xcc8   : > { %v22762_v7 = vadd.f32 %v25987_v52, %v22722_v53 }
 0xcca   : > { %v22771_v14 = vmax.f32 %v22762_v7, 0.0 }
 0xccc   : > { %22776 = vst [vmem:[%s39989_s11 + $0x20] sm:$0xff] %v22771_v14 }
 0xccd PF: > { %s17_s24 = sadd.s32 1, %s30657_s24  }
 0xcce   : > { %p14_p4 = scmp.ge.s32.totalorder %s17_s24, 4  }
 0xcd0   :  { %16 = sbr.rel (!%p14_p4) target bundleno = 1 (0x1), region = 78 }

</bundles_post_ra>
